<compile_context>
chip_gen: v5e
topology: v5e:2x2
jax: 0.10.0
libtpu: 0.0.40
codegen_flags: <defaults>
</compile_context>

<pallas_src>
import jax
import jax.numpy as jnp
from jax import lax
from jax.experimental import pallas as pl
from jax.experimental.pallas import tpu as pltpu

_BN_EPS = 1e-5

_VMEM = pl.BlockSpec(memory_space=pltpu.MemorySpace.VMEM)


def _vmem_limit_bytes():
    # 128 MiB chips (v5e/v6e) -> ~96 MiB scoped limit; v7x (64 MiB) -> ~48 MiB.
    # Conservative 48 MiB fallback if the trace-time query is unavailable.
    cap = 64 * 1024 * 1024
    try:
        cap = int(getattr(pltpu.get_tpu_info(), "vmem_capacity_bytes", cap))
    except Exception:
        pass
    return min(100 * 1024 * 1024, max(32 * 1024 * 1024, (cap * 3) // 4))


_CPARAMS = pltpu.CompilerParams(vmem_limit_bytes=_vmem_limit_bytes())


# ----------------------------------------------------------------------------
# In-kernel helpers (traced inside kernel bodies)
# ----------------------------------------------------------------------------

def _conv3_acc(x, w_ref, b_ref=None):
    """Conv1d(k=3, pad=1) as three accumulated K=Cin MXU matmuls (no im2col).

    x: (B, L, Cin) bf16 activations; w_ref: (3, Cin, Cout) bf16; b_ref: (1, Cout)
    f32 or None.  Returns (B, L, Cout) f32.  Tap t multiplies x[l + t - 1]; we
    matmul the unshifted x against each tap and sublane-shift the f32 outputs,
    so no (B, L, 3C) buffer and no lane-dim concatenate is ever built.
    """
    B, L, C = x.shape
    xf = x.reshape(B * L, C)
    cout = w_ref.shape[2]
    yp = jnp.dot(xf, w_ref[0], preferred_element_type=jnp.float32).reshape(B, L, cout)
    ym = jnp.dot(xf, w_ref[1], preferred_element_type=jnp.float32).reshape(B, L, cout)
    yn = jnp.dot(xf, w_ref[2], preferred_element_type=jnp.float32).reshape(B, L, cout)
    zero = jnp.zeros((B, 1, cout), jnp.float32)
    y = (ym
         + jnp.concatenate([zero, yp[:, :L - 1, :]], axis=1)   # tap l-1 -> l
         + jnp.concatenate([yn[:, 1:, :], zero], axis=1))      # tap l+1 -> l
    if b_ref is not None:
        y = y + b_ref[...][None, :, :]
    return y


def _bn_relu(y, g_ref, be_ref):
    """BatchNorm1d (training-mode batch stats, biased var) + ReLU on f32 (N, C).

    Centered two-pass variance (mean, then E[(y-mean)^2]) for numerical safety.
    """
    inv_n = 1.0 / y.shape[0]
    mean = jnp.sum(y, axis=0, keepdims=True) * inv_n
    yc = y - mean
    var = jnp.sum(yc * yc, axis=0, keepdims=True) * inv_n
    yn = g_ref[...] * yc * lax.rsqrt(var + _BN_EPS) + be_ref[...]
    return jnp.maximum(yn, 0.0)


def _pool2(x):
    """MaxPool1d(k=2, s=2) on f32 (B, L, C)."""
    B, L, C = x.shape
    Lh = L // 2
    # TODO(synk): two strided sublane reads (x[:, 0::2], x[:, 1::2]) + VPU max
    # would avoid splitting the sublane dim; kept the proven reshape form.
    return jnp.max(x[:, :2 * Lh, :].reshape(B, Lh, 2, C), axis=2)


# ----------------------------------------------------------------------------
# Fused kernels
# ----------------------------------------------------------------------------

def _enc1_kernel(x_ref, w1_ref, b1_ref, g1_ref, be1_ref,
                 w2_ref, b2_ref, g2_ref, be2_ref, o_ref, p_ref):
    """Cin=1 block: f32 VPU 3-tap stencil + BN/ReLU + conv3/BN/ReLU + pool."""
    B, L, _ = x_ref.shape
    cout = w1_ref.shape[1]
    x = x_ref[...]                                       # (B, L, 1) f32
    z = jnp.zeros((B, 1, 1), jnp.float32)
    x_prev = jnp.concatenate([z, x[:, :L - 1, :]], axis=1)
    x_next = jnp.concatenate([x[:, 1:, :], z], axis=1)
    w = w1_ref[...]                                      # (3, cout) f32
    # Cin == 1: pure VPU broadcast multiply-add (no MXU-hostile K=1 matmul).
    y = (x_prev * w[0:1, :][None, :, :]
         + x * w[1:2, :][None, :, :]
         + x_next * w[2:3, :][None, :, :]
         + b1_ref[...][None, :, :])                      # (B, L, cout) f32
    h = _bn_relu(y.reshape(B * L, cout), g1_ref, be1_ref)
    h = h.reshape(B, L, cout).astype(jnp.bfloat16)       # bf16 into the MXU conv
    h2 = _bn_relu(_conv3_acc(h, w2_ref, b2_ref).reshape(B * L, cout),
                  g2_ref, be2_ref).reshape(B, L, cout)   # f32
    o_ref[...] = h2.astype(o_ref.dtype)
    p_ref[...] = _pool2(h2).astype(p_ref.dtype)          # MaxPool folded in


def _make_block_kernel(with_pool):
    """Generic UNetBlock: conv3+BN+ReLU twice (per-tap matmuls), optional pool."""
    def kernel(x_ref, w1_ref, b1_ref, g1_ref, be1_ref,
               w2_ref, b2_ref, g2_ref, be2_ref, *o_refs):
        B, L, _ = x_ref.shape
        cout = w1_ref.shape[2]
        h = _bn_relu(_conv3_acc(x_ref[...], w1_ref, b1_ref).reshape(B * L, cout),
                     g1_ref, be1_ref).reshape(B, L, cout).astype(jnp.bfloat16)
        h2 = _bn_relu(_conv3_acc(h, w2_ref, b2_ref).reshape(B * L, cout),
                      g2_ref, be2_ref).reshape(B, L, cout)   # f32
        o_refs[0][...] = h2.astype(o_refs[0].dtype)
        if with_pool:
            o_refs[1][...] = _pool2(h2).astype(o_refs[1].dtype)
    return kernel


def _make_dec_kernel(with_final):
    """Decoder: ConvTranspose(k=2,s=2) + skip-concat-as-split-K conv3+BN+ReLU
    + conv3+BN+ReLU (+ optional final 1x1 conv fused into the epilogue)."""
    def kernel(x_ref, s_ref, wu_ref, bu_ref,
               w1d_ref, w1e_ref, b1_ref, g1_ref, be1_ref,
               w2_ref, b2_ref, g2_ref, be2_ref, *rest):
        if with_final:
            wf_ref, bf_ref, o_ref = rest
        else:
            (o_ref,) = rest
        B, Lin, cin = x_ref.shape
        cu = wu_ref.shape[2]
        cm = w1d_ref.shape[2]
        L = 2 * Lin
        # --- ConvTranspose1d(k=2, s=2): two K=cin matmuls, phase interleave.
        x2 = x_ref[...].reshape(B * Lin, cin)                        # bf16
        y0 = jnp.dot(x2, wu_ref[0], preferred_element_type=jnp.float32) + bu_ref[...]
        y1 = jnp.dot(x2, wu_ref[1], preferred_element_type=jnp.float32) + bu_ref[...]
        # TODO(synk): this concat+reshape interleave is one sublane relayout of d;
        # replace with an even/odd-decomposed conv (never materialize d) or
        # strided sublane stores into a VMEM scratch.
        d = jnp.concatenate(
            [y0.reshape(B, Lin, 1, cu), y1.reshape(B, Lin, 1, cu)],
            axis=2).reshape(B, L, cu).astype(jnp.bfloat16)
        # --- channel-concat skip folded into conv1 as a split-K matmul; the
        # PyTorch _crop_tensor crop is fused as a static slice of the skip ref.
        s3 = s_ref[:, 0:L, :]                                        # (B, L, cs) bf16
        acc = (_conv3_acc(d, w1d_ref) + _conv3_acc(s3, w1e_ref)
               + b1_ref[...][None, :, :])
        h = _bn_relu(acc.reshape(B * L, cm), g1_ref, be1_ref)
        h = h.reshape(B, L, cm).astype(jnp.bfloat16)
        h2 = _bn_relu(_conv3_acc(h, w2_ref, b2_ref).reshape(B * L, cm),
                      g2_ref, be2_ref)                               # (B*L, cm) f32
        if with_final:
            out = (jnp.dot(h2.astype(jnp.bfloat16), wf_ref[...],
                           preferred_element_type=jnp.float32) + bf_ref[...])
            o_ref[...] = out.reshape(B, L, -1).astype(o_ref.dtype)
        else:
            o_ref[...] = h2.reshape(B, L, cm).astype(o_ref.dtype)
    return kernel


def _combine_kernel(tok_ref, emb_ref, pe_ref, wave_ref, o_ref):
    """token_embedding(tokens) + positional_encoding + wave_features."""
    B, S = tok_ref.shape
    V, E = emb_ref.shape
    tok = tok_ref[...]
    iota = lax.broadcasted_iota(jnp.int32, (B, S, V), 2)
    onehot = (tok[:, :, None] == iota).astype(jnp.float32).reshape(B * S, V)
    # Single (B*S, V) @ (V, E) MXU matmul (exact fp32 gather of the table rows).
    tok_emb = jnp.dot(onehot, emb_ref[...], preferred_element_type=jnp.float32)
    o_ref[...] = (tok_emb.reshape(B, S, E)
                  + pe_ref[...][None, :, :]
                  + wave_ref[...].astype(jnp.float32))
    # TODO(synk): for large vocab replace the one-hot matmul with a
    # scalar-prefetched row gather (PrefetchScalarGridSpec + pl.Element).


# ----------------------------------------------------------------------------
# pallas_call wrappers
# ----------------------------------------------------------------------------

def _pcall(kernel, n_in, out_shape):
    multi = isinstance(out_shape, tuple)
    out_specs = tuple(_VMEM for _ in out_shape) if multi else _VMEM
    return pl.pallas_call(
        kernel,
        out_shape=out_shape,
        in_specs=[_VMEM] * n_in,
        out_specs=out_specs,
        compiler_params=_CPARAMS,
    )


def enc1_apply(signals, p):
    B, L = signals.shape
    x = signals[:, :, None].astype(jnp.float32)
    cout = p['w1'].shape[1]
    return _pcall(
        _enc1_kernel, 9,
        (jax.ShapeDtypeStruct((B, L, cout), jnp.bfloat16),
         jax.ShapeDtypeStruct((B, L // 2, cout), jnp.bfloat16)),
    )(x, p['w1'], p['b1'], p['g1'], p['be1'],
      p['w2'], p['b2'], p['g2'], p['be2'])


def block_apply(x, p, with_pool):
    B, L, _ = x.shape
    cout = p['w1'].shape[2]
    if with_pool:
        out_shape = (jax.ShapeDtypeStruct((B, L, cout), jnp.bfloat16),
                     jax.ShapeDtypeStruct((B, L // 2, cout), jnp.bfloat16))
    else:
        out_shape = jax.ShapeDtypeStruct((B, L, cout), jnp.bfloat16)
    return _pcall(_make_block_kernel(with_pool), 9, out_shape)(
        x, p['w1'], p['b1'], p['g1'], p['be1'],
        p['w2'], p['b2'], p['g2'], p['be2'])


def dec_apply(x, skip, p_up, p_blk, p_final=None):
    B, Lin, _ = x.shape
    L = 2 * Lin
    # PyTorch _crop_tensor: the crop happens inside the kernel (static ref slice).
    assert skip.shape[1] >= L, "encoder skip shorter than decoder feature"
    cm = p_blk['w1d'].shape[2]
    args = [x, skip, p_up['w'], p_up['b'],
            p_blk['w1d'], p_blk['w1e'], p_blk['b1'], p_blk['g1'], p_blk['be1'],
            p_blk['w2'], p_blk['b2'], p_blk['g2'], p_blk['be2']]
    if p_final is None:
        out_shape = jax.ShapeDtypeStruct((B, L, cm), jnp.bfloat16)
        return _pcall(_make_dec_kernel(False), 13, out_shape)(*args)
    E = p_final['w'].shape[1]
    args += [p_final['w'], p_final['b']]
    out_shape = jax.ShapeDtypeStruct((B, L, E), jnp.bfloat16)
    return _pcall(_make_dec_kernel(True), 15, out_shape)(*args)


def positional_encoding(seq_len, embed_dim):
    # Same values as the PyTorch PositionalEncoding buffer (first seq_len rows).
    pos = jnp.arange(seq_len, dtype=jnp.float32)[:, None]
    div = jnp.exp(jnp.arange(0, embed_dim, 2, dtype=jnp.float32)
                  * (-jnp.log(10000.0) / embed_dim))
    pe = jnp.zeros((seq_len, embed_dim), jnp.float32)
    pe = pe.at[:, 0::2].set(jnp.sin(pos * div))
    pe = pe.at[:, 1::2].set(jnp.cos(pos * div))
    return pe


# ----------------------------------------------------------------------------
# Parameters (conv weights stored bf16 as (3, Cin, Cout) tap-major slabs)
# ----------------------------------------------------------------------------

def _init_conv3(key, cin, cout, scale=0.1):
    kw, kb = jax.random.split(key)
    w = scale * jax.random.normal(kw, (3, cin, cout), jnp.float32)
    b = scale * jax.random.normal(kb, (1, cout), jnp.float32)
    return w, b


def _init_bn(key, c):
    kg, kb = jax.random.split(key)
    return (1.0 + 0.1 * jax.random.normal(kg, (1, c), jnp.float32),
            0.1 * jax.random.normal(kb, (1, c), jnp.float32))


def _init_enc_block(key, cin, cout, squeeze_first=False):
    k1, k2, k3, k4 = jax.random.split(key, 4)
    w1, b1 = _init_conv3(k1, cin, cout)
    g1, be1 = _init_bn(k2, cout)
    w2, b2 = _init_conv3(k3, cout, cout)
    g2, be2 = _init_bn(k4, cout)
    if squeeze_first:                 # Cin == 1: f32 VPU stencil weights (3, cout)
        w1p = w1.reshape(3, cout)
    else:
        w1p = w1.astype(jnp.bfloat16)
    return dict(w1=w1p, b1=b1, g1=g1, be1=be1,
                w2=w2.astype(jnp.bfloat16), b2=b2, g2=g2, be2=be2)


def _init_dec_block(key, cd, cs, cout):
    k1, k2, k3, k4 = jax.random.split(key, 4)
    w1, b1 = _init_conv3(k1, cd + cs, cout)
    g1, be1 = _init_bn(k2, cout)
    w2, b2 = _init_conv3(k3, cout, cout)
    g2, be2 = _init_bn(k4, cout)
    return dict(w1d=w1[:, :cd, :].astype(jnp.bfloat16),
                w1e=w1[:, cd:, :].astype(jnp.bfloat16),
                b1=b1, g1=g1, be1=be1,
                w2=w2.astype(jnp.bfloat16), b2=b2, g2=g2, be2=be2)


def _init_upconv(key, cin, cout, scale=0.1):
    kw, kb = jax.random.split(key)
    return dict(w=(scale * jax.random.normal(kw, (2, cin, cout), jnp.float32)
                   ).astype(jnp.bfloat16),
                b=scale * jax.random.normal(kb, (1, cout), jnp.float32))


def init_params(key, vocab_size, embedding_dim):
    ks = jax.random.split(key, 9)
    params = {}
    params['embedding'] = 0.1 * jax.random.normal(
        ks[0], (vocab_size, embedding_dim), jnp.float32)
    params['enc1'] = _init_enc_block(ks[1], 1, 64, squeeze_first=True)
    params['enc2'] = _init_enc_block(ks[2], 64, 128)
    params['bottleneck'] = _init_enc_block(ks[3], 128, 256)
    params['up1'] = _init_upconv(ks[4], 256, 128)
    params['dec1'] = _init_dec_block(ks[5], 128, 128, 128)
    params['up2'] = _init_upconv(ks[6], 128, 64)
    params['dec2'] = _init_dec_block(ks[7], 64, 64, 64)
    kf1, kf2 = jax.random.split(ks[8])
    params['final'] = dict(
        w=(0.1 * jax.random.normal(kf1, (64, embedding_dim), jnp.float32)
           ).astype(jnp.bfloat16),
        b=0.1 * jax.random.normal(kf2, (1, embedding_dim), jnp.float32))
    return params


# ----------------------------------------------------------------------------
# Model forward
# ----------------------------------------------------------------------------

def unet_apply(signals, params):
    e1, p1 = enc1_apply(signals, params['enc1'])                  # (B,L,64), (B,L/2,64)
    e2, p2 = block_apply(p1, params['enc2'], with_pool=True)      # (B,L/2,128), (B,L/4,128)
    bk = block_apply(p2, params['bottleneck'], with_pool=False)   # (B,L/4,256)
    d1 = dec_apply(bk, e2, params['up1'], params['dec1'])         # (B,L/2,128)
    wave = dec_apply(d1, e1, params['up2'], params['dec2'],
                     params['final'])                             # (B,L,E) bf16
    return wave


def ecg_embedding_forward(params, tokens, signals):
    B, S = tokens.shape
    E = params['embedding'].shape[1]
    wave = unet_apply(signals, params)           # (B, Lw, E) == permute(0,2,1)
    Lw = wave.shape[1]
    if Lw < S:
        wave = jnp.pad(wave, ((0, 0), (0, S - Lw), (0, 0)))
    elif Lw > S:
        wave = wave[:, :S, :]
    pe = positional_encoding(S, E)
    return _pcall(_combine_kernel, 4,
                  jax.ShapeDtypeStruct((B, S, E), jnp.float32))(
        tokens.astype(jnp.int32), params['embedding'], pe, wave)


if __name__ == "__main__":
    vocab_size, embedding_dim = 50, 32
    B, S, Lsig = 2, 8, 16

    key = jax.random.PRNGKey(0)
    kt, ks, kp = jax.random.split(key, 3)
    tokens = jax.random.randint(kt, (B, S), 0, vocab_size, dtype=jnp.int32)
    signals = jax.random.normal(ks, (B, Lsig), jnp.float32)
    params = init_params(kp, vocab_size, embedding_dim)

    fwd = jax.jit(ecg_embedding_forward)
    out = fwd(params, tokens, signals)
    out = jax.block_until_ready(out)
    assert out.shape == (B, S, embedding_dim)
    assert bool(jnp.all(jnp.isfinite(out)))
    print("KERNEL_OK")
</pallas_src>

<mosaic_0001>
module attributes {stable_mosaic.version = 11 : i64} {
  func.func @_enc1_kernel(%arg0: memref<2x16x1xf32, #tpu.memory_space<vmem>>, %arg1: memref<3x64xf32, #tpu.memory_space<vmem>>, %arg2: memref<1x64xf32, #tpu.memory_space<vmem>>, %arg3: memref<1x64xf32, #tpu.memory_space<vmem>>, %arg4: memref<1x64xf32, #tpu.memory_space<vmem>>, %arg5: memref<3x64x64xbf16, #tpu.memory_space<vmem>>, %arg6: memref<1x64xf32, #tpu.memory_space<vmem>>, %arg7: memref<1x64xf32, #tpu.memory_space<vmem>>, %arg8: memref<1x64xf32, #tpu.memory_space<vmem>>, %arg9: memref<2x16x64xbf16, #tpu.memory_space<vmem>>, %arg10: memref<2x8x64xbf16, #tpu.memory_space<vmem>>) attributes {dimension_semantics = [], scalar_prefetch = 0 : i64, scratch_operands = 0 : i64, tpu.core_type = #tpu.core_type<tc>} {
    %c0 = arith.constant 0 : index
    %c0_0 = arith.constant 0 : index
    %c0_1 = arith.constant 0 : index
    %0 = vector.load %arg0[%c0, %c0_0, %c0_1] : memref<2x16x1xf32, #tpu.memory_space<vmem>>, vector<2x16x1xf32>
    %cst = arith.constant 0.000000e+00 : f32
    %1 = vector.broadcast %cst : f32 to vector<2x1x1xf32>
    %2 = vector.extract_strided_slice %0 {offsets = [0, 0, 0], sizes = [2, 15, 1], strides = [1, 1, 1]} : vector<2x16x1xf32> to vector<2x15x1xf32>
    %3 = tpu.concatenate %1, %2 in 1 : vector<2x1x1xf32>, vector<2x15x1xf32> -> vector<2x16x1xf32>
    %4 = vector.extract_strided_slice %0 {offsets = [0, 1, 0], sizes = [2, 15, 1], strides = [1, 1, 1]} : vector<2x16x1xf32> to vector<2x15x1xf32>
    %5 = tpu.concatenate %4, %1 in 1 : vector<2x15x1xf32>, vector<2x1x1xf32> -> vector<2x16x1xf32>
    %c0_2 = arith.constant 0 : index
    %c0_3 = arith.constant 0 : index
    %6 = vector.load %arg1[%c0_2, %c0_3] : memref<3x64xf32, #tpu.memory_space<vmem>>, vector<3x64xf32>
    %7 = vector.extract_strided_slice %6 {offsets = [0, 0], sizes = [1, 64], strides = [1, 1]} : vector<3x64xf32> to vector<1x64xf32>
    %8 = vector.shape_cast %7 : vector<1x64xf32> to vector<1x1x64xf32>
    %9 = vector.broadcast %3 : vector<2x16x1xf32> to vector<2x16x64xf32>
    %10 = vector.broadcast %8 : vector<1x1x64xf32> to vector<2x16x64xf32>
    %11 = arith.mulf %9, %10 : vector<2x16x64xf32>
    %12 = vector.extract_strided_slice %6 {offsets = [1, 0], sizes = [1, 64], strides = [1, 1]} : vector<3x64xf32> to vector<1x64xf32>
    %13 = vector.shape_cast %12 : vector<1x64xf32> to vector<1x1x64xf32>
    %14 = vector.broadcast %0 : vector<2x16x1xf32> to vector<2x16x64xf32>
    %15 = vector.broadcast %13 : vector<1x1x64xf32> to vector<2x16x64xf32>
    %16 = arith.mulf %14, %15 : vector<2x16x64xf32>
    %17 = arith.addf %11, %16 : vector<2x16x64xf32>
    %18 = vector.extract_strided_slice %6 {offsets = [2, 0], sizes = [1, 64], strides = [1, 1]} : vector<3x64xf32> to vector<1x64xf32>
    %19 = vector.shape_cast %18 : vector<1x64xf32> to vector<1x1x64xf32>
    %20 = vector.broadcast %5 : vector<2x16x1xf32> to vector<2x16x64xf32>
    %21 = vector.broadcast %19 : vector<1x1x64xf32> to vector<2x16x64xf32>
    %22 = arith.mulf %20, %21 : vector<2x16x64xf32>
    %23 = arith.addf %17, %22 : vector<2x16x64xf32>
    %c0_4 = arith.constant 0 : index
    %c0_5 = arith.constant 0 : index
    %24 = vector.load %arg2[%c0_4, %c0_5] : memref<1x64xf32, #tpu.memory_space<vmem>>, vector<1x64xf32>
    %25 = vector.shape_cast %24 : vector<1x64xf32> to vector<1x1x64xf32>
    %26 = vector.broadcast %25 : vector<1x1x64xf32> to vector<2x16x64xf32>
    %27 = arith.addf %23, %26 : vector<2x16x64xf32>
    %28 = vector.shape_cast %27 : vector<2x16x64xf32> to vector<32x64xf32>
    %cst_6 = arith.constant dense<0.000000e+00> : vector<64xf32>
    %29 = vector.multi_reduction <add>, %28, %cst_6 [0] : vector<32x64xf32> to vector<64xf32>
    %30 = vector.shape_cast %29 : vector<64xf32> to vector<1x64xf32>
    %cst_7 = arith.constant 3.125000e-02 : f32
    %31 = vector.broadcast %cst_7 : f32 to vector<1x64xf32>
    %32 = arith.mulf %30, %31 : vector<1x64xf32>
    %33 = vector.broadcast %32 : vector<1x64xf32> to vector<32x64xf32>
    %34 = arith.subf %28, %33 : vector<32x64xf32>
    %35 = arith.mulf %34, %34 : vector<32x64xf32>
    %cst_8 = arith.constant dense<0.000000e+00> : vector<64xf32>
    %36 = vector.multi_reduction <add>, %35, %cst_8 [0] : vector<32x64xf32> to vector<64xf32>
    %37 = vector.shape_cast %36 : vector<64xf32> to vector<1x64xf32>
    %cst_9 = arith.constant 3.125000e-02 : f32
    %38 = vector.broadcast %cst_9 : f32 to vector<1x64xf32>
    %39 = arith.mulf %37, %38 : vector<1x64xf32>
    %c0_10 = arith.constant 0 : index
    %c0_11 = arith.constant 0 : index
    %40 = vector.load %arg3[%c0_10, %c0_11] : memref<1x64xf32, #tpu.memory_space<vmem>>, vector<1x64xf32>
    %41 = vector.broadcast %40 : vector<1x64xf32> to vector<32x64xf32>
    %42 = arith.mulf %41, %34 : vector<32x64xf32>
    %cst_12 = arith.constant 9.99999974E-6 : f32
    %43 = vector.broadcast %cst_12 : f32 to vector<1x64xf32>
    %44 = arith.addf %39, %43 : vector<1x64xf32>
    %45 = math.rsqrt %44 : vector<1x64xf32>
    %46 = vector.broadcast %45 : vector<1x64xf32> to vector<32x64xf32>
    %47 = arith.mulf %42, %46 : vector<32x64xf32>
    %c0_13 = arith.constant 0 : index
    %c0_14 = arith.constant 0 : index
    %48 = vector.load %arg4[%c0_13, %c0_14] : memref<1x64xf32, #tpu.memory_space<vmem>>, vector<1x64xf32>
    %49 = vector.broadcast %48 : vector<1x64xf32> to vector<32x64xf32>
    %50 = arith.addf %47, %49 : vector<32x64xf32>
    %cst_15 = arith.constant 0.000000e+00 : f32
    %51 = vector.broadcast %cst_15 : f32 to vector<32x64xf32>
    %52 = arith.maximumf %50, %51 : vector<32x64xf32>
    %53 = vector.shape_cast %52 : vector<32x64xf32> to vector<2x16x64xf32>
    %54 = arith.truncf %53 : vector<2x16x64xf32> to vector<2x16x64xbf16>
    %55 = vector.shape_cast %54 : vector<2x16x64xbf16> to vector<32x64xbf16>
    %c0_16 = arith.constant 0 : index
    %c0_17 = arith.constant 0 : index
    %c0_18 = arith.constant 0 : index
    %56 = vector.load %arg5[%c0_16, %c0_17, %c0_18] : memref<3x64x64xbf16, #tpu.memory_space<vmem>>, vector<1x64x64xbf16>
    %57 = vector.shape_cast %56 : vector<1x64x64xbf16> to vector<64x64xbf16>
    %cst_19 = arith.constant dense<0.000000e+00> : vector<32x64xf32>
    %58 = tpu.matmul %55, %57, %cst_19 {dimension_numbers = #tpu.dot_dimension_numbers<[1], [0], [0], [1], [0, 0, 1, 1], [], []>} : vector<32x64xbf16>, vector<64x64xbf16>, vector<32x64xf32> -> vector<32x64xf32>
    %59 = vector.shape_cast %58 : vector<32x64xf32> to vector<2x16x64xf32>
    %c1 = arith.constant 1 : index
    %c0_20 = arith.constant 0 : index
    %c0_21 = arith.constant 0 : index
    %60 = vector.load %arg5[%c1, %c0_20, %c0_21] : memref<3x64x64xbf16, #tpu.memory_space<vmem>>, vector<1x64x64xbf16>
    %61 = vector.shape_cast %60 : vector<1x64x64xbf16> to vector<64x64xbf16>
    %cst_22 = arith.constant dense<0.000000e+00> : vector<32x64xf32>
    %62 = tpu.matmul %55, %61, %cst_22 {dimension_numbers = #tpu.dot_dimension_numbers<[1], [0], [0], [1], [0, 0, 1, 1], [], []>} : vector<32x64xbf16>, vector<64x64xbf16>, vector<32x64xf32> -> vector<32x64xf32>
    %63 = vector.shape_cast %62 : vector<32x64xf32> to vector<2x16x64xf32>
    %c2 = arith.constant 2 : index
    %c0_23 = arith.constant 0 : index
    %c0_24 = arith.constant 0 : index
    %64 = vector.load %arg5[%c2, %c0_23, %c0_24] : memref<3x64x64xbf16, #tpu.memory_space<vmem>>, vector<1x64x64xbf16>
    %65 = vector.shape_cast %64 : vector<1x64x64xbf16> to vector<64x64xbf16>
    %cst_25 = arith.constant dense<0.000000e+00> : vector<32x64xf32>
    %66 = tpu.matmul %55, %65, %cst_25 {dimension_numbers = #tpu.dot_dimension_numbers<[1], [0], [0], [1], [0, 0, 1, 1], [], []>} : vector<32x64xbf16>, vector<64x64xbf16>, vector<32x64xf32> -> vector<32x64xf32>
    %67 = vector.shape_cast %66 : vector<32x64xf32> to vector<2x16x64xf32>
    %cst_26 = arith.constant 0.000000e+00 : f32
    %68 = vector.broadcast %cst_26 : f32 to vector<2x1x64xf32>
    %69 = vector.extract_strided_slice %59 {offsets = [0, 0, 0], sizes = [2, 15, 64], strides = [1, 1, 1]} : vector<2x16x64xf32> to vector<2x15x64xf32>
    %70 = tpu.concatenate %68, %69 in 1 : vector<2x1x64xf32>, vector<2x15x64xf32> -> vector<2x16x64xf32>
    %71 = arith.addf %63, %70 : vector<2x16x64xf32>
    %72 = vector.extract_strided_slice %67 {offsets = [0, 1, 0], sizes = [2, 15, 64], strides = [1, 1, 1]} : vector<2x16x64xf32> to vector<2x15x64xf32>
    %73 = tpu.concatenate %72, %68 in 1 : vector<2x15x64xf32>, vector<2x1x64xf32> -> vector<2x16x64xf32>
    %74 = arith.addf %71, %73 : vector<2x16x64xf32>
    %c0_27 = arith.constant 0 : index
    %c0_28 = arith.constant 0 : index
    %75 = vector.load %arg6[%c0_27, %c0_28] : memref<1x64xf32, #tpu.memory_space<vmem>>, vector<1x64xf32>
    %76 = vector.shape_cast %75 : vector<1x64xf32> to vector<1x1x64xf32>
    %77 = vector.broadcast %76 : vector<1x1x64xf32> to vector<2x16x64xf32>
    %78 = arith.addf %74, %77 : vector<2x16x64xf32>
    %79 = vector.shape_cast %78 : vector<2x16x64xf32> to vector<32x64xf32>
    %cst_29 = arith.constant dense<0.000000e+00> : vector<64xf32>
    %80 = vector.multi_reduction <add>, %79, %cst_29 [0] : vector<32x64xf32> to vector<64xf32>
    %81 = vector.shape_cast %80 : vector<64xf32> to vector<1x64xf32>
    %cst_30 = arith.constant 3.125000e-02 : f32
    %82 = vector.broadcast %cst_30 : f32 to vector<1x64xf32>
    %83 = arith.mulf %81, %82 : vector<1x64xf32>
    %84 = vector.broadcast %83 : vector<1x64xf32> to vector<32x64xf32>
    %85 = arith.subf %79, %84 : vector<32x64xf32>
    %86 = arith.mulf %85, %85 : vector<32x64xf32>
    %cst_31 = arith.constant dense<0.000000e+00> : vector<64xf32>
    %87 = vector.multi_reduction <add>, %86, %cst_31 [0] : vector<32x64xf32> to vector<64xf32>
    %88 = vector.shape_cast %87 : vector<64xf32> to vector<1x64xf32>
    %cst_32 = arith.constant 3.125000e-02 : f32
    %89 = vector.broadcast %cst_32 : f32 to vector<1x64xf32>
    %90 = arith.mulf %88, %89 : vector<1x64xf32>
    %c0_33 = arith.constant 0 : index
    %c0_34 = arith.constant 0 : index
    %91 = vector.load %arg7[%c0_33, %c0_34] : memref<1x64xf32, #tpu.memory_space<vmem>>, vector<1x64xf32>
    %92 = vector.broadcast %91 : vector<1x64xf32> to vector<32x64xf32>
    %93 = arith.mulf %92, %85 : vector<32x64xf32>
    %cst_35 = arith.constant 9.99999974E-6 : f32
    %94 = vector.broadcast %cst_35 : f32 to vector<1x64xf32>
    %95 = arith.addf %90, %94 : vector<1x64xf32>
    %96 = math.rsqrt %95 : vector<1x64xf32>
    %97 = vector.broadcast %96 : vector<1x64xf32> to vector<32x64xf32>
    %98 = arith.mulf %93, %97 : vector<32x64xf32>
    %c0_36 = arith.constant 0 : index
    %c0_37 = arith.constant 0 : index
    %99 = vector.load %arg8[%c0_36, %c0_37] : memref<1x64xf32, #tpu.memory_space<vmem>>, vector<1x64xf32>
    %100 = vector.broadcast %99 : vector<1x64xf32> to vector<32x64xf32>
    %101 = arith.addf %98, %100 : vector<32x64xf32>
    %cst_38 = arith.constant 0.000000e+00 : f32
    %102 = vector.broadcast %cst_38 : f32 to vector<32x64xf32>
    %103 = arith.maximumf %101, %102 : vector<32x64xf32>
    %104 = vector.shape_cast %103 : vector<32x64xf32> to vector<2x16x64xf32>
    %105 = arith.truncf %104 : vector<2x16x64xf32> to vector<2x16x64xbf16>
    %c0_39 = arith.constant 0 : index
    %c0_40 = arith.constant 0 : index
    %c0_41 = arith.constant 0 : index
    %106 = vector.load %arg9[%c0_39, %c0_40, %c0_41] : memref<2x16x64xbf16, #tpu.memory_space<vmem>>, vector<2x16x64xbf16>
    tpu.vector_store %arg9[%c0_39, %c0_40, %c0_41], %105 {strides = array<i32>} : memref<2x16x64xbf16, #tpu.memory_space<vmem>>, vector<2x16x64xbf16>,
    %107 = vector.shape_cast %104 : vector<2x16x64xf32> to vector<2x8x2x64xf32>
    %cst_42 = arith.constant dense<0xFF800000> : vector<2x8x64xf32>
    %108 = vector.multi_reduction <maximumf>, %107, %cst_42 [2] : vector<2x8x2x64xf32> to vector<2x8x64xf32>
    %109 = arith.truncf %108 : vector<2x8x64xf32> to vector<2x8x64xbf16>
    %c0_43 = arith.constant 0 : index
    %c0_44 = arith.constant 0 : index
    %c0_45 = arith.constant 0 : index
    %110 = vector.load %arg10[%c0_43, %c0_44, %c0_45] : memref<2x8x64xbf16, #tpu.memory_space<vmem>>, vector<2x8x64xbf16>
    tpu.vector_store %arg10[%c0_43, %c0_44, %c0_45], %109 {strides = array<i32>} : memref<2x8x64xbf16, #tpu.memory_space<vmem>>, vector<2x8x64xbf16>,
    return
  }
}

module attributes {stable_mosaic.version = 11 : i64} {
  func.func @kernel(%arg0: memref<2x8x64xbf16, #tpu.memory_space<vmem>>, %arg1: memref<3x64x128xbf16, #tpu.memory_space<vmem>>, %arg2: memref<1x128xf32, #tpu.memory_space<vmem>>, %arg3: memref<1x128xf32, #tpu.memory_space<vmem>>, %arg4: memref<1x128xf32, #tpu.memory_space<vmem>>, %arg5: memref<3x128x128xbf16, #tpu.memory_space<vmem>>, %arg6: memref<1x128xf32, #tpu.memory_space<vmem>>, %arg7: memref<1x128xf32, #tpu.memory_space<vmem>>, %arg8: memref<1x128xf32, #tpu.memory_space<vmem>>, %arg9: memref<2x8x128xbf16, #tpu.memory_space<vmem>>, %arg10: memref<2x4x128xbf16, #tpu.memory_space<vmem>>) attributes {dimension_semantics = [], scalar_prefetch = 0 : i64, scratch_operands = 0 : i64, tpu.core_type = #tpu.core_type<tc>} {
    %c0 = arith.constant 0 : index
    %c0_0 = arith.constant 0 : index
    %c0_1 = arith.constant 0 : index
    %0 = vector.load %arg0[%c0, %c0_0, %c0_1] : memref<2x8x64xbf16, #tpu.memory_space<vmem>>, vector<2x8x64xbf16>
    %1 = vector.shape_cast %0 : vector<2x8x64xbf16> to vector<16x64xbf16>
    %c0_2 = arith.constant 0 : index
    %c0_3 = arith.constant 0 : index
    %c0_4 = arith.constant 0 : index
    %2 = vector.load %arg1[%c0_2, %c0_3, %c0_4] : memref<3x64x128xbf16, #tpu.memory_space<vmem>>, vector<1x64x128xbf16>
    %3 = vector.shape_cast %2 : vector<1x64x128xbf16> to vector<64x128xbf16>
    %cst = arith.constant dense<0.000000e+00> : vector<16x128xf32>
    %4 = tpu.matmul %1, %3, %cst {dimension_numbers = #tpu.dot_dimension_numbers<[1], [0], [0], [1], [0, 0, 1, 1], [], []>} : vector<16x64xbf16>, vector<64x128xbf16>, vector<16x128xf32> -> vector<16x128xf32>
    %5 = vector.shape_cast %4 : vector<16x128xf32> to vector<2x8x128xf32>
    %c1 = arith.constant 1 : index
    %c0_5 = arith.constant 0 : index
    %c0_6 = arith.constant 0 : index
    %6 = vector.load %arg1[%c1, %c0_5, %c0_6] : memref<3x64x128xbf16, #tpu.memory_space<vmem>>, vector<1x64x128xbf16>
    %7 = vector.shape_cast %6 : vector<1x64x128xbf16> to vector<64x128xbf16>
    %cst_7 = arith.constant dense<0.000000e+00> : vector<16x128xf32>
    %8 = tpu.matmul %1, %7, %cst_7 {dimension_numbers = #tpu.dot_dimension_numbers<[1], [0], [0], [1], [0, 0, 1, 1], [], []>} : vector<16x64xbf16>, vector<64x128xbf16>, vector<16x128xf32> -> vector<16x128xf32>
    %9 = vector.shape_cast %8 : vector<16x128xf32> to vector<2x8x128xf32>
    %c2 = arith.constant 2 : index
    %c0_8 = arith.constant 0 : index
    %c0_9 = arith.constant 0 : index
    %10 = vector.load %arg1[%c2, %c0_8, %c0_9] : memref<3x64x128xbf16, #tpu.memory_space<vmem>>, vector<1x64x128xbf16>
    %11 = vector.shape_cast %10 : vector<1x64x128xbf16> to vector<64x128xbf16>
    %cst_10 = arith.constant dense<0.000000e+00> : vector<16x128xf32>
    %12 = tpu.matmul %1, %11, %cst_10 {dimension_numbers = #tpu.dot_dimension_numbers<[1], [0], [0], [1], [0, 0, 1, 1], [], []>} : vector<16x64xbf16>, vector<64x128xbf16>, vector<16x128xf32> -> vector<16x128xf32>
    %13 = vector.shape_cast %12 : vector<16x128xf32> to vector<2x8x128xf32>
    %cst_11 = arith.constant 0.000000e+00 : f32
    %14 = vector.broadcast %cst_11 : f32 to vector<2x1x128xf32>
    %15 = vector.extract_strided_slice %5 {offsets = [0, 0, 0], sizes = [2, 7, 128], strides = [1, 1, 1]} : vector<2x8x128xf32> to vector<2x7x128xf32>
    %16 = tpu.concatenate %14, %15 in 1 : vector<2x1x128xf32>, vector<2x7x128xf32> -> vector<2x8x128xf32>
    %17 = arith.addf %9, %16 : vector<2x8x128xf32>
    %18 = vector.extract_strided_slice %13 {offsets = [0, 1, 0], sizes = [2, 7, 128], strides = [1, 1, 1]} : vector<2x8x128xf32> to vector<2x7x128xf32>
    %19 = tpu.concatenate %18, %14 in 1 : vector<2x7x128xf32>, vector<2x1x128xf32> -> vector<2x8x128xf32>
    %20 = arith.addf %17, %19 : vector<2x8x128xf32>
    %c0_12 = arith.constant 0 : index
    %c0_13 = arith.constant 0 : index
    %21 = vector.load %arg2[%c0_12, %c0_13] : memref<1x128xf32, #tpu.memory_space<vmem>>, vector<1x128xf32>
    %22 = vector.shape_cast %21 : vector<1x128xf32> to vector<1x1x128xf32>
    %23 = vector.broadcast %22 : vector<1x1x128xf32> to vector<2x8x128xf32>
    %24 = arith.addf %20, %23 : vector<2x8x128xf32>
    %25 = vector.shape_cast %24 : vector<2x8x128xf32> to vector<16x128xf32>
    %cst_14 = arith.constant dense<0.000000e+00> : vector<128xf32>
    %26 = vector.multi_reduction <add>, %25, %cst_14 [0] : vector<16x128xf32> to vector<128xf32>
    %27 = vector.shape_cast %26 : vector<128xf32> to vector<1x128xf32>
    %cst_15 = arith.constant 6.250000e-02 : f32
    %28 = vector.broadcast %cst_15 : f32 to vector<1x128xf32>
    %29 = arith.mulf %27, %28 : vector<1x128xf32>
    %30 = vector.broadcast %29 : vector<1x128xf32> to vector<16x128xf32>
    %31 = arith.subf %25, %30 : vector<16x128xf32>
    %32 = arith.mulf %31, %31 : vector<16x128xf32>
    %cst_16 = arith.constant dense<0.000000e+00> : vector<128xf32>
    %33 = vector.multi_reduction <add>, %32, %cst_16 [0] : vector<16x128xf32> to vector<128xf32>
    %34 = vector.shape_cast %33 : vector<128xf32> to vector<1x128xf32>
    %cst_17 = arith.constant 6.250000e-02 : f32
    %35 = vector.broadcast %cst_17 : f32 to vector<1x128xf32>
    %36 = arith.mulf %34, %35 : vector<1x128xf32>
    %c0_18 = arith.constant 0 : index
    %c0_19 = arith.constant 0 : index
    %37 = vector.load %arg3[%c0_18, %c0_19] : memref<1x128xf32, #tpu.memory_space<vmem>>, vector<1x128xf32>
    %38 = vector.broadcast %37 : vector<1x128xf32> to vector<16x128xf32>
    %39 = arith.mulf %38, %31 : vector<16x128xf32>
    %cst_20 = arith.constant 9.99999974E-6 : f32
    %40 = vector.broadcast %cst_20 : f32 to vector<1x128xf32>
    %41 = arith.addf %36, %40 : vector<1x128xf32>
    %42 = math.rsqrt %41 : vector<1x128xf32>
    %43 = vector.broadcast %42 : vector<1x128xf32> to vector<16x128xf32>
    %44 = arith.mulf %39, %43 : vector<16x128xf32>
    %c0_21 = arith.constant 0 : index
    %c0_22 = arith.constant 0 : index
    %45 = vector.load %arg4[%c0_21, %c0_22] : memref<1x128xf32, #tpu.memory_space<vmem>>, vector<1x128xf32>
    %46 = vector.broadcast %45 : vector<1x128xf32> to vector<16x128xf32>
    %47 = arith.addf %44, %46 : vector<16x128xf32>
    %cst_23 = arith.constant 0.000000e+00 : f32
    %48 = vector.broadcast %cst_23 : f32 to vector<16x128xf32>
    %49 = arith.maximumf %47, %48 : vector<16x128xf32>
    %50 = vector.shape_cast %49 : vector<16x128xf32> to vector<2x8x128xf32>
    %51 = arith.truncf %50 : vector<2x8x128xf32> to vector<2x8x128xbf16>
    %52 = vector.shape_cast %51 : vector<2x8x128xbf16> to vector<16x128xbf16>
    %c0_24 = arith.constant 0 : index
    %c0_25 = arith.constant 0 : index
    %c0_26 = arith.constant 0 : index
    %53 = vector.load %arg5[%c0_24, %c0_25, %c0_26] : memref<3x128x128xbf16, #tpu.memory_space<vmem>>, vector<1x128x128xbf16>
    %54 = vector.shape_cast %53 : vector<1x128x128xbf16> to vector<128x128xbf16>
    %cst_27 = arith.constant dense<0.000000e+00> : vector<16x128xf32>
    %55 = tpu.matmul %52, %54, %cst_27 {dimension_numbers = #tpu.dot_dimension_numbers<[1], [0], [0], [1], [0, 0, 1, 1], [], []>} : vector<16x128xbf16>, vector<128x128xbf16>, vector<16x128xf32> -> vector<16x128xf32>
    %56 = vector.shape_cast %55 : vector<16x128xf32> to vector<2x8x128xf32>
    %c1_28 = arith.constant 1 : index
    %c0_29 = arith.constant 0 : index
    %c0_30 = arith.constant 0 : index
    %57 = vector.load %arg5[%c1_28, %c0_29, %c0_30] : memref<3x128x128xbf16, #tpu.memory_space<vmem>>, vector<1x128x128xbf16>
    %58 = vector.shape_cast %57 : vector<1x128x128xbf16> to vector<128x128xbf16>
    %cst_31 = arith.constant dense<0.000000e+00> : vector<16x128xf32>
    %59 = tpu.matmul %52, %58, %cst_31 {dimension_numbers = #tpu.dot_dimension_numbers<[1], [0], [0], [1], [0, 0, 1, 1], [], []>} : vector<16x128xbf16>, vector<128x128xbf16>, vector<16x128xf32> -> vector<16x128xf32>
    %60 = vector.shape_cast %59 : vector<16x128xf32> to vector<2x8x128xf32>
    %c2_32 = arith.constant 2 : index
    %c0_33 = arith.constant 0 : index
    %c0_34 = arith.constant 0 : index
    %61 = vector.load %arg5[%c2_32, %c0_33, %c0_34] : memref<3x128x128xbf16, #tpu.memory_space<vmem>>, vector<1x128x128xbf16>
    %62 = vector.shape_cast %61 : vector<1x128x128xbf16> to vector<128x128xbf16>
    %cst_35 = arith.constant dense<0.000000e+00> : vector<16x128xf32>
    %63 = tpu.matmul %52, %62, %cst_35 {dimension_numbers = #tpu.dot_dimension_numbers<[1], [0], [0], [1], [0, 0, 1, 1], [], []>} : vector<16x128xbf16>, vector<128x128xbf16>, vector<16x128xf32> -> vector<16x128xf32>
    %64 = vector.shape_cast %63 : vector<16x128xf32> to vector<2x8x128xf32>
    %cst_36 = arith.constant 0.000000e+00 : f32
    %65 = vector.broadcast %cst_36 : f32 to vector<2x1x128xf32>
    %66 = vector.extract_strided_slice %56 {offsets = [0, 0, 0], sizes = [2, 7, 128], strides = [1, 1, 1]} : vector<2x8x128xf32> to vector<2x7x128xf32>
    %67 = tpu.concatenate %65, %66 in 1 : vector<2x1x128xf32>, vector<2x7x128xf32> -> vector<2x8x128xf32>
    %68 = arith.addf %60, %67 : vector<2x8x128xf32>
    %69 = vector.extract_strided_slice %64 {offsets = [0, 1, 0], sizes = [2, 7, 128], strides = [1, 1, 1]} : vector<2x8x128xf32> to vector<2x7x128xf32>
    %70 = tpu.concatenate %69, %65 in 1 : vector<2x7x128xf32>, vector<2x1x128xf32> -> vector<2x8x128xf32>
    %71 = arith.addf %68, %70 : vector<2x8x128xf32>
    %c0_37 = arith.constant 0 : index
    %c0_38 = arith.constant 0 : index
    %72 = vector.load %arg6[%c0_37, %c0_38] : memref<1x128xf32, #tpu.memory_space<vmem>>, vector<1x128xf32>
    %73 = vector.shape_cast %72 : vector<1x128xf32> to vector<1x1x128xf32>
    %74 = vector.broadcast %73 : vector<1x1x128xf32> to vector<2x8x128xf32>
    %75 = arith.addf %71, %74 : vector<2x8x128xf32>
    %76 = vector.shape_cast %75 : vector<2x8x128xf32> to vector<16x128xf32>
    %cst_39 = arith.constant dense<0.000000e+00> : vector<128xf32>
    %77 = vector.multi_reduction <add>, %76, %cst_39 [0] : vector<16x128xf32> to vector<128xf32>
    %78 = vector.shape_cast %77 : vector<128xf32> to vector<1x128xf32>
    %cst_40 = arith.constant 6.250000e-02 : f32
    %79 = vector.broadcast %cst_40 : f32 to vector<1x128xf32>
    %80 = arith.mulf %78, %79 : vector<1x128xf32>
    %81 = vector.broadcast %80 : vector<1x128xf32> to vector<16x128xf32>
    %82 = arith.subf %76, %81 : vector<16x128xf32>
    %83 = arith.mulf %82, %82 : vector<16x128xf32>
    %cst_41 = arith.constant dense<0.000000e+00> : vector<128xf32>
    %84 = vector.multi_reduction <add>, %83, %cst_41 [0] : vector<16x128xf32> to vector<128xf32>
    %85 = vector.shape_cast %84 : vector<128xf32> to vector<1x128xf32>
    %cst_42 = arith.constant 6.250000e-02 : f32
    %86 = vector.broadcast %cst_42 : f32 to vector<1x128xf32>
    %87 = arith.mulf %85, %86 : vector<1x128xf32>
    %c0_43 = arith.constant 0 : index
    %c0_44 = arith.constant 0 : index
    %88 = vector.load %arg7[%c0_43, %c0_44] : memref<1x128xf32, #tpu.memory_space<vmem>>, vector<1x128xf32>
    %89 = vector.broadcast %88 : vector<1x128xf32> to vector<16x128xf32>
    %90 = arith.mulf %89, %82 : vector<16x128xf32>
    %cst_45 = arith.constant 9.99999974E-6 : f32
    %91 = vector.broadcast %cst_45 : f32 to vector<1x128xf32>
    %92 = arith.addf %87, %91 : vector<1x128xf32>
    %93 = math.rsqrt %92 : vector<1x128xf32>
    %94 = vector.broadcast %93 : vector<1x128xf32> to vector<16x128xf32>
    %95 = arith.mulf %90, %94 : vector<16x128xf32>
    %c0_46 = arith.constant 0 : index
    %c0_47 = arith.constant 0 : index
    %96 = vector.load %arg8[%c0_46, %c0_47] : memref<1x128xf32, #tpu.memory_space<vmem>>, vector<1x128xf32>
    %97 = vector.broadcast %96 : vector<1x128xf32> to vector<16x128xf32>
    %98 = arith.addf %95, %97 : vector<16x128xf32>
    %cst_48 = arith.constant 0.000000e+00 : f32
    %99 = vector.broadcast %cst_48 : f32 to vector<16x128xf32>
    %100 = arith.maximumf %98, %99 : vector<16x128xf32>
    %101 = vector.shape_cast %100 : vector<16x128xf32> to vector<2x8x128xf32>
    %102 = arith.truncf %101 : vector<2x8x128xf32> to vector<2x8x128xbf16>
    %c0_49 = arith.constant 0 : index
    %c0_50 = arith.constant 0 : index
    %c0_51 = arith.constant 0 : index
    %103 = vector.load %arg9[%c0_49, %c0_50, %c0_51] : memref<2x8x128xbf16, #tpu.memory_space<vmem>>, vector<2x8x128xbf16>
    tpu.vector_store %arg9[%c0_49, %c0_50, %c0_51], %102 {strides = array<i32>} : memref<2x8x128xbf16, #tpu.memory_space<vmem>>, vector<2x8x128xbf16>,
    %104 = vector.shape_cast %101 : vector<2x8x128xf32> to vector<2x4x2x128xf32>
    %cst_52 = arith.constant dense<0xFF800000> : vector<2x4x128xf32>
    %105 = vector.multi_reduction <maximumf>, %104, %cst_52 [2] : vector<2x4x2x128xf32> to vector<2x4x128xf32>
    %106 = arith.truncf %105 : vector<2x4x128xf32> to vector<2x4x128xbf16>
    %c0_53 = arith.constant 0 : index
    %c0_54 = arith.constant 0 : index
    %c0_55 = arith.constant 0 : index
    %107 = vector.load %arg10[%c0_53, %c0_54, %c0_55] : memref<2x4x128xbf16, #tpu.memory_space<vmem>>, vector<2x4x128xbf16>
    tpu.vector_store %arg10[%c0_53, %c0_54, %c0_55], %106 {strides = array<i32>} : memref<2x4x128xbf16, #tpu.memory_space<vmem>>, vector<2x4x128xbf16>,
    return
  }
}

module attributes {stable_mosaic.version = 11 : i64} {
  func.func @kernel(%arg0: memref<2x4x128xbf16, #tpu.memory_space<vmem>>, %arg1: memref<3x128x256xbf16, #tpu.memory_space<vmem>>, %arg2: memref<1x256xf32, #tpu.memory_space<vmem>>, %arg3: memref<1x256xf32, #tpu.memory_space<vmem>>, %arg4: memref<1x256xf32, #tpu.memory_space<vmem>>, %arg5: memref<3x256x256xbf16, #tpu.memory_space<vmem>>, %arg6: memref<1x256xf32, #tpu.memory_space<vmem>>, %arg7: memref<1x256xf32, #tpu.memory_space<vmem>>, %arg8: memref<1x256xf32, #tpu.memory_space<vmem>>, %arg9: memref<2x4x256xbf16, #tpu.memory_space<vmem>>) attributes {dimension_semantics = [], scalar_prefetch = 0 : i64, scratch_operands = 0 : i64, tpu.core_type = #tpu.core_type<tc>} {
    %c0 = arith.constant 0 : index
    %c0_0 = arith.constant 0 : index
    %c0_1 = arith.constant 0 : index
    %0 = vector.load %arg0[%c0, %c0_0, %c0_1] : memref<2x4x128xbf16, #tpu.memory_space<vmem>>, vector<2x4x128xbf16>
    %1 = vector.shape_cast %0 : vector<2x4x128xbf16> to vector<8x128xbf16>
    %c0_2 = arith.constant 0 : index
    %c0_3 = arith.constant 0 : index
    %c0_4 = arith.constant 0 : index
    %2 = vector.load %arg1[%c0_2, %c0_3, %c0_4] : memref<3x128x256xbf16, #tpu.memory_space<vmem>>, vector<1x128x256xbf16>
    %3 = vector.shape_cast %2 : vector<1x128x256xbf16> to vector<128x256xbf16>
    %cst = arith.constant dense<0.000000e+00> : vector<8x256xf32>
    %4 = tpu.matmul %1, %3, %cst {dimension_numbers = #tpu.dot_dimension_numbers<[1], [0], [0], [1], [0, 0, 1, 1], [], []>} : vector<8x128xbf16>, vector<128x256xbf16>, vector<8x256xf32> -> vector<8x256xf32>
    %5 = vector.shape_cast %4 : vector<8x256xf32> to vector<2x4x256xf32>
    %c1 = arith.constant 1 : index
    %c0_5 = arith.constant 0 : index
    %c0_6 = arith.constant 0 : index
    %6 = vector.load %arg1[%c1, %c0_5, %c0_6] : memref<3x128x256xbf16, #tpu.memory_space<vmem>>, vector<1x128x256xbf16>
    %7 = vector.shape_cast %6 : vector<1x128x256xbf16> to vector<128x256xbf16>
    %cst_7 = arith.constant dense<0.000000e+00> : vector<8x256xf32>
    %8 = tpu.matmul %1, %7, %cst_7 {dimension_numbers = #tpu.dot_dimension_numbers<[1], [0], [0], [1], [0, 0, 1, 1], [], []>} : vector<8x128xbf16>, vector<128x256xbf16>, vector<8x256xf32> -> vector<8x256xf32>
    %9 = vector.shape_cast %8 : vector<8x256xf32> to vector<2x4x256xf32>
    %c2 = arith.constant 2 : index
    %c0_8 = arith.constant 0 : index
    %c0_9 = arith.constant 0 : index
    %10 = vector.load %arg1[%c2, %c0_8, %c0_9] : memref<3x128x256xbf16, #tpu.memory_space<vmem>>, vector<1x128x256xbf16>
    %11 = vector.shape_cast %10 : vector<1x128x256xbf16> to vector<128x256xbf16>
    %cst_10 = arith.constant dense<0.000000e+00> : vector<8x256xf32>
    %12 = tpu.matmul %1, %11, %cst_10 {dimension_numbers = #tpu.dot_dimension_numbers<[1], [0], [0], [1], [0, 0, 1, 1], [], []>} : vector<8x128xbf16>, vector<128x256xbf16>, vector<8x256xf32> -> vector<8x256xf32>
    %13 = vector.shape_cast %12 : vector<8x256xf32> to vector<2x4x256xf32>
    %cst_11 = arith.constant 0.000000e+00 : f32
    %14 = vector.broadcast %cst_11 : f32 to vector<2x1x256xf32>
    %15 = vector.extract_strided_slice %5 {offsets = [0, 0, 0], sizes = [2, 3, 256], strides = [1, 1, 1]} : vector<2x4x256xf32> to vector<2x3x256xf32>
    %16 = tpu.concatenate %14, %15 in 1 : vector<2x1x256xf32>, vector<2x3x256xf32> -> vector<2x4x256xf32>
    %17 = arith.addf %9, %16 : vector<2x4x256xf32>
    %18 = vector.extract_strided_slice %13 {offsets = [0, 1, 0], sizes = [2, 3, 256], strides = [1, 1, 1]} : vector<2x4x256xf32> to vector<2x3x256xf32>
    %19 = tpu.concatenate %18, %14 in 1 : vector<2x3x256xf32>, vector<2x1x256xf32> -> vector<2x4x256xf32>
    %20 = arith.addf %17, %19 : vector<2x4x256xf32>
    %c0_12 = arith.constant 0 : index
    %c0_13 = arith.constant 0 : index
    %21 = vector.load %arg2[%c0_12, %c0_13] : memref<1x256xf32, #tpu.memory_space<vmem>>, vector<1x256xf32>
    %22 = vector.shape_cast %21 : vector<1x256xf32> to vector<1x1x256xf32>
    %23 = vector.broadcast %22 : vector<1x1x256xf32> to vector<2x4x256xf32>
    %24 = arith.addf %20, %23 : vector<2x4x256xf32>
    %25 = vector.shape_cast %24 : vector<2x4x256xf32> to vector<8x256xf32>
    %cst_14 = arith.constant dense<0.000000e+00> : vector<256xf32>
    %26 = vector.multi_reduction <add>, %25, %cst_14 [0] : vector<8x256xf32> to vector<256xf32>
    %27 = vector.shape_cast %26 : vector<256xf32> to vector<1x256xf32>
    %cst_15 = arith.constant 1.250000e-01 : f32
    %28 = vector.broadcast %cst_15 : f32 to vector<1x256xf32>
    %29 = arith.mulf %27, %28 : vector<1x256xf32>
    %30 = vector.broadcast %29 : vector<1x256xf32> to vector<8x256xf32>
    %31 = arith.subf %25, %30 : vector<8x256xf32>
    %32 = arith.mulf %31, %31 : vector<8x256xf32>
    %cst_16 = arith.constant dense<0.000000e+00> : vector<256xf32>
    %33 = vector.multi_reduction <add>, %32, %cst_16 [0] : vector<8x256xf32> to vector<256xf32>
    %34 = vector.shape_cast %33 : vector<256xf32> to vector<1x256xf32>
    %cst_17 = arith.constant 1.250000e-01 : f32
    %35 = vector.broadcast %cst_17 : f32 to vector<1x256xf32>
    %36 = arith.mulf %34, %35 : vector<1x256xf32>
    %c0_18 = arith.constant 0 : index
    %c0_19 = arith.constant 0 : index
    %37 = vector.load %arg3[%c0_18, %c0_19] : memref<1x256xf32, #tpu.memory_space<vmem>>, vector<1x256xf32>
    %38 = vector.broadcast %37 : vector<1x256xf32> to vector<8x256xf32>
    %39 = arith.mulf %38, %31 : vector<8x256xf32>
    %cst_20 = arith.constant 9.99999974E-6 : f32
    %40 = vector.broadcast %cst_20 : f32 to vector<1x256xf32>
    %41 = arith.addf %36, %40 : vector<1x256xf32>
    %42 = math.rsqrt %41 : vector<1x256xf32>
    %43 = vector.broadcast %42 : vector<1x256xf32> to vector<8x256xf32>
    %44 = arith.mulf %39, %43 : vector<8x256xf32>
    %c0_21 = arith.constant 0 : index
    %c0_22 = arith.constant 0 : index
    %45 = vector.load %arg4[%c0_21, %c0_22] : memref<1x256xf32, #tpu.memory_space<vmem>>, vector<1x256xf32>
    %46 = vector.broadcast %45 : vector<1x256xf32> to vector<8x256xf32>
    %47 = arith.addf %44, %46 : vector<8x256xf32>
    %cst_23 = arith.constant 0.000000e+00 : f32
    %48 = vector.broadcast %cst_23 : f32 to vector<8x256xf32>
    %49 = arith.maximumf %47, %48 : vector<8x256xf32>
    %50 = vector.shape_cast %49 : vector<8x256xf32> to vector<2x4x256xf32>
    %51 = arith.truncf %50 : vector<2x4x256xf32> to vector<2x4x256xbf16>
    %52 = vector.shape_cast %51 : vector<2x4x256xbf16> to vector<8x256xbf16>
    %c0_24 = arith.constant 0 : index
    %c0_25 = arith.constant 0 : index
    %c0_26 = arith.constant 0 : index
    %53 = vector.load %arg5[%c0_24, %c0_25, %c0_26] : memref<3x256x256xbf16, #tpu.memory_space<vmem>>, vector<1x256x256xbf16>
    %54 = vector.shape_cast %53 : vector<1x256x256xbf16> to vector<256x256xbf16>
    %cst_27 = arith.constant dense<0.000000e+00> : vector<8x256xf32>
    %55 = tpu.matmul %52, %54, %cst_27 {dimension_numbers = #tpu.dot_dimension_numbers<[1], [0], [0], [1], [0, 0, 1, 1], [], []>} : vector<8x256xbf16>, vector<256x256xbf16>, vector<8x256xf32> -> vector<8x256xf32>
    %56 = vector.shape_cast %55 : vector<8x256xf32> to vector<2x4x256xf32>
    %c1_28 = arith.constant 1 : index
    %c0_29 = arith.constant 0 : index
    %c0_30 = arith.constant 0 : index
    %57 = vector.load %arg5[%c1_28, %c0_29, %c0_30] : memref<3x256x256xbf16, #tpu.memory_space<vmem>>, vector<1x256x256xbf16>
    %58 = vector.shape_cast %57 : vector<1x256x256xbf16> to vector<256x256xbf16>
    %cst_31 = arith.constant dense<0.000000e+00> : vector<8x256xf32>
    %59 = tpu.matmul %52, %58, %cst_31 {dimension_numbers = #tpu.dot_dimension_numbers<[1], [0], [0], [1], [0, 0, 1, 1], [], []>} : vector<8x256xbf16>, vector<256x256xbf16>, vector<8x256xf32> -> vector<8x256xf32>
    %60 = vector.shape_cast %59 : vector<8x256xf32> to vector<2x4x256xf32>
    %c2_32 = arith.constant 2 : index
    %c0_33 = arith.constant 0 : index
    %c0_34 = arith.constant 0 : index
    %61 = vector.load %arg5[%c2_32, %c0_33, %c0_34] : memref<3x256x256xbf16, #tpu.memory_space<vmem>>, vector<1x256x256xbf16>
    %62 = vector.shape_cast %61 : vector<1x256x256xbf16> to vector<256x256xbf16>
    %cst_35 = arith.constant dense<0.000000e+00> : vector<8x256xf32>
    %63 = tpu.matmul %52, %62, %cst_35 {dimension_numbers = #tpu.dot_dimension_numbers<[1], [0], [0], [1], [0, 0, 1, 1], [], []>} : vector<8x256xbf16>, vector<256x256xbf16>, vector<8x256xf32> -> vector<8x256xf32>
    %64 = vector.shape_cast %63 : vector<8x256xf32> to vector<2x4x256xf32>
    %cst_36 = arith.constant 0.000000e+00 : f32
    %65 = vector.broadcast %cst_36 : f32 to vector<2x1x256xf32>
    %66 = vector.extract_strided_slice %56 {offsets = [0, 0, 0], sizes = [2, 3, 256], strides = [1, 1, 1]} : vector<2x4x256xf32> to vector<2x3x256xf32>
    %67 = tpu.concatenate %65, %66 in 1 : vector<2x1x256xf32>, vector<2x3x256xf32> -> vector<2x4x256xf32>
    %68 = arith.addf %60, %67 : vector<2x4x256xf32>
    %69 = vector.extract_strided_slice %64 {offsets = [0, 1, 0], sizes = [2, 3, 256], strides = [1, 1, 1]} : vector<2x4x256xf32> to vector<2x3x256xf32>
    %70 = tpu.concatenate %69, %65 in 1 : vector<2x3x256xf32>, vector<2x1x256xf32> -> vector<2x4x256xf32>
    %71 = arith.addf %68, %70 : vector<2x4x256xf32>
    %c0_37 = arith.constant 0 : index
    %c0_38 = arith.constant 0 : index
    %72 = vector.load %arg6[%c0_37, %c0_38] : memref<1x256xf32, #tpu.memory_space<vmem>>, vector<1x256xf32>
    %73 = vector.shape_cast %72 : vector<1x256xf32> to vector<1x1x256xf32>
    %74 = vector.broadcast %73 : vector<1x1x256xf32> to vector<2x4x256xf32>
    %75 = arith.addf %71, %74 : vector<2x4x256xf32>
    %76 = vector.shape_cast %75 : vector<2x4x256xf32> to vector<8x256xf32>
    %cst_39 = arith.constant dense<0.000000e+00> : vector<256xf32>
    %77 = vector.multi_reduction <add>, %76, %cst_39 [0] : vector<8x256xf32> to vector<256xf32>
    %78 = vector.shape_cast %77 : vector<256xf32> to vector<1x256xf32>
    %cst_40 = arith.constant 1.250000e-01 : f32
    %79 = vector.broadcast %cst_40 : f32 to vector<1x256xf32>
    %80 = arith.mulf %78, %79 : vector<1x256xf32>
    %81 = vector.broadcast %80 : vector<1x256xf32> to vector<8x256xf32>
    %82 = arith.subf %76, %81 : vector<8x256xf32>
    %83 = arith.mulf %82, %82 : vector<8x256xf32>
    %cst_41 = arith.constant dense<0.000000e+00> : vector<256xf32>
    %84 = vector.multi_reduction <add>, %83, %cst_41 [0] : vector<8x256xf32> to vector<256xf32>
    %85 = vector.shape_cast %84 : vector<256xf32> to vector<1x256xf32>
    %cst_42 = arith.constant 1.250000e-01 : f32
    %86 = vector.broadcast %cst_42 : f32 to vector<1x256xf32>
    %87 = arith.mulf %85, %86 : vector<1x256xf32>
    %c0_43 = arith.constant 0 : index
    %c0_44 = arith.constant 0 : index
    %88 = vector.load %arg7[%c0_43, %c0_44] : memref<1x256xf32, #tpu.memory_space<vmem>>, vector<1x256xf32>
    %89 = vector.broadcast %88 : vector<1x256xf32> to vector<8x256xf32>
    %90 = arith.mulf %89, %82 : vector<8x256xf32>
    %cst_45 = arith.constant 9.99999974E-6 : f32
    %91 = vector.broadcast %cst_45 : f32 to vector<1x256xf32>
    %92 = arith.addf %87, %91 : vector<1x256xf32>
    %93 = math.rsqrt %92 : vector<1x256xf32>
    %94 = vector.broadcast %93 : vector<1x256xf32> to vector<8x256xf32>
    %95 = arith.mulf %90, %94 : vector<8x256xf32>
    %c0_46 = arith.constant 0 : index
    %c0_47 = arith.constant 0 : index
    %96 = vector.load %arg8[%c0_46, %c0_47] : memref<1x256xf32, #tpu.memory_space<vmem>>, vector<1x256xf32>
    %97 = vector.broadcast %96 : vector<1x256xf32> to vector<8x256xf32>
    %98 = arith.addf %95, %97 : vector<8x256xf32>
    %cst_48 = arith.constant 0.000000e+00 : f32
    %99 = vector.broadcast %cst_48 : f32 to vector<8x256xf32>
    %100 = arith.maximumf %98, %99 : vector<8x256xf32>
    %101 = vector.shape_cast %100 : vector<8x256xf32> to vector<2x4x256xf32>
    %102 = arith.truncf %101 : vector<2x4x256xf32> to vector<2x4x256xbf16>
    %c0_49 = arith.constant 0 : index
    %c0_50 = arith.constant 0 : index
    %c0_51 = arith.constant 0 : index
    %103 = vector.load %arg9[%c0_49, %c0_50, %c0_51] : memref<2x4x256xbf16, #tpu.memory_space<vmem>>, vector<2x4x256xbf16>
    tpu.vector_store %arg9[%c0_49, %c0_50, %c0_51], %102 {strides = array<i32>} : memref<2x4x256xbf16, #tpu.memory_space<vmem>>, vector<2x4x256xbf16>,
    return
  }
}

module attributes {stable_mosaic.version = 11 : i64} {
  func.func @kernel(%arg0: memref<2x4x256xbf16, #tpu.memory_space<vmem>>, %arg1: memref<2x8x128xbf16, #tpu.memory_space<vmem>>, %arg2: memref<2x256x128xbf16, #tpu.memory_space<vmem>>, %arg3: memref<1x128xf32, #tpu.memory_space<vmem>>, %arg4: memref<3x128x128xbf16, #tpu.memory_space<vmem>>, %arg5: memref<3x128x128xbf16, #tpu.memory_space<vmem>>, %arg6: memref<1x128xf32, #tpu.memory_space<vmem>>, %arg7: memref<1x128xf32, #tpu.memory_space<vmem>>, %arg8: memref<1x128xf32, #tpu.memory_space<vmem>>, %arg9: memref<3x128x128xbf16, #tpu.memory_space<vmem>>, %arg10: memref<1x128xf32, #tpu.memory_space<vmem>>, %arg11: memref<1x128xf32, #tpu.memory_space<vmem>>, %arg12: memref<1x128xf32, #tpu.memory_space<vmem>>, %arg13: memref<2x8x128xbf16, #tpu.memory_space<vmem>>) attributes {dimension_semantics = [], scalar_prefetch = 0 : i64, scratch_operands = 0 : i64, tpu.core_type = #tpu.core_type<tc>} {
    %c0 = arith.constant 0 : index
    %c0_0 = arith.constant 0 : index
    %c0_1 = arith.constant 0 : index
    %0 = vector.load %arg0[%c0, %c0_0, %c0_1] : memref<2x4x256xbf16, #tpu.memory_space<vmem>>, vector<2x4x256xbf16>
    %1 = vector.shape_cast %0 : vector<2x4x256xbf16> to vector<8x256xbf16>
    %c0_2 = arith.constant 0 : index
    %c0_3 = arith.constant 0 : index
    %c0_4 = arith.constant 0 : index
    %2 = vector.load %arg2[%c0_2, %c0_3, %c0_4] : memref<2x256x128xbf16, #tpu.memory_space<vmem>>, vector<1x256x128xbf16>
    %3 = vector.shape_cast %2 : vector<1x256x128xbf16> to vector<256x128xbf16>
    %cst = arith.constant dense<0.000000e+00> : vector<8x128xf32>
    %4 = tpu.matmul %1, %3, %cst {dimension_numbers = #tpu.dot_dimension_numbers<[1], [0], [0], [1], [0, 0, 1, 1], [], []>} : vector<8x256xbf16>, vector<256x128xbf16>, vector<8x128xf32> -> vector<8x128xf32>
    %c0_5 = arith.constant 0 : index
    %c0_6 = arith.constant 0 : index
    %5 = vector.load %arg3[%c0_5, %c0_6] : memref<1x128xf32, #tpu.memory_space<vmem>>, vector<1x128xf32>
    %6 = vector.broadcast %5 : vector<1x128xf32> to vector<8x128xf32>
    %7 = arith.addf %4, %6 : vector<8x128xf32>
    %c1 = arith.constant 1 : index
    %c0_7 = arith.constant 0 : index
    %c0_8 = arith.constant 0 : index
    %8 = vector.load %arg2[%c1, %c0_7, %c0_8] : memref<2x256x128xbf16, #tpu.memory_space<vmem>>, vector<1x256x128xbf16>
    %9 = vector.shape_cast %8 : vector<1x256x128xbf16> to vector<256x128xbf16>
    %cst_9 = arith.constant dense<0.000000e+00> : vector<8x128xf32>
    %10 = tpu.matmul %1, %9, %cst_9 {dimension_numbers = #tpu.dot_dimension_numbers<[1], [0], [0], [1], [0, 0, 1, 1], [], []>} : vector<8x256xbf16>, vector<256x128xbf16>, vector<8x128xf32> -> vector<8x128xf32>
    %c0_10 = arith.constant 0 : index
    %c0_11 = arith.constant 0 : index
    %11 = vector.load %arg3[%c0_10, %c0_11] : memref<1x128xf32, #tpu.memory_space<vmem>>, vector<1x128xf32>
    %12 = vector.broadcast %11 : vector<1x128xf32> to vector<8x128xf32>
    %13 = arith.addf %10, %12 : vector<8x128xf32>
    %14 = vector.shape_cast %7 : vector<8x128xf32> to vector<2x4x1x128xf32>
    %15 = vector.shape_cast %13 : vector<8x128xf32> to vector<2x4x1x128xf32>
    %16 = tpu.concatenate %14, %15 in 2 : vector<2x4x1x128xf32>, vector<2x4x1x128xf32> -> vector<2x4x2x128xf32>
    %17 = vector.shape_cast %16 : vector<2x4x2x128xf32> to vector<2x8x128xf32>
    %18 = arith.truncf %17 : vector<2x8x128xf32> to vector<2x8x128xbf16>
    %c0_12 = arith.constant 0 : index
    %c0_13 = arith.constant 0 : index
    %c0_14 = arith.constant 0 : index
    %19 = vector.load %arg1[%c0_12, %c0_13, %c0_14] : memref<2x8x128xbf16, #tpu.memory_space<vmem>>, vector<2x8x128xbf16>
    %20 = vector.shape_cast %18 : vector<2x8x128xbf16> to vector<16x128xbf16>
    %c0_15 = arith.constant 0 : index
    %c0_16 = arith.constant 0 : index
    %c0_17 = arith.constant 0 : index
    %21 = vector.load %arg4[%c0_15, %c0_16, %c0_17] : memref<3x128x128xbf16, #tpu.memory_space<vmem>>, vector<1x128x128xbf16>
    %22 = vector.shape_cast %21 : vector<1x128x128xbf16> to vector<128x128xbf16>
    %cst_18 = arith.constant dense<0.000000e+00> : vector<16x128xf32>
    %23 = tpu.matmul %20, %22, %cst_18 {dimension_numbers = #tpu.dot_dimension_numbers<[1], [0], [0], [1], [0, 0, 1, 1], [], []>} : vector<16x128xbf16>, vector<128x128xbf16>, vector<16x128xf32> -> vector<16x128xf32>
    %24 = vector.shape_cast %23 : vector<16x128xf32> to vector<2x8x128xf32>
    %c1_19 = arith.constant 1 : index
    %c0_20 = arith.constant 0 : index
    %c0_21 = arith.constant 0 : index
    %25 = vector.load %arg4[%c1_19, %c0_20, %c0_21] : memref<3x128x128xbf16, #tpu.memory_space<vmem>>, vector<1x128x128xbf16>
    %26 = vector.shape_cast %25 : vector<1x128x128xbf16> to vector<128x128xbf16>
    %cst_22 = arith.constant dense<0.000000e+00> : vector<16x128xf32>
    %27 = tpu.matmul %20, %26, %cst_22 {dimension_numbers = #tpu.dot_dimension_numbers<[1], [0], [0], [1], [0, 0, 1, 1], [], []>} : vector<16x128xbf16>, vector<128x128xbf16>, vector<16x128xf32> -> vector<16x128xf32>
    %28 = vector.shape_cast %27 : vector<16x128xf32> to vector<2x8x128xf32>
    %c2 = arith.constant 2 : index
    %c0_23 = arith.constant 0 : index
    %c0_24 = arith.constant 0 : index
    %29 = vector.load %arg4[%c2, %c0_23, %c0_24] : memref<3x128x128xbf16, #tpu.memory_space<vmem>>, vector<1x128x128xbf16>
    %30 = vector.shape_cast %29 : vector<1x128x128xbf16> to vector<128x128xbf16>
    %cst_25 = arith.constant dense<0.000000e+00> : vector<16x128xf32>
    %31 = tpu.matmul %20, %30, %cst_25 {dimension_numbers = #tpu.dot_dimension_numbers<[1], [0], [0], [1], [0, 0, 1, 1], [], []>} : vector<16x128xbf16>, vector<128x128xbf16>, vector<16x128xf32> -> vector<16x128xf32>
    %32 = vector.shape_cast %31 : vector<16x128xf32> to vector<2x8x128xf32>
    %cst_26 = arith.constant 0.000000e+00 : f32
    %33 = vector.broadcast %cst_26 : f32 to vector<2x1x128xf32>
    %34 = vector.extract_strided_slice %24 {offsets = [0, 0, 0], sizes = [2, 7, 128], strides = [1, 1, 1]} : vector<2x8x128xf32> to vector<2x7x128xf32>
    %35 = tpu.concatenate %33, %34 in 1 : vector<2x1x128xf32>, vector<2x7x128xf32> -> vector<2x8x128xf32>
    %36 = arith.addf %28, %35 : vector<2x8x128xf32>
    %37 = vector.extract_strided_slice %32 {offsets = [0, 1, 0], sizes = [2, 7, 128], strides = [1, 1, 1]} : vector<2x8x128xf32> to vector<2x7x128xf32>
    %38 = tpu.concatenate %37, %33 in 1 : vector<2x7x128xf32>, vector<2x1x128xf32> -> vector<2x8x128xf32>
    %39 = arith.addf %36, %38 : vector<2x8x128xf32>
    %40 = vector.shape_cast %19 : vector<2x8x128xbf16> to vector<16x128xbf16>
    %c0_27 = arith.constant 0 : index
    %c0_28 = arith.constant 0 : index
    %c0_29 = arith.constant 0 : index
    %41 = vector.load %arg5[%c0_27, %c0_28, %c0_29] : memref<3x128x128xbf16, #tpu.memory_space<vmem>>, vector<1x128x128xbf16>
    %42 = vector.shape_cast %41 : vector<1x128x128xbf16> to vector<128x128xbf16>
    %cst_30 = arith.constant dense<0.000000e+00> : vector<16x128xf32>
    %43 = tpu.matmul %40, %42, %cst_30 {dimension_numbers = #tpu.dot_dimension_numbers<[1], [0], [0], [1], [0, 0, 1, 1], [], []>} : vector<16x128xbf16>, vector<128x128xbf16>, vector<16x128xf32> -> vector<16x128xf32>
    %44 = vector.shape_cast %43 : vector<16x128xf32> to vector<2x8x128xf32>
    %c1_31 = arith.constant 1 : index
    %c0_32 = arith.constant 0 : index
    %c0_33 = arith.constant 0 : index
    %45 = vector.load %arg5[%c1_31, %c0_32, %c0_33] : memref<3x128x128xbf16, #tpu.memory_space<vmem>>, vector<1x128x128xbf16>
    %46 = vector.shape_cast %45 : vector<1x128x128xbf16> to vector<128x128xbf16>
    %cst_34 = arith.constant dense<0.000000e+00> : vector<16x128xf32>
    %47 = tpu.matmul %40, %46, %cst_34 {dimension_numbers = #tpu.dot_dimension_numbers<[1], [0], [0], [1], [0, 0, 1, 1], [], []>} : vector<16x128xbf16>, vector<128x128xbf16>, vector<16x128xf32> -> vector<16x128xf32>
    %48 = vector.shape_cast %47 : vector<16x128xf32> to vector<2x8x128xf32>
    %c2_35 = arith.constant 2 : index
    %c0_36 = arith.constant 0 : index
    %c0_37 = arith.constant 0 : index
    %49 = vector.load %arg5[%c2_35, %c0_36, %c0_37] : memref<3x128x128xbf16, #tpu.memory_space<vmem>>, vector<1x128x128xbf16>
    %50 = vector.shape_cast %49 : vector<1x128x128xbf16> to vector<128x128xbf16>
    %cst_38 = arith.constant dense<0.000000e+00> : vector<16x128xf32>
    %51 = tpu.matmul %40, %50, %cst_38 {dimension_numbers = #tpu.dot_dimension_numbers<[1], [0], [0], [1], [0, 0, 1, 1], [], []>} : vector<16x128xbf16>, vector<128x128xbf16>, vector<16x128xf32> -> vector<16x128xf32>
    %52 = vector.shape_cast %51 : vector<16x128xf32> to vector<2x8x128xf32>
    %cst_39 = arith.constant 0.000000e+00 : f32
    %53 = vector.broadcast %cst_39 : f32 to vector<2x1x128xf32>
    %54 = vector.extract_strided_slice %44 {offsets = [0, 0, 0], sizes = [2, 7, 128], strides = [1, 1, 1]} : vector<2x8x128xf32> to vector<2x7x128xf32>
    %55 = tpu.concatenate %53, %54 in 1 : vector<2x1x128xf32>, vector<2x7x128xf32> -> vector<2x8x128xf32>
    %56 = arith.addf %48, %55 : vector<2x8x128xf32>
    %57 = vector.extract_strided_slice %52 {offsets = [0, 1, 0], sizes = [2, 7, 128], strides = [1, 1, 1]} : vector<2x8x128xf32> to vector<2x7x128xf32>
    %58 = tpu.concatenate %57, %53 in 1 : vector<2x7x128xf32>, vector<2x1x128xf32> -> vector<2x8x128xf32>
    %59 = arith.addf %56, %58 : vector<2x8x128xf32>
    %60 = arith.addf %39, %59 : vector<2x8x128xf32>
    %c0_40 = arith.constant 0 : index
    %c0_41 = arith.constant 0 : index
    %61 = vector.load %arg6[%c0_40, %c0_41] : memref<1x128xf32, #tpu.memory_space<vmem>>, vector<1x128xf32>
    %62 = vector.shape_cast %61 : vector<1x128xf32> to vector<1x1x128xf32>
    %63 = vector.broadcast %62 : vector<1x1x128xf32> to vector<2x8x128xf32>
    %64 = arith.addf %60, %63 : vector<2x8x128xf32>
    %65 = vector.shape_cast %64 : vector<2x8x128xf32> to vector<16x128xf32>
    %cst_42 = arith.constant dense<0.000000e+00> : vector<128xf32>
    %66 = vector.multi_reduction <add>, %65, %cst_42 [0] : vector<16x128xf32> to vector<128xf32>
    %67 = vector.shape_cast %66 : vector<128xf32> to vector<1x128xf32>
    %cst_43 = arith.constant 6.250000e-02 : f32
    %68 = vector.broadcast %cst_43 : f32 to vector<1x128xf32>
    %69 = arith.mulf %67, %68 : vector<1x128xf32>
    %70 = vector.broadcast %69 : vector<1x128xf32> to vector<16x128xf32>
    %71 = arith.subf %65, %70 : vector<16x128xf32>
    %72 = arith.mulf %71, %71 : vector<16x128xf32>
    %cst_44 = arith.constant dense<0.000000e+00> : vector<128xf32>
    %73 = vector.multi_reduction <add>, %72, %cst_44 [0] : vector<16x128xf32> to vector<128xf32>
    %74 = vector.shape_cast %73 : vector<128xf32> to vector<1x128xf32>
    %cst_45 = arith.constant 6.250000e-02 : f32
    %75 = vector.broadcast %cst_45 : f32 to vector<1x128xf32>
    %76 = arith.mulf %74, %75 : vector<1x128xf32>
    %c0_46 = arith.constant 0 : index
    %c0_47 = arith.constant 0 : index
    %77 = vector.load %arg7[%c0_46, %c0_47] : memref<1x128xf32, #tpu.memory_space<vmem>>, vector<1x128xf32>
    %78 = vector.broadcast %77 : vector<1x128xf32> to vector<16x128xf32>
    %79 = arith.mulf %78, %71 : vector<16x128xf32>
    %cst_48 = arith.constant 9.99999974E-6 : f32
    %80 = vector.broadcast %cst_48 : f32 to vector<1x128xf32>
    %81 = arith.addf %76, %80 : vector<1x128xf32>
    %82 = math.rsqrt %81 : vector<1x128xf32>
    %83 = vector.broadcast %82 : vector<1x128xf32> to vector<16x128xf32>
    %84 = arith.mulf %79, %83 : vector<16x128xf32>
    %c0_49 = arith.constant 0 : index
    %c0_50 = arith.constant 0 : index
    %85 = vector.load %arg8[%c0_49, %c0_50] : memref<1x128xf32, #tpu.memory_space<vmem>>, vector<1x128xf32>
    %86 = vector.broadcast %85 : vector<1x128xf32> to vector<16x128xf32>
    %87 = arith.addf %84, %86 : vector<16x128xf32>
    %cst_51 = arith.constant 0.000000e+00 : f32
    %88 = vector.broadcast %cst_51 : f32 to vector<16x128xf32>
    %89 = arith.maximumf %87, %88 : vector<16x128xf32>
    %90 = vector.shape_cast %89 : vector<16x128xf32> to vector<2x8x128xf32>
    %91 = arith.truncf %90 : vector<2x8x128xf32> to vector<2x8x128xbf16>
    %92 = vector.shape_cast %91 : vector<2x8x128xbf16> to vector<16x128xbf16>
    %c0_52 = arith.constant 0 : index
    %c0_53 = arith.constant 0 : index
    %c0_54 = arith.constant 0 : index
    %93 = vector.load %arg9[%c0_52, %c0_53, %c0_54] : memref<3x128x128xbf16, #tpu.memory_space<vmem>>, vector<1x128x128xbf16>
    %94 = vector.shape_cast %93 : vector<1x128x128xbf16> to vector<128x128xbf16>
    %cst_55 = arith.constant dense<0.000000e+00> : vector<16x128xf32>
    %95 = tpu.matmul %92, %94, %cst_55 {dimension_numbers = #tpu.dot_dimension_numbers<[1], [0], [0], [1], [0, 0, 1, 1], [], []>} : vector<16x128xbf16>, vector<128x128xbf16>, vector<16x128xf32> -> vector<16x128xf32>
    %96 = vector.shape_cast %95 : vector<16x128xf32> to vector<2x8x128xf32>
    %c1_56 = arith.constant 1 : index
    %c0_57 = arith.constant 0 : index
    %c0_58 = arith.constant 0 : index
    %97 = vector.load %arg9[%c1_56, %c0_57, %c0_58] : memref<3x128x128xbf16, #tpu.memory_space<vmem>>, vector<1x128x128xbf16>
    %98 = vector.shape_cast %97 : vector<1x128x128xbf16> to vector<128x128xbf16>
    %cst_59 = arith.constant dense<0.000000e+00> : vector<16x128xf32>
    %99 = tpu.matmul %92, %98, %cst_59 {dimension_numbers = #tpu.dot_dimension_numbers<[1], [0], [0], [1], [0, 0, 1, 1], [], []>} : vector<16x128xbf16>, vector<128x128xbf16>, vector<16x128xf32> -> vector<16x128xf32>
    %100 = vector.shape_cast %99 : vector<16x128xf32> to vector<2x8x128xf32>
    %c2_60 = arith.constant 2 : index
    %c0_61 = arith.constant 0 : index
    %c0_62 = arith.constant 0 : index
    %101 = vector.load %arg9[%c2_60, %c0_61, %c0_62] : memref<3x128x128xbf16, #tpu.memory_space<vmem>>, vector<1x128x128xbf16>
    %102 = vector.shape_cast %101 : vector<1x128x128xbf16> to vector<128x128xbf16>
    %cst_63 = arith.constant dense<0.000000e+00> : vector<16x128xf32>
    %103 = tpu.matmul %92, %102, %cst_63 {dimension_numbers = #tpu.dot_dimension_numbers<[1], [0], [0], [1], [0, 0, 1, 1], [], []>} : vector<16x128xbf16>, vector<128x128xbf16>, vector<16x128xf32> -> vector<16x128xf32>
    %104 = vector.shape_cast %103 : vector<16x128xf32> to vector<2x8x128xf32>
    %cst_64 = arith.constant 0.000000e+00 : f32
    %105 = vector.broadcast %cst_64 : f32 to vector<2x1x128xf32>
    %106 = vector.extract_strided_slice %96 {offsets = [0, 0, 0], sizes = [2, 7, 128], strides = [1, 1, 1]} : vector<2x8x128xf32> to vector<2x7x128xf32>
    %107 = tpu.concatenate %105, %106 in 1 : vector<2x1x128xf32>, vector<2x7x128xf32> -> vector<2x8x128xf32>
    %108 = arith.addf %100, %107 : vector<2x8x128xf32>
    %109 = vector.extract_strided_slice %104 {offsets = [0, 1, 0], sizes = [2, 7, 128], strides = [1, 1, 1]} : vector<2x8x128xf32> to vector<2x7x128xf32>
    %110 = tpu.concatenate %109, %105 in 1 : vector<2x7x128xf32>, vector<2x1x128xf32> -> vector<2x8x128xf32>
    %111 = arith.addf %108, %110 : vector<2x8x128xf32>
    %c0_65 = arith.constant 0 : index
    %c0_66 = arith.constant 0 : index
    %112 = vector.load %arg10[%c0_65, %c0_66] : memref<1x128xf32, #tpu.memory_space<vmem>>, vector<1x128xf32>
    %113 = vector.shape_cast %112 : vector<1x128xf32> to vector<1x1x128xf32>
    %114 = vector.broadcast %113 : vector<1x1x128xf32> to vector<2x8x128xf32>
    %115 = arith.addf %111, %114 : vector<2x8x128xf32>
    %116 = vector.shape_cast %115 : vector<2x8x128xf32> to vector<16x128xf32>
    %cst_67 = arith.constant dense<0.000000e+00> : vector<128xf32>
    %117 = vector.multi_reduction <add>, %116, %cst_67 [0] : vector<16x128xf32> to vector<128xf32>
    %118 = vector.shape_cast %117 : vector<128xf32> to vector<1x128xf32>
    %cst_68 = arith.constant 6.250000e-02 : f32
    %119 = vector.broadcast %cst_68 : f32 to vector<1x128xf32>
    %120 = arith.mulf %118, %119 : vector<1x128xf32>
    %121 = vector.broadcast %120 : vector<1x128xf32> to vector<16x128xf32>
    %122 = arith.subf %116, %121 : vector<16x128xf32>
    %123 = arith.mulf %122, %122 : vector<16x128xf32>
    %cst_69 = arith.constant dense<0.000000e+00> : vector<128xf32>
    %124 = vector.multi_reduction <add>, %123, %cst_69 [0] : vector<16x128xf32> to vector<128xf32>
    %125 = vector.shape_cast %124 : vector<128xf32> to vector<1x128xf32>
    %cst_70 = arith.constant 6.250000e-02 : f32
    %126 = vector.broadcast %cst_70 : f32 to vector<1x128xf32>
    %127 = arith.mulf %125, %126 : vector<1x128xf32>
    %c0_71 = arith.constant 0 : index
    %c0_72 = arith.constant 0 : index
    %128 = vector.load %arg11[%c0_71, %c0_72] : memref<1x128xf32, #tpu.memory_space<vmem>>, vector<1x128xf32>
    %129 = vector.broadcast %128 : vector<1x128xf32> to vector<16x128xf32>
    %130 = arith.mulf %129, %122 : vector<16x128xf32>
    %cst_73 = arith.constant 9.99999974E-6 : f32
    %131 = vector.broadcast %cst_73 : f32 to vector<1x128xf32>
    %132 = arith.addf %127, %131 : vector<1x128xf32>
    %133 = math.rsqrt %132 : vector<1x128xf32>
    %134 = vector.broadcast %133 : vector<1x128xf32> to vector<16x128xf32>
    %135 = arith.mulf %130, %134 : vector<16x128xf32>
    %c0_74 = arith.constant 0 : index
    %c0_75 = arith.constant 0 : index
    %136 = vector.load %arg12[%c0_74, %c0_75] : memref<1x128xf32, #tpu.memory_space<vmem>>, vector<1x128xf32>
    %137 = vector.broadcast %136 : vector<1x128xf32> to vector<16x128xf32>
    %138 = arith.addf %135, %137 : vector<16x128xf32>
    %cst_76 = arith.constant 0.000000e+00 : f32
    %139 = vector.broadcast %cst_76 : f32 to vector<16x128xf32>
    %140 = arith.maximumf %138, %139 : vector<16x128xf32>
    %141 = vector.shape_cast %140 : vector<16x128xf32> to vector<2x8x128xf32>
    %142 = arith.truncf %141 : vector<2x8x128xf32> to vector<2x8x128xbf16>
    %c0_77 = arith.constant 0 : index
    %c0_78 = arith.constant 0 : index
    %c0_79 = arith.constant 0 : index
    %143 = vector.load %arg13[%c0_77, %c0_78, %c0_79] : memref<2x8x128xbf16, #tpu.memory_space<vmem>>, vector<2x8x128xbf16>
    tpu.vector_store %arg13[%c0_77, %c0_78, %c0_79], %142 {strides = array<i32>} : memref<2x8x128xbf16, #tpu.memory_space<vmem>>, vector<2x8x128xbf16>,
    return
  }
}

module attributes {stable_mosaic.version = 11 : i64} {
  func.func @kernel(%arg0: memref<2x8x128xbf16, #tpu.memory_space<vmem>>, %arg1: memref<2x16x64xbf16, #tpu.memory_space<vmem>>, %arg2: memref<2x128x64xbf16, #tpu.memory_space<vmem>>, %arg3: memref<1x64xf32, #tpu.memory_space<vmem>>, %arg4: memref<3x64x64xbf16, #tpu.memory_space<vmem>>, %arg5: memref<3x64x64xbf16, #tpu.memory_space<vmem>>, %arg6: memref<1x64xf32, #tpu.memory_space<vmem>>, %arg7: memref<1x64xf32, #tpu.memory_space<vmem>>, %arg8: memref<1x64xf32, #tpu.memory_space<vmem>>, %arg9: memref<3x64x64xbf16, #tpu.memory_space<vmem>>, %arg10: memref<1x64xf32, #tpu.memory_space<vmem>>, %arg11: memref<1x64xf32, #tpu.memory_space<vmem>>, %arg12: memref<1x64xf32, #tpu.memory_space<vmem>>, %arg13: memref<64x32xbf16, #tpu.memory_space<vmem>>, %arg14: memref<1x32xf32, #tpu.memory_space<vmem>>, %arg15: memref<2x16x32xbf16, #tpu.memory_space<vmem>>) attributes {dimension_semantics = [], scalar_prefetch = 0 : i64, scratch_operands = 0 : i64, tpu.core_type = #tpu.core_type<tc>} {
    %c0 = arith.constant 0 : index
    %c0_0 = arith.constant 0 : index
    %c0_1 = arith.constant 0 : index
    %0 = vector.load %arg0[%c0, %c0_0, %c0_1] : memref<2x8x128xbf16, #tpu.memory_space<vmem>>, vector<2x8x128xbf16>
    %1 = vector.shape_cast %0 : vector<2x8x128xbf16> to vector<16x128xbf16>
    %c0_2 = arith.constant 0 : index
    %c0_3 = arith.constant 0 : index
    %c0_4 = arith.constant 0 : index
    %2 = vector.load %arg2[%c0_2, %c0_3, %c0_4] : memref<2x128x64xbf16, #tpu.memory_space<vmem>>, vector<1x128x64xbf16>
    %3 = vector.shape_cast %2 : vector<1x128x64xbf16> to vector<128x64xbf16>
    %cst = arith.constant dense<0.000000e+00> : vector<16x64xf32>
    %4 = tpu.matmul %1, %3, %cst {dimension_numbers = #tpu.dot_dimension_numbers<[1], [0], [0], [1], [0, 0, 1, 1], [], []>} : vector<16x128xbf16>, vector<128x64xbf16>, vector<16x64xf32> -> vector<16x64xf32>
    %c0_5 = arith.constant 0 : index
    %c0_6 = arith.constant 0 : index
    %5 = vector.load %arg3[%c0_5, %c0_6] : memref<1x64xf32, #tpu.memory_space<vmem>>, vector<1x64xf32>
    %6 = vector.broadcast %5 : vector<1x64xf32> to vector<16x64xf32>
    %7 = arith.addf %4, %6 : vector<16x64xf32>
    %c1 = arith.constant 1 : index
    %c0_7 = arith.constant 0 : index
    %c0_8 = arith.constant 0 : index
    %8 = vector.load %arg2[%c1, %c0_7, %c0_8] : memref<2x128x64xbf16, #tpu.memory_space<vmem>>, vector<1x128x64xbf16>
    %9 = vector.shape_cast %8 : vector<1x128x64xbf16> to vector<128x64xbf16>
    %cst_9 = arith.constant dense<0.000000e+00> : vector<16x64xf32>
    %10 = tpu.matmul %1, %9, %cst_9 {dimension_numbers = #tpu.dot_dimension_numbers<[1], [0], [0], [1], [0, 0, 1, 1], [], []>} : vector<16x128xbf16>, vector<128x64xbf16>, vector<16x64xf32> -> vector<16x64xf32>
    %c0_10 = arith.constant 0 : index
    %c0_11 = arith.constant 0 : index
    %11 = vector.load %arg3[%c0_10, %c0_11] : memref<1x64xf32, #tpu.memory_space<vmem>>, vector<1x64xf32>
    %12 = vector.broadcast %11 : vector<1x64xf32> to vector<16x64xf32>
    %13 = arith.addf %10, %12 : vector<16x64xf32>
    %14 = vector.shape_cast %7 : vector<16x64xf32> to vector<2x8x1x64xf32>
    %15 = vector.shape_cast %13 : vector<16x64xf32> to vector<2x8x1x64xf32>
    %16 = tpu.concatenate %14, %15 in 2 : vector<2x8x1x64xf32>, vector<2x8x1x64xf32> -> vector<2x8x2x64xf32>
    %17 = vector.shape_cast %16 : vector<2x8x2x64xf32> to vector<2x16x64xf32>
    %18 = arith.truncf %17 : vector<2x16x64xf32> to vector<2x16x64xbf16>
    %c0_12 = arith.constant 0 : index
    %c0_13 = arith.constant 0 : index
    %c0_14 = arith.constant 0 : index
    %19 = vector.load %arg1[%c0_12, %c0_13, %c0_14] : memref<2x16x64xbf16, #tpu.memory_space<vmem>>, vector<2x16x64xbf16>
    %20 = vector.shape_cast %18 : vector<2x16x64xbf16> to vector<32x64xbf16>
    %c0_15 = arith.constant 0 : index
    %c0_16 = arith.constant 0 : index
    %c0_17 = arith.constant 0 : index
    %21 = vector.load %arg4[%c0_15, %c0_16, %c0_17] : memref<3x64x64xbf16, #tpu.memory_space<vmem>>, vector<1x64x64xbf16>
    %22 = vector.shape_cast %21 : vector<1x64x64xbf16> to vector<64x64xbf16>
    %cst_18 = arith.constant dense<0.000000e+00> : vector<32x64xf32>
    %23 = tpu.matmul %20, %22, %cst_18 {dimension_numbers = #tpu.dot_dimension_numbers<[1], [0], [0], [1], [0, 0, 1, 1], [], []>} : vector<32x64xbf16>, vector<64x64xbf16>, vector<32x64xf32> -> vector<32x64xf32>
    %24 = vector.shape_cast %23 : vector<32x64xf32> to vector<2x16x64xf32>
    %c1_19 = arith.constant 1 : index
    %c0_20 = arith.constant 0 : index
    %c0_21 = arith.constant 0 : index
    %25 = vector.load %arg4[%c1_19, %c0_20, %c0_21] : memref<3x64x64xbf16, #tpu.memory_space<vmem>>, vector<1x64x64xbf16>
    %26 = vector.shape_cast %25 : vector<1x64x64xbf16> to vector<64x64xbf16>
    %cst_22 = arith.constant dense<0.000000e+00> : vector<32x64xf32>
    %27 = tpu.matmul %20, %26, %cst_22 {dimension_numbers = #tpu.dot_dimension_numbers<[1], [0], [0], [1], [0, 0, 1, 1], [], []>} : vector<32x64xbf16>, vector<64x64xbf16>, vector<32x64xf32> -> vector<32x64xf32>
    %28 = vector.shape_cast %27 : vector<32x64xf32> to vector<2x16x64xf32>
    %c2 = arith.constant 2 : index
    %c0_23 = arith.constant 0 : index
    %c0_24 = arith.constant 0 : index
    %29 = vector.load %arg4[%c2, %c0_23, %c0_24] : memref<3x64x64xbf16, #tpu.memory_space<vmem>>, vector<1x64x64xbf16>
    %30 = vector.shape_cast %29 : vector<1x64x64xbf16> to vector<64x64xbf16>
    %cst_25 = arith.constant dense<0.000000e+00> : vector<32x64xf32>
    %31 = tpu.matmul %20, %30, %cst_25 {dimension_numbers = #tpu.dot_dimension_numbers<[1], [0], [0], [1], [0, 0, 1, 1], [], []>} : vector<32x64xbf16>, vector<64x64xbf16>, vector<32x64xf32> -> vector<32x64xf32>
    %32 = vector.shape_cast %31 : vector<32x64xf32> to vector<2x16x64xf32>
    %cst_26 = arith.constant 0.000000e+00 : f32
    %33 = vector.broadcast %cst_26 : f32 to vector<2x1x64xf32>
    %34 = vector.extract_strided_slice %24 {offsets = [0, 0, 0], sizes = [2, 15, 64], strides = [1, 1, 1]} : vector<2x16x64xf32> to vector<2x15x64xf32>
    %35 = tpu.concatenate %33, %34 in 1 : vector<2x1x64xf32>, vector<2x15x64xf32> -> vector<2x16x64xf32>
    %36 = arith.addf %28, %35 : vector<2x16x64xf32>
    %37 = vector.extract_strided_slice %32 {offsets = [0, 1, 0], sizes = [2, 15, 64], strides = [1, 1, 1]} : vector<2x16x64xf32> to vector<2x15x64xf32>
    %38 = tpu.concatenate %37, %33 in 1 : vector<2x15x64xf32>, vector<2x1x64xf32> -> vector<2x16x64xf32>
    %39 = arith.addf %36, %38 : vector<2x16x64xf32>
    %40 = vector.shape_cast %19 : vector<2x16x64xbf16> to vector<32x64xbf16>
    %c0_27 = arith.constant 0 : index
    %c0_28 = arith.constant 0 : index
    %c0_29 = arith.constant 0 : index
    %41 = vector.load %arg5[%c0_27, %c0_28, %c0_29] : memref<3x64x64xbf16, #tpu.memory_space<vmem>>, vector<1x64x64xbf16>
    %42 = vector.shape_cast %41 : vector<1x64x64xbf16> to vector<64x64xbf16>
    %cst_30 = arith.constant dense<0.000000e+00> : vector<32x64xf32>
    %43 = tpu.matmul %40, %42, %cst_30 {dimension_numbers = #tpu.dot_dimension_numbers<[1], [0], [0], [1], [0, 0, 1, 1], [], []>} : vector<32x64xbf16>, vector<64x64xbf16>, vector<32x64xf32> -> vector<32x64xf32>
    %44 = vector.shape_cast %43 : vector<32x64xf32> to vector<2x16x64xf32>
    %c1_31 = arith.constant 1 : index
    %c0_32 = arith.constant 0 : index
    %c0_33 = arith.constant 0 : index
    %45 = vector.load %arg5[%c1_31, %c0_32, %c0_33] : memref<3x64x64xbf16, #tpu.memory_space<vmem>>, vector<1x64x64xbf16>
    %46 = vector.shape_cast %45 : vector<1x64x64xbf16> to vector<64x64xbf16>
    %cst_34 = arith.constant dense<0.000000e+00> : vector<32x64xf32>
    %47 = tpu.matmul %40, %46, %cst_34 {dimension_numbers = #tpu.dot_dimension_numbers<[1], [0], [0], [1], [0, 0, 1, 1], [], []>} : vector<32x64xbf16>, vector<64x64xbf16>, vector<32x64xf32> -> vector<32x64xf32>
    %48 = vector.shape_cast %47 : vector<32x64xf32> to vector<2x16x64xf32>
    %c2_35 = arith.constant 2 : index
    %c0_36 = arith.constant 0 : index
    %c0_37 = arith.constant 0 : index
    %49 = vector.load %arg5[%c2_35, %c0_36, %c0_37] : memref<3x64x64xbf16, #tpu.memory_space<vmem>>, vector<1x64x64xbf16>
    %50 = vector.shape_cast %49 : vector<1x64x64xbf16> to vector<64x64xbf16>
    %cst_38 = arith.constant dense<0.000000e+00> : vector<32x64xf32>
    %51 = tpu.matmul %40, %50, %cst_38 {dimension_numbers = #tpu.dot_dimension_numbers<[1], [0], [0], [1], [0, 0, 1, 1], [], []>} : vector<32x64xbf16>, vector<64x64xbf16>, vector<32x64xf32> -> vector<32x64xf32>
    %52 = vector.shape_cast %51 : vector<32x64xf32> to vector<2x16x64xf32>
    %cst_39 = arith.constant 0.000000e+00 : f32
    %53 = vector.broadcast %cst_39 : f32 to vector<2x1x64xf32>
    %54 = vector.extract_strided_slice %44 {offsets = [0, 0, 0], sizes = [2, 15, 64], strides = [1, 1, 1]} : vector<2x16x64xf32> to vector<2x15x64xf32>
    %55 = tpu.concatenate %53, %54 in 1 : vector<2x1x64xf32>, vector<2x15x64xf32> -> vector<2x16x64xf32>
    %56 = arith.addf %48, %55 : vector<2x16x64xf32>
    %57 = vector.extract_strided_slice %52 {offsets = [0, 1, 0], sizes = [2, 15, 64], strides = [1, 1, 1]} : vector<2x16x64xf32> to vector<2x15x64xf32>
    %58 = tpu.concatenate %57, %53 in 1 : vector<2x15x64xf32>, vector<2x1x64xf32> -> vector<2x16x64xf32>
    %59 = arith.addf %56, %58 : vector<2x16x64xf32>
    %60 = arith.addf %39, %59 : vector<2x16x64xf32>
    %c0_40 = arith.constant 0 : index
    %c0_41 = arith.constant 0 : index
    %61 = vector.load %arg6[%c0_40, %c0_41] : memref<1x64xf32, #tpu.memory_space<vmem>>, vector<1x64xf32>
    %62 = vector.shape_cast %61 : vector<1x64xf32> to vector<1x1x64xf32>
    %63 = vector.broadcast %62 : vector<1x1x64xf32> to vector<2x16x64xf32>
    %64 = arith.addf %60, %63 : vector<2x16x64xf32>
    %65 = vector.shape_cast %64 : vector<2x16x64xf32> to vector<32x64xf32>
    %cst_42 = arith.constant dense<0.000000e+00> : vector<64xf32>
    %66 = vector.multi_reduction <add>, %65, %cst_42 [0] : vector<32x64xf32> to vector<64xf32>
    %67 = vector.shape_cast %66 : vector<64xf32> to vector<1x64xf32>
    %cst_43 = arith.constant 3.125000e-02 : f32
    %68 = vector.broadcast %cst_43 : f32 to vector<1x64xf32>
    %69 = arith.mulf %67, %68 : vector<1x64xf32>
    %70 = vector.broadcast %69 : vector<1x64xf32> to vector<32x64xf32>
    %71 = arith.subf %65, %70 : vector<32x64xf32>
    %72 = arith.mulf %71, %71 : vector<32x64xf32>
    %cst_44 = arith.constant dense<0.000000e+00> : vector<64xf32>
    %73 = vector.multi_reduction <add>, %72, %cst_44 [0] : vector<32x64xf32> to vector<64xf32>
    %74 = vector.shape_cast %73 : vector<64xf32> to vector<1x64xf32>
    %cst_45 = arith.constant 3.125000e-02 : f32
    %75 = vector.broadcast %cst_45 : f32 to vector<1x64xf32>
    %76 = arith.mulf %74, %75 : vector<1x64xf32>
    %c0_46 = arith.constant 0 : index
    %c0_47 = arith.constant 0 : index
    %77 = vector.load %arg7[%c0_46, %c0_47] : memref<1x64xf32, #tpu.memory_space<vmem>>, vector<1x64xf32>
    %78 = vector.broadcast %77 : vector<1x64xf32> to vector<32x64xf32>
    %79 = arith.mulf %78, %71 : vector<32x64xf32>
    %cst_48 = arith.constant 9.99999974E-6 : f32
    %80 = vector.broadcast %cst_48 : f32 to vector<1x64xf32>
    %81 = arith.addf %76, %80 : vector<1x64xf32>
    %82 = math.rsqrt %81 : vector<1x64xf32>
    %83 = vector.broadcast %82 : vector<1x64xf32> to vector<32x64xf32>
    %84 = arith.mulf %79, %83 : vector<32x64xf32>
    %c0_49 = arith.constant 0 : index
    %c0_50 = arith.constant 0 : index
    %85 = vector.load %arg8[%c0_49, %c0_50] : memref<1x64xf32, #tpu.memory_space<vmem>>, vector<1x64xf32>
    %86 = vector.broadcast %85 : vector<1x64xf32> to vector<32x64xf32>
    %87 = arith.addf %84, %86 : vector<32x64xf32>
    %cst_51 = arith.constant 0.000000e+00 : f32
    %88 = vector.broadcast %cst_51 : f32 to vector<32x64xf32>
    %89 = arith.maximumf %87, %88 : vector<32x64xf32>
    %90 = vector.shape_cast %89 : vector<32x64xf32> to vector<2x16x64xf32>
    %91 = arith.truncf %90 : vector<2x16x64xf32> to vector<2x16x64xbf16>
    %92 = vector.shape_cast %91 : vector<2x16x64xbf16> to vector<32x64xbf16>
    %c0_52 = arith.constant 0 : index
    %c0_53 = arith.constant 0 : index
    %c0_54 = arith.constant 0 : index
    %93 = vector.load %arg9[%c0_52, %c0_53, %c0_54] : memref<3x64x64xbf16, #tpu.memory_space<vmem>>, vector<1x64x64xbf16>
    %94 = vector.shape_cast %93 : vector<1x64x64xbf16> to vector<64x64xbf16>
    %cst_55 = arith.constant dense<0.000000e+00> : vector<32x64xf32>
    %95 = tpu.matmul %92, %94, %cst_55 {dimension_numbers = #tpu.dot_dimension_numbers<[1], [0], [0], [1], [0, 0, 1, 1], [], []>} : vector<32x64xbf16>, vector<64x64xbf16>, vector<32x64xf32> -> vector<32x64xf32>
    %96 = vector.shape_cast %95 : vector<32x64xf32> to vector<2x16x64xf32>
    %c1_56 = arith.constant 1 : index
    %c0_57 = arith.constant 0 : index
    %c0_58 = arith.constant 0 : index
    %97 = vector.load %arg9[%c1_56, %c0_57, %c0_58] : memref<3x64x64xbf16, #tpu.memory_space<vmem>>, vector<1x64x64xbf16>
    %98 = vector.shape_cast %97 : vector<1x64x64xbf16> to vector<64x64xbf16>
    %cst_59 = arith.constant dense<0.000000e+00> : vector<32x64xf32>
    %99 = tpu.matmul %92, %98, %cst_59 {dimension_numbers = #tpu.dot_dimension_numbers<[1], [0], [0], [1], [0, 0, 1, 1], [], []>} : vector<32x64xbf16>, vector<64x64xbf16>, vector<32x64xf32> -> vector<32x64xf32>
    %100 = vector.shape_cast %99 : vector<32x64xf32> to vector<2x16x64xf32>
    %c2_60 = arith.constant 2 : index
    %c0_61 = arith.constant 0 : index
    %c0_62 = arith.constant 0 : index
    %101 = vector.load %arg9[%c2_60, %c0_61, %c0_62] : memref<3x64x64xbf16, #tpu.memory_space<vmem>>, vector<1x64x64xbf16>
    %102 = vector.shape_cast %101 : vector<1x64x64xbf16> to vector<64x64xbf16>
    %cst_63 = arith.constant dense<0.000000e+00> : vector<32x64xf32>
    %103 = tpu.matmul %92, %102, %cst_63 {dimension_numbers = #tpu.dot_dimension_numbers<[1], [0], [0], [1], [0, 0, 1, 1], [], []>} : vector<32x64xbf16>, vector<64x64xbf16>, vector<32x64xf32> -> vector<32x64xf32>
    %104 = vector.shape_cast %103 : vector<32x64xf32> to vector<2x16x64xf32>
    %cst_64 = arith.constant 0.000000e+00 : f32
    %105 = vector.broadcast %cst_64 : f32 to vector<2x1x64xf32>
    %106 = vector.extract_strided_slice %96 {offsets = [0, 0, 0], sizes = [2, 15, 64], strides = [1, 1, 1]} : vector<2x16x64xf32> to vector<2x15x64xf32>
    %107 = tpu.concatenate %105, %106 in 1 : vector<2x1x64xf32>, vector<2x15x64xf32> -> vector<2x16x64xf32>
    %108 = arith.addf %100, %107 : vector<2x16x64xf32>
    %109 = vector.extract_strided_slice %104 {offsets = [0, 1, 0], sizes = [2, 15, 64], strides = [1, 1, 1]} : vector<2x16x64xf32> to vector<2x15x64xf32>
    %110 = tpu.concatenate %109, %105 in 1 : vector<2x15x64xf32>, vector<2x1x64xf32> -> vector<2x16x64xf32>
    %111 = arith.addf %108, %110 : vector<2x16x64xf32>
    %c0_65 = arith.constant 0 : index
    %c0_66 = arith.constant 0 : index
    %112 = vector.load %arg10[%c0_65, %c0_66] : memref<1x64xf32, #tpu.memory_space<vmem>>, vector<1x64xf32>
    %113 = vector.shape_cast %112 : vector<1x64xf32> to vector<1x1x64xf32>
    %114 = vector.broadcast %113 : vector<1x1x64xf32> to vector<2x16x64xf32>
    %115 = arith.addf %111, %114 : vector<2x16x64xf32>
    %116 = vector.shape_cast %115 : vector<2x16x64xf32> to vector<32x64xf32>
    %cst_67 = arith.constant dense<0.000000e+00> : vector<64xf32>
    %117 = vector.multi_reduction <add>, %116, %cst_67 [0] : vector<32x64xf32> to vector<64xf32>
    %118 = vector.shape_cast %117 : vector<64xf32> to vector<1x64xf32>
    %cst_68 = arith.constant 3.125000e-02 : f32
    %119 = vector.broadcast %cst_68 : f32 to vector<1x64xf32>
    %120 = arith.mulf %118, %119 : vector<1x64xf32>
    %121 = vector.broadcast %120 : vector<1x64xf32> to vector<32x64xf32>
    %122 = arith.subf %116, %121 : vector<32x64xf32>
    %123 = arith.mulf %122, %122 : vector<32x64xf32>
    %cst_69 = arith.constant dense<0.000000e+00> : vector<64xf32>
    %124 = vector.multi_reduction <add>, %123, %cst_69 [0] : vector<32x64xf32> to vector<64xf32>
    %125 = vector.shape_cast %124 : vector<64xf32> to vector<1x64xf32>
    %cst_70 = arith.constant 3.125000e-02 : f32
    %126 = vector.broadcast %cst_70 : f32 to vector<1x64xf32>
    %127 = arith.mulf %125, %126 : vector<1x64xf32>
    %c0_71 = arith.constant 0 : index
    %c0_72 = arith.constant 0 : index
    %128 = vector.load %arg11[%c0_71, %c0_72] : memref<1x64xf32, #tpu.memory_space<vmem>>, vector<1x64xf32>
    %129 = vector.broadcast %128 : vector<1x64xf32> to vector<32x64xf32>
    %130 = arith.mulf %129, %122 : vector<32x64xf32>
    %cst_73 = arith.constant 9.99999974E-6 : f32
    %131 = vector.broadcast %cst_73 : f32 to vector<1x64xf32>
    %132 = arith.addf %127, %131 : vector<1x64xf32>
    %133 = math.rsqrt %132 : vector<1x64xf32>
    %134 = vector.broadcast %133 : vector<1x64xf32> to vector<32x64xf32>
    %135 = arith.mulf %130, %134 : vector<32x64xf32>
    %c0_74 = arith.constant 0 : index
    %c0_75 = arith.constant 0 : index
    %136 = vector.load %arg12[%c0_74, %c0_75] : memref<1x64xf32, #tpu.memory_space<vmem>>, vector<1x64xf32>
    %137 = vector.broadcast %136 : vector<1x64xf32> to vector<32x64xf32>
    %138 = arith.addf %135, %137 : vector<32x64xf32>
    %cst_76 = arith.constant 0.000000e+00 : f32
    %139 = vector.broadcast %cst_76 : f32 to vector<32x64xf32>
    %140 = arith.maximumf %138, %139 : vector<32x64xf32>
    %141 = arith.truncf %140 : vector<32x64xf32> to vector<32x64xbf16>
    %c0_77 = arith.constant 0 : index
    %c0_78 = arith.constant 0 : index
    %142 = vector.load %arg13[%c0_77, %c0_78] : memref<64x32xbf16, #tpu.memory_space<vmem>>, vector<64x32xbf16>
    %cst_79 = arith.constant dense<0.000000e+00> : vector<32x32xf32>
    %143 = tpu.matmul %141, %142, %cst_79 {dimension_numbers = #tpu.dot_dimension_numbers<[1], [0], [0], [1], [0, 0, 1, 1], [], []>} : vector<32x64xbf16>, vector<64x32xbf16>, vector<32x32xf32> -> vector<32x32xf32>
    %c0_80 = arith.constant 0 : index
    %c0_81 = arith.constant 0 : index
    %144 = vector.load %arg14[%c0_80, %c0_81] : memref<1x32xf32, #tpu.memory_space<vmem>>, vector<1x32xf32>
    %145 = vector.broadcast %144 : vector<1x32xf32> to vector<32x32xf32>
    %146 = arith.addf %143, %145 : vector<32x32xf32>
    %147 = vector.shape_cast %146 : vector<32x32xf32> to vector<2x16x32xf32>
    %148 = arith.truncf %147 : vector<2x16x32xf32> to vector<2x16x32xbf16>
    %c0_82 = arith.constant 0 : index
    %c0_83 = arith.constant 0 : index
    %c0_84 = arith.constant 0 : index
    %149 = vector.load %arg15[%c0_82, %c0_83, %c0_84] : memref<2x16x32xbf16, #tpu.memory_space<vmem>>, vector<2x16x32xbf16>
    tpu.vector_store %arg15[%c0_82, %c0_83, %c0_84], %148 {strides = array<i32>} : memref<2x16x32xbf16, #tpu.memory_space<vmem>>, vector<2x16x32xbf16>,
    return
  }
}

module attributes {stable_mosaic.version = 11 : i64} {
  func.func @_combine_kernel(%arg0: memref<2x8xi32, #tpu.memory_space<vmem>>, %arg1: memref<50x32xf32, #tpu.memory_space<vmem>>, %arg2: memref<8x32xf32, #tpu.memory_space<vmem>>, %arg3: memref<2x8x32xbf16, #tpu.memory_space<vmem>>, %arg4: memref<2x8x32xf32, #tpu.memory_space<vmem>>) attributes {dimension_semantics = [], scalar_prefetch = 0 : i64, scratch_operands = 0 : i64, tpu.core_type = #tpu.core_type<tc>} {
    %c0 = arith.constant 0 : index
    %c0_0 = arith.constant 0 : index
    %0 = vector.load %arg0[%c0, %c0_0] : memref<2x8xi32, #tpu.memory_space<vmem>>, vector<2x8xi32>
    %1 = tpu.iota {dimensions = array<i32: 2>} : vector<2x8x50xi32>
    %2 = vector.shape_cast %0 : vector<2x8xi32> to vector<2x8x1xi32>
    %3 = vector.broadcast %2 : vector<2x8x1xi32> to vector<2x8x50xi32>
    %4 = arith.cmpi eq, %3, %1 : vector<2x8x50xi32>
    %5 = arith.extui %4 : vector<2x8x50xi1> to vector<2x8x50xi32>
    %6 = arith.sitofp %5 : vector<2x8x50xi32> to vector<2x8x50xf32>
    %7 = vector.shape_cast %6 : vector<2x8x50xf32> to vector<16x50xf32>
    %c0_1 = arith.constant 0 : index
    %c0_2 = arith.constant 0 : index
    %8 = vector.load %arg1[%c0_1, %c0_2] : memref<50x32xf32, #tpu.memory_space<vmem>>, vector<50x32xf32>
    %cst = arith.constant dense<0.000000e+00> : vector<16x32xf32>
    %9 = tpu.matmul %7, %8, %cst {dimension_numbers = #tpu.dot_dimension_numbers<[1], [0], [0], [1], [0, 0, 1, 1], [], []>} : vector<16x50xf32>, vector<50x32xf32>, vector<16x32xf32> -> vector<16x32xf32>
    %10 = vector.shape_cast %9 : vector<16x32xf32> to vector<2x8x32xf32>
    %c0_3 = arith.constant 0 : index
    %c0_4 = arith.constant 0 : index
    %11 = vector.load %arg2[%c0_3, %c0_4] : memref<8x32xf32, #tpu.memory_space<vmem>>, vector<8x32xf32>
    %12 = vector.shape_cast %11 : vector<8x32xf32> to vector<1x8x32xf32>
    %13 = vector.broadcast %12 : vector<1x8x32xf32> to vector<2x8x32xf32>
    %14 = arith.addf %10, %13 : vector<2x8x32xf32>
    %c0_5 = arith.constant 0 : index
    %c0_6 = arith.constant 0 : index
    %c0_7 = arith.constant 0 : index
    %15 = vector.load %arg3[%c0_5, %c0_6, %c0_7] : memref<2x8x32xbf16, #tpu.memory_space<vmem>>, vector<2x8x32xbf16>
    %16 = arith.extf %15 : vector<2x8x32xbf16> to vector<2x8x32xf32>
    %17 = arith.addf %14, %16 : vector<2x8x32xf32>
    %c0_8 = arith.constant 0 : index
    %c0_9 = arith.constant 0 : index
    %c0_10 = arith.constant 0 : index
    %18 = vector.load %arg4[%c0_8, %c0_9, %c0_10] : memref<2x8x32xf32, #tpu.memory_space<vmem>>, vector<2x8x32xf32>
    tpu.vector_store %arg4[%c0_8, %c0_9, %c0_10], %17 {strides = array<i32>} : memref<2x8x32xf32, #tpu.memory_space<vmem>>, vector<2x8x32xf32>,
    return
  }
}

</mosaic_0001>

<bundles_post_ra>
// kernel: ecg_embedding_forward.6
= control target key start
LH: loop header
LB: loop body
LE: loop exit
PB: predicated region body
PF: predicated region fallthrough
CT: control target
= control target key end

     0   :  { %16 = vsyncpa [#allocation3], 0  ;;  %s878_s16 = smov [#allocation2]   ;;  %s879_s18 = smov 64   ;;  %s1101_s0 = inlined_call_operand.vmem [shape: f32[2,16,1], index: 0, kind: input, shape index: {}]   ;;  %s1102_s1 = inlined_call_operand.vmem [shape: f32[3,64], index: 1, kind: input, shape index: {}]   ;;  %s1103_s2 = inlined_call_operand.vmem [shape: f32[1,64], index: 2, kind: input, shape index: {}]   ;;  %s1104_s3 = inlined_call_operand.vmem [shape: f32[1,64], index: 3, kind: input, shape index: {}]   ;;  %s1105_s4 = inlined_call_operand.vmem [shape: f32[1,64], index: 4, kind: input, shape index: {}]   ;;  %s1106_s5 = inlined_call_operand.hbm [shape: bf16[3,64,64], index: 5, kind: input, shape index: {}]   ;;  %s1107_s6 = inlined_call_operand.vmem [shape: f32[1,64], index: 6, kind: input, shape index: {}]   ;;  %s1108_s7 = inlined_call_operand.vmem [shape: f32[1,64], index: 7, kind: input, shape index: {}]   ;;  %s1109_s8 = inlined_call_operand.vmem [shape: f32[1,64], index: 8, kind: input, shape index: {}]   ;;  %s1110_s9 = inlined_call_operand.vmem [shape: bf16[2,16,64], index: 9, kind: output, shape index: {0}]   ;;  %s1111_s10 = inlined_call_operand.vmem [shape: bf16[2,8,64], index: 10, kind: output, shape index: {1}]  }
   0x1   :  { %s31_s15 = sshll.u32 %s1106_s5, 4  ;;  %s33_s17 = sshll.u32 %s878_s16, 4  ;;  %s32_s15 = int_to_ptr.hbm [resolvable:$true] %s31_s15  ;;  %s34_s17 = int_to_ptr.vmem [resolvable:$true] %s33_s17 }
   0x2   :  { %s880_s19 = smov 4  }
   0x3   :  { %39 = dma.hbm_to_vmem [thread:$0]  %s32_s15, 1536, %s34_s17, [#allocation3], %s879_s18, %s879_s18, %s880_s19  }
   0x4   :  { %876 = dma.done.wait [#allocation3], 1536  }
   0x5   :  { %877 = vsyncadd [#allocation3], 4294965760  ;;  %v881_v0 = vmov 0   ;;  %v51_v1 = vld [vmem:[%s1101_s0] sm:$0xff]  ;;  %vm59_vm0 = vcmask 1040384   ;;  %v53_v2 = vld [vmem:[%s1101_s0 + $0x10] sm:$0xff] }
   0x6   :  { %839 = vset.pattern.permute.xlu1 %v881_v0  ;;  %841 = vset.pattern.permute.xlu0 %v881_v0  ;;  %v60_v3 = vrot.slane %v51_v1, 7  ;;  %v52_v4 = vld [vmem:[%s1101_s0 + $0x8] sm:$0xff]  ;;  %v63_v5 = vrot.slane %v53_v2, 7  ;;  %v54_v9 = vld [vmem:[%s1101_s0 + $0x18] sm:$0xff]  ;;  %vm70_vm1 = vcmask 1046528   ;;  %v71_v13 = vrot.slane %v51_v1, 1 }
   0x7   :  { %840 = vset.pattern.permute.xlu2 %v881_v0  ;;  %106 = vperm.xlu1 %839, %v51_v1   ;;  %v61_v7 = vrot.slane %v52_v4, 7  ;;  %v72_v11 = vrot.slane %v52_v4, 1  ;;  %v64_v12 = vrot.slane %v54_v9, 7  ;;  %v74_v17 = vrot.slane %v53_v2, 1  ;;  %v81_v26 = vld [vmem:[%s1102_s1] sm:$0x7] }
   0x8   :  { %114 = vperm.xlu2 %840, %v53_v2   ;;  %v68_v6 = vsel %vm59_vm0, 0.0, %v60_v3  ;;  %v69_v8 = vsel %vm59_vm0, 0.0, %v63_v5  ;;  %v75_v18 = vrot.slane %v54_v9, 1  ;;  %v121_v28 = vperm.slane %v81_v26, 1  ;;  %v842_v45 = vld [vmem:[%s1103_s2] ss:$0 sm:$0xff] }
   0x9   :  { %84 = vperm.xlu0 %841, %v68_v6   ;;  %v62_v10 = vsel %vm59_vm0, %v60_v3, %v61_v7  ;;  %v79_v14 = vsel %vm70_vm1, %v72_v11, 0.0  ;;  %v65_v15 = vsel %vm59_vm0, %v63_v5, %v64_v12  ;;  %v73_v16 = vsel %vm70_vm1, %v71_v13, %v72_v11  ;;  %v826_v11 = vld [vmem:[#allocation2 + $0x38] sm:$0xff] }
   0xa   :  { %v76_v19 = vsel %vm70_vm1, %v74_v17, %v75_v18  ;;  %v80_v20 = vsel %vm70_vm1, %v75_v18, 0.0  ;;  %v100_v29 = vperm.slane %v81_v26, 0  ;;  %v148_v34 = vperm.slane %v81_v26, 2  ;;  %v830_v12 = vld [vmem:[#allocation2 + $0x58] sm:$0xff]  ;;  %345 = vmatpush.bf16.msra.mxu1 %v826_v11  ;;  %v829_v17 = vld [vmem:[#allocation2 + $0x50] sm:$0xff]  ;;  %v824_v26 = vld [vmem:[#allocation2 + $0x28] sm:$0xff] }
   0xb   :  { %vm165_vm2 = vcmask 523264   ;;  %397 = vmatpush.bf16.msra.mxu2 %v830_v12  ;;  %vm535_vm9 = vcmask 519168   ;;  %vm568_vm10 = vcmask 517120   ;;  %vm729_vm11 = vcmask 1041409  }
   0xc   :  { %vm731_vm12 = vcmask 1042434   ;;  %vm733_vm13 = vcmask 1043459   ;;  %vm735_vm14 = vcmask 1044484   ;;  %vm737_vm15 = vcmask 1045509  }
   0xf   :  { %110 = vperm.xlu1 %839, %v52_v4   ;;  %398 = vmatpush.bf16.msra.mxu2 %v829_v17 }
  0x10   :  { %93 = vperm.xlu2 %840, %v69_v8  }
  0x11   :  { %88 = vperm.xlu0 %841, %v62_v10   ;;  %v822_v10 = vld [vmem:[#allocation2 + $0x18] sm:$0xff] }
  0x12   :  { %293 = vmatpush.bf16.msra.mxu0 %v822_v10  ;;  %831 = vmatpush.bf16.msra.mxu3 %v822_v10 }
  0x17   :  { %136 = vperm.xlu1 %839, %v79_v14   ;;  %v821_v14 = vld [vmem:[#allocation2 + $0x10] sm:$0xff] }
  0x18   :  { %97 = vperm.xlu2 %840, %v65_v15   ;;  %294 = vmatpush.bf16.msra.mxu0 %v821_v14 }
  0x19   :  { %131 = vperm.xlu0 %841, %v73_v16   ;;  %v825_v16 = vld [vmem:[#allocation2 + $0x30] sm:$0xff]  ;;  %832 = vmatpush.bf16.msra.mxu3 %v821_v14 }
  0x1a   :  { %346 = vmatpush.bf16.msra.mxu1 %v825_v16 }
  0x1e   :  { %347 = vmatpush.bf16.msra.mxu1 %v824_v26 }
  0x1f   :  { %140 = vperm.xlu1 %839, %v76_v19  }
  0x20   :  { %145 = vperm.xlu2 %840, %v80_v20  }
  0x21   :  { %118 = vperm.xlu0 %841, %v54_v9  }
  0x62   :  { %v115_v21 = vpop.permute.xlu2 %114 }
  0x63   :  { %v124_v41 = vmul.f32 %v121_v28, %v115_v21 }
  0x6a   :  { %v94_v24 = vpop.permute.xlu2 %93 }
  0x6b   :  { %v103_v42 = vmul.f32 %v100_v29, %v94_v24 }
  0x6d   :  { %v128_v48 = vadd.f32 %v124_v41, %v103_v42 }
  0x72   :  { %v98_v33 = vpop.permute.xlu2 %97 }
  0x73   :  { %v104_v54 = vmul.f32 %v100_v29, %v98_v33 }
  0x79   :  { %v107_v22 = vpop.permute.xlu1 %106 }
  0x7a   :  { %v122_v30 = vmul.f32 %v121_v28, %v107_v22  ;;  %v146_v51 = vpop.permute.xlu2 %145  ;;  %v820_v22 = vld [vmem:[#allocation2 + $0x8] sm:$0xff] }
  0x7b   :  { %v85_v23 = vpop.permute.xlu0 %84  ;;  %v152_v58 = vmul.f32 %v148_v34, %v146_v51  ;;  %295 = vmatpush.bf16.msra.mxu0 %v820_v22  ;;  %833 = vmatpush.bf16.msra.mxu3 %v820_v22  ;;  %v843_v51 = vld [vmem:[%s1104_s3] ss:$0 sm:$0xff] }
  0x7c   :  { %v101_v31 = vmul.f32 %v100_v29, %v85_v23 }
  0x7e   :  { %v126_v37 = vadd.f32 %v122_v30, %v101_v31 }
  0x81   :  { %v111_v25 = vpop.permute.xlu1 %110 }
  0x82   :  { %v123_v38 = vmul.f32 %v121_v28, %v111_v25 }
  0x83   :  { %v89_v27 = vpop.permute.xlu0 %88 }
  0x84   :  { %v102_v35 = vmul.f32 %v100_v29, %v89_v27  ;;  %v828_v27 = vld [vmem:[#allocation2 + $0x48] sm:$0xff] }
  0x85   :  { %399 = vmatpush.bf16.msra.mxu2 %v828_v27 }
  0x86   :  { %v127_v43 = vadd.f32 %v123_v38, %v102_v35 }
  0x89   :  { %v137_v32 = vpop.permute.xlu1 %136 }
  0x8a   :  { %v150_v39 = vmul.f32 %v148_v34, %v137_v32  ;;  %v819_v32 = vld [vmem:[#allocation2] sm:$0xff] }
  0x8b   :  { %v132_v36 = vpop.permute.xlu0 %131  ;;  %296 = vmatpush.bf16.msra.mxu0 %v819_v32  ;;  %834 = vmatpush.bf16.msra.mxu3 %v819_v32 }
  0x8c   :  { %v149_v40 = vmul.f32 %v148_v34, %v132_v36  ;;  %v154_v46 = vadd.f32 %v150_v39, %v127_v43  ;;  %v827_v36 = vld [vmem:[#allocation2 + $0x40] sm:$0xff] }
  0x8d   :  { %400 = vmatpush.bf16.msra.mxu2 %v827_v36 }
  0x8e   :  { %v153_v44 = vadd.f32 %v149_v40, %v126_v37  ;;  %v162_v55 = vadd.f32 %v842_v45, %v154_v46 }
  0x90   :  { %v161_v50 = vadd.f32 %v842_v45, %v153_v44  ;;  %v167_v61 = vsel %vm165_vm2, %v162_v55, 0.0 }
  0x91   :  { %v141_v47 = vpop.permute.xlu1 %140 }
  0x92   :  { %v151_v49 = vmul.f32 %v148_v34, %v141_v47  ;;  %v166_v59 = vsel %vm165_vm2, %v161_v50, 0.0  ;;  %v823_v34 = vld [vmem:[#allocation2 + $0x20] sm:$0xff] }
  0x93   :  { %v119_v53 = vpop.permute.xlu0 %118  ;;  %v168_v0 = vadd.f32 %v167_v61, %v166_v59  ;;  %348 = vmatpush.bf16.msra.mxu1 %v823_v34 }
  0x94   :  { %v155_v52 = vadd.f32 %v151_v49, %v128_v48  ;;  %v125_v56 = vmul.f32 %v121_v28, %v119_v53 }
  0x96   :  { %v163_v57 = vadd.f32 %v842_v45, %v155_v52  ;;  %v129_v60 = vadd.f32 %v125_v56, %v104_v54 }
  0x98   :  { %v169_v62 = vsel %vm165_vm2, %v163_v57, 0.0  ;;  %v156_v63 = vadd.f32 %v152_v58, %v129_v60 }
  0x99   :  { %v170_v2 = vadd.f32 %v169_v62, %v168_v0 }
  0x9a   :  { %v164_v1 = vadd.f32 %v842_v45, %v156_v63 }
  0x9c   :  { %v171_v3 = vsel %vm165_vm2, %v164_v1, 0.0 }
  0x9d   :  { %v172_v4 = vadd.f32 %v171_v3, %v170_v2 }
  0x9f   :  { %v173_v5 = vrot.slane %v172_v4, 4 }
  0xa1   :  { %v174_v6 = vadd.f32 %v173_v5, %v172_v4 }
  0xa3   :  { %v175_v7 = vrot.slane %v174_v6, 2 }
  0xa5   :  { %v176_v8 = vadd.f32 %v175_v7, %v174_v6 }
  0xa7   :  { %v177_v9 = vrot.slane %v176_v8, 1 }
  0xa9   :  { %v178_v13 = vadd.f32 %v177_v9, %v176_v8 }
  0xab   :  { %v179_v15 = vmul.f32 0.03125, %v178_v13 }
  0xad   :  { %v180_v18 = vsub.f32 %v161_v50, %v179_v15  ;;  %v181_v19 = vsub.f32 %v162_v55, %v179_v15  ;;  %v182_v20 = vsub.f32 %v163_v57, %v179_v15  ;;  %v183_v21 = vsub.f32 %v164_v1, %v179_v15  ;;  %v844_v57 = vld [vmem:[%s1105_s4] ss:$0 sm:$0xff] }
  0xaf   :  { %v184_v23 = vmul.f32 %v180_v18, %v180_v18  ;;  %v185_v24 = vmul.f32 %v181_v19, %v181_v19  ;;  %v186_v25 = vmul.f32 %v182_v20, %v182_v20  ;;  %v187_v28 = vmul.f32 %v183_v21, %v183_v21 }
  0xb0   :  { %v209_v54 = vmul.f32 %v843_v51, %v183_v21  ;;  %v206_v55 = vmul.f32 %v843_v51, %v180_v18  ;;  %v207_v56 = vmul.f32 %v843_v51, %v181_v19  ;;  %v208_v58 = vmul.f32 %v843_v51, %v182_v20 }
  0xb1   :  { %v188_v29 = vsel %vm165_vm2, %v184_v23, 0.0  ;;  %v189_v30 = vsel %vm165_vm2, %v185_v24, 0.0  ;;  %v191_v33 = vsel %vm165_vm2, %v186_v25, 0.0  ;;  %v193_v37 = vsel %vm165_vm2, %v187_v28, 0.0 }
  0xb2   :  { %v190_v31 = vadd.f32 %v189_v30, %v188_v29 }
  0xb4   :  { %v192_v35 = vadd.f32 %v191_v33, %v190_v31 }
  0xb6   :  { %v194_v38 = vadd.f32 %v193_v37, %v192_v35 }
  0xb8   :  { %v195_v39 = vrot.slane %v194_v38, 4 }
  0xba   :  { %v196_v40 = vadd.f32 %v195_v39, %v194_v38 }
  0xbc   :  { %v197_v41 = vrot.slane %v196_v40, 2 }
  0xbe   :  { %v198_v42 = vadd.f32 %v197_v41, %v196_v40  ;;  %v845_v40 = vld [vmem:[%s1107_s6] ss:$0 sm:$0xff] }
  0xc0   :  { %v199_v43 = vrot.slane %v198_v42, 1 }
  0xc2   :  { %v200_v44 = vadd.f32 %v199_v43, %v198_v42 }
  0xc4   :  { %v201_v45 = vmul.f32 0.03125, %v200_v44 }
  0xc6   :  { %v210_v46 = vadd.f32 1e-05, %v201_v45 }
  0xc8   :  { %848 = vrsqrt.f32 %v210_v46  ;;  %vm217_vm4 = vweird.f32 %v210_v46 }
  0xce   :  { %v849_v47 = vpop.eup %848 }
  0xcf   :  { %v212_v48 = vmul.f32 %v849_v47, %v210_v46  ;;  %vm218_vm3 = vweird.f32 %v849_v47 }
  0xd0   :  { %vm219_vm5 = vmor %vm217_vm4, %vm218_vm3 }
  0xd1   :  { %v213_v49 = vmul.f32 %v849_v47, %v212_v48 }
  0xd3   :  { %v214_v50 = vmul.f32 0.5, %v213_v49 }
  0xd5   :  { %v215_v52 = vsub.f32 1.5, %v214_v50 }
  0xd7   :  { %v216_v53 = vmul.f32 %v849_v47, %v215_v52 }
  0xd9   :  { %v220_v59 = vsel %vm219_vm5, %v849_v47, %v216_v53 }
  0xda   :  { %v221_v60 = vmul.f32 %v220_v59, %v206_v55  ;;  %v222_v61 = vmul.f32 %v220_v59, %v207_v56  ;;  %v223_v62 = vmul.f32 %v220_v59, %v208_v58  ;;  %v224_v63 = vmul.f32 %v220_v59, %v209_v54 }
  0xdc   :  { %v229_v0 = vadd.f32 %v844_v57, %v221_v60  ;;  %v230_v1 = vadd.f32 %v844_v57, %v222_v61  ;;  %v231_v2 = vadd.f32 %v844_v57, %v223_v62  ;;  %v232_v3 = vadd.f32 %v844_v57, %v224_v63 }
  0xde   :  { %v233_v4 = vmax.f32 %v229_v0, 0.0  ;;  %v234_v5 = vmax.f32 %v230_v1, 0.0  ;;  %v235_v6 = vmax.f32 %v231_v2, 0.0  ;;  %v236_v7 = vmax.f32 %v232_v3, 0.0 }
  0xe0   :  { %v237_v8 = vpack.c.bf16 %v233_v4, %v233_v4  ;;  %v238_v9 = vpack.c.bf16 %v234_v5, %v234_v5  ;;  %v239_v10 = vpack.c.bf16 %v235_v6, %v235_v6  ;;  %v240_v11 = vpack.c.bf16 %v236_v7, %v236_v7 }
  0xe2   :  { %v253_v12 = vunpack.c.l.b16 %v237_v8  ;;  %v254_v13 = vunpack.c.l.b16 %v238_v9  ;;  %v255_v14 = vunpack.c.l.b16 %v239_v10  ;;  %v256_v15 = vunpack.c.l.b16 %v240_v11 }
  0xe4   :  { %v257_v16 = vpack.c.b16 %v254_v13, %v253_v12  ;;  %v258_v17 = vpack.c.b16 %v256_v15, %v255_v14 }
  0xe6   :  { %781 = vmatmul.msk.bf16.vlgmr.msra.gmra.mxu0 %vm165_vm2, %v257_v16  ;;  %782 = vmatmul.msk.bf16.vlgmr.msra.gmra.mxu3 %vm165_vm2, %v258_v17 }
  0xe7   :  { %799 = vmatmul.msk.bf16.vlgmr.msra.gmra.mxu1 %vm165_vm2, %v257_v16  ;;  %817 = vmatmul.msk.bf16.vlgmr.msra.gmra.mxu2 %vm165_vm2, %v257_v16 }
  0xf7   :  { %800 = vmatmul.msk.bf16.gmra.mxu1 %vm165_vm2, %v258_v17  ;;  %818 = vmatmul.msk.bf16.gmra.mxu2 %vm165_vm2, %v258_v17 }
 0x163   :  { %v298_v19 = vpop.f32.mrf.mxu0 }
 0x164   :  { %v350_v18 = vpop.f32.mrf.mxu1  ;;  %v416_v25 = vrot.slane %v298_v19, 7 }
 0x166   :  { %v426_v29 = vsel %vm59_vm0, 0.0, %v416_v25 }
 0x167   :  { %v428_v35 = vadd.f32 %v426_v29, %v350_v18 }
 0x169   :  { %v303_v22 = vpop.f32.mrf.mxu3 }
 0x16a   :  { %v402_v20 = vpop.f32.mrf.mxu2  ;;  %v419_v41 = vrot.slane %v303_v22, 7 }
 0x16b   :  { %v300_v23 = vpop.f32.mrf.mxu0  ;;  %v436_v30 = vrot.slane %v402_v20, 1 }
 0x16c   :  { %v352_v21 = vpop.f32.mrf.mxu1  ;;  %v417_v26 = vrot.slane %v300_v23, 7  ;;  %v427_v47 = vsel %vm59_vm0, 0.0, %v419_v41 }
 0x16e   :  { %v418_v31 = vsel %vm59_vm0, %v416_v25, %v417_v26 }
 0x16f   :  { %v429_v36 = vadd.f32 %v418_v31, %v352_v21 }
 0x171   :  { %v305_v37 = vpop.f32.mrf.mxu3 }
 0x172   :  { %v404_v24 = vpop.f32.mrf.mxu2  ;;  %v420_v42 = vrot.slane %v305_v37, 7 }
 0x173   :  { %v437_v27 = vrot.slane %v404_v24, 1 }
 0x174   :  { %v355_v28 = vpop.f32.mrf.mxu1  ;;  %v421_v49 = vsel %vm59_vm0, %v419_v41, %v420_v42  ;;  %vm739_vm0 = vcmask 1046534  }
 0x175   :  { %v438_v33 = vsel %vm70_vm1, %v436_v30, %v437_v27  ;;  %v446_v34 = vsel %vm70_vm1, %v437_v27, 0.0  ;;  %v430_v51 = vadd.f32 %v427_v47, %v355_v28 }
 0x176   :  { %v448_v38 = vadd.f32 %v438_v33, %v428_v35  ;;  %v449_v39 = vadd.f32 %v446_v34, %v429_v36  ;;  %v846_v36 = vld [vmem:[%s1108_s7] ss:$0 sm:$0xff] }
 0x178   :  { %v456_v44 = vadd.f32 %v845_v40, %v448_v38  ;;  %v457_v45 = vadd.f32 %v845_v40, %v449_v39 }
 0x17a   :  { %v407_v32 = vpop.f32.mrf.mxu2  ;;  %v460_v55 = vsel %vm165_vm2, %v456_v44, 0.0  ;;  %v461_v56 = vsel %vm165_vm2, %v457_v45, 0.0 }
 0x17b   :  { %v439_v48 = vrot.slane %v407_v32, 1  ;;  %v462_v61 = vadd.f32 %v461_v56, %v460_v55 }
 0x17c   :  { %v357_v43 = vpop.f32.mrf.mxu1 }
 0x17d   :  { %v431_v52 = vadd.f32 %v421_v49, %v357_v43  ;;  %v847_v43 = vld [vmem:[%s1109_s8] ss:$0 sm:$0xff] }
 0x182   :  { %v409_v46 = vpop.f32.mrf.mxu2 }
 0x183   :  { %v440_v50 = vrot.slane %v409_v46, 1 }
 0x185   :  { %v441_v53 = vsel %vm70_vm1, %v439_v48, %v440_v50  ;;  %v447_v54 = vsel %vm70_vm1, %v440_v50, 0.0  ;;  %vm741_vm1 = vcmask 1047559  }
 0x186   :  { %v450_v57 = vadd.f32 %v441_v53, %v430_v51  ;;  %v451_v58 = vadd.f32 %v447_v54, %v431_v52 }
 0x188   :  { %v458_v59 = vadd.f32 %v845_v40, %v450_v57  ;;  %v459_v60 = vadd.f32 %v845_v40, %v451_v58 }
 0x18a   :  { %v463_v62 = vsel %vm165_vm2, %v458_v59, 0.0  ;;  %v465_v0 = vsel %vm165_vm2, %v459_v60, 0.0 }
 0x18b   :  { %v464_v63 = vadd.f32 %v463_v62, %v462_v61 }
 0x18d   :  { %v466_v1 = vadd.f32 %v465_v0, %v464_v63 }
 0x18f   :  { %v467_v2 = vrot.slane %v466_v1, 4 }
 0x191   :  { %v468_v3 = vadd.f32 %v467_v2, %v466_v1 }
 0x193   :  { %v469_v4 = vrot.slane %v468_v3, 2 }
 0x195   :  { %v470_v5 = vadd.f32 %v469_v4, %v468_v3 }
 0x197   :  { %v471_v6 = vrot.slane %v470_v5, 1 }
 0x199   :  { %v472_v7 = vadd.f32 %v471_v6, %v470_v5 }
 0x19b   :  { %v473_v8 = vmul.f32 0.03125, %v472_v7 }
 0x19d   :  { %v474_v9 = vsub.f32 %v456_v44, %v473_v8  ;;  %v475_v10 = vsub.f32 %v457_v45, %v473_v8  ;;  %v476_v11 = vsub.f32 %v458_v59, %v473_v8  ;;  %v477_v12 = vsub.f32 %v459_v60, %v473_v8 }
 0x19f   :  { %v478_v13 = vmul.f32 %v474_v9, %v474_v9  ;;  %v479_v14 = vmul.f32 %v475_v10, %v475_v10  ;;  %v480_v15 = vmul.f32 %v476_v11, %v476_v11  ;;  %v481_v16 = vmul.f32 %v477_v12, %v477_v12 }
 0x1a0   :  { %v500_v39 = vmul.f32 %v846_v36, %v474_v9  ;;  %v501_v40 = vmul.f32 %v846_v36, %v475_v10  ;;  %v502_v41 = vmul.f32 %v846_v36, %v476_v11  ;;  %v503_v42 = vmul.f32 %v846_v36, %v477_v12 }
 0x1a1   :  { %v482_v17 = vsel %vm165_vm2, %v478_v13, 0.0  ;;  %v483_v18 = vsel %vm165_vm2, %v479_v14, 0.0  ;;  %v485_v20 = vsel %vm165_vm2, %v480_v15, 0.0  ;;  %v487_v22 = vsel %vm165_vm2, %v481_v16, 0.0 }
 0x1a2   :  { %v484_v19 = vadd.f32 %v483_v18, %v482_v17 }
 0x1a4   :  { %v486_v21 = vadd.f32 %v485_v20, %v484_v19 }
 0x1a6   :  { %v488_v23 = vadd.f32 %v487_v22, %v486_v21 }
 0x1a8   :  { %v489_v24 = vrot.slane %v488_v23, 4 }
 0x1aa   :  { %v490_v25 = vadd.f32 %v489_v24, %v488_v23 }
 0x1ac   :  { %v491_v26 = vrot.slane %v490_v25, 2 }
 0x1ae   :  { %v492_v27 = vadd.f32 %v491_v26, %v490_v25 }
 0x1b0   :  { %v493_v28 = vrot.slane %v492_v27, 1 }
 0x1b2   :  { %v494_v29 = vadd.f32 %v493_v28, %v492_v27 }
 0x1b4   :  { %v495_v30 = vmul.f32 0.03125, %v494_v29 }
 0x1b6   :  { %v504_v31 = vadd.f32 1e-05, %v495_v30 }
 0x1b8   :  { %850 = vrsqrt.f32 %v504_v31  ;;  %vm511_vm7 = vweird.f32 %v504_v31 }
 0x1be   :  { %v851_v32 = vpop.eup %850 }
 0x1bf   :  { %v506_v33 = vmul.f32 %v851_v32, %v504_v31  ;;  %vm512_vm6 = vweird.f32 %v851_v32 }
 0x1c0   :  { %vm513_vm8 = vmor %vm511_vm7, %vm512_vm6 }
 0x1c1   :  { %v507_v34 = vmul.f32 %v851_v32, %v506_v33 }
 0x1c3   :  { %v508_v35 = vmul.f32 0.5, %v507_v34 }
 0x1c5   :  { %v509_v37 = vsub.f32 1.5, %v508_v35 }
 0x1c7   :  { %v510_v38 = vmul.f32 %v851_v32, %v509_v37 }
 0x1c9   :  { %v514_v44 = vsel %vm513_vm8, %v851_v32, %v510_v38 }
 0x1ca   :  { %v515_v45 = vmul.f32 %v514_v44, %v500_v39  ;;  %v516_v46 = vmul.f32 %v514_v44, %v501_v40  ;;  %v517_v47 = vmul.f32 %v514_v44, %v502_v41  ;;  %v518_v48 = vmul.f32 %v514_v44, %v503_v42 }
 0x1cc   :  { %v523_v49 = vadd.f32 %v847_v43, %v515_v45  ;;  %v524_v50 = vadd.f32 %v847_v43, %v516_v46  ;;  %v525_v51 = vadd.f32 %v847_v43, %v517_v47  ;;  %v526_v52 = vadd.f32 %v847_v43, %v518_v48 }
 0x1ce   :  { %v527_v53 = vmax.f32 %v523_v49, 0.0  ;;  %v528_v54 = vmax.f32 %v524_v50, 0.0  ;;  %v1011_v55 = vmax.f32 %v525_v51, 0.0  ;;  %v1013_v56 = vmax.f32 %v526_v52, 0.0 }
 0x1d0   :  { %v531_v57 = vpack.c.bf16 %v527_v53, %v527_v53  ;;  %v532_v58 = vpack.c.bf16 %v528_v54, %v528_v54  ;;  %v533_v59 = vpack.c.bf16 %v1011_v55, %v1011_v55  ;;  %v534_v60 = vpack.c.bf16 %v1013_v56, %v1013_v56 }
 0x1d1   :  { %v544_v61 = vrot.slane %v527_v53, 2  ;;  %v545_v62 = vrot.slane %v527_v53, 4  ;;  %v546_v63 = vrot.slane %v527_v53, 6  ;;  %v547_v0 = vrot.slane %v528_v54, 2 }
 0x1d2   :  { %536 = vst.msk [vmem:[%s1110_s9] sm:$0xf] %vm535_vm9, %v531_v57  ;;  %v548_v1 = vrot.slane %v528_v54, 4  ;;  %v549_v2 = vrot.slane %v528_v54, 6  ;;  %v569_v3 = vsel %vm568_vm10, %v527_v53, -inf  ;;  %v597_v11 = vsel %vm568_vm10, %v528_v54, -inf }
 0x1d3   :  { %537 = vst.msk [vmem:[%s1110_s9 + $0x4] sm:$0xf] %vm535_vm9, %v532_v58  ;;  %v576_v4 = vsel %vm568_vm10, %v544_v61, -inf  ;;  %v583_v5 = vsel %vm568_vm10, %v545_v62, -inf  ;;  %v590_v6 = vsel %vm568_vm10, %v546_v63, -inf  ;;  %v570_v7 = vrot.slane %v569_v3, 4 }
 0x1d4   :  { %538 = vst.msk [vmem:[%s1110_s9 + $0x8] sm:$0xf] %vm535_vm9, %v533_v59  ;;  %v577_v8 = vrot.slane %v576_v4, 4  ;;  %v584_v9 = vrot.slane %v583_v5, 4  ;;  %v591_v10 = vrot.slane %v590_v6, 4  ;;  %v604_v12 = vsel %vm568_vm10, %v547_v0, -inf }
 0x1d5   :  { %539 = vst.msk [vmem:[%s1110_s9 + $0xc] sm:$0xf] %vm535_vm9, %v534_v60  ;;  %v611_v13 = vsel %vm568_vm10, %v548_v1, -inf  ;;  %v618_v14 = vsel %vm568_vm10, %v549_v2, -inf  ;;  %v571_v15 = vmax.f32 %v569_v3, %v570_v7  ;;  %v598_v19 = vrot.slane %v597_v11, 4 }
 0x1d6   :  { %v578_v16 = vmax.f32 %v576_v4, %v577_v8  ;;  %v585_v17 = vmax.f32 %v583_v5, %v584_v9  ;;  %v592_v18 = vmax.f32 %v590_v6, %v591_v10  ;;  %v605_v20 = vrot.slane %v604_v12, 4 }
 0x1d7   :  { %v612_v21 = vrot.slane %v611_v13, 4  ;;  %v619_v22 = vrot.slane %v618_v14, 4  ;;  %v572_v23 = vrot.slane %v571_v15, 2  ;;  %v599_v27 = vmax.f32 %v597_v11, %v598_v19 }
 0x1d8   :  { %v579_v24 = vrot.slane %v578_v16, 2  ;;  %v586_v25 = vrot.slane %v585_v17, 2  ;;  %v593_v26 = vrot.slane %v592_v18, 2  ;;  %v606_v28 = vmax.f32 %v604_v12, %v605_v20 }
 0x1d9   :  { %v613_v29 = vmax.f32 %v611_v13, %v612_v21  ;;  %v620_v30 = vmax.f32 %v618_v14, %v619_v22  ;;  %v1043_v31 = vmax.f32 %v571_v15, %v572_v23  ;;  %v600_v35 = vrot.slane %v599_v27, 2 }
 0x1da   :  { %v1045_v32 = vmax.f32 %v578_v16, %v579_v24  ;;  %v1047_v33 = vmax.f32 %v585_v17, %v586_v25  ;;  %v1049_v34 = vmax.f32 %v592_v18, %v593_v26  ;;  %v607_v36 = vrot.slane %v606_v28, 2 }
 0x1db   :  { %v614_v37 = vrot.slane %v613_v29, 2  ;;  %v550_v38 = vrot.slane %v1011_v55, 2  ;;  %v551_v39 = vrot.slane %v1011_v55, 4  ;;  %v552_v40 = vrot.slane %v1011_v55, 6 }
 0x1dc   :  { %v1054_v41 = vmax.f32 %v599_v27, %v600_v35  ;;  %v1056_v42 = vmax.f32 %v606_v28, %v607_v36  ;;  %v621_v44 = vrot.slane %v620_v30, 2  ;;  %v553_v45 = vrot.slane %v1013_v56, 2 }
 0x1dd   :  { %v1058_v43 = vmax.f32 %v613_v29, %v614_v37  ;;  %v554_v46 = vrot.slane %v1013_v56, 4  ;;  %v555_v47 = vrot.slane %v1013_v56, 6  ;;  %v574_v48 = vrot.slane %v1043_v31, 1 }
 0x1de   :  { %v581_v49 = vrot.slane %v1045_v32, 1  ;;  %v588_v50 = vrot.slane %v1047_v33, 1  ;;  %v595_v51 = vrot.slane %v1049_v34, 1  ;;  %v625_v52 = vsel %vm568_vm10, %v1011_v55, -inf }
 0x1df   :  { %v632_v53 = vsel %vm568_vm10, %v550_v38, -inf  ;;  %v639_v54 = vsel %vm568_vm10, %v551_v39, -inf  ;;  %v646_v57 = vsel %vm568_vm10, %v552_v40, -inf  ;;  %v602_v58 = vrot.slane %v1054_v41, 1 }
 0x1e0   :  { %v609_v59 = vrot.slane %v1056_v42, 1  ;;  %v616_v60 = vrot.slane %v1058_v43, 1  ;;  %v622_v61 = vmax.f32 %v620_v30, %v621_v44  ;;  %v626_v62 = vrot.slane %v625_v52, 4 }
 0x1e1   :  { %v633_v63 = vrot.slane %v632_v53, 4  ;;  %v640_v0 = vrot.slane %v639_v54, 4  ;;  %v647_v1 = vrot.slane %v646_v57, 4  ;;  %v653_v55 = vsel %vm568_vm10, %v1013_v56, -inf }
 0x1e2   :  { %v660_v2 = vsel %vm568_vm10, %v553_v45, -inf  ;;  %v667_v3 = vsel %vm568_vm10, %v554_v46, -inf  ;;  %v674_v4 = vsel %vm568_vm10, %v555_v47, -inf  ;;  %v627_v5 = vmax.f32 %v625_v52, %v626_v62 }
 0x1e3   :  { %v634_v6 = vmax.f32 %v632_v53, %v633_v63  ;;  %v641_v7 = vmax.f32 %v639_v54, %v640_v0  ;;  %v648_v8 = vmax.f32 %v646_v57, %v647_v1  ;;  %v654_v9 = vrot.slane %v653_v55, 4 }
 0x1e4   :  { %v661_v10 = vrot.slane %v660_v2, 4  ;;  %v668_v11 = vrot.slane %v667_v3, 4  ;;  %v675_v12 = vrot.slane %v674_v4, 4  ;;  %v628_v13 = vrot.slane %v627_v5, 2 }
 0x1e5   :  { %v635_v14 = vrot.slane %v634_v6, 2  ;;  %v642_v15 = vrot.slane %v641_v7, 2  ;;  %v649_v16 = vrot.slane %v648_v8, 2  ;;  %v655_v17 = vmax.f32 %v653_v55, %v654_v9 }
 0x1e6   :  { %v662_v56 = vmax.f32 %v660_v2, %v661_v10  ;;  %v669_v18 = vmax.f32 %v667_v3, %v668_v11  ;;  %v676_v19 = vmax.f32 %v674_v4, %v675_v12  ;;  %v629_v20 = vmax.f32 %v627_v5, %v628_v13 }
 0x1e7   :  { %v636_v21 = vmax.f32 %v634_v6, %v635_v14  ;;  %v643_v22 = vmax.f32 %v641_v7, %v642_v15  ;;  %v650_v23 = vmax.f32 %v648_v8, %v649_v16  ;;  %v656_v24 = vrot.slane %v655_v17, 2 }
 0x1e8   :  { %v663_v25 = vrot.slane %v662_v56, 2  ;;  %v670_v26 = vrot.slane %v669_v18, 2  ;;  %v677_v27 = vrot.slane %v676_v19, 2  ;;  %v623_v28 = vrot.slane %v622_v61, 1 }
 0x1e9   :  { %v630_v29 = vrot.slane %v629_v20, 1  ;;  %v637_v30 = vrot.slane %v636_v21, 1  ;;  %v644_v35 = vrot.slane %v643_v22, 1  ;;  %v657_v36 = vmax.f32 %v655_v17, %v656_v24 }
 0x1ea   :  { %v664_v37 = vmax.f32 %v662_v56, %v663_v25  ;;  %v671_v38 = vmax.f32 %v669_v18, %v670_v26  ;;  %v678_v39 = vmax.f32 %v676_v19, %v677_v27  ;;  %v582_v40 = vmax.f32 %v1045_v32, %v581_v49 }
 0x1eb   :  { %v589_v44 = vmax.f32 %v1047_v33, %v588_v50  ;;  %v638_v45 = vmax.f32 %v636_v21, %v637_v30  ;;  %v651_v46 = vrot.slane %v650_v23, 1  ;;  %v658_v47 = vrot.slane %v657_v36, 1 }
 0x1ec   :  { %v665_v52 = vrot.slane %v664_v37, 1  ;;  %v672_v53 = vrot.slane %v671_v38, 1  ;;  %v679_v54 = vrot.slane %v678_v39, 1  ;;  %v575_v57 = vmax.f32 %v1043_v31, %v574_v48 }
 0x1ed   :  { %v596_v62 = vmax.f32 %v1049_v34, %v595_v51  ;;  %v603_v63 = vmax.f32 %v1054_v41, %v602_v58  ;;  %v645_v0 = vmax.f32 %v643_v22, %v644_v35  ;;  %v610_v1 = vmax.f32 %v1056_v42, %v609_v59 }
 0x1ee   :  { %v617_v55 = vmax.f32 %v1058_v43, %v616_v60  ;;  %v624_v32 = vmax.f32 %v622_v61, %v623_v28  ;;  %v631_v49 = vmax.f32 %v629_v20, %v630_v29  ;;  %v652_v33 = vmax.f32 %v650_v23, %v651_v46 }
 0x1ef   :  { %v659_v50 = vmax.f32 %v657_v36, %v658_v47  ;;  %v666_v2 = vmax.f32 %v664_v37, %v665_v52  ;;  %v682_v3 = vpack.c.bf16 %v582_v40, %v582_v40  ;;  %v673_v4 = vmax.f32 %v671_v38, %v672_v53 }
 0x1f0   :  { %v680_v5 = vmax.f32 %v678_v39, %v679_v54  ;;  %v683_v6 = vpack.c.bf16 %v589_v44, %v589_v44  ;;  %v690_v7 = vpack.c.bf16 %v638_v45, %v638_v45  ;;  %v681_v31 = vpack.c.bf16 %v575_v57, %v575_v57 }
 0x1f1   :  { %v684_v48 = vpack.c.bf16 %v596_v62, %v596_v62  ;;  %v685_v34 = vpack.c.bf16 %v603_v63, %v603_v63  ;;  %v691_v51 = vpack.c.bf16 %v645_v0, %v645_v0  ;;  %v686_v41 = vpack.c.bf16 %v610_v1, %v610_v1 }
 0x1f2   :  { %v687_v58 = vpack.c.bf16 %v617_v55, %v617_v55  ;;  %v688_v8 = vpack.c.bf16 %v624_v32, %v624_v32  ;;  %v689_v42 = vpack.c.bf16 %v631_v49, %v631_v49  ;;  %v692_v59 = vpack.c.bf16 %v652_v33, %v652_v33 }
 0x1f3   :  { %v693_v43 = vpack.c.bf16 %v659_v50, %v659_v50  ;;  %v694_v60 = vpack.c.bf16 %v666_v2, %v666_v2  ;;  %v714_v61 = vunpack.c.l.b16 %v682_v3  ;;  %v695_v9 = vpack.c.bf16 %v673_v4, %v673_v4 }
 0x1f4   :  { %v696_v10 = vpack.c.bf16 %v680_v5, %v680_v5  ;;  %v715_v11 = vunpack.c.l.b16 %v683_v6  ;;  %v722_v12 = vunpack.c.l.b16 %v690_v7  ;;  %v713_v13 = vunpack.c.l.b16 %v681_v31 }
 0x1f5   :  { %v716_v14 = vunpack.c.l.b16 %v684_v48  ;;  %v717_v15 = vunpack.c.l.b16 %v685_v34  ;;  %v723_v16 = vunpack.c.l.b16 %v691_v51  ;;  %v721_v17 = vunpack.c.l.b16 %v689_v42 }
 0x1f6   :  { %v718_v56 = vunpack.c.l.b16 %v686_v41  ;;  %v719_v18 = vunpack.c.l.b16 %v687_v58  ;;  %v730_v19 = vsel %vm729_vm11, %v714_v61, %v713_v13  ;;  %v724_v20 = vunpack.c.l.b16 %v692_v59 }
 0x1f7   :  { %v732_v21 = vsel %vm731_vm12, %v715_v11, %v730_v19  ;;  %v743_v22 = vsel %vm729_vm11, %v722_v12, %v721_v17  ;;  %v725_v23 = vunpack.c.l.b16 %v693_v43  ;;  %v726_v26 = vunpack.c.l.b16 %v694_v60 }
 0x1f8   :  { %v734_v24 = vsel %vm733_vm13, %v716_v14, %v732_v21  ;;  %v744_v25 = vsel %vm731_vm12, %v723_v16, %v743_v22  ;;  %v720_v29 = vunpack.c.l.b16 %v688_v8  ;;  %v727_v30 = vunpack.c.l.b16 %v695_v9 }
 0x1f9   :  { %v736_v27 = vsel %vm735_vm14, %v717_v15, %v734_v24  ;;  %v745_v28 = vsel %vm733_vm13, %v724_v20, %v744_v25  ;;  %v728_v37 = vunpack.c.l.b16 %v696_v10 }
 0x1fa   :  { %v738_v35 = vsel %vm737_vm15, %v718_v56, %v736_v27  ;;  %v746_v36 = vsel %vm735_vm14, %v725_v23, %v745_v28 }
 0x1fb   :  { %v740_v38 = vsel %vm739_vm0, %v719_v18, %v738_v35  ;;  %v747_v39 = vsel %vm737_vm15, %v726_v26, %v746_v36 }
 0x1fc   :  { %v742_v40 = vsel %vm741_vm1, %v720_v29, %v740_v38  ;;  %v748_v44 = vsel %vm739_vm0, %v727_v30, %v747_v39 }
 0x1fd   :  { %v749_v45 = vsel %vm741_vm1, %v728_v37, %v748_v44  ;;  %v750_v46 = vpack.c.b16 %v742_v40, %v742_v40 }
 0x1fe   :  { %v751_v47 = vpack.c.b16 %v749_v45, %v749_v45 }
 0x1ff   :  { %754 = vst.msk [vmem:[%s1111_s10] sm:$0xf] %vm535_vm9, %v750_v46 }
 0x200   :  { %755 = vst.msk [vmem:[%s1111_s10 + $0x4] sm:$0xf] %vm535_vm9, %v751_v47 }
 0x201   :  { %764 = vsyncpa [#allocation3], 1 }

// kernel: ecg_embedding_forward.7
= control target key start
LH: loop header
LB: loop body
LE: loop exit
PB: predicated region body
PF: predicated region fallthrough
CT: control target
= control target key end

     0   :  { %16 = vsyncpa [#allocation3], 0  ;;  %s1193_s0 = inlined_call_operand.vmem [shape: bf16[2,8,64], index: 0, kind: input, shape index: {}]   ;;  %s1194_s1 = inlined_call_operand.hbm [shape: bf16[3,64,128], index: 1, kind: input, shape index: {}]   ;;  %s1195_s2 = inlined_call_operand.vmem [shape: f32[1,128], index: 2, kind: input, shape index: {}]   ;;  %s1196_s3 = inlined_call_operand.vmem [shape: f32[1,128], index: 3, kind: input, shape index: {}]   ;;  %s1197_s4 = inlined_call_operand.vmem [shape: f32[1,128], index: 4, kind: input, shape index: {}]   ;;  %s1198_s5 = inlined_call_operand.hbm [shape: bf16[3,128,128], index: 5, kind: input, shape index: {}]   ;;  %s1199_s6 = inlined_call_operand.vmem [shape: f32[1,128], index: 6, kind: input, shape index: {}]   ;;  %s1200_s7 = inlined_call_operand.vmem [shape: f32[1,128], index: 7, kind: input, shape index: {}]   ;;  %s1201_s8 = inlined_call_operand.vmem [shape: f32[1,128], index: 8, kind: input, shape index: {}]   ;;  %s1202_s9 = inlined_call_operand.vmem [shape: bf16[2,8,128], index: 9, kind: output, shape index: {0}]   ;;  %s1203_s10 = inlined_call_operand.vmem [shape: bf16[2,4,128], index: 10, kind: output, shape index: {1}]  }
   0x1   :  { %s24_s15 = sshll.u32 %s1194_s1, 4  ;;  %s25_s15 = int_to_ptr.hbm [resolvable:$true] %s24_s15 }
   0x2   :  { %17 = vsyncpa [#allocation5], 0  ;;  %s1066_s16 = smov [#allocation2]   ;;  %s43_s20 = sshll.u32 %s1198_s5, 4  ;;  %s44_s20 = int_to_ptr.hbm [resolvable:$true] %s43_s20 }
   0x3   :  { %s26_s17 = sshll.u32 %s1066_s16, 4  ;;  %s1067_s21 = smov 64   ;;  %s27_s17 = int_to_ptr.vmem [resolvable:$true] %s26_s17 }
   0x4   :  { %s1068_s22 = smov 4   ;;  %s1069_s23 = smov [#allocation4]  }
   0x5   :  { %32 = dma.hbm_to_vmem [thread:$0]  %s25_s15, 1536, %s27_s17, [#allocation3], %s1067_s21, %s1067_s21, %s1068_s22  }
   0x6   :  { %s45_s24 = sshll.u32 %s1069_s23, 4  ;;  %s46_s24 = int_to_ptr.vmem [resolvable:$true] %s45_s24 }
   0x7   :  { %51 = dma.hbm_to_vmem [thread:$0]  %s44_s20, 3072, %s46_s24, [#allocation5], %s1067_s21, %s1067_s21, %s1068_s22  }
   0x8   :  { %1062 = dma.done.wait [#allocation3], 1536  }
   0x9   :  { %1063 = vsyncadd [#allocation3], 4294965760 }
   0xa   :  { %1064 = dma.done.wait [#allocation5], 3072  }
   0xb   :  { %1065 = vsyncadd [#allocation5], 4294964224  ;;  %v962_v0 = vld [vmem:[#allocation2 + $0x18] sm:$0xff]  ;;  %v961_v2 = vld [vmem:[#allocation2 + $0x10] sm:$0xff]  ;;  %vm106_vm0 = vcmask 523264   ;;  %vm224_vm1 = vcmask 1040384  }
   0xc   :  { %v966_v1 = vld [vmem:[#allocation2 + $0x38] sm:$0xff]  ;;  %114 = vmatpush.bf16.msra.mxu2 %v962_v0  ;;  %v965_v3 = vld [vmem:[#allocation2 + $0x30] sm:$0xff]  ;;  %v960_v4 = vld [vmem:[#allocation2 + $0x8] sm:$0xff]  ;;  %vm235_vm2 = vcmask 1046528   ;;  %vm628_vm9 = vcmask 1041408   ;;  %vm769_vm10 = vcmask 1041409  }
   0xd   :  { %161 = vmatpush.bf16.msra.mxu1 %v966_v1  ;;  %v964_v5 = vld [vmem:[#allocation2 + $0x28] sm:$0xff]  ;;  %v959_v6 = vld [vmem:[#allocation2] sm:$0xff]  ;;  %v970_v7 = vld [vmem:[#allocation2 + $0x58] sm:$0xff]  ;;  %vm772_vm11 = vcmask 1042434   ;;  %vm775_vm12 = vcmask 1043459  }
   0xe   :  { %v963_v8 = vld [vmem:[#allocation2 + $0x20] sm:$0xff]  ;;  %v958_v9 = vld [vmem:[%s1193_s0] sm:$0xff]  ;;  %v969_v10 = vld [vmem:[#allocation2 + $0x50] sm:$0xff] }
   0xf   :  { %v968_v11 = vld [vmem:[#allocation2 + $0x48] sm:$0xff]  ;;  %v967_v12 = vld [vmem:[#allocation2 + $0x40] sm:$0xff]  ;;  %v1004_v29 = vld [vmem:[%s1195_s2] ss:$0 sm:$0xff] }
  0x10   :  { %115 = vmatpush.bf16.msra.mxu2 %v961_v2  ;;  %v978_v36 = vld [vmem:[#allocation4 + $0x38] sm:$0xff]  ;;  %v977_v41 = vld [vmem:[#allocation4 + $0x30] sm:$0xff]  ;;  %v976_v45 = vld [vmem:[#allocation4 + $0x28] sm:$0xff] }
  0x11   :  { %162 = vmatpush.bf16.msra.mxu1 %v965_v3  ;;  %v986_v37 = vld [vmem:[#allocation4 + $0x78] sm:$0xff]  ;;  %365 = vmatpush.bf16.msra.mxu3 %v978_v36  ;;  %v985_v42 = vld [vmem:[#allocation4 + $0x70] sm:$0xff]  ;;  %v984_v46 = vld [vmem:[#allocation4 + $0x68] sm:$0xff] }
  0x12   :  { %v994_v38 = vld [vmem:[#allocation4 + $0xb8] sm:$0xff]  ;;  %444 = vmatpush.bf16.msra.mxu0 %v986_v37  ;;  %v993_v43 = vld [vmem:[#allocation4 + $0xb0] sm:$0xff]  ;;  %v992_v48 = vld [vmem:[#allocation4 + $0xa8] sm:$0xff] }
  0x13   :  { %v975_v50 = vld [vmem:[#allocation4 + $0x20] sm:$0xff]  ;;  %v974_v56 = vld [vmem:[#allocation4 + $0x18] sm:$0xff]  ;;  %v973_v62 = vld [vmem:[#allocation4 + $0x10] sm:$0xff] }
  0x14   :  { %116 = vmatpush.bf16.msra.mxu2 %v960_v4  ;;  %v983_v51 = vld [vmem:[#allocation4 + $0x60] sm:$0xff]  ;;  %v982_v57 = vld [vmem:[#allocation4 + $0x58] sm:$0xff]  ;;  %v981_v63 = vld [vmem:[#allocation4 + $0x50] sm:$0xff] }
  0x15   :  { %163 = vmatpush.bf16.msra.mxu1 %v964_v5  ;;  %366 = vmatpush.bf16.msra.mxu3 %v977_v41  ;;  %v991_v53 = vld [vmem:[#allocation4 + $0xa0] sm:$0xff]  ;;  %v990_v60 = vld [vmem:[#allocation4 + $0x98] sm:$0xff]  ;;  %v989_v1 = vld [vmem:[#allocation4 + $0x90] sm:$0xff] }
  0x16   :  { %445 = vmatpush.bf16.msra.mxu0 %v985_v42  ;;  %v972_v3 = vld [vmem:[#allocation4 + $0x8] sm:$0xff] }
  0x17   :  { %v980_v4 = vld [vmem:[#allocation4 + $0x48] sm:$0xff] }
  0x18   :  { %117 = vmatpush.bf16.msra.mxu2 %v959_v6  ;;  %v988_v6 = vld [vmem:[#allocation4 + $0x88] sm:$0xff] }
  0x19   :  { %164 = vmatpush.bf16.msra.mxu1 %v963_v8  ;;  %367 = vmatpush.bf16.msra.mxu3 %v976_v45  ;;  %v971_v8 = vld [vmem:[#allocation4] sm:$0xff] }
  0x1a   :  { %446 = vmatpush.bf16.msra.mxu0 %v984_v46 }
  0x1b   :  { %827 = vmatmul.msk.bf16.vlgmr.msra.gmra.mxu2 %vm106_vm0, %v958_v9 }
  0x1c   :  { %208 = vmatpush.bf16.msrb.mxu2 %v970_v7  ;;  %844 = vmatmul.msk.bf16.vlgmr.msra.gmra.mxu1 %vm106_vm0, %v958_v9 }
  0x1d   :  { %523 = vmatpush.bf16.msrb.mxu1 %v994_v38  ;;  %368 = vmatpush.bf16.msra.mxu3 %v975_v50 }
  0x1e   :  { %447 = vmatpush.bf16.msra.mxu0 %v983_v51 }
  0x20   :  { %209 = vmatpush.bf16.msrb.mxu2 %v969_v10 }
  0x21   :  { %524 = vmatpush.bf16.msrb.mxu1 %v993_v43  ;;  %369 = vmatpush.bf16.msra.mxu3 %v974_v56 }
  0x22   :  { %448 = vmatpush.bf16.msra.mxu0 %v982_v57 }
  0x24   :  { %210 = vmatpush.bf16.msrb.mxu2 %v968_v11  ;;  %v987_v11 = vld [vmem:[#allocation4 + $0x80] sm:$0xff] }
  0x25   :  { %525 = vmatpush.bf16.msrb.mxu1 %v992_v48  ;;  %370 = vmatpush.bf16.msra.mxu3 %v973_v62 }
  0x26   :  { %449 = vmatpush.bf16.msra.mxu0 %v981_v63 }
  0x28   :  { %211 = vmatpush.bf16.msrb.mxu2 %v967_v12 }
  0x29   :  { %526 = vmatpush.bf16.msrb.mxu1 %v991_v53  ;;  %371 = vmatpush.bf16.msra.mxu3 %v972_v3 }
  0x2a   :  { %450 = vmatpush.bf16.msra.mxu0 %v980_v4 }
  0x2b   :  { %861 = vmatmul.msk.bf16.vlgmr.msrb.gmra.mxu2 %vm106_vm0, %v958_v9  ;;  %v979_v9 = vld [vmem:[#allocation4 + $0x40] sm:$0xff] }
  0x2d   :  { %527 = vmatpush.bf16.msrb.mxu1 %v990_v60  ;;  %372 = vmatpush.bf16.msra.mxu3 %v971_v8 }
  0x2e   :  { %451 = vmatpush.bf16.msra.mxu0 %v979_v9 }
  0x31   :  { %528 = vmatpush.bf16.msrb.mxu1 %v989_v1 }
  0x35   :  { %529 = vmatpush.bf16.msrb.mxu1 %v988_v6 }
  0x39   :  { %530 = vmatpush.bf16.msrb.mxu1 %v987_v11 }
  0x99   :  { %v166_v15 = vpop.f32.mrf.mxu1 }
  0x9e   :  { %v119_v13 = vpop.f32.mrf.mxu2 }
  0x9f   :  { %v220_v17 = vrot.slane %v119_v13, 7 }
  0xa1   :  { %v225_v20 = vsel %vm224_vm1, 0.0, %v220_v17  ;;  %v168_v21 = vpop.f32.mrf.mxu1 }
  0xa2   :  { %v227_v24 = vadd.f32 %v225_v20, %v166_v15 }
  0xa6   :  { %v121_v14 = vpop.f32.mrf.mxu2 }
  0xa7   :  { %v221_v18 = vrot.slane %v121_v14, 7 }
  0xa9   :  { %v226_v22 = vsel %vm224_vm1, 0.0, %v221_v18 }
  0xaa   :  { %v228_v27 = vadd.f32 %v226_v22, %v168_v21 }
  0xae   :  { %v213_v16 = vpop.f32.mrf.mxu2 }
  0xaf   :  { %v231_v19 = vrot.slane %v213_v16, 1 }
  0xb1   :  { %v236_v23 = vsel %vm235_vm2, %v231_v19, 0.0  ;;  %v1005_v19 = vld [vmem:[%s1196_s3] ss:$0 sm:$0xff] }
  0xb2   :  { %v238_v28 = vadd.f32 %v236_v23, %v227_v24  ;;  %v1006_v24 = vld [vmem:[%s1197_s4] ss:$0 sm:$0xff] }
  0xb4   :  { %v244_v32 = vadd.f32 %v1004_v29, %v238_v28 }
  0xb6   :  { %v215_v25 = vpop.f32.mrf.mxu2 }
  0xb7   :  { %v232_v26 = vrot.slane %v215_v25, 1 }
  0xb9   :  { %v237_v30 = vsel %vm235_vm2, %v232_v26, 0.0 }
  0xba   :  { %v239_v31 = vadd.f32 %v237_v30, %v228_v27 }
  0xbc   :  { %v245_v33 = vadd.f32 %v1004_v29, %v239_v31 }
  0xbe   :  { %v246_v34 = vadd.f32 %v245_v33, %v244_v32 }
  0xc0   :  { %v247_v35 = vrot.slane %v246_v34, 4 }
  0xc2   :  { %v248_v39 = vadd.f32 %v247_v35, %v246_v34 }
  0xc4   :  { %v249_v40 = vrot.slane %v248_v39, 2 }
  0xc6   :  { %v250_v44 = vadd.f32 %v249_v40, %v248_v39 }
  0xc8   :  { %v251_v47 = vrot.slane %v250_v44, 1 }
  0xca   :  { %v252_v49 = vadd.f32 %v251_v47, %v250_v44 }
  0xcc   :  { %v253_v52 = vmul.f32 0.0625, %v252_v49 }
  0xce   :  { %v254_v54 = vsub.f32 %v244_v32, %v253_v52  ;;  %v255_v55 = vsub.f32 %v245_v33, %v253_v52  ;;  %v1007_v52 = vld [vmem:[%s1199_s6] ss:$0 sm:$0xff] }
  0xd0   :  { %v256_v58 = vmul.f32 %v254_v54, %v254_v54  ;;  %v257_v59 = vmul.f32 %v255_v55, %v255_v55  ;;  %v271_v22 = vmul.f32 %v1005_v19, %v255_v55  ;;  %v270_v23 = vmul.f32 %v1005_v19, %v254_v54  ;;  %v1008_v19 = vld [vmem:[%s1200_s7] ss:$0 sm:$0xff] }
  0xd2   :  { %v258_v61 = vadd.f32 %v257_v59, %v256_v58 }
  0xd4   :  { %v259_v0 = vrot.slane %v258_v61, 4 }
  0xd6   :  { %v260_v2 = vadd.f32 %v259_v0, %v258_v61 }
  0xd8   :  { %v261_v5 = vrot.slane %v260_v2, 2 }
  0xda   :  { %v262_v7 = vadd.f32 %v261_v5, %v260_v2 }
  0xdc   :  { %v263_v10 = vrot.slane %v262_v7, 1 }
  0xde   :  { %v264_v12 = vadd.f32 %v263_v10, %v262_v7 }
  0xe0   :  { %v265_v13 = vmul.f32 0.0625, %v264_v12 }
  0xe2   :  { %v272_v14 = vadd.f32 1e-05, %v265_v13 }
  0xe4   :  { %1010 = vrsqrt.f32 %v272_v14  ;;  %vm279_vm4 = vweird.f32 %v272_v14 }
  0xea   :  { %v1011_v15 = vpop.eup %1010 }
  0xeb   :  { %v274_v16 = vmul.f32 %v1011_v15, %v272_v14  ;;  %vm280_vm3 = vweird.f32 %v1011_v15 }
  0xec   :  { %vm281_vm5 = vmor %vm279_vm4, %vm280_vm3 }
  0xed   :  { %v275_v17 = vmul.f32 %v1011_v15, %v274_v16 }
  0xef   :  { %v276_v18 = vmul.f32 0.5, %v275_v17 }
  0xf1   :  { %v277_v20 = vsub.f32 1.5, %v276_v18 }
  0xf3   :  { %v278_v21 = vmul.f32 %v1011_v15, %v277_v20 }
  0xf5   :  { %v282_v25 = vsel %vm281_vm5, %v1011_v15, %v278_v21 }
  0xf6   :  { %v283_v26 = vmul.f32 %v282_v25, %v270_v23  ;;  %v284_v27 = vmul.f32 %v282_v25, %v271_v22 }
  0xf8   :  { %v289_v28 = vadd.f32 %v1006_v24, %v283_v26  ;;  %v290_v29 = vadd.f32 %v1006_v24, %v284_v27  ;;  %v1009_v24 = vld [vmem:[%s1201_s8] ss:$0 sm:$0xff] }
  0xfa   :  { %v291_v30 = vmax.f32 %v289_v28, 0.0  ;;  %v292_v31 = vmax.f32 %v290_v29, 0.0 }
  0xfc   :  { %v293_v32 = vpack.c.bf16 %v291_v30, %v291_v30  ;;  %v294_v33 = vpack.c.bf16 %v292_v31, %v292_v31 }
  0xfe   :  { %v313_v34 = vunpack.c.l.b16 %v293_v32  ;;  %v314_v35 = vunpack.c.l.b16 %v294_v33 }
 0x100   :  { %v315_v36 = vpack.c.b16 %v314_v35, %v313_v34 }
 0x102   :  { %373 = vmatmul.bf16.vlgmr.msra.gmra.mxu3 %v315_v36  ;;  %452 = vmatmul.bf16.vlgmr.msra.gmra.mxu0 %v315_v36 }
 0x103   :  { %531 = vmatmul.bf16.vlgmr.msrb.gmra.mxu1 %v315_v36 }
 0x17f   :  { %v453_v39 = vpop.f32.mrf.mxu0 }
 0x180   :  { %v532_v37 = vpop.f32.mrf.mxu1 }
 0x181   :  { %v549_v43 = vrot.slane %v532_v37, 1 }
 0x183   :  { %v553_v48 = vsel %vm235_vm2, %v549_v43, 0.0 }
 0x185   :  { %v374_v38 = vpop.f32.mrf.mxu3 }
 0x186   :  { %v539_v40 = vrot.slane %v374_v38, 7 }
 0x187   :  { %v455_v49 = vpop.f32.mrf.mxu0 }
 0x188   :  { %v543_v41 = vsel %vm224_vm1, 0.0, %v539_v40  ;;  %v534_v42 = vpop.f32.mrf.mxu1 }
 0x189   :  { %v545_v44 = vadd.f32 %v543_v41, %v453_v39  ;;  %v550_v46 = vrot.slane %v534_v42, 1 }
 0x18b   :  { %v555_v51 = vadd.f32 %v553_v48, %v545_v44  ;;  %v554_v54 = vsel %vm235_vm2, %v550_v46, 0.0 }
 0x18d   :  { %v376_v45 = vpop.f32.mrf.mxu3  ;;  %v561_v56 = vadd.f32 %v1007_v52, %v555_v51 }
 0x18e   :  { %v540_v47 = vrot.slane %v376_v45, 7 }
 0x190   :  { %v544_v50 = vsel %vm224_vm1, 0.0, %v540_v47 }
 0x191   :  { %v546_v53 = vadd.f32 %v544_v50, %v455_v49 }
 0x193   :  { %v556_v55 = vadd.f32 %v554_v54, %v546_v53 }
 0x195   :  { %v562_v57 = vadd.f32 %v1007_v52, %v556_v55 }
 0x197   :  { %v563_v58 = vadd.f32 %v562_v57, %v561_v56 }
 0x199   :  { %v564_v59 = vrot.slane %v563_v58, 4 }
 0x19b   :  { %v565_v60 = vadd.f32 %v564_v59, %v563_v58 }
 0x19d   :  { %v566_v61 = vrot.slane %v565_v60, 2 }
 0x19f   :  { %v567_v62 = vadd.f32 %v566_v61, %v565_v60 }
 0x1a1   :  { %v568_v63 = vrot.slane %v567_v62, 1 }
 0x1a3   :  { %v569_v0 = vadd.f32 %v568_v63, %v567_v62 }
 0x1a5   :  { %v570_v1 = vmul.f32 0.0625, %v569_v0 }
 0x1a7   :  { %v571_v2 = vsub.f32 %v561_v56, %v570_v1  ;;  %v572_v3 = vsub.f32 %v562_v57, %v570_v1 }
 0x1a9   :  { %v573_v4 = vmul.f32 %v571_v2, %v571_v2  ;;  %v574_v5 = vmul.f32 %v572_v3, %v572_v3  ;;  %v587_v22 = vmul.f32 %v1008_v19, %v571_v2  ;;  %v588_v23 = vmul.f32 %v1008_v19, %v572_v3 }
 0x1ab   :  { %v575_v6 = vadd.f32 %v574_v5, %v573_v4 }
 0x1ad   :  { %v576_v7 = vrot.slane %v575_v6, 4 }
 0x1af   :  { %v577_v8 = vadd.f32 %v576_v7, %v575_v6 }
 0x1b1   :  { %v578_v9 = vrot.slane %v577_v8, 2 }
 0x1b3   :  { %v579_v10 = vadd.f32 %v578_v9, %v577_v8 }
 0x1b5   :  { %v580_v11 = vrot.slane %v579_v10, 1 }
 0x1b7   :  { %v581_v12 = vadd.f32 %v580_v11, %v579_v10 }
 0x1b9   :  { %v582_v13 = vmul.f32 0.0625, %v581_v12 }
 0x1bb   :  { %v589_v14 = vadd.f32 1e-05, %v582_v13 }
 0x1bd   :  { %1012 = vrsqrt.f32 %v589_v14  ;;  %vm596_vm7 = vweird.f32 %v589_v14 }
 0x1c3   :  { %v1013_v15 = vpop.eup %1012 }
 0x1c4   :  { %v591_v16 = vmul.f32 %v1013_v15, %v589_v14  ;;  %vm597_vm6 = vweird.f32 %v1013_v15 }
 0x1c5   :  { %vm598_vm8 = vmor %vm596_vm7, %vm597_vm6 }
 0x1c6   :  { %v592_v17 = vmul.f32 %v1013_v15, %v591_v16 }
 0x1c8   :  { %v593_v18 = vmul.f32 0.5, %v592_v17 }
 0x1ca   :  { %v594_v20 = vsub.f32 1.5, %v593_v18 }
 0x1cc   :  { %v595_v21 = vmul.f32 %v1013_v15, %v594_v20 }
 0x1ce   :  { %v599_v25 = vsel %vm598_vm8, %v1013_v15, %v595_v21 }
 0x1cf   :  { %v600_v26 = vmul.f32 %v599_v25, %v587_v22  ;;  %v601_v27 = vmul.f32 %v599_v25, %v588_v23 }
 0x1d1   :  { %v606_v28 = vadd.f32 %v1009_v24, %v600_v26  ;;  %v607_v29 = vadd.f32 %v1009_v24, %v601_v27 }
 0x1d3   :  { %v608_v30 = vmax.f32 %v606_v28, 0.0  ;;  %v609_v31 = vmax.f32 %v607_v29, 0.0 }
 0x1d5   :  { %v998_v32 = vpack.c.bf16 %v609_v31, %v608_v30  ;;  %v616_v33 = vrot.slane %v608_v30, 2  ;;  %v617_v34 = vrot.slane %v608_v30, 4  ;;  %v618_v35 = vrot.slane %v608_v30, 6 }
 0x1d6   :  { %v619_v36 = vrot.slane %v609_v31, 2  ;;  %v620_v37 = vrot.slane %v609_v31, 4  ;;  %v621_v38 = vrot.slane %v609_v31, 6  ;;  %v629_v39 = vsel %vm628_vm9, %v608_v30, -inf }
 0x1d7   :  { %999 = vst [vmem:[%s1202_s9] sm:$0xff] %v998_v32   ;;  %v630_v40 = vrot.slane %v629_v39, 4  ;;  %v636_v41 = vsel %vm628_vm9, %v616_v33, -inf  ;;  %v643_v42 = vsel %vm628_vm9, %v617_v34, -inf  ;;  %v650_v43 = vsel %vm628_vm9, %v618_v35, -inf }
 0x1d8   :  { %v637_v44 = vrot.slane %v636_v41, 4  ;;  %v644_v45 = vrot.slane %v643_v42, 4  ;;  %v651_v46 = vrot.slane %v650_v43, 4  ;;  %v657_v47 = vsel %vm628_vm9, %v609_v31, -inf }
 0x1d9   :  { %v631_v48 = vmax.f32 %v629_v39, %v630_v40  ;;  %v658_v49 = vrot.slane %v657_v47, 4  ;;  %v664_v50 = vsel %vm628_vm9, %v619_v36, -inf  ;;  %v671_v51 = vsel %vm628_vm9, %v620_v37, -inf }
 0x1da   :  { %v638_v52 = vmax.f32 %v636_v41, %v637_v44  ;;  %v645_v53 = vmax.f32 %v643_v42, %v644_v45  ;;  %v652_v54 = vmax.f32 %v650_v43, %v651_v46  ;;  %v665_v55 = vrot.slane %v664_v50, 4 }
 0x1db   :  { %v632_v56 = vrot.slane %v631_v48, 2  ;;  %v659_v57 = vmax.f32 %v657_v47, %v658_v49  ;;  %v672_v58 = vrot.slane %v671_v51, 4  ;;  %v678_v59 = vsel %vm628_vm9, %v621_v38, -inf }
 0x1dc   :  { %v639_v60 = vrot.slane %v638_v52, 2  ;;  %v646_v61 = vrot.slane %v645_v53, 2  ;;  %v653_v62 = vrot.slane %v652_v54, 2  ;;  %v666_v63 = vmax.f32 %v664_v50, %v665_v55 }
 0x1dd   :  { %v633_v0 = vmax.f32 %v631_v48, %v632_v56  ;;  %v660_v1 = vrot.slane %v659_v57, 2  ;;  %v673_v2 = vmax.f32 %v671_v51, %v672_v58  ;;  %v679_v3 = vrot.slane %v678_v59, 4 }
 0x1de   :  { %v640_v4 = vmax.f32 %v638_v52, %v639_v60  ;;  %v647_v5 = vmax.f32 %v645_v53, %v646_v61  ;;  %v654_v6 = vmax.f32 %v652_v54, %v653_v62  ;;  %v667_v7 = vrot.slane %v666_v63, 2 }
 0x1df   :  { %v634_v8 = vrot.slane %v633_v0, 1  ;;  %v661_v9 = vmax.f32 %v659_v57, %v660_v1  ;;  %v674_v10 = vrot.slane %v673_v2, 2  ;;  %v680_v11 = vmax.f32 %v678_v59, %v679_v3 }
 0x1e0   :  { %v641_v12 = vrot.slane %v640_v4, 1  ;;  %v648_v13 = vrot.slane %v647_v5, 1  ;;  %v655_v14 = vrot.slane %v654_v6, 1  ;;  %v668_v15 = vmax.f32 %v666_v63, %v667_v7 }
 0x1e1   :  { %v635_v16 = vmax.f32 %v633_v0, %v634_v8  ;;  %v662_v17 = vrot.slane %v661_v9, 1  ;;  %v675_v18 = vmax.f32 %v673_v2, %v674_v10  ;;  %v681_v19 = vrot.slane %v680_v11, 2 }
 0x1e2   :  { %v642_v20 = vmax.f32 %v640_v4, %v641_v12  ;;  %v649_v21 = vmax.f32 %v647_v5, %v648_v13  ;;  %v656_v22 = vmax.f32 %v654_v6, %v655_v14  ;;  %v669_v23 = vrot.slane %v668_v15, 1 }
 0x1e3   :  { %v663_v24 = vmax.f32 %v661_v9, %v662_v17  ;;  %v676_v25 = vrot.slane %v675_v18, 1  ;;  %v682_v26 = vmax.f32 %v680_v11, %v681_v19  ;;  %v685_v27 = vpack.c.bf16 %v635_v16, %v635_v16 }
 0x1e4   :  { %v670_v28 = vmax.f32 %v668_v15, %v669_v23  ;;  %v686_v29 = vpack.c.bf16 %v642_v20, %v642_v20  ;;  %v687_v30 = vpack.c.bf16 %v649_v21, %v649_v21  ;;  %v688_v31 = vpack.c.bf16 %v656_v22, %v656_v22 }
 0x1e5   :  { %v677_v32 = vmax.f32 %v675_v18, %v676_v25  ;;  %v683_v33 = vrot.slane %v682_v26, 1  ;;  %v701_v34 = vrot.slane %v685_v27, 2  ;;  %v689_v39 = vpack.c.bf16 %v663_v24, %v663_v24 }
 0x1e6   :  { %v702_v35 = vrot.slane %v686_v29, 2  ;;  %v703_v36 = vrot.slane %v687_v30, 2  ;;  %v704_v37 = vrot.slane %v688_v31, 2  ;;  %v690_v41 = vpack.c.bf16 %v670_v28, %v670_v28 }
 0x1e7   :  { %v684_v38 = vmax.f32 %v682_v26, %v683_v33  ;;  %v711_v40 = vsel %vm628_vm9, %v685_v27, %v701_v34  ;;  %v691_v45 = vpack.c.bf16 %v677_v32, %v677_v32  ;;  %v705_v47 = vrot.slane %v689_v39, 2 }
 0x1e8   :  { %v714_v42 = vsel %vm628_vm9, %v686_v29, %v702_v35  ;;  %v717_v43 = vsel %vm628_vm9, %v687_v30, %v703_v36  ;;  %v720_v44 = vsel %vm628_vm9, %v688_v31, %v704_v37  ;;  %733 = vst [vmem:[#allocation1] ss:$2 sm:$0xff] %v711_v40  ;;  %v706_v48 = vrot.slane %v690_v41, 2 }
 0x1e9   :  { %737 = vst [vmem:[#allocation1 + $0x10] ss:$2 sm:$0xff] %v714_v42  ;;  %v692_v46 = vpack.c.bf16 %v684_v38, %v684_v38  ;;  %v707_v49 = vrot.slane %v691_v45, 2  ;;  %v723_v51 = vsel %vm628_vm9, %v689_v39, %v705_v47 }
 0x1ea   :  { %741 = vst [vmem:[#allocation1 + $0x20] ss:$2 sm:$0xff] %v717_v43  ;;  %v726_v53 = vsel %vm628_vm9, %v690_v41, %v706_v48 }
 0x1eb   :  { %745 = vst [vmem:[#allocation1 + $0x30] ss:$2 sm:$0xff] %v720_v44  ;;  %v708_v50 = vrot.slane %v692_v46, 2  ;;  %v729_v55 = vsel %vm628_vm9, %v691_v45, %v707_v49 }
 0x1ed   :  { %v732_v58 = vsel %vm628_vm9, %v692_v46, %v708_v50 }
 0x1ef   :  { %v734_v52 = vld.sshfl [vmem:[#allocation1] sm:$0xff pattern:$0x75643120] }
 0x1f0   :  { %v738_v54 = vld.sshfl [vmem:[#allocation1 + $0x10] sm:$0xff pattern:$0x75643120]  ;;  %748 = vst [vmem:[#allocation1] ss:$2 sm:$0xff] %v723_v51  ;;  %v760_v61 = vunpack.c.l.b16 %v734_v52 }
 0x1f1   :  { %v742_v56 = vld.sshfl [vmem:[#allocation1 + $0x20] sm:$0xff pattern:$0x75643120]  ;;  %751 = vst [vmem:[#allocation1 + $0x10] ss:$2 sm:$0xff] %v726_v53  ;;  %v761_v57 = vunpack.c.l.b16 %v738_v54 }
 0x1f2   :  { %v746_v59 = vld.sshfl [vmem:[#allocation1 + $0x30] sm:$0xff pattern:$0x75643120]  ;;  %754 = vst [vmem:[#allocation1 + $0x20] ss:$2 sm:$0xff] %v729_v55  ;;  %v762_v60 = vunpack.c.l.b16 %v742_v56 }
 0x1f3   :  { %757 = vst [vmem:[#allocation1 + $0x30] ss:$2 sm:$0xff] %v732_v58  ;;  %v763_v62 = vunpack.c.l.b16 %v746_v59  ;;  %v768_v63 = vrot.slane %v761_v57, 7 }
 0x1f4   :  { %v771_v0 = vrot.slane %v762_v60, 6 }
 0x1f5   :  { %v770_v1 = vsel %vm769_vm10, %v768_v63, %v760_v61  ;;  %v774_v2 = vrot.slane %v763_v62, 5 }
 0x1f6   :  { %v773_v3 = vsel %vm772_vm11, %v771_v0, %v770_v1 }
 0x1f7   :  { %v776_v4 = vsel %vm775_vm12, %v774_v2, %v773_v3  ;;  %v749_v5 = vld.sshfl [vmem:[#allocation1] sm:$0xff pattern:$0x75643120] }
 0x1f8   :  { %v752_v6 = vld.sshfl [vmem:[#allocation1 + $0x10] sm:$0xff pattern:$0x75643120]  ;;  %v783_v7 = vpack.c.b16 %v776_v4, %v776_v4  ;;  %v764_v13 = vunpack.c.l.b16 %v749_v5 }
 0x1f9   :  { %v755_v8 = vld.sshfl [vmem:[#allocation1 + $0x20] sm:$0xff pattern:$0x75643120]  ;;  %v765_v9 = vunpack.c.l.b16 %v752_v6 }
 0x1fa   :  { %v758_v10 = vld.sshfl [vmem:[#allocation1 + $0x30] sm:$0xff pattern:$0x75643120]  ;;  %v766_v11 = vunpack.c.l.b16 %v755_v8  ;;  %v785_v12 = vrot.slane %v783_v7, 2 }
 0x1fb   :  { %v767_v14 = vunpack.c.l.b16 %v758_v10  ;;  %v777_v15 = vrot.slane %v765_v9, 7 }
 0x1fc   :  { %v779_v16 = vrot.slane %v766_v11, 6  ;;  %v789_v17 = vsel %vm628_vm9, %v783_v7, %v785_v12 }
 0x1fd   :  { %v778_v18 = vsel %vm769_vm10, %v777_v15, %v764_v13  ;;  %v781_v19 = vrot.slane %v767_v14, 5  ;;  %795 = vst [vmem:[%s1203_s10] sm:$0x3] %v789_v17 }
 0x1fe   :  { %v780_v20 = vsel %vm772_vm11, %v779_v16, %v778_v18 }
 0x1ff   :  { %v782_v21 = vsel %vm775_vm12, %v781_v19, %v780_v20 }
 0x200   :  { %v784_v22 = vpack.c.b16 %v782_v21, %v782_v21 }
 0x202   :  { %v786_v23 = vrot.slane %v784_v22, 2 }
 0x204   :  { %v792_v24 = vsel %vm628_vm9, %v784_v22, %v786_v23 }
 0x205   :  { %796 = vst [vmem:[%s1203_s10 + $0x2] sm:$0x3] %v792_v24 }
 0x206   :  { %805 = vsyncpa [#allocation3], 1 }
 0x207   :  { %806 = vsyncpa [#allocation5], 1 }

// kernel: ecg_embedding_forward.8
= control target key start
LH: loop header
LB: loop body
LE: loop exit
PB: predicated region body
PF: predicated region fallthrough
CT: control target
= control target key end

     0   :  { %14 = vsyncpa [#allocation3], 0  ;;  %s2679_s0 = inlined_call_operand.vmem [shape: bf16[2,4,128], index: 0, kind: input, shape index: {}]   ;;  %s2680_s1 = inlined_call_operand.hbm [shape: bf16[3,128,256], index: 1, kind: input, shape index: {}]   ;;  %s2681_s2 = inlined_call_operand.vmem [shape: f32[1,256], index: 2, kind: input, shape index: {}]   ;;  %s2682_s3 = inlined_call_operand.vmem [shape: f32[1,256], index: 3, kind: input, shape index: {}]   ;;  %s2683_s4 = inlined_call_operand.vmem [shape: f32[1,256], index: 4, kind: input, shape index: {}]   ;;  %s2684_s5 = inlined_call_operand.hbm [shape: bf16[3,256,256], index: 5, kind: input, shape index: {}]   ;;  %s2685_s6 = inlined_call_operand.vmem [shape: f32[1,256], index: 6, kind: input, shape index: {}]   ;;  %s2686_s7 = inlined_call_operand.vmem [shape: f32[1,256], index: 7, kind: input, shape index: {}]   ;;  %s2687_s8 = inlined_call_operand.vmem [shape: f32[1,256], index: 8, kind: input, shape index: {}]   ;;  %s2688_s9 = inlined_call_operand.vmem [shape: bf16[2,4,256], index: 9, kind: output, shape index: {}]  }
   0x1   :  { %s22_s11 = sshll.u32 %s2680_s1, 4  ;;  %s23_s11 = int_to_ptr.hbm [resolvable:$true] %s22_s11 }
   0x2   :  { %15 = vsyncpa [#allocation5], 0  ;;  %s2462_s12 = smov [#allocation2]   ;;  %s41_s16 = sshll.u32 %s2684_s5, 4  ;;  %s42_s16 = int_to_ptr.hbm [resolvable:$true] %s41_s16 }
   0x3   :  { %s24_s13 = sshll.u32 %s2462_s12, 4  ;;  %s2463_s17 = smov 128   ;;  %s25_s13 = int_to_ptr.vmem [resolvable:$true] %s24_s13 }
   0x4   :  { %s2464_s18 = smov 8   ;;  %s2465_s19 = smov [#allocation4]  }
   0x5   :  { %30 = dma.hbm_to_vmem [thread:$0]  %s23_s11, 6144, %s25_s13, [#allocation3], %s2463_s17, %s2463_s17, %s2464_s18  }
   0x6   :  { %s43_s20 = sshll.u32 %s2465_s19, 4  ;;  %s44_s20 = int_to_ptr.vmem [resolvable:$true] %s43_s20 }
   0x7   :  { %49 = dma.hbm_to_vmem [thread:$0]  %s42_s16, 12288, %s44_s20, [#allocation5], %s2463_s17, %s2463_s17, %s2464_s18  }
   0x8   :  { %2458 = dma.done.wait [#allocation3], 6144  }
   0x9   :  { %2459 = vsyncadd [#allocation3], 4294961152 }
   0xa   :  { %2460 = dma.done.wait [#allocation5], 12288  }
   0xb   :  { %2461 = vsyncadd [#allocation5], 4294955008  ;;  %v1736_v0 = vld [vmem:[#allocation2 + $0x70] sm:$0xf]  ;;  %v2269_v1 = vld [vmem:[#allocation2 + $0x74] sm:$0xf0] }
   0xc   :  { %v2268_v2 = vld [vmem:[#allocation2 + $0x74] sm:$0xf]  ;;  %v1737_v3 = vor.u32 %v2269_v1, %v1736_v0  ;;  %v1738_v4 = vld [vmem:[#allocation2 + $0x78] sm:$0xf0]  ;;  %v1728_v5 = vld [vmem:[#allocation2 + $0x60] sm:$0xf] }
   0xd   :  { %v2267_v6 = vld [vmem:[#allocation2 + $0x64] sm:$0xf0]  ;;  %v1741_v7 = vor.u32 %v2268_v2, %v1738_v4  ;;  %v2266_v8 = vld [vmem:[#allocation2 + $0x64] sm:$0xf]  ;;  %v1730_v9 = vld [vmem:[#allocation2 + $0x68] sm:$0xf0] }
   0xe   :  { %169 = vmatpush.bf16.msra.mxu0 %v1737_v3  ;;  %v1729_v10 = vor.u32 %v2267_v6, %v1728_v5  ;;  %v1733_v11 = vor.u32 %v2266_v8, %v1730_v9  ;;  %v1720_v12 = vld [vmem:[#allocation2 + $0x50] sm:$0xf]  ;;  %v2265_v13 = vld [vmem:[#allocation2 + $0x54] sm:$0xf0]  ;;  %v2264_v14 = vld [vmem:[#allocation2 + $0x54] sm:$0xf] }
   0xf   :  { %182 = vmatpush.bf16.msra.mxu1 %v1741_v7  ;;  %v1722_v15 = vld [vmem:[#allocation2 + $0x58] sm:$0xf0]  ;;  %v2284_v16 = vld [vmem:[#allocation2 + $0xf4] sm:$0xf]  ;;  %v1721_v17 = vor.u32 %v2265_v13, %v1720_v12  ;;  %v1712_v18 = vld [vmem:[#allocation2 + $0x40] sm:$0xf] }
  0x10   :  { %v2263_v19 = vld [vmem:[#allocation2 + $0x44] sm:$0xf0]  ;;  %v1802_v20 = vld [vmem:[#allocation2 + $0xf8] sm:$0xf0]  ;;  %v1725_v21 = vor.u32 %v2264_v14, %v1722_v15  ;;  %v2262_v22 = vld [vmem:[#allocation2 + $0x44] sm:$0xf] }
  0x11   :  { %v1714_v23 = vld [vmem:[#allocation2 + $0x48] sm:$0xf0]  ;;  %v1805_v24 = vor.u32 %v2284_v16, %v1802_v20  ;;  %v1800_v25 = vld [vmem:[#allocation2 + $0xf0] sm:$0xf]  ;;  %v2285_v26 = vld [vmem:[#allocation2 + $0xf4] sm:$0xf0]  ;;  %v1713_v31 = vor.u32 %v2263_v19, %v1712_v18 }
  0x12   :  { %170 = vmatpush.bf16.msra.mxu0 %v1729_v10  ;;  %v2282_v27 = vld [vmem:[#allocation2 + $0xe4] sm:$0xf]  ;;  %v1794_v28 = vld [vmem:[#allocation2 + $0xe8] sm:$0xf0]  ;;  %v1801_v29 = vor.u32 %v2285_v26, %v1800_v25  ;;  %v1704_v32 = vld [vmem:[#allocation2 + $0x30] sm:$0xf]  ;;  %v1717_v35 = vor.u32 %v2262_v22, %v1714_v23 }
  0x13   :  { %183 = vmatpush.bf16.msra.mxu1 %v1733_v11  ;;  %317 = vmatpush.bf16.msra.mxu3 %v1805_v24  ;;  %v1797_v30 = vor.u32 %v2282_v27, %v1794_v28  ;;  %v1792_v33 = vld [vmem:[#allocation2 + $0xe0] sm:$0xf]  ;;  %v2283_v34 = vld [vmem:[#allocation2 + $0xe4] sm:$0xf0]  ;;  %v2261_v36 = vld [vmem:[#allocation2 + $0x34] sm:$0xf0] }
  0x14   :  { %304 = vmatpush.bf16.msra.mxu2 %v1801_v29  ;;  %v1793_v37 = vor.u32 %v2283_v34, %v1792_v33  ;;  %v2280_v38 = vld [vmem:[#allocation2 + $0xd4] sm:$0xf]  ;;  %v1786_v39 = vld [vmem:[#allocation2 + $0xd8] sm:$0xf0]  ;;  %v1784_v43 = vld [vmem:[#allocation2 + $0xd0] sm:$0xf]  ;;  %v1705_v45 = vor.u32 %v2261_v36, %v1704_v32 }
  0x15   :  { %v2260_v40 = vld [vmem:[#allocation2 + $0x34] sm:$0xf]  ;;  %v1706_v41 = vld [vmem:[#allocation2 + $0x38] sm:$0xf0]  ;;  %v1789_v42 = vor.u32 %v2280_v38, %v1786_v39  ;;  %v2281_v44 = vld [vmem:[#allocation2 + $0xd4] sm:$0xf0] }
  0x16   :  { %171 = vmatpush.bf16.msra.mxu0 %v1721_v17  ;;  %v1696_v46 = vld [vmem:[#allocation2 + $0x20] sm:$0xf]  ;;  %v2259_v47 = vld [vmem:[#allocation2 + $0x24] sm:$0xf0]  ;;  %v1709_v48 = vor.u32 %v2260_v40, %v1706_v41  ;;  %v2258_v49 = vld [vmem:[#allocation2 + $0x24] sm:$0xf]  ;;  %v1785_v50 = vor.u32 %v2281_v44, %v1784_v43 }
  0x17   :  { %184 = vmatpush.bf16.msra.mxu1 %v1725_v21  ;;  %318 = vmatpush.bf16.msra.mxu3 %v1797_v30  ;;  %v2278_v51 = vld [vmem:[#allocation2 + $0xc4] sm:$0xf]  ;;  %v1778_v52 = vld [vmem:[#allocation2 + $0xc8] sm:$0xf0]  ;;  %v1776_v54 = vld [vmem:[#allocation2 + $0xc0] sm:$0xf]  ;;  %v1697_v60 = vor.u32 %v2259_v47, %v1696_v46 }
  0x18   :  { %305 = vmatpush.bf16.msra.mxu2 %v1793_v37  ;;  %v1698_v53 = vld [vmem:[#allocation2 + $0x28] sm:$0xf0]  ;;  %v2279_v55 = vld [vmem:[#allocation2 + $0xc4] sm:$0xf0]  ;;  %v1688_v56 = vld [vmem:[#allocation2 + $0x10] sm:$0xf]  ;;  %v1781_v58 = vor.u32 %v2278_v51, %v1778_v52 }
  0x19   :  { %v2257_v57 = vld [vmem:[#allocation2 + $0x14] sm:$0xf0]  ;;  %v2276_v59 = vld [vmem:[#allocation2 + $0xb4] sm:$0xf]  ;;  %v1770_v61 = vld [vmem:[#allocation2 + $0xb8] sm:$0xf0]  ;;  %v1701_v0 = vor.u32 %v2258_v49, %v1698_v53  ;;  %v1777_v3 = vor.u32 %v2279_v55, %v1776_v54 }
  0x1a   :  { %172 = vmatpush.bf16.msra.mxu0 %v1713_v31  ;;  %v2525_v62 = vld [vmem:[%s2679_s0] sm:$0x3]  ;;  %v2530_v63 = vld [vmem:[%s2679_s0 + $0x2] sm:$0x3]  ;;  %v2256_v1 = vld [vmem:[#allocation2 + $0x14] sm:$0xf]  ;;  %v1773_v6 = vor.u32 %v2276_v59, %v1770_v61  ;;  %v1689_v7 = vor.u32 %v2257_v57, %v1688_v56 }
  0x1b   :  { %185 = vmatpush.bf16.msra.mxu1 %v1717_v35  ;;  %319 = vmatpush.bf16.msra.mxu3 %v1789_v42  ;;  %v1690_v2 = vld [vmem:[#allocation2 + $0x18] sm:$0xf0]  ;;  %83 = vst [vmem:[#allocation1] ss:$4 sm:$0xff] %v2525_v62  ;;  %v1768_v4 = vld [vmem:[#allocation2 + $0xb0] sm:$0xf] }
  0x1c   :  { %306 = vmatpush.bf16.msra.mxu2 %v1785_v50  ;;  %86 = vst [vmem:[#allocation1 + $0x1] ss:$4 sm:$0xff] %v2530_v63  ;;  %v2277_v5 = vld [vmem:[#allocation2 + $0xb4] sm:$0xf0]  ;;  %v1680_v8 = vld [vmem:[#allocation2] sm:$0xf]  ;;  %v1693_v11 = vor.u32 %v2256_v1, %v1690_v2 }
  0x1d   :  { %v2274_v9 = vld [vmem:[#allocation2 + $0xa4] sm:$0xf]  ;;  %v1762_v10 = vld [vmem:[#allocation2 + $0xa8] sm:$0xf0]  ;;  %v2255_v12 = vld [vmem:[#allocation2 + $0x4] sm:$0xf0]  ;;  %v1769_v15 = vor.u32 %v2277_v5, %v1768_v4 }
  0x1e   :  { %173 = vmatpush.bf16.msra.mxu0 %v1705_v45  ;;  %v2254_v13 = vld [vmem:[#allocation2 + $0x4] sm:$0xf]  ;;  %v1682_v14 = vld [vmem:[#allocation2 + $0x8] sm:$0xf0]  ;;  %v1864_v16 = vld [vmem:[#allocation2 + $0x170] sm:$0xf]  ;;  %v1765_v20 = vor.u32 %v2274_v9, %v1762_v10  ;;  %v1681_v23 = vor.u32 %v2255_v12, %v1680_v8 }
  0x1f   :  { %186 = vmatpush.bf16.msra.mxu1 %v1709_v48  ;;  %320 = vmatpush.bf16.msra.mxu3 %v1781_v58  ;;  %v2301_v17 = vld [vmem:[#allocation2 + $0x174] sm:$0xf0]  ;;  %v2300_v18 = vld [vmem:[#allocation2 + $0x174] sm:$0xf]  ;;  %v1866_v19 = vld [vmem:[#allocation2 + $0x178] sm:$0xf0]  ;;  %v1685_v27 = vor.u32 %v2254_v13, %v1682_v14 }
  0x20   :  { %307 = vmatpush.bf16.msra.mxu2 %v1777_v3  ;;  %v1760_v21 = vld [vmem:[#allocation2 + $0xa0] sm:$0xf]  ;;  %v2275_v22 = vld [vmem:[#allocation2 + $0xa4] sm:$0xf0]  ;;  %v2272_v25 = vld [vmem:[#allocation2 + $0x94] sm:$0xf]  ;;  %v1865_v28 = vor.u32 %v2301_v17, %v1864_v16  ;;  %v1869_v31 = vor.u32 %v2300_v18, %v1866_v19 }
  0x21   :  { %v1856_v24 = vld [vmem:[#allocation2 + $0x160] sm:$0xf]  ;;  %v1754_v26 = vld [vmem:[#allocation2 + $0x98] sm:$0xf0]  ;;  %v2299_v29 = vld [vmem:[#allocation2 + $0x164] sm:$0xf0]  ;;  %v1761_v34 = vor.u32 %v2275_v22, %v1760_v21 }
  0x22   :  { %174 = vmatpush.bf16.msra.mxu0 %v1697_v60  ;;  %v2298_v32 = vld [vmem:[#allocation2 + $0x164] sm:$0xf]  ;;  %v1858_v33 = vld [vmem:[#allocation2 + $0x168] sm:$0xf0]  ;;  %v1757_v35 = vor.u32 %v2272_v25, %v1754_v26  ;;  %v1752_v36 = vld [vmem:[#allocation2 + $0x90] sm:$0xf]  ;;  %v1857_v40 = vor.u32 %v2299_v29, %v1856_v24 }
  0x23   :  { %187 = vmatpush.bf16.msra.mxu1 %v1701_v0  ;;  %321 = vmatpush.bf16.msra.mxu3 %v1773_v6  ;;  %v87_v30 = vld.sshfl [vmem:[#allocation1] sm:$0xff pattern:$0x73625140]  ;;  %v2270_v38 = vld [vmem:[#allocation2 + $0x84] sm:$0xf]  ;;  %v1861_v41 = vor.u32 %v2298_v32, %v1858_v33  ;;  %vm198_vm0 = vcmask 1043456  }
  0x24   :  { %308 = vmatpush.bf16.msra.mxu2 %v1769_v15  ;;  %219 = vst [vmem:[#allocation1] ss:$4 sm:$0xff] %v2525_v62  ;;  %v2273_v37 = vld [vmem:[#allocation2 + $0x94] sm:$0xf0]  ;;  %v1746_v39 = vld [vmem:[#allocation2 + $0x88] sm:$0xf0] }
  0x25   :  { %221 = vst [vmem:[#allocation1 + $0x1] ss:$4 sm:$0xff] %v2530_v63  ;;  %v1848_v42 = vld [vmem:[#allocation2 + $0x150] sm:$0xf]  ;;  %v2297_v43 = vld [vmem:[#allocation2 + $0x154] sm:$0xf0]  ;;  %v1753_v45 = vor.u32 %v2273_v37, %v1752_v36  ;;  %v1749_v47 = vor.u32 %v2270_v38, %v1746_v39 }
  0x26   :  { %175 = vmatpush.bf16.msra.mxu0 %v1689_v7  ;;  %v2296_v44 = vld [vmem:[#allocation2 + $0x154] sm:$0xf]  ;;  %v1850_v46 = vld [vmem:[#allocation2 + $0x158] sm:$0xf0]  ;;  %v1744_v48 = vld [vmem:[#allocation2 + $0x80] sm:$0xf]  ;;  %v1849_v50 = vor.u32 %v2297_v43, %v1848_v42 }
  0x27   :  { %188 = vmatpush.bf16.msra.mxu1 %v1693_v11  ;;  %322 = vmatpush.bf16.msra.mxu3 %v1765_v20  ;;  %v2271_v49 = vld [vmem:[#allocation2 + $0x84] sm:$0xf0]  ;;  %v1840_v51 = vld [vmem:[#allocation2 + $0x140] sm:$0xf]  ;;  %v1853_v52 = vor.u32 %v2296_v44, %v1850_v46  ;;  %v2294_v56 = vld [vmem:[#allocation2 + $0x144] sm:$0xf] }
  0x28   :  { %309 = vmatpush.bf16.msra.mxu2 %v1761_v34  ;;  %v2295_v53 = vld [vmem:[#allocation2 + $0x144] sm:$0xf0]  ;;  %v1745_v54 = vor.u32 %v2271_v49, %v1744_v48  ;;  %v1842_v57 = vld [vmem:[#allocation2 + $0x148] sm:$0xf0]  ;;  %v1832_v60 = vld [vmem:[#allocation2 + $0x130] sm:$0xf] }
  0x29   :  { %v1841_v58 = vor.u32 %v2295_v53, %v1840_v51  ;;  %v1845_v59 = vor.u32 %v2294_v56, %v1842_v57  ;;  %v2293_v61 = vld [vmem:[#allocation2 + $0x134] sm:$0xf0]  ;;  %v2292_v0 = vld [vmem:[#allocation2 + $0x134] sm:$0xf]  ;;  %v1834_v1 = vld [vmem:[#allocation2 + $0x138] sm:$0xf0] }
  0x2a   :  { %176 = vmatpush.bf16.msra.mxu0 %v1681_v23  ;;  %v1833_v2 = vor.u32 %v2293_v61, %v1832_v60  ;;  %v1837_v3 = vor.u32 %v2292_v0, %v1834_v1  ;;  %v1824_v4 = vld [vmem:[#allocation2 + $0x120] sm:$0xf]  ;;  %v2291_v5 = vld [vmem:[#allocation2 + $0x124] sm:$0xf0]  ;;  %v1826_v6 = vld [vmem:[#allocation2 + $0x128] sm:$0xf0] }
  0x2b   :  { %189 = vmatpush.bf16.msra.mxu1 %v1685_v27  ;;  %323 = vmatpush.bf16.msra.mxu3 %v1757_v35  ;;  %v1816_v8 = vld [vmem:[#allocation2 + $0x110] sm:$0xf]  ;;  %v2289_v9 = vld [vmem:[#allocation2 + $0x114] sm:$0xf0]  ;;  %v2288_v10 = vld [vmem:[#allocation2 + $0x114] sm:$0xf] }
  0x2c   :  { %310 = vmatpush.bf16.msra.mxu2 %v1753_v45  ;;  %v222_v55 = vld.sshfl [vmem:[#allocation1] sm:$0xff pattern:$0x73625140]  ;;  %v1817_v12 = vor.u32 %v2289_v9, %v1816_v8  ;;  %v1808_v14 = vld [vmem:[#allocation2 + $0x100] sm:$0xf]  ;;  %vm487_vm1 = vcmask 1040384  }
  0x2d   :  { %177 = vmatmul.bf16.vlgmr.msra.gmra.mxu0 %v87_v30  ;;  %355 = vst [vmem:[#allocation1] ss:$4 sm:$0xff] %v2525_v62  ;;  %v2290_v62 = vld [vmem:[#allocation2 + $0x124] sm:$0xf]  ;;  %v1818_v11 = vld [vmem:[#allocation2 + $0x118] sm:$0xf0] }
  0x2e   :  { %440 = vmatpush.bf16.msrb.mxu0 %v1865_v28  ;;  %190 = vmatmul.bf16.vlgmr.msra.gmra.mxu1 %v87_v30  ;;  %357 = vst [vmem:[#allocation1 + $0x1] ss:$4 sm:$0xff] %v2530_v63  ;;  %v1825_v63 = vor.u32 %v2291_v5, %v1824_v4  ;;  %v1829_v7 = vor.u32 %v2290_v62, %v1826_v6  ;;  %v2287_v15 = vld [vmem:[#allocation2 + $0x104] sm:$0xf0]  ;;  %v2286_v16 = vld [vmem:[#allocation2 + $0x104] sm:$0xf] }
  0x2f   :  { %453 = vmatpush.bf16.msrb.mxu1 %v1869_v31  ;;  %324 = vmatpush.bf16.msra.mxu3 %v1749_v47  ;;  %v1821_v13 = vor.u32 %v2288_v10, %v1818_v11  ;;  %v1810_v17 = vld [vmem:[#allocation2 + $0x108] sm:$0xf0]  ;;  %v1809_v18 = vor.u32 %v2287_v15, %v1808_v14  ;;  %v536_v45 = vld [vmem:[%s2681_s2] sm:$0x3]  ;;  %vm519_vm2 = vcmask 1042432   ;;  %vm677_vm9 = vcmask 1041408  }
  0x30   :  { %311 = vmatpush.bf16.msra.mxu2 %v1745_v54  ;;  %v1813_v19 = vor.u32 %v2286_v16, %v1810_v17  ;;  %v538_v57 = vperm.slane %v536_v45, 0 }
  0x32   :  { %441 = vmatpush.bf16.msrb.mxu0 %v1857_v40  ;;  %325 = vmatmul.bf16.vlgmr.msra.gmra.mxu3 %v222_v55 }
  0x33   :  { %454 = vmatpush.bf16.msrb.mxu1 %v1861_v41  ;;  %312 = vmatmul.bf16.vlgmr.msra.gmra.mxu2 %v222_v55 }
  0x35   :  { %v358_v20 = vld.sshfl [vmem:[#allocation1] sm:$0xff pattern:$0x73625140] }
  0x36   :  { %442 = vmatpush.bf16.msrb.mxu0 %v1849_v50 }
  0x37   :  { %455 = vmatpush.bf16.msrb.mxu1 %v1853_v52  ;;  %v539_v52 = vperm.slane %v536_v45, 1  ;;  %v1994_v45 = vld [vmem:[#allocation4 + $0xf8] sm:$0xf0] }
  0x3a   :  { %443 = vmatpush.bf16.msrb.mxu0 %v1841_v58 }
  0x3b   :  { %456 = vmatpush.bf16.msrb.mxu1 %v1845_v59 }
  0x3e   :  { %444 = vmatpush.bf16.msrb.mxu0 %v1833_v2  ;;  %v540_v2 = vrot.slane %v539_v52, 4  ;;  %v1984_v52 = vld [vmem:[#allocation4 + $0xe0] sm:$0xf] }
  0x3f   :  { %457 = vmatpush.bf16.msrb.mxu1 %v1837_v3 }
  0x40   :  { %v541_v16 = vsel %vm198_vm0, %v538_v57, %v540_v2 }
  0x42   :  { %445 = vmatpush.bf16.msrb.mxu0 %v1825_v63 }
  0x43   :  { %458 = vmatpush.bf16.msrb.mxu1 %v1829_v7 }
  0x46   :  { %446 = vmatpush.bf16.msrb.mxu0 %v1817_v12 }
  0x47   :  { %459 = vmatpush.bf16.msrb.mxu1 %v1821_v13 }
  0x4a   :  { %447 = vmatpush.bf16.msrb.mxu0 %v1809_v18 }
  0x4b   :  { %460 = vmatpush.bf16.msrb.mxu1 %v1813_v19 }
  0x4d   :  { %448 = vmatmul.bf16.vlgmr.msrb.gmra.mxu0 %v358_v20 }
  0x4e   :  { %461 = vmatmul.bf16.vlgmr.msrb.gmra.mxu1 %v358_v20 }
  0xaa   :  { %v178_v21 = vpop.f32.mrf.mxu0 }
  0xab   :  { %v191_v22 = vpop.f32.mrf.mxu1 }
  0xac   :  { %v197_v23 = vrot.slane %v191_v22, 4 }
  0xae   :  { %v199_v24 = vsel %vm198_vm0, %v178_v21, %v197_v23  ;;  %v200_v25 = vsel %vm198_vm0, %v197_v23, %v178_v21 }
  0xaf   :  { %v201_v26 = vrot.slane %v200_v25, 4  ;;  %472 = vst [vmem:[#allocation1] ss:$2 sm:$0xff] %v199_v24 }
  0xb1   :  { %476 = vst [vmem:[#allocation1 + $0x10] ss:$2 sm:$0xff] %v201_v26 }
  0xb2   :  { %v180_v27 = vpop.f32.mrf.mxu0 }
  0xb3   :  { %v193_v28 = vpop.f32.mrf.mxu1 }
  0xb5   :  { %v326_v29 = vpop.f32.mrf.mxu3 }
  0xb6   :  { %v313_v30 = vpop.f32.mrf.mxu2  ;;  %v474_v33 = vld.sshfl [vmem:[#allocation1 + $0x8] sm:$0xff pattern:$0x75316420]  ;;  %v473_v39 = vld.sshfl [vmem:[#allocation1] sm:$0xff pattern:$0x75316420] }
  0xb7   :  { %v480_v38 = vrot.slane %v474_v33, 7  ;;  %v479_v46 = vrot.slane %v473_v39, 7  ;;  %v332_v48 = vrot.slane %v326_v29, 4 }
  0xb8   :  { %v478_v35 = vld.sshfl [vmem:[#allocation1 + $0x18] sm:$0xff pattern:$0x75316420]  ;;  %v477_v44 = vld.sshfl [vmem:[#allocation1 + $0x10] sm:$0xff pattern:$0x75316420] }
  0xb9   :  { %v482_v40 = vrot.slane %v478_v35, 7  ;;  %v489_v47 = vsel %vm487_vm1, 0.0, %v480_v38  ;;  %v481_v51 = vrot.slane %v477_v44, 7  ;;  %v488_v55 = vsel %vm487_vm1, 0.0, %v479_v46  ;;  %v2317_v35 = vld [vmem:[#allocation4 + $0x74] sm:$0xf0] }
  0xba   :  { %v496_v54 = vrot.slane %v489_v47, 4  ;;  %v334_v58 = vsel %vm198_vm0, %v332_v48, %v313_v30  ;;  %v333_v3 = vsel %vm198_vm0, %v313_v30, %v332_v48  ;;  %v2332_v44 = vld [vmem:[#allocation4 + $0xf4] sm:$0xf] }
  0xbb   :  { %v491_v49 = vsel %vm487_vm1, 0.0, %v482_v40  ;;  %v490_v61 = vsel %vm487_vm1, 0.0, %v481_v51  ;;  %v335_v6 = vrot.slane %v334_v58, 4  ;;  %v2333_v40 = vld [vmem:[#allocation4 + $0xf4] sm:$0xf0] }
  0xbc   :  { %v497_v56 = vrot.slane %v491_v49, 4  ;;  %v498_v4 = vsel %vm198_vm0, %v488_v55, %v496_v54  ;;  %v1997_v49 = vor.u32 %v2332_v44, %v1994_v45  ;;  %v2315_v51 = vld [vmem:[#allocation4 + $0x64] sm:$0xf0]  ;;  %v1922_v58 = vld [vmem:[#allocation4 + $0x68] sm:$0xf0] }
  0xbd   :  { %v328_v31 = vpop.f32.mrf.mxu3  ;;  %v502_v11 = vadd.f32 %v498_v4, %v333_v3  ;;  %v2331_v55 = vld [vmem:[#allocation4 + $0xe4] sm:$0xf0]  ;;  %v1912_v3 = vld [vmem:[#allocation4 + $0x50] sm:$0xf]  ;;  %v2313_v4 = vld [vmem:[#allocation4 + $0x54] sm:$0xf0] }
  0xbe   :  { %v315_v32 = vpop.f32.mrf.mxu2  ;;  %v499_v9 = vsel %vm198_vm0, %v490_v61, %v497_v56  ;;  %922 = vmatpush.bf16.msra.mxu1 %v1997_v49  ;;  %v2314_v56 = vld [vmem:[#allocation4 + $0x64] sm:$0xf]  ;;  %v1985_v57 = vor.u32 %v2331_v55, %v1984_v52  ;;  %v1888_v44 = vld [vmem:[#allocation4 + $0x20] sm:$0xf]  ;;  %v2307_v45 = vld [vmem:[#allocation4 + $0x24] sm:$0xf0] }
  0xbf   :  { %v503_v17 = vadd.f32 %v499_v9, %v335_v6  ;;  %v1914_v9 = vld [vmem:[#allocation4 + $0x58] sm:$0xf0]  ;;  %v2306_v49 = vld [vmem:[#allocation4 + $0x24] sm:$0xf] }
  0xca   :  { %v449_v34 = vpop.f32.mrf.mxu0 }
  0xcb   :  { %v462_v36 = vpop.f32.mrf.mxu1 }
  0xcc   :  { %v468_v37 = vrot.slane %v462_v36, 4  ;;  %v1992_v36 = vld [vmem:[#allocation4 + $0xf0] sm:$0xf] }
  0xce   :  { %v469_v41 = vsel %vm198_vm0, %v449_v34, %v468_v37  ;;  %v470_v42 = vsel %vm198_vm0, %v468_v37, %v449_v34  ;;  %v1928_v34 = vld [vmem:[#allocation4 + $0x70] sm:$0xf] }
  0xcf   :  { %v471_v43 = vrot.slane %v470_v42, 4  ;;  %504 = vst [vmem:[#allocation1] ss:$2 sm:$0xff] %v469_v41  ;;  %v1929_v39 = vor.u32 %v2317_v35, %v1928_v34  ;;  %v2316_v41 = vld [vmem:[#allocation4 + $0x74] sm:$0xf]  ;;  %v1993_v42 = vor.u32 %v2333_v40, %v1992_v36 }
  0xd0   :  { %v1960_v35 = vld [vmem:[#allocation4 + $0xb0] sm:$0xf]  ;;  %v2325_v36 = vld [vmem:[#allocation4 + $0xb4] sm:$0xf0]  ;;  %v2324_v40 = vld [vmem:[#allocation4 + $0xb4] sm:$0xf] }
  0xd1   :  { %508 = vst [vmem:[#allocation1 + $0x10] ss:$2 sm:$0xff] %v471_v43  ;;  %v1930_v43 = vld [vmem:[#allocation4 + $0x78] sm:$0xf0]  ;;  %883 = vmatpush.bf16.msrb.mxu2 %v1929_v39  ;;  %896 = vmatpush.bf16.msrb.mxu3 %v1993_v42 }
  0xd2   :  { %v451_v50 = vpop.f32.mrf.mxu0  ;;  %v1933_v48 = vor.u32 %v2316_v41, %v1930_v43  ;;  %v1898_v39 = vld [vmem:[#allocation4 + $0x38] sm:$0xf0] }
  0xd3   :  { %v464_v53 = vpop.f32.mrf.mxu1  ;;  %v1920_v50 = vld [vmem:[#allocation4 + $0x60] sm:$0xf]  ;;  %v1962_v41 = vld [vmem:[#allocation4 + $0xb8] sm:$0xf0] }
  0xd4   :  { %909 = vmatpush.bf16.msra.mxu0 %v1933_v48  ;;  %v1921_v54 = vor.u32 %v2315_v51, %v1920_v50  ;;  %v1965_v43 = vor.u32 %v2324_v40, %v1962_v41  ;;  %v2323_v48 = vld [vmem:[#allocation4 + $0xa4] sm:$0xf0]  ;;  %v1890_v50 = vld [vmem:[#allocation4 + $0x28] sm:$0xf0]  ;;  %v2122_v40 = vld [vmem:[#allocation4 + $0x1f8] sm:$0xf0] }
  0xd5   :  { %897 = vmatpush.bf16.msrb.mxu3 %v1985_v57  ;;  %v1893_v52 = vor.u32 %v2306_v49, %v1890_v50  ;;  %v2048_v41 = vld [vmem:[#allocation4 + $0x160] sm:$0xf]  ;;  %v2346_v49 = vld [vmem:[#allocation4 + $0x164] sm:$0xf]  ;;  %v2050_v50 = vld [vmem:[#allocation4 + $0x168] sm:$0xf0] }
  0xd6   :  { %v505_v59 = vld.sshfl [vmem:[#allocation1] sm:$0xff pattern:$0x75316420]  ;;  %v506_v60 = vld.sshfl [vmem:[#allocation1 + $0x8] sm:$0xff pattern:$0x75316420]  ;;  %884 = vmatpush.bf16.msrb.mxu2 %v1921_v54 }
  0xd7   :  { %v511_v0 = vrot.slane %v505_v59, 1  ;;  %v512_v1 = vrot.slane %v506_v60, 1  ;;  %v2330_v59 = vld [vmem:[#allocation4 + $0xe4] sm:$0xf]  ;;  %v1986_v60 = vld [vmem:[#allocation4 + $0xe8] sm:$0xf0] }
  0xd8   :  { %v509_v5 = vld.sshfl [vmem:[#allocation1 + $0x10] sm:$0xff pattern:$0x75316420]  ;;  %v510_v62 = vld.sshfl [vmem:[#allocation1 + $0x18] sm:$0xff pattern:$0x75316420]  ;;  %v1989_v2 = vor.u32 %v2330_v59, %v1986_v60 }
  0xd9   :  { %v513_v63 = vrot.slane %v509_v5, 1  ;;  %v514_v7 = vrot.slane %v510_v62, 1  ;;  %v521_v8 = vsel %vm519_vm2, %v512_v1, 0.0  ;;  %v520_v12 = vsel %vm519_vm2, %v511_v0, 0.0  ;;  %v1976_v5 = vld [vmem:[#allocation4 + $0xd0] sm:$0xf] }
  0xda   :  { %v528_v10 = vrot.slane %v521_v8, 4  ;;  %v1925_v1 = vor.u32 %v2314_v56, %v1922_v58  ;;  %923 = vmatpush.bf16.msra.mxu1 %v1989_v2  ;;  %v2312_v8 = vld [vmem:[#allocation4 + $0x54] sm:$0xf]  ;;  %v1954_v54 = vld [vmem:[#allocation4 + $0xa8] sm:$0xf0] }
  0xdb   :  { %v523_v13 = vsel %vm519_vm2, %v514_v7, 0.0  ;;  %v522_v18 = vsel %vm519_vm2, %v513_v63, 0.0  ;;  %v1913_v63 = vor.u32 %v2313_v4, %v1912_v3  ;;  %v2329_v7 = vld [vmem:[#allocation4 + $0xd4] sm:$0xf0]  ;;  %v1880_v60 = vld [vmem:[#allocation4 + $0x10] sm:$0xf] }
  0xdc   :  { %v529_v14 = vrot.slane %v523_v13, 4  ;;  %v530_v15 = vsel %vm198_vm0, %v520_v12, %v528_v10  ;;  %910 = vmatpush.bf16.msra.mxu0 %v1925_v1  ;;  %v1977_v12 = vor.u32 %v2329_v7, %v1976_v5  ;;  %v1917_v13 = vor.u32 %v2312_v8, %v1914_v9  ;;  %v2321_v4 = vld [vmem:[#allocation4 + $0x94] sm:$0xf0]  ;;  %v2304_v5 = vld [vmem:[#allocation4 + $0x14] sm:$0xf] }
  0xdd   :  { %v534_v19 = vadd.f32 %v530_v15, %v502_v11  ;;  %v1978_v15 = vld [vmem:[#allocation4 + $0xd8] sm:$0xf0]  ;;  %885 = vmatpush.bf16.msrb.mxu2 %v1913_v63  ;;  %v2320_v7 = vld [vmem:[#allocation4 + $0x94] sm:$0xf] }
  0xde   :  { %v531_v20 = vsel %vm198_vm0, %v522_v18, %v529_v14  ;;  %v2328_v14 = vld [vmem:[#allocation4 + $0xd4] sm:$0xf]  ;;  %898 = vmatpush.bf16.msrb.mxu3 %v1977_v12  ;;  %v1946_v8 = vld [vmem:[#allocation4 + $0x98] sm:$0xf0] }
  0xdf   :  { %v535_v21 = vadd.f32 %v531_v20, %v503_v17  ;;  %v2560_v22 = vadd.f32 %v541_v16, %v534_v19  ;;  %v1904_v19 = vld [vmem:[#allocation4 + $0x40] sm:$0xf]  ;;  %v2311_v20 = vld [vmem:[#allocation4 + $0x44] sm:$0xf0]  ;;  %v1949_v12 = vor.u32 %v2320_v7, %v1946_v8 }
  0xe0   :  { %911 = vmatpush.bf16.msra.mxu0 %v1917_v13  ;;  %v2303_v13 = vld [vmem:[#allocation4 + $0x4] sm:$0xf0]  ;;  %v2096_v8 = vld [vmem:[#allocation4 + $0x1c0] sm:$0xf] }
  0xe1   :  { %v2562_v23 = vadd.f32 %v541_v16, %v535_v21  ;;  %547 = vst [vmem:[#allocation1] ss:$2 sm:$0xff] %v2560_v22  ;;  %v1981_v16 = vor.u32 %v2328_v14, %v1978_v15  ;;  %v1968_v21 = vld [vmem:[#allocation4 + $0xc0] sm:$0xf]  ;;  %v2319_v15 = vld [vmem:[#allocation4 + $0x84] sm:$0xf0] }
  0xe2   :  { %v1936_v14 = vld [vmem:[#allocation4 + $0x80] sm:$0xf]  ;;  %v2343_v7 = vld [vmem:[#allocation4 + $0x144] sm:$0xf0] }
  0xe3   :  { %549 = vst [vmem:[#allocation1 + $0x1] ss:$2 sm:$0xff] %v2562_v23  ;;  %924 = vmatpush.bf16.msra.mxu1 %v1981_v16 }
  0xea   :  { %v550_v24 = vld.sshfl [vmem:[#allocation1] sm:$0xff pattern:$0x75316420]  ;;  %v551_v25 = vld.sshfl [vmem:[#allocation1 + $0x8] sm:$0xff pattern:$0x75316420] }
  0xeb   :  { %v554_v26 = vrot.slane %v550_v24, 4  ;;  %v560_v27 = vrot.slane %v551_v25, 4 }
  0xed   :  { %v555_v28 = vadd.f32 %v554_v26, %v550_v24  ;;  %v561_v29 = vadd.f32 %v560_v27, %v551_v25  ;;  %v1905_v24 = vor.u32 %v2311_v20, %v1904_v19  ;;  %v2310_v25 = vld [vmem:[#allocation4 + $0x44] sm:$0xf]  ;;  %v1906_v26 = vld [vmem:[#allocation4 + $0x48] sm:$0xf0]  ;;  %v1937_v19 = vor.u32 %v2319_v15, %v1936_v14 }
  0xee   :  { %v2302_v20 = vld [vmem:[#allocation4 + $0x4] sm:$0xf]  ;;  %v2098_v14 = vld [vmem:[#allocation4 + $0x1c8] sm:$0xf0] }
  0xef   :  { %v556_v30 = vrot.slane %v555_v28, 2  ;;  %v562_v31 = vrot.slane %v561_v29, 2  ;;  %886 = vmatpush.bf16.msrb.mxu2 %v1905_v24  ;;  %v2318_v24 = vld [vmem:[#allocation4 + $0x84] sm:$0xf] }
  0xf1   :  { %v557_v32 = vadd.f32 %v556_v30, %v555_v28  ;;  %v563_v33 = vadd.f32 %v562_v31, %v561_v29  ;;  %v1909_v29 = vor.u32 %v2310_v25, %v1906_v26  ;;  %v2326_v30 = vld [vmem:[#allocation4 + $0xc4] sm:$0xf]  ;;  %v1970_v31 = vld [vmem:[#allocation4 + $0xc8] sm:$0xf0]  ;;  %v2056_v26 = vld [vmem:[#allocation4 + $0x170] sm:$0xf] }
  0xf2   :  { %v1938_v25 = vld [vmem:[#allocation4 + $0x88] sm:$0xf0] }
  0xf3   :  { %v558_v37 = vrot.slane %v557_v32, 1  ;;  %v564_v38 = vrot.slane %v563_v33, 1  ;;  %912 = vmatpush.bf16.msra.mxu0 %v1909_v29 }
  0xf5   :  { %v559_v46 = vadd.f32 %v558_v37, %v557_v32  ;;  %v565_v47 = vadd.f32 %v564_v38, %v563_v33  ;;  %v1896_v32 = vld [vmem:[#allocation4 + $0x30] sm:$0xf]  ;;  %v2309_v33 = vld [vmem:[#allocation4 + $0x34] sm:$0xf0]  ;;  %v2308_v37 = vld [vmem:[#allocation4 + $0x34] sm:$0xf]  ;;  %v1961_v38 = vor.u32 %v2325_v36, %v1960_v35 }
  0xf6   :  { %v1897_v34 = vor.u32 %v2309_v33, %v1896_v32  ;;  %v1901_v42 = vor.u32 %v2308_v37, %v1898_v39  ;;  %v2348_v35 = vld [vmem:[#allocation4 + $0x174] sm:$0xf]  ;;  %v2058_v36 = vld [vmem:[#allocation4 + $0x178] sm:$0xf0] }
  0xf7   :  { %v567_v53 = vmul.f32 0.125, %v565_v47  ;;  %v566_v61 = vmul.f32 0.125, %v559_v46  ;;  %v1952_v46 = vld [vmem:[#allocation4 + $0xa0] sm:$0xf]  ;;  %v1889_v47 = vor.u32 %v2307_v45, %v1888_v44  ;;  %v2364_v39 = vld [vmem:[#allocation4 + $0x1f4] sm:$0xf] }
  0xf8   :  { %887 = vmatpush.bf16.msrb.mxu2 %v1897_v34  ;;  %913 = vmatpush.bf16.msra.mxu0 %v1901_v42  ;;  %v1953_v51 = vor.u32 %v2323_v48, %v1952_v46  ;;  %v2365_v34 = vld [vmem:[#allocation4 + $0x1f4] sm:$0xf0]  ;;  %v2125_v44 = vor.u32 %v2364_v39, %v2122_v40  ;;  %v2347_v45 = vld [vmem:[#allocation4 + $0x164] sm:$0xf0]  ;;  %v2112_v46 = vld [vmem:[#allocation4 + $0x1e0] sm:$0xf] }
  0xf9   :  { %v570_v0 = vrot.slane %v567_v53, 4  ;;  %v2322_v53 = vld [vmem:[#allocation4 + $0xa4] sm:$0xf]  ;;  %v2363_v48 = vld [vmem:[#allocation4 + $0x1e4] sm:$0xf0] }
  0xfa   :  { %v1957_v57 = vor.u32 %v2322_v53, %v1954_v54  ;;  %v2113_v53 = vor.u32 %v2363_v48, %v2112_v46  ;;  %v2053_v54 = vor.u32 %v2346_v49, %v2050_v50  ;;  %v2080_v40 = vld [vmem:[#allocation4 + $0x1a0] sm:$0xf]  ;;  %v2018_v48 = vld [vmem:[#allocation4 + $0x128] sm:$0xf0]  ;;  %v2354_v49 = vld [vmem:[#allocation4 + $0x1a4] sm:$0xf] }
  0xfb   :  { %v571_v62 = vsel %vm198_vm0, %v566_v61, %v570_v0  ;;  %v572_v6 = vsel %vm198_vm0, %v570_v0, %v566_v61  ;;  %v2305_v61 = vld [vmem:[#allocation4 + $0x14] sm:$0xf0]  ;;  %v1944_v0 = vld [vmem:[#allocation4 + $0x90] sm:$0xf] }
  0xfc   :  { %v573_v10 = vrot.slane %v572_v6, 4  ;;  %v2569_v11 = vsub.f32 %v2560_v22, %v571_v62  ;;  %v2327_v22 = vld [vmem:[#allocation4 + $0xc4] sm:$0xf0]  ;;  %888 = vmatpush.bf16.msrb.mxu2 %v1889_v47  ;;  %914 = vmatpush.bf16.msra.mxu0 %v1893_v52  ;;  %v1881_v3 = vor.u32 %v2305_v61, %v1880_v60  ;;  %v1882_v62 = vld [vmem:[#allocation4 + $0x18] sm:$0xf0]  ;;  %v1945_v6 = vor.u32 %v2321_v4, %v1944_v0 }
  0xfd   :  { %v1969_v28 = vor.u32 %v2327_v22, %v1968_v21  ;;  %v1885_v63 = vor.u32 %v2304_v5, %v1882_v62  ;;  %v1874_v21 = vld [vmem:[#allocation4 + $0x8] sm:$0xf0]  ;;  %v2049_v47 = vor.u32 %v2347_v45, %v2048_v41  ;;  %v2104_v60 = vld [vmem:[#allocation4 + $0x1d0] sm:$0xf]  ;;  %v2361_v61 = vld [vmem:[#allocation4 + $0x1d4] sm:$0xf0] }
  0xfe   :  { %v577_v17 = vsub.f32 %v2562_v23, %v573_v10  ;;  %v578_v18 = vmul.f32 %v2569_v11, %v2569_v11  ;;  %v1973_v23 = vor.u32 %v2326_v30, %v1970_v31  ;;  %v1877_v22 = vor.u32 %v2302_v20, %v1874_v21  ;;  %v2344_v0 = vld [vmem:[#allocation4 + $0x154] sm:$0xf]  ;;  %v2106_v5 = vld [vmem:[#allocation4 + $0x1d8] sm:$0xf0]  ;;  %v2355_v41 = vld [vmem:[#allocation4 + $0x1a4] sm:$0xf0] }
  0xff   :  { %899 = vmatpush.bf16.msrb.mxu3 %v1969_v28  ;;  %v1941_v30 = vor.u32 %v2318_v24, %v1938_v25  ;;  %v2360_v4 = vld [vmem:[#allocation4 + $0x1d4] sm:$0xf]  ;;  %v2357_v24 = vld [vmem:[#allocation4 + $0x1b4] sm:$0xf0]  ;;  %v2026_v25 = vld [vmem:[#allocation4 + $0x138] sm:$0xf0] }
 0x100   :  { %v579_v27 = vmul.f32 %v577_v17, %v577_v17  ;;  %582 = vst [vmem:[#allocation1] ss:$2 sm:$0xff] %v578_v18  ;;  %925 = vmatpush.bf16.msra.mxu1 %v1973_v23  ;;  %889 = vmatpush.bf16.msrb.mxu2 %v1881_v3  ;;  %v2120_v23 = vld [vmem:[#allocation4 + $0x1f0] sm:$0xf]  ;;  %v2042_v3 = vld [vmem:[#allocation4 + $0x158] sm:$0xf0] }
 0x101   :  { %915 = vmatpush.bf16.msra.mxu0 %v1885_v63  ;;  %v2121_v37 = vor.u32 %v2365_v34, %v2120_v23  ;;  %v2045_v62 = vor.u32 %v2344_v0, %v2042_v3  ;;  %v2032_v63 = vld [vmem:[#allocation4 + $0x140] sm:$0xf]  ;;  %v2336_v3 = vld [vmem:[#allocation4 + $0x114] sm:$0xf] }
 0x102   :  { %584 = vst [vmem:[#allocation1 + $0x1] ss:$2 sm:$0xff] %v579_v27  ;;  %v2349_v27 = vld [vmem:[#allocation4 + $0x174] sm:$0xf0] }
 0x103   :  { %900 = vmatpush.bf16.msrb.mxu3 %v1961_v38  ;;  %v2057_v31 = vor.u32 %v2349_v27, %v2056_v26  ;;  %v2061_v38 = vor.u32 %v2348_v35, %v2058_v36  ;;  %v2016_v36 = vld [vmem:[#allocation4 + $0x120] sm:$0xf] }
 0x104   :  { %926 = vmatpush.bf16.msra.mxu1 %v1965_v43 }
 0x105   :  { %916 = vmatpush.bf16.msra.mxu0 %v1877_v22  ;;  %v2340_v22 = vld [vmem:[#allocation4 + $0x134] sm:$0xf] }
 0x106   :  { %v2029_v35 = vor.u32 %v2340_v22, %v2026_v25  ;;  %v2002_v22 = vld [vmem:[#allocation4 + $0x108] sm:$0xf0] }
 0x107   :  { %901 = vmatpush.bf16.msrb.mxu3 %v1953_v51 }
 0x108   :  { %927 = vmatpush.bf16.msra.mxu1 %v1957_v57  ;;  %v2040_v57 = vld [vmem:[#allocation4 + $0x150] sm:$0xf] }
 0x109   :  { %v585_v55 = vld.sshfl [vmem:[#allocation1] sm:$0xff pattern:$0x75316420]  ;;  %v586_v56 = vld.sshfl [vmem:[#allocation1 + $0x8] sm:$0xff pattern:$0x75316420]  ;;  %1167 = vmatpush.bf16.msrb.mxu0 %v2061_v38 }
 0x10a   :  { %v589_v58 = vrot.slane %v585_v55, 4  ;;  %v595_v59 = vrot.slane %v586_v56, 4  ;;  %611 = vst [vmem:[#allocation1] ss:$2 sm:$0xff] %v2569_v11  ;;  %v1872_v11 = vld [vmem:[#allocation4] sm:$0xf] }
 0x10b   :  { %613 = vst [vmem:[#allocation1 + $0x1] ss:$2 sm:$0xff] %v577_v17  ;;  %902 = vmatpush.bf16.msrb.mxu3 %v1945_v6  ;;  %v1873_v18 = vor.u32 %v2303_v13, %v1872_v11  ;;  %v2109_v6 = vor.u32 %v2360_v4, %v2106_v5  ;;  %v2342_v11 = vld [vmem:[#allocation4 + $0x144] sm:$0xf] }
 0x10c   :  { %v590_v1 = vadd.f32 %v589_v58, %v585_v55  ;;  %v596_v2 = vadd.f32 %v595_v59, %v586_v56  ;;  %928 = vmatpush.bf16.msra.mxu1 %v1949_v12  ;;  %v2362_v55 = vld [vmem:[#allocation4 + $0x1e4] sm:$0xf]  ;;  %v2114_v56 = vld [vmem:[#allocation4 + $0x1e8] sm:$0xf0]  ;;  %v2345_v58 = vld [vmem:[#allocation4 + $0x154] sm:$0xf0] }
 0x10d   :  { %890 = vmatpush.bf16.msrb.mxu2 %v1873_v18  ;;  %v2117_v59 = vor.u32 %v2362_v55, %v2114_v56  ;;  %1168 = vmatpush.bf16.msrb.mxu0 %v2053_v54  ;;  %v2034_v12 = vld [vmem:[#allocation4 + $0x148] sm:$0xf0]  ;;  %v2358_v13 = vld [vmem:[#allocation4 + $0x1c4] sm:$0xf]  ;;  %v2341_v18 = vld [vmem:[#allocation4 + $0x134] sm:$0xf0] }
 0x10e   :  { %v591_v9 = vrot.slane %v590_v1, 2  ;;  %v597_v10 = vrot.slane %v596_v2, 2  ;;  %v2101_v21 = vor.u32 %v2358_v13, %v2098_v14  ;;  %v2082_v54 = vld [vmem:[#allocation4 + $0x1a8] sm:$0xf0]  ;;  %v2008_v55 = vld [vmem:[#allocation4 + $0x110] sm:$0xf] }
 0x10f   :  { %903 = vmatpush.bf16.msrb.mxu3 %v1937_v19  ;;  %v2088_v19 = vld [vmem:[#allocation4 + $0x1b0] sm:$0xf]  ;;  %v2000_v14 = vld [vmem:[#allocation4 + $0x100] sm:$0xf] }
 0x110   :  { %v592_v16 = vadd.f32 %v591_v9, %v590_v1  ;;  %v598_v17 = vadd.f32 %v597_v10, %v596_v2  ;;  %929 = vmatpush.bf16.msra.mxu1 %v1941_v30  ;;  %v2041_v1 = vor.u32 %v2345_v58, %v2040_v57  ;;  %v2105_v2 = vor.u32 %v2361_v61, %v2104_v60  ;;  %v2359_v10 = vld [vmem:[#allocation4 + $0x1c4] sm:$0xf0]  ;;  %v2090_v30 = vld [vmem:[#allocation4 + $0x1b8] sm:$0xf0]  ;;  %v2072_v60 = vld [vmem:[#allocation4 + $0x190] sm:$0xf] }
 0x111   :  { %1141 = vmatpush.bf16.msra.mxu2 %v2057_v31  ;;  %v2033_v9 = vor.u32 %v2343_v7, %v2032_v63  ;;  %1169 = vmatpush.bf16.msrb.mxu0 %v2045_v62  ;;  %v2097_v15 = vor.u32 %v2359_v10, %v2096_v8  ;;  %v603_v31 = vld [vmem:[%s2682_s3] sm:$0x3]  ;;  %v2089_v34 = vor.u32 %v2357_v24, %v2088_v19  ;;  %v2010_v62 = vld [vmem:[#allocation4 + $0x118] sm:$0xf0]  ;;  %v2334_v24 = vld [vmem:[#allocation4 + $0x104] sm:$0xf] }
 0x112   :  { %v593_v28 = vrot.slane %v592_v16, 1  ;;  %v599_v29 = vrot.slane %v598_v17, 1  ;;  %v615_v45 = vld.sshfl [vmem:[#allocation1 + $0x8] sm:$0xff pattern:$0x75316420]  ;;  %v606_v50 = vperm.slane %v603_v31, 1  ;;  %v2081_v57 = vor.u32 %v2355_v41, %v2080_v40 }
 0x113   :  { %1154 = vmatpush.bf16.msra.mxu3 %v2121_v37  ;;  %v2339_v37 = vld [vmem:[#allocation4 + $0x124] sm:$0xf0]  ;;  %v2074_v63 = vld [vmem:[#allocation4 + $0x198] sm:$0xf0]  ;;  %v2013_v13 = vor.u32 %v2336_v3, %v2010_v62  ;;  %v2377_v10 = vld [vmem:[#allocation4 + $0x254] sm:$0xf0] }
 0x114   :  { %v594_v32 = vadd.f32 %v593_v28, %v592_v16  ;;  %v600_v33 = vadd.f32 %v599_v29, %v598_v17  ;;  %1180 = vmatpush.bf16.msrb.mxu1 %v2125_v44  ;;  %v2037_v16 = vor.u32 %v2342_v11, %v2034_v12  ;;  %v2024_v17 = vld [vmem:[#allocation4 + $0x130] sm:$0xf]  ;;  %v2356_v29 = vld [vmem:[#allocation4 + $0x1b4] sm:$0xf]  ;;  %v619_v8 = vmul.f32 %v615_v45, %v606_v50 }
 0x115   :  { %1142 = vmatpush.bf16.msra.mxu2 %v2049_v47  ;;  %v2025_v28 = vor.u32 %v2341_v18, %v2024_v17  ;;  %v2093_v39 = vor.u32 %v2356_v29, %v2090_v30  ;;  %v614_v44 = vld.sshfl [vmem:[#allocation1] sm:$0xff pattern:$0x75316420]  ;;  %v2017_v47 = vor.u32 %v2339_v37, %v2016_v36  ;;  %v2248_v50 = vld [vmem:[#allocation4 + $0x2f0] sm:$0xf] }
 0x116   :  { %v601_v42 = vmul.f32 0.125, %v594_v32  ;;  %v602_v43 = vmul.f32 0.125, %v600_v33  ;;  %v2596_v33 = vld [vmem:[%s2683_s4] sm:$0x3]  ;;  %1170 = vmatpush.bf16.msrb.mxu0 %v2037_v16  ;;  %v2064_v16 = vld [vmem:[#allocation4 + $0x180] sm:$0xf] }
 0x117   :  { %1155 = vmatpush.bf16.msra.mxu3 %v2113_v53  ;;  %v647_v11 = vperm.slane %v2596_v33, 1 }
 0x118   :  { %v2575_v51 = vadd.f32 1e-05, %v601_v42  ;;  %v2577_v52 = vadd.f32 1e-05, %v602_v43  ;;  %1181 = vmatpush.bf16.msrb.mxu1 %v2117_v59  ;;  %v2338_v42 = vld [vmem:[#allocation4 + $0x124] sm:$0xf] }
 0x119   :  { %1143 = vmatpush.bf16.msra.mxu2 %v2041_v1  ;;  %v605_v43 = vperm.slane %v603_v31, 0  ;;  %v2021_v58 = vor.u32 %v2338_v42, %v2018_v48  ;;  %v2337_v59 = vld [vmem:[#allocation4 + $0x114] sm:$0xf0]  ;;  %v2085_v1 = vor.u32 %v2354_v49, %v2082_v54  ;;  %v2184_v48 = vld [vmem:[#allocation4 + $0x270] sm:$0xf] }
 0x11a   :  { %2402 = vrsqrt.f32 %v2575_v51  ;;  %vm628_vm4 = vweird.f32 %v2575_v51  ;;  %1171 = vmatpush.bf16.msrb.mxu0 %v2029_v35  ;;  %vm638_vm7 = vweird.f32 %v2577_v52  ;;  %v2009_v5 = vor.u32 %v2337_v59, %v2008_v55  ;;  %v2381_v49 = vld [vmem:[#allocation4 + $0x274] sm:$0xf0]  ;;  %v2380_v54 = vld [vmem:[#allocation4 + $0x274] sm:$0xf]  ;;  %v2186_v55 = vld [vmem:[#allocation4 + $0x278] sm:$0xf0] }
 0x11b   :  { %2404 = vrsqrt.f32 %v2577_v52  ;;  %1156 = vmatpush.bf16.msra.mxu3 %v2105_v2  ;;  %v2353_v2 = vld [vmem:[#allocation4 + $0x194] sm:$0xf0]  ;;  %v618_v7 = vmul.f32 %v614_v44, %v605_v43  ;;  %v2379_v59 = vld [vmem:[#allocation4 + $0x264] sm:$0xf0]  ;;  %v2185_v61 = vor.u32 %v2381_v49, %v2184_v48 }
 0x11c   :  { %1182 = vmatpush.bf16.msrb.mxu1 %v2109_v6  ;;  %v2352_v6 = vld [vmem:[#allocation4 + $0x194] sm:$0xf]  ;;  %v2073_v12 = vor.u32 %v2353_v2, %v2072_v60  ;;  %v2240_v60 = vld [vmem:[#allocation4 + $0x2e0] sm:$0xf]  ;;  %v2178_v2 = vld [vmem:[#allocation4 + $0x268] sm:$0xf0] }
 0x11d   :  { %1144 = vmatpush.bf16.msra.mxu2 %v2033_v9  ;;  %v2077_v19 = vor.u32 %v2352_v6, %v2074_v63  ;;  %v2394_v6 = vld [vmem:[#allocation4 + $0x2e4] sm:$0xf]  ;;  %v2242_v63 = vld [vmem:[#allocation4 + $0x2e8] sm:$0xf0]  ;;  %v2371_v48 = vld [vmem:[#allocation4 + $0x224] sm:$0xf0] }
 0x11e   :  { %1172 = vmatpush.bf16.msrb.mxu0 %v2021_v58  ;;  %v2176_v58 = vld [vmem:[#allocation4 + $0x260] sm:$0xf] }
 0x11f   :  { %1157 = vmatpush.bf16.msra.mxu3 %v2097_v15  ;;  %v2335_v15 = vld [vmem:[#allocation4 + $0x104] sm:$0xf0] }
 0x120   :  { %v2581_v20 = vpop.eup %2402  ;;  %1183 = vmatpush.bf16.msrb.mxu1 %v2101_v21  ;;  %v2351_v21 = vld [vmem:[#allocation4 + $0x184] sm:$0xf0] }
 0x121   :  { %v2583_v26 = vpop.eup %2404  ;;  %v623_v27 = vmul.f32 %v2581_v20, %v2575_v51  ;;  %vm629_vm3 = vweird.f32 %v2581_v20  ;;  %1145 = vmatpush.bf16.msra.mxu2 %v2025_v28  ;;  %v646_v51 = vperm.slane %v2596_v33, 0  ;;  %v2066_v28 = vld [vmem:[#allocation4 + $0x188] sm:$0xf0]  ;;  %v2065_v29 = vor.u32 %v2351_v21, %v2064_v16  ;;  %v2392_v16 = vld [vmem:[#allocation4 + $0x2d4] sm:$0xf] }
 0x122   :  { %v633_v23 = vmul.f32 %v2583_v26, %v2577_v52  ;;  %vm639_vm5 = vweird.f32 %v2583_v26  ;;  %vm2604_vm6 = vmor %vm628_vm4, %vm629_vm3  ;;  %1173 = vmatpush.bf16.msrb.mxu0 %v2013_v13  ;;  %v2393_v13 = vld [vmem:[#allocation4 + $0x2d4] sm:$0xf0] }
 0x123   :  { %v624_v32 = vmul.f32 %v2581_v20, %v623_v27  ;;  %1158 = vmatpush.bf16.msra.mxu3 %v2089_v34  ;;  %vm2614_vm8 = vmor %vm638_vm7, %vm639_vm5  ;;  %v2350_v27 = vld [vmem:[#allocation4 + $0x184] sm:$0xf] }
 0x124   :  { %v634_v38 = vmul.f32 %v2583_v26, %v633_v23  ;;  %1184 = vmatpush.bf16.msrb.mxu1 %v2093_v39  ;;  %v2005_v23 = vor.u32 %v2334_v24, %v2002_v22  ;;  %v2224_v22 = vld [vmem:[#allocation4 + $0x2c0] sm:$0xf] }
 0x125   :  { %v625_v46 = vmul.f32 0.5, %v624_v32  ;;  %1146 = vmatpush.bf16.msra.mxu2 %v2017_v47  ;;  %v2069_v32 = vor.u32 %v2350_v27, %v2066_v28 }
 0x126   :  { %v635_v53 = vmul.f32 0.5, %v634_v38  ;;  %1174 = vmatpush.bf16.msrb.mxu0 %v2005_v23 }
 0x127   :  { %v626_v56 = vsub.f32 1.5, %v625_v46  ;;  %1159 = vmatpush.bf16.msra.mxu3 %v2081_v57  ;;  %v2250_v57 = vld [vmem:[#allocation4 + $0x2f8] sm:$0xf0] }
 0x128   :  { %v636_v0 = vsub.f32 1.5, %v635_v53  ;;  %1185 = vmatpush.bf16.msrb.mxu1 %v2085_v1  ;;  %v2397_v53 = vld [vmem:[#allocation4 + $0x2f4] sm:$0xf0]  ;;  %v2378_v1 = vld [vmem:[#allocation4 + $0x264] sm:$0xf] }
 0x129   :  { %v627_v4 = vmul.f32 %v2581_v20, %v626_v56  ;;  %1147 = vmatpush.bf16.msra.mxu2 %v2009_v5  ;;  %v2396_v56 = vld [vmem:[#allocation4 + $0x2f4] sm:$0xf]  ;;  %v2189_v5 = vor.u32 %v2380_v54, %v2186_v55  ;;  %v2370_v54 = vld [vmem:[#allocation4 + $0x224] sm:$0xf]  ;;  %v2146_v55 = vld [vmem:[#allocation4 + $0x228] sm:$0xf0] }
 0x12a   :  { %v637_v9 = vmul.f32 %v2583_v26, %v636_v0  ;;  %v2249_v0 = vor.u32 %v2397_v53, %v2248_v50  ;;  %v2253_v62 = vor.u32 %v2396_v56, %v2250_v57  ;;  %v2208_v50 = vld [vmem:[#allocation4 + $0x2a0] sm:$0xf]  ;;  %v2387_v53 = vld [vmem:[#allocation4 + $0x2a4] sm:$0xf0]  ;;  %v2386_v56 = vld [vmem:[#allocation4 + $0x2a4] sm:$0xf] }
 0x12b   :  { %v631_v52 = vsel %vm2604_vm6, %v2581_v20, %v627_v4  ;;  %v2001_v20 = vor.u32 %v2335_v15, %v2000_v14  ;;  %1160 = vmatpush.bf16.msra.mxu3 %v2073_v12  ;;  %v2232_v12 = vld [vmem:[#allocation4 + $0x2d0] sm:$0xf]  ;;  %v2376_v14 = vld [vmem:[#allocation4 + $0x254] sm:$0xf]  ;;  %v2170_v15 = vld [vmem:[#allocation4 + $0x258] sm:$0xf0] }
 0x12c   :  { %v641_v17 = vsel %vm2614_vm8, %v2583_v26, %v637_v9  ;;  %v642_v18 = vmul.f32 %v631_v52, %v618_v7  ;;  %1186 = vmatpush.bf16.msrb.mxu1 %v2077_v19  ;;  %v2177_v7 = vor.u32 %v2379_v59, %v2176_v58  ;;  %v2168_v9 = vld [vmem:[#allocation4 + $0x250] sm:$0xf]  ;;  %v2245_v52 = vor.u32 %v2394_v6, %v2242_v63  ;;  %v2375_v19 = vld [vmem:[#allocation4 + $0x244] sm:$0xf0]  ;;  %v2210_v57 = vld [vmem:[#allocation4 + $0x2a8] sm:$0xf0] }
 0x12d   :  { %v643_v25 = vmul.f32 %v641_v17, %v619_v8  ;;  %1148 = vmatpush.bf16.msra.mxu2 %v2001_v20  ;;  %v2234_v17 = vld [vmem:[#allocation4 + $0x2d8] sm:$0xf0]  ;;  %v2169_v21 = vor.u32 %v2377_v10, %v2168_v9  ;;  %v2233_v24 = vor.u32 %v2393_v13, %v2232_v12  ;;  %v2374_v20 = vld [vmem:[#allocation4 + $0x244] sm:$0xf]  ;;  %v2173_v27 = vor.u32 %v2376_v14, %v2170_v15  ;;  %v2130_v13 = vld [vmem:[#allocation4 + $0x208] sm:$0xf0] }
 0x12e   :  { %v650_v30 = vadd.f32 %v646_v51, %v642_v18  ;;  %v2395_v51 = vld [vmem:[#allocation4 + $0x2e4] sm:$0xf0]  ;;  %v2160_v18 = vld [vmem:[#allocation4 + $0x240] sm:$0xf]  ;;  %v2237_v28 = vor.u32 %v2392_v16, %v2234_v17  ;;  %v2209_v59 = vor.u32 %v2387_v53, %v2208_v50  ;;  %v2366_v12 = vld [vmem:[#allocation4 + $0x204] sm:$0xf] }
 0x12f   :  { %v651_v31 = vadd.f32 %v647_v11, %v643_v25  ;;  %1161 = vmatpush.bf16.msra.mxu3 %v2065_v29  ;;  %v2241_v8 = vor.u32 %v2395_v51, %v2240_v60  ;;  %v2181_v11 = vor.u32 %v2378_v1, %v2178_v2  ;;  %v2391_v25 = vld [vmem:[#allocation4 + $0x2c4] sm:$0xf0]  ;;  %v2162_v29 = vld [vmem:[#allocation4 + $0x248] sm:$0xf0]  ;;  %v2136_v60 = vld [vmem:[#allocation4 + $0x210] sm:$0xf]  ;;  %v2213_v51 = vor.u32 %v2386_v56, %v2210_v57 }
 0x130   :  { %v652_v33 = vmax.f32 %v650_v30, 0.0  ;;  %1187 = vmatpush.bf16.msrb.mxu1 %v2069_v32  ;;  %v2390_v30 = vld [vmem:[#allocation4 + $0x2c4] sm:$0xf]  ;;  %v2200_v1 = vld [vmem:[#allocation4 + $0x290] sm:$0xf] }
 0x131   :  { %v653_v26 = vmax.f32 %v651_v31, 0.0  ;;  %v2226_v31 = vld [vmem:[#allocation4 + $0x2c8] sm:$0xf0]  ;;  %v2385_v2 = vld [vmem:[#allocation4 + $0x294] sm:$0xf0] }
 0x132   :  { %v2201_v63 = vor.u32 %v2385_v2, %v2200_v1  ;;  %v2382_v14 = vld [vmem:[#allocation4 + $0x284] sm:$0xf]  ;;  %v2194_v15 = vld [vmem:[#allocation4 + $0x288] sm:$0xf0]  ;;  %v1521_v2 = vld [vmem:[%s2685_s6] sm:$0x3] }
 0x133   :  { %v656_v34 = vrot.slane %v653_v26, 4  ;;  %v2161_v26 = vor.u32 %v2375_v19, %v2160_v18  ;;  %v2133_v18 = vor.u32 %v2366_v12, %v2130_v13  ;;  %v2197_v19 = vor.u32 %v2382_v14, %v2194_v15 }
 0x135   :  { %v657_v35 = vsel %vm198_vm0, %v652_v33, %v656_v34  ;;  %v658_v36 = vsel %vm198_vm0, %v656_v34, %v652_v33  ;;  %v2225_v33 = vor.u32 %v2391_v25, %v2224_v22  ;;  %v2152_v34 = vld [vmem:[#allocation4 + $0x230] sm:$0xf] }
 0x136   :  { %v659_v37 = vrot.slane %v658_v36, 4  ;;  %660 = vst [vmem:[#allocation1] ss:$2 sm:$0xff] %v657_v35  ;;  %v2373_v35 = vld [vmem:[#allocation4 + $0x234] sm:$0xf0]  ;;  %v2165_v36 = vor.u32 %v2374_v20, %v2162_v29 }
 0x138   :  { %664 = vst [vmem:[#allocation1 + $0x10] ss:$2 sm:$0xff] %v659_v37  ;;  %v2229_v37 = vor.u32 %v2390_v30, %v2226_v31 }
 0x13d   :  { %v661_v38 = vld.sshfl [vmem:[#allocation1] sm:$0xff pattern:$0x75316420]  ;;  %v662_v39 = vld.sshfl [vmem:[#allocation1 + $0x8] sm:$0xff pattern:$0x75316420] }
 0x13e   :  { %v671_v40 = vpack.c.bf16 %v662_v39, %v661_v38  ;;  %v2216_v38 = vld [vmem:[#allocation4 + $0x2b0] sm:$0xf]  ;;  %v2389_v39 = vld [vmem:[#allocation4 + $0x2b4] sm:$0xf0] }
 0x13f   :  { %v665_v41 = vld.sshfl [vmem:[#allocation1 + $0x10] sm:$0xff pattern:$0x75316420]  ;;  %v666_v42 = vld.sshfl [vmem:[#allocation1 + $0x18] sm:$0xff pattern:$0x75316420] }
 0x140   :  { %v672_v43 = vpack.c.bf16 %v666_v42, %v665_v41  ;;  %v675_v44 = vrot.slane %v671_v40, 2  ;;  %v2154_v41 = vld [vmem:[#allocation4 + $0x238] sm:$0xf0]  ;;  %v2388_v42 = vld [vmem:[#allocation4 + $0x2b4] sm:$0xf] }
 0x142   :  { %v676_v45 = vrot.slane %v672_v43, 2  ;;  %v2628_v46 = vsel %vm677_vm9, %v671_v40, %v675_v44  ;;  %v2372_v40 = vld [vmem:[#allocation4 + $0x234] sm:$0xf]  ;;  %v2153_v44 = vor.u32 %v2373_v35, %v2152_v34 }
 0x143   :  { %716 = vst [vmem:[#allocation1] ss:$4 sm:$0xff] %v2628_v46 }
 0x144   :  { %v2632_v47 = vsel %vm677_vm9, %v672_v43, %v676_v45  ;;  %v2218_v43 = vld [vmem:[#allocation4 + $0x2b8] sm:$0xf0]  ;;  %v2217_v45 = vor.u32 %v2389_v39, %v2216_v38 }
 0x145   :  { %718 = vst [vmem:[#allocation1 + $0x1] ss:$4 sm:$0xff] %v2632_v47  ;;  %v2221_v49 = vor.u32 %v2388_v42, %v2218_v43 }
 0x14c   :  { %v719_v3 = vld.sshfl [vmem:[#allocation1] sm:$0xff pattern:$0x73625140]  ;;  %v720_v4 = vld.sshfl [vmem:[#allocation1 + $0x8] sm:$0xff pattern:$0x73625140] }
 0x14d   :  { %891 = vmatmul.bf16.vlgmr.msrb.gmra.mxu2 %v719_v3  ;;  %904 = vmatmul.bf16.vlgmr.msrb.gmra.mxu3 %v720_v4  ;;  %974 = vst [vmem:[#allocation1] ss:$4 sm:$0xff] %v2628_v46 }
 0x14e   :  { %976 = vst [vmem:[#allocation1 + $0x1] ss:$4 sm:$0xff] %v2632_v47  ;;  %917 = vmatmul.bf16.vlgmr.msra.gmra.mxu0 %v719_v3  ;;  %930 = vmatmul.bf16.vlgmr.msra.gmra.mxu1 %v720_v4  ;;  %v2368_v3 = vld [vmem:[#allocation4 + $0x214] sm:$0xf]  ;;  %v2138_v4 = vld [vmem:[#allocation4 + $0x218] sm:$0xf0] }
 0x14f   :  { %1401 = vmatpush.bf16.msrb.mxu2 %v2185_v61  ;;  %1414 = vmatpush.bf16.msrb.mxu3 %v2249_v0  ;;  %v2369_v61 = vld [vmem:[#allocation4 + $0x214] sm:$0xf0]  ;;  %v2149_v0 = vor.u32 %v2370_v54, %v2146_v55  ;;  %v2141_v9 = vor.u32 %v2368_v3, %v2138_v4 }
 0x150   :  { %1427 = vmatpush.bf16.msra.mxu0 %v2189_v5  ;;  %1440 = vmatpush.bf16.msra.mxu1 %v2253_v62  ;;  %v2384_v5 = vld [vmem:[#allocation4 + $0x294] sm:$0xf]  ;;  %v2202_v62 = vld [vmem:[#allocation4 + $0x298] sm:$0xf0]  ;;  %v2137_v6 = vor.u32 %v2369_v61, %v2136_v60 }
 0x151   :  { %v2205_v10 = vor.u32 %v2384_v5, %v2202_v62 }
 0x153   :  { %1402 = vmatpush.bf16.msrb.mxu2 %v2177_v7  ;;  %1415 = vmatpush.bf16.msrb.mxu3 %v2241_v8  ;;  %v2128_v7 = vld [vmem:[#allocation4 + $0x200] sm:$0xf]  ;;  %v2367_v8 = vld [vmem:[#allocation4 + $0x204] sm:$0xf0] }
 0x154   :  { %1428 = vmatpush.bf16.msra.mxu0 %v2181_v11  ;;  %1441 = vmatpush.bf16.msra.mxu1 %v2245_v52  ;;  %v2192_v11 = vld [vmem:[#allocation4 + $0x280] sm:$0xf]  ;;  %v2383_v52 = vld [vmem:[#allocation4 + $0x284] sm:$0xf0]  ;;  %v2129_v16 = vor.u32 %v2367_v8, %v2128_v7 }
 0x155   :  { %v977_v23 = vld.sshfl [vmem:[#allocation1] sm:$0xff pattern:$0x73625140]  ;;  %v978_v32 = vld.sshfl [vmem:[#allocation1 + $0x8] sm:$0xff pattern:$0x73625140]  ;;  %v2193_v17 = vor.u32 %v2383_v52, %v2192_v11 }
 0x156   :  { %1234 = vst [vmem:[#allocation1] ss:$4 sm:$0xff] %v2628_v46  ;;  %v2144_v46 = vld [vmem:[#allocation4 + $0x220] sm:$0xf] }
 0x157   :  { %1403 = vmatpush.bf16.msrb.mxu2 %v2169_v21  ;;  %1416 = vmatpush.bf16.msrb.mxu3 %v2233_v24  ;;  %1236 = vst [vmem:[#allocation1 + $0x1] ss:$4 sm:$0xff] %v2632_v47  ;;  %v2157_v47 = vor.u32 %v2372_v40, %v2154_v41  ;;  %v2145_v58 = vor.u32 %v2371_v48, %v2144_v46 }
 0x158   :  { %1429 = vmatpush.bf16.msra.mxu0 %v2173_v27  ;;  %1442 = vmatpush.bf16.msra.mxu1 %v2237_v28 }
 0x15b   :  { %1404 = vmatpush.bf16.msrb.mxu2 %v2161_v26  ;;  %1417 = vmatpush.bf16.msrb.mxu3 %v2225_v33 }
 0x15c   :  { %1430 = vmatpush.bf16.msra.mxu0 %v2165_v36  ;;  %1443 = vmatpush.bf16.msra.mxu1 %v2229_v37 }
 0x15d   :  { %1149 = vmatmul.bf16.vlgmr.msra.gmra.mxu2 %v977_v23  ;;  %1162 = vmatmul.bf16.vlgmr.msra.gmra.mxu3 %v978_v32 }
 0x15e   :  { %1175 = vmatmul.bf16.vlgmr.msrb.gmra.mxu0 %v977_v23  ;;  %1188 = vmatmul.bf16.vlgmr.msrb.gmra.mxu1 %v978_v32  ;;  %v1237_v21 = vld.sshfl [vmem:[#allocation1] sm:$0xff pattern:$0x73625140]  ;;  %v1238_v24 = vld.sshfl [vmem:[#allocation1 + $0x8] sm:$0xff pattern:$0x73625140] }
 0x15f   :  { %1405 = vmatpush.bf16.msrb.mxu2 %v2153_v44  ;;  %1418 = vmatpush.bf16.msrb.mxu3 %v2217_v45 }
 0x160   :  { %1431 = vmatpush.bf16.msra.mxu0 %v2157_v47  ;;  %1444 = vmatpush.bf16.msra.mxu1 %v2221_v49 }
 0x163   :  { %1406 = vmatpush.bf16.msrb.mxu2 %v2145_v58  ;;  %1419 = vmatpush.bf16.msrb.mxu3 %v2209_v59 }
 0x164   :  { %1432 = vmatpush.bf16.msra.mxu0 %v2149_v0  ;;  %1445 = vmatpush.bf16.msra.mxu1 %v2213_v51 }
 0x167   :  { %1407 = vmatpush.bf16.msrb.mxu2 %v2137_v6  ;;  %1420 = vmatpush.bf16.msrb.mxu3 %v2201_v63  ;;  %v1524_v6 = vperm.slane %v1521_v2, 1 }
 0x168   :  { %1433 = vmatpush.bf16.msra.mxu0 %v2141_v9  ;;  %1446 = vmatpush.bf16.msra.mxu1 %v2205_v10 }
 0x16b   :  { %1408 = vmatpush.bf16.msrb.mxu2 %v2129_v16  ;;  %1421 = vmatpush.bf16.msrb.mxu3 %v2193_v17  ;;  %v1523_v17 = vperm.slane %v1521_v2, 0 }
 0x16c   :  { %1434 = vmatpush.bf16.msra.mxu0 %v2133_v18  ;;  %1447 = vmatpush.bf16.msra.mxu1 %v2197_v19  ;;  %v1525_v18 = vrot.slane %v1524_v6, 4 }
 0x16e   :  { %1409 = vmatmul.bf16.vlgmr.msrb.gmra.mxu2 %v1237_v21  ;;  %1422 = vmatmul.bf16.vlgmr.msrb.gmra.mxu3 %v1238_v24 }
 0x16f   :  { %1435 = vmatmul.bf16.vlgmr.msra.gmra.mxu0 %v1237_v21  ;;  %1448 = vmatmul.bf16.vlgmr.msra.gmra.mxu1 %v1238_v24 }
 0x1cb   :  { %v918_v22 = vpop.f32.mrf.mxu0  ;;  %v931_v25 = vpop.f32.mrf.mxu1 }
 0x1cc   :  { %v932_v20 = vadd.f32 %v931_v25, %v918_v22 }
 0x1ce   :  { %v937_v29 = vrot.slane %v932_v20, 4 }
 0x1d0   :  { %v892_v27 = vpop.f32.mrf.mxu2  ;;  %v905_v28 = vpop.f32.mrf.mxu3 }
 0x1d1   :  { %v906_v30 = vadd.f32 %v905_v28, %v892_v27 }
 0x1d3   :  { %v938_v31 = vsel %vm198_vm0, %v906_v30, %v937_v29  ;;  %v939_v23 = vsel %vm198_vm0, %v937_v29, %v906_v30  ;;  %v920_v32 = vpop.f32.mrf.mxu0  ;;  %v933_v26 = vpop.f32.mrf.mxu1 }
 0x1d4   :  { %v940_v33 = vrot.slane %v939_v23, 4  ;;  %1459 = vst [vmem:[#allocation1] ss:$2 sm:$0xff] %v938_v31 }
 0x1d6   :  { %1463 = vst [vmem:[#allocation1 + $0x10] ss:$2 sm:$0xff] %v940_v33 }
 0x1d8   :  { %v894_v34 = vpop.f32.mrf.mxu2  ;;  %v907_v35 = vpop.f32.mrf.mxu3 }
 0x1d9   :  { %v1526_v35 = vsel %vm198_vm0, %v1523_v17, %v1525_v18 }
 0x1db   :  { %v1176_v36 = vpop.f32.mrf.mxu0  ;;  %v1189_v37 = vpop.f32.mrf.mxu1  ;;  %v1461_v48 = vld.sshfl [vmem:[#allocation1 + $0x8] sm:$0xff pattern:$0x75316420]  ;;  %v1460_v55 = vld.sshfl [vmem:[#allocation1] sm:$0xff pattern:$0x75316420] }
 0x1dc   :  { %v1467_v56 = vrot.slane %v1461_v48, 7  ;;  %v1190_v51 = vadd.f32 %v1189_v37, %v1176_v36  ;;  %v1466_v3 = vrot.slane %v1460_v55, 7 }
 0x1dd   :  { %v1465_v47 = vld.sshfl [vmem:[#allocation1 + $0x18] sm:$0xff pattern:$0x75316420]  ;;  %v1464_v1 = vld.sshfl [vmem:[#allocation1 + $0x10] sm:$0xff pattern:$0x75316420] }
 0x1de   :  { %v1469_v57 = vrot.slane %v1465_v47, 7  ;;  %v1475_v5 = vsel %vm487_vm1, 0.0, %v1467_v56  ;;  %v1195_v8 = vrot.slane %v1190_v51, 4  ;;  %v1468_v9 = vrot.slane %v1464_v1, 7 }
 0x1df   :  { %v1474_v10 = vsel %vm487_vm1, 0.0, %v1466_v3  ;;  %v1482_v11 = vrot.slane %v1475_v5, 4 }
 0x1e0   :  { %v1150_v38 = vpop.f32.mrf.mxu2  ;;  %v1163_v39 = vpop.f32.mrf.mxu3  ;;  %v1477_v62 = vsel %vm487_vm1, 0.0, %v1469_v57  ;;  %v1476_v30 = vsel %vm487_vm1, 0.0, %v1468_v9 }
 0x1e1   :  { %v1164_v4 = vadd.f32 %v1163_v39, %v1150_v38  ;;  %v1483_v52 = vrot.slane %v1477_v62, 4  ;;  %v1484_v28 = vsel %vm198_vm0, %v1474_v10, %v1482_v11 }
 0x1e3   :  { %v1178_v40 = vpop.f32.mrf.mxu0  ;;  %v1191_v41 = vpop.f32.mrf.mxu1  ;;  %v1197_v12 = vsel %vm198_vm0, %v1195_v8, %v1164_v4  ;;  %v1196_v19 = vsel %vm198_vm0, %v1164_v4, %v1195_v8  ;;  %v1485_v26 = vsel %vm198_vm0, %v1476_v30, %v1483_v52 }
 0x1e4   :  { %v1198_v22 = vrot.slane %v1197_v12, 4  ;;  %v1488_v31 = vadd.f32 %v1484_v28, %v1196_v19 }
 0x1e6   :  { %v1489_v36 = vadd.f32 %v1485_v26, %v1198_v22 }
 0x1e8   :  { %v1152_v42 = vpop.f32.mrf.mxu2  ;;  %v1165_v43 = vpop.f32.mrf.mxu3 }
 0x1ec   :  { %v1436_v44 = vpop.f32.mrf.mxu0  ;;  %v1449_v45 = vpop.f32.mrf.mxu1 }
 0x1ed   :  { %v1450_v46 = vadd.f32 %v1449_v45, %v1436_v44 }
 0x1ef   :  { %v1455_v53 = vrot.slane %v1450_v46, 4 }
 0x1f1   :  { %v1410_v49 = vpop.f32.mrf.mxu2  ;;  %v1423_v50 = vpop.f32.mrf.mxu3 }
 0x1f2   :  { %v1424_v54 = vadd.f32 %v1423_v50, %v1410_v49 }
 0x1f4   :  { %v1456_v58 = vsel %vm198_vm0, %v1424_v54, %v1455_v53  ;;  %v1457_v59 = vsel %vm198_vm0, %v1455_v53, %v1424_v54  ;;  %v1438_v60 = vpop.f32.mrf.mxu0  ;;  %v1451_v61 = vpop.f32.mrf.mxu1 }
 0x1f5   :  { %v1458_v0 = vrot.slane %v1457_v59, 4  ;;  %1490 = vst [vmem:[#allocation1] ss:$2 sm:$0xff] %v1456_v58 }
 0x1f7   :  { %1494 = vst [vmem:[#allocation1 + $0x10] ss:$2 sm:$0xff] %v1458_v0 }
 0x1f9   :  { %v1412_v63 = vpop.f32.mrf.mxu2  ;;  %v1425_v7 = vpop.f32.mrf.mxu3 }
 0x1fc   :  { %v1491_v13 = vld.sshfl [vmem:[#allocation1] sm:$0xff pattern:$0x75316420]  ;;  %v1492_v14 = vld.sshfl [vmem:[#allocation1 + $0x8] sm:$0xff pattern:$0x75316420] }
 0x1fd   :  { %v1497_v15 = vrot.slane %v1491_v13, 1  ;;  %v1498_v16 = vrot.slane %v1492_v14, 1 }
 0x1fe   :  { %v1495_v21 = vld.sshfl [vmem:[#allocation1 + $0x10] sm:$0xff pattern:$0x75316420]  ;;  %v1496_v24 = vld.sshfl [vmem:[#allocation1 + $0x18] sm:$0xff pattern:$0x75316420] }
 0x1ff   :  { %v1499_v25 = vrot.slane %v1495_v21, 1  ;;  %v1500_v20 = vrot.slane %v1496_v24, 1  ;;  %v1506_v27 = vsel %vm519_vm2, %v1498_v16, 0.0  ;;  %v1505_v23 = vsel %vm519_vm2, %v1497_v15, 0.0 }
 0x200   :  { %v1513_v29 = vrot.slane %v1506_v27, 4  ;;  %v1588_v27 = vld [vmem:[%s2686_s7] sm:$0x3] }
 0x201   :  { %v1508_v32 = vsel %vm519_vm2, %v1500_v20, 0.0  ;;  %v1507_v37 = vsel %vm519_vm2, %v1499_v25, 0.0 }
 0x202   :  { %v1514_v33 = vrot.slane %v1508_v32, 4  ;;  %v1515_v34 = vsel %vm198_vm0, %v1505_v23, %v1513_v29  ;;  %v1591_v32 = vperm.slane %v1588_v27, 1 }
 0x203   :  { %v1519_v38 = vadd.f32 %v1515_v34, %v1488_v31  ;;  %v1590_v31 = vperm.slane %v1588_v27, 0 }
 0x204   :  { %v1516_v39 = vsel %vm198_vm0, %v1507_v37, %v1514_v33 }
 0x205   :  { %v1520_v40 = vadd.f32 %v1516_v39, %v1489_v36  ;;  %v1528_v41 = vadd.f32 %v1526_v35, %v1519_v38  ;;  %v1629_v36 = vld [vmem:[%s2687_s8] sm:$0x3] }
 0x207   :  { %v1529_v42 = vadd.f32 %v1526_v35, %v1520_v40  ;;  %1532 = vst [vmem:[#allocation1] ss:$2 sm:$0xff] %v1528_v41 }
 0x209   :  { %1534 = vst [vmem:[#allocation1 + $0x1] ss:$2 sm:$0xff] %v1529_v42 }
 0x210   :  { %v1535_v43 = vld.sshfl [vmem:[#allocation1] sm:$0xff pattern:$0x75316420]  ;;  %v1536_v44 = vld.sshfl [vmem:[#allocation1 + $0x8] sm:$0xff pattern:$0x75316420] }
 0x211   :  { %v1539_v45 = vrot.slane %v1535_v43, 4  ;;  %v1545_v46 = vrot.slane %v1536_v44, 4 }
 0x213   :  { %v1540_v48 = vadd.f32 %v1539_v45, %v1535_v43  ;;  %v1546_v47 = vadd.f32 %v1545_v46, %v1536_v44  ;;  %v1632_v43 = vperm.slane %v1629_v36, 1 }
 0x215   :  { %v1541_v49 = vrot.slane %v1540_v48, 2  ;;  %v1547_v50 = vrot.slane %v1546_v47, 2 }
 0x217   :  { %v1542_v53 = vadd.f32 %v1541_v49, %v1540_v48  ;;  %v1548_v54 = vadd.f32 %v1547_v50, %v1546_v47 }
 0x219   :  { %v1543_v55 = vrot.slane %v1542_v53, 1  ;;  %v1549_v56 = vrot.slane %v1548_v54, 1 }
 0x21b   :  { %v1544_v57 = vadd.f32 %v1543_v55, %v1542_v53  ;;  %v1550_v58 = vadd.f32 %v1549_v56, %v1548_v54 }
 0x21d   :  { %v1552_v59 = vmul.f32 0.125, %v1550_v58  ;;  %v1551_v60 = vmul.f32 0.125, %v1544_v57 }
 0x21f   :  { %v1555_v61 = vrot.slane %v1552_v59, 4 }
 0x221   :  { %v1556_v0 = vsel %vm198_vm0, %v1551_v60, %v1555_v61  ;;  %v1557_v51 = vsel %vm198_vm0, %v1555_v61, %v1551_v60 }
 0x222   :  { %v1558_v1 = vrot.slane %v1557_v51, 4  ;;  %v1561_v2 = vsub.f32 %v1528_v41, %v1556_v0 }
 0x224   :  { %v1562_v3 = vsub.f32 %v1529_v42, %v1558_v1  ;;  %v1563_v4 = vmul.f32 %v1561_v2, %v1561_v2  ;;  %v1631_v42 = vperm.slane %v1629_v36, 0 }
 0x226   :  { %v1564_v5 = vmul.f32 %v1562_v3, %v1562_v3  ;;  %1567 = vst [vmem:[#allocation1] ss:$2 sm:$0xff] %v1563_v4 }
 0x228   :  { %1569 = vst [vmem:[#allocation1 + $0x1] ss:$2 sm:$0xff] %v1564_v5 }
 0x22f   :  { %v1570_v62 = vld.sshfl [vmem:[#allocation1] sm:$0xff pattern:$0x75316420]  ;;  %v1571_v6 = vld.sshfl [vmem:[#allocation1 + $0x8] sm:$0xff pattern:$0x75316420] }
 0x230   :  { %v1574_v63 = vrot.slane %v1570_v62, 4  ;;  %v1580_v7 = vrot.slane %v1571_v6, 4  ;;  %1596 = vst [vmem:[#allocation1] ss:$2 sm:$0xff] %v1561_v2 }
 0x231   :  { %1598 = vst [vmem:[#allocation1 + $0x1] ss:$2 sm:$0xff] %v1562_v3 }
 0x232   :  { %v1575_v8 = vadd.f32 %v1574_v63, %v1570_v62  ;;  %v1581_v9 = vadd.f32 %v1580_v7, %v1571_v6 }
 0x234   :  { %v1576_v10 = vrot.slane %v1575_v8, 2  ;;  %v1582_v11 = vrot.slane %v1581_v9, 2 }
 0x236   :  { %v1577_v52 = vadd.f32 %v1576_v10, %v1575_v8  ;;  %v1583_v12 = vadd.f32 %v1582_v11, %v1581_v9 }
 0x238   :  { %v1578_v13 = vrot.slane %v1577_v52, 1  ;;  %v1584_v14 = vrot.slane %v1583_v12, 1  ;;  %v1599_v26 = vld.sshfl [vmem:[#allocation1] sm:$0xff pattern:$0x75316420] }
 0x239   :  { %v1600_v34 = vld.sshfl [vmem:[#allocation1 + $0x8] sm:$0xff pattern:$0x75316420]  ;;  %v1603_v38 = vmul.f32 %v1599_v26, %v1590_v31 }
 0x23a   :  { %v1579_v15 = vadd.f32 %v1578_v13, %v1577_v52  ;;  %v1585_v16 = vadd.f32 %v1584_v14, %v1583_v12  ;;  %v1604_v40 = vmul.f32 %v1600_v34, %v1591_v32 }
 0x23c   :  { %v1586_v17 = vmul.f32 0.125, %v1579_v15  ;;  %v1587_v18 = vmul.f32 0.125, %v1585_v16 }
 0x23e   :  { %v1605_v19 = vadd.f32 1e-05, %v1586_v17  ;;  %v1606_v21 = vadd.f32 1e-05, %v1587_v18 }
 0x240   :  { %2406 = vrsqrt.f32 %v1605_v19  ;;  %vm1613_vm12 = vweird.f32 %v1605_v19  ;;  %vm1623_vm14 = vweird.f32 %v1606_v21 }
 0x241   :  { %2408 = vrsqrt.f32 %v1606_v21 }
 0x246   :  { %v2407_v24 = vpop.eup %2406 }
 0x247   :  { %v2409_v22 = vpop.eup %2408  ;;  %v1608_v25 = vmul.f32 %v2407_v24, %v1605_v19  ;;  %vm1614_vm10 = vweird.f32 %v2407_v24 }
 0x248   :  { %v1618_v20 = vmul.f32 %v2409_v22, %v1606_v21  ;;  %vm1624_vm11 = vweird.f32 %v2409_v22  ;;  %vm1615_vm13 = vmor %vm1613_vm12, %vm1614_vm10 }
 0x249   :  { %v1609_v28 = vmul.f32 %v2407_v24, %v1608_v25  ;;  %vm1625_vm15 = vmor %vm1623_vm14, %vm1624_vm11 }
 0x24a   :  { %v1619_v29 = vmul.f32 %v2409_v22, %v1618_v20 }
 0x24b   :  { %v1610_v30 = vmul.f32 0.5, %v1609_v28 }
 0x24c   :  { %v1620_v23 = vmul.f32 0.5, %v1619_v29 }
 0x24d   :  { %v1611_v33 = vsub.f32 1.5, %v1610_v30 }
 0x24e   :  { %v1621_v35 = vsub.f32 1.5, %v1620_v23 }
 0x24f   :  { %v1612_v37 = vmul.f32 %v2407_v24, %v1611_v33 }
 0x250   :  { %v1622_v39 = vmul.f32 %v2409_v22, %v1621_v35 }
 0x251   :  { %v1616_v41 = vsel %vm1615_vm13, %v2407_v24, %v1612_v37 }
 0x252   :  { %v1626_v44 = vsel %vm1625_vm15, %v2409_v22, %v1622_v39  ;;  %v1627_v45 = vmul.f32 %v1616_v41, %v1603_v38 }
 0x253   :  { %v1628_v46 = vmul.f32 %v1626_v44, %v1604_v40 }
 0x254   :  { %v1635_v48 = vadd.f32 %v1631_v42, %v1627_v45 }
 0x255   :  { %v1636_v47 = vadd.f32 %v1632_v43, %v1628_v46 }
 0x256   :  { %v1637_v50 = vmax.f32 %v1635_v48, 0.0 }
 0x257   :  { %v1638_v49 = vmax.f32 %v1636_v47, 0.0 }
 0x259   :  { %v1641_v53 = vrot.slane %v1638_v49, 4 }
 0x25b   :  { %v1642_v54 = vsel %vm198_vm0, %v1637_v50, %v1641_v53  ;;  %v1643_v55 = vsel %vm198_vm0, %v1641_v53, %v1637_v50 }
 0x25c   :  { %v1644_v56 = vrot.slane %v1643_v55, 4  ;;  %1645 = vst [vmem:[#allocation1] ss:$2 sm:$0xff] %v1642_v54 }
 0x25e   :  { %1649 = vst [vmem:[#allocation1 + $0x10] ss:$2 sm:$0xff] %v1644_v56 }
 0x263   :  { %v1646_v57 = vld.sshfl [vmem:[#allocation1] sm:$0xff pattern:$0x75316420]  ;;  %v1647_v58 = vld.sshfl [vmem:[#allocation1 + $0x8] sm:$0xff pattern:$0x75316420] }
 0x264   :  { %v1656_v59 = vpack.c.bf16 %v1647_v58, %v1646_v57 }
 0x265   :  { %v1650_v60 = vld.sshfl [vmem:[#allocation1 + $0x10] sm:$0xff pattern:$0x75316420]  ;;  %v1651_v61 = vld.sshfl [vmem:[#allocation1 + $0x18] sm:$0xff pattern:$0x75316420] }
 0x266   :  { %v1657_v0 = vpack.c.bf16 %v1651_v61, %v1650_v60  ;;  %v1660_v51 = vrot.slane %v1656_v59, 2 }
 0x268   :  { %v1661_v1 = vrot.slane %v1657_v0, 2  ;;  %v1664_v2 = vsel %vm677_vm9, %v1656_v59, %v1660_v51 }
 0x269   :  { %1670 = vst [vmem:[%s2688_s9] sm:$0xf] %v1664_v2 }
 0x26a   :  { %v1667_v3 = vsel %vm677_vm9, %v1657_v0, %v1661_v1 }
 0x26b   :  { %1671 = vst [vmem:[%s2688_s9 + $0x4] sm:$0xf] %v1667_v3 }
 0x26c   :  { %1676 = vsyncpa [#allocation3], 1 }
 0x26d   :  { %1677 = vsyncpa [#allocation5], 1 }

// kernel: ecg_embedding_forward.9
= control target key start
LH: loop header
LB: loop body
LE: loop exit
PB: predicated region body
PF: predicated region fallthrough
CT: control target
= control target key end

     0   :  { %18 = vsyncpa [#allocation3], 0  ;;  %s2220_s0 = inlined_call_operand.vmem [shape: bf16[2,4,256], index: 0, kind: input, shape index: {}]   ;;  %s2221_s1 = inlined_call_operand.vmem [shape: bf16[2,8,128], index: 1, kind: input, shape index: {}]   ;;  %s2222_s2 = inlined_call_operand.hbm [shape: bf16[2,256,128], index: 2, kind: input, shape index: {}]   ;;  %s2223_s3 = inlined_call_operand.vmem [shape: f32[1,128], index: 3, kind: input, shape index: {}]   ;;  %s2224_s4 = inlined_call_operand.hbm [shape: bf16[3,128,128], index: 4, kind: input, shape index: {}]   ;;  %s2225_s5 = inlined_call_operand.hbm [shape: bf16[3,128,128], index: 5, kind: input, shape index: {}]   ;;  %s2226_s6 = inlined_call_operand.vmem [shape: f32[1,128], index: 6, kind: input, shape index: {}]   ;;  %s2227_s7 = inlined_call_operand.vmem [shape: f32[1,128], index: 7, kind: input, shape index: {}]   ;;  %s2228_s8 = inlined_call_operand.vmem [shape: f32[1,128], index: 8, kind: input, shape index: {}]   ;;  %s2229_s9 = inlined_call_operand.hbm [shape: bf16[3,128,128], index: 9, kind: input, shape index: {}]   ;;  %s2230_s10 = inlined_call_operand.vmem [shape: f32[1,128], index: 10, kind: input, shape index: {}]   ;;  %s2231_s11 = inlined_call_operand.vmem [shape: f32[1,128], index: 11, kind: input, shape index: {}]   ;;  %s2232_s12 = inlined_call_operand.vmem [shape: f32[1,128], index: 12, kind: input, shape index: {}]   ;;  %s2233_s13 = inlined_call_operand.vmem [shape: bf16[2,8,128], index: 13, kind: output, shape index: {}]  }
   0x1   :  { %19 = vsyncpa [#allocation5], 0 }
   0x2   :  { %20 = vsyncpa [#allocation8], 0  ;;  %s44_s27 = sshll.u32 %s2224_s4, 4  ;;  %s2074_s28 = smov [#allocation4]   ;;  %s45_s27 = int_to_ptr.hbm [resolvable:$true] %s44_s27 }
   0x3   :  { %s46_s29 = sshll.u32 %s2074_s28, 4  ;;  %s29_s15 = sshll.u32 %s2222_s2, 4  ;;  %s47_s29 = int_to_ptr.vmem [resolvable:$true] %s46_s29  ;;  %s30_s15 = int_to_ptr.hbm [resolvable:$true] %s29_s15 }
   0x4   :  { %s2075_s16 = smov 64   ;;  %s2076_s17 = smov 4  }
   0x5   :  { %52 = dma.hbm_to_vmem [thread:$0]  %s45_s27, 3072, %s47_s29, [#allocation5], %s2075_s16, %s2075_s16, %s2076_s17  }
   0x6   :  { %s2077_s18 = smov [#allocation2]   ;;  %s57_s22 = sshll.u32 %s2225_s5, 4  ;;  %s58_s22 = int_to_ptr.hbm [resolvable:$true] %s57_s22 }
   0x7   :  { %s31_s19 = sshll.u32 %s2077_s18, 4  ;;  %s76_s24 = sshll.u32 %s2229_s9, 4  ;;  %s32_s19 = int_to_ptr.vmem [resolvable:$true] %s31_s19  ;;  %s77_s24 = int_to_ptr.hbm [resolvable:$true] %s76_s24 }
   0x8   :  { %37 = dma.hbm_to_vmem [thread:$0]  %s30_s15, 4096, %s32_s19, [#allocation3], %s2075_s16, %s2075_s16, %s2076_s17  }
   0x9   :  { %s2078_s25 = smov [#allocation6]   ;;  %s2079_s2 = smov [#allocation7]  }
   0xa   :  { %s59_s26 = sshll.u32 %s2078_s25, 4  ;;  %s78_s27 = sshll.u32 %s2079_s2, 4  ;;  %s60_s26 = int_to_ptr.vmem [resolvable:$true] %s59_s26  ;;  %s79_s27 = int_to_ptr.vmem [resolvable:$true] %s78_s27 }
   0xb   :  { %65 = dma.hbm_to_vmem [thread:$0]  %s58_s22, 3072, %s60_s26, [#allocation5], %s2075_s16, %s2075_s16, %s2076_s17  }
   0xc   :  { %84 = dma.hbm_to_vmem [thread:$0]  %s77_s24, 3072, %s79_s27, [#allocation8], %s2075_s16, %s2075_s16, %s2076_s17  }
   0xd   :  { %2068 = dma.done.wait [#allocation3], 4096  }
   0xe   :  { %2069 = vsyncadd [#allocation3], 4294963200 }
   0xf   :  { %2070 = dma.done.wait [#allocation5], 6144  }
  0x10   :  { %2071 = vsyncadd [#allocation5], 4294961152 }
  0x11   :  { %2072 = dma.done.wait [#allocation8], 3072  }
  0x12   :  { %2073 = vsyncadd [#allocation8], 4294964224  ;;  %v1852_v0 = vld [vmem:[#allocation2 + $0x38] sm:$0xff]  ;;  %v1851_v4 = vld [vmem:[#allocation2 + $0x30] sm:$0xff]  ;;  %vm477_vm0 = vcmask 1040384   ;;  %vm775_vm1 = vcmask 1046528  }
  0x13   :  { %v1868_v1 = vld [vmem:[#allocation2 + $0xb8] sm:$0xff]  ;;  %250 = vmatpush.bf16.msra.mxu0 %v1852_v0  ;;  %v1867_v5 = vld [vmem:[#allocation2 + $0xb0] sm:$0xff]  ;;  %v1850_v8 = vld [vmem:[#allocation2 + $0x28] sm:$0xff] }
  0x14   :  { %v1876_v2 = vld [vmem:[#allocation2 + $0xf8] sm:$0xff]  ;;  %412 = vmatpush.bf16.msra.mxu2 %v1868_v1  ;;  %v1875_v6 = vld [vmem:[#allocation2 + $0xf0] sm:$0xff]  ;;  %v1866_v9 = vld [vmem:[#allocation2 + $0xa8] sm:$0xff] }
  0x15   :  { %v1860_v3 = vld [vmem:[#allocation2 + $0x78] sm:$0xff]  ;;  %425 = vmatpush.bf16.msra.mxu3 %v1876_v2  ;;  %v1859_v7 = vld [vmem:[#allocation2 + $0x70] sm:$0xff]  ;;  %v1874_v10 = vld [vmem:[#allocation2 + $0xe8] sm:$0xff] }
  0x16   :  { %263 = vmatpush.bf16.msra.mxu1 %v1860_v3  ;;  %v1858_v11 = vld [vmem:[#allocation2 + $0x68] sm:$0xff]  ;;  %v1849_v12 = vld [vmem:[#allocation2 + $0x20] sm:$0xff]  ;;  %v107_v14 = vld [vmem:[%s2220_s0] sm:$0xf] }
  0x17   :  { %251 = vmatpush.bf16.msra.mxu0 %v1851_v4  ;;  %v1865_v13 = vld [vmem:[#allocation2 + $0xa0] sm:$0xff]  ;;  %v108_v17 = vld [vmem:[%s2220_s0 + $0x4] sm:$0xf]  ;;  %146 = vst [vmem:[#allocation1] ss:$4 sm:$0xff] %v107_v14  ;;  %v1847_v22 = vld [vmem:[#allocation2 + $0x10] sm:$0xff] }
  0x18   :  { %413 = vmatpush.bf16.msra.mxu2 %v1867_v5  ;;  %v1873_v15 = vld [vmem:[#allocation2 + $0xe0] sm:$0xff]  ;;  %149 = vst [vmem:[#allocation1 + $0x1] ss:$4 sm:$0xff] %v108_v17  ;;  %v1848_v18 = vld [vmem:[#allocation2 + $0x18] sm:$0xff]  ;;  %v1863_v23 = vld [vmem:[#allocation2 + $0x90] sm:$0xff] }
  0x19   :  { %426 = vmatpush.bf16.msra.mxu3 %v1875_v6  ;;  %v1857_v16 = vld [vmem:[#allocation2 + $0x60] sm:$0xff]  ;;  %v1864_v19 = vld [vmem:[#allocation2 + $0x98] sm:$0xff]  ;;  %v1871_v24 = vld [vmem:[#allocation2 + $0xd0] sm:$0xff] }
  0x1a   :  { %264 = vmatpush.bf16.msra.mxu1 %v1859_v7  ;;  %v1872_v20 = vld [vmem:[#allocation2 + $0xd8] sm:$0xff]  ;;  %v1855_v25 = vld [vmem:[#allocation2 + $0x50] sm:$0xff]  ;;  %v1846_v28 = vld [vmem:[#allocation2 + $0x8] sm:$0xff] }
  0x1b   :  { %252 = vmatpush.bf16.msra.mxu0 %v1850_v8  ;;  %v1856_v21 = vld [vmem:[#allocation2 + $0x58] sm:$0xff]  ;;  %v1862_v29 = vld [vmem:[#allocation2 + $0x88] sm:$0xff]  ;;  %v1845_v32 = vld [vmem:[#allocation2] sm:$0xff] }
  0x1c   :  { %414 = vmatpush.bf16.msra.mxu2 %v1866_v9  ;;  %v1870_v30 = vld [vmem:[#allocation2 + $0xc8] sm:$0xff]  ;;  %v1861_v33 = vld [vmem:[#allocation2 + $0x80] sm:$0xff]  ;;  %v1885_v36 = vld [vmem:[#allocation4 + $0x38] sm:$0xff] }
  0x1d   :  { %427 = vmatpush.bf16.msra.mxu3 %v1874_v10  ;;  %v1854_v31 = vld [vmem:[#allocation2 + $0x48] sm:$0xff]  ;;  %v1869_v34 = vld [vmem:[#allocation2 + $0xc0] sm:$0xff]  ;;  %v1893_v37 = vld [vmem:[#allocation4 + $0x78] sm:$0xff] }
  0x1e   :  { %265 = vmatpush.bf16.msra.mxu1 %v1858_v11  ;;  %v1853_v35 = vld [vmem:[#allocation2 + $0x40] sm:$0xff]  ;;  %v1901_v40 = vld [vmem:[#allocation4 + $0xb8] sm:$0xff]  ;;  %v1884_v42 = vld [vmem:[#allocation4 + $0x30] sm:$0xff] }
  0x1f   :  { %253 = vmatpush.bf16.msra.mxu0 %v1849_v12  ;;  %v150_v26 = vld.sshfl [vmem:[#allocation1] sm:$0xff pattern:$0x73625140]  ;;  %v151_v27 = vld.sshfl [vmem:[#allocation1 + $0x8] sm:$0xff pattern:$0x73625140] }
  0x20   :  { %415 = vmatpush.bf16.msra.mxu2 %v1865_v13  ;;  %309 = vst [vmem:[#allocation1] ss:$4 sm:$0xff] %v107_v14  ;;  %v1909_v41 = vld [vmem:[#allocation6 + $0x38] sm:$0xff]  ;;  %v1892_v43 = vld [vmem:[#allocation4 + $0x70] sm:$0xff]  ;;  %v1883_v44 = vld [vmem:[#allocation4 + $0x28] sm:$0xff] }
  0x21   :  { %428 = vmatpush.bf16.msra.mxu3 %v1873_v15  ;;  %311 = vst [vmem:[#allocation1 + $0x1] ss:$4 sm:$0xff] %v108_v17  ;;  %v1891_v45 = vld [vmem:[#allocation4 + $0x68] sm:$0xff]  ;;  %v1882_v46 = vld [vmem:[#allocation4 + $0x20] sm:$0xff]  ;;  %v1881_v48 = vld [vmem:[#allocation4 + $0x18] sm:$0xff] }
  0x22   :  { %266 = vmatpush.bf16.msra.mxu1 %v1857_v16  ;;  %v1890_v47 = vld [vmem:[#allocation4 + $0x60] sm:$0xff]  ;;  %v1889_v49 = vld [vmem:[#allocation4 + $0x58] sm:$0xff]  ;;  %v1900_v50 = vld [vmem:[#allocation4 + $0xb0] sm:$0xff] }
  0x23   :  { %254 = vmatpush.bf16.msra.mxu0 %v1848_v18  ;;  %v1908_v51 = vld [vmem:[#allocation6 + $0x30] sm:$0xff]  ;;  %v1899_v54 = vld [vmem:[#allocation4 + $0xa8] sm:$0xff]  ;;  %v1898_v58 = vld [vmem:[#allocation4 + $0xa0] sm:$0xff] }
  0x24   :  { %416 = vmatpush.bf16.msra.mxu2 %v1864_v19  ;;  %v1880_v52 = vld [vmem:[#allocation4 + $0x10] sm:$0xff]  ;;  %v1907_v55 = vld [vmem:[#allocation6 + $0x28] sm:$0xff]  ;;  %v1906_v59 = vld [vmem:[#allocation6 + $0x20] sm:$0xff] }
  0x25   :  { %429 = vmatpush.bf16.msra.mxu3 %v1872_v20  ;;  %v1888_v53 = vld [vmem:[#allocation4 + $0x50] sm:$0xff]  ;;  %v1879_v56 = vld [vmem:[#allocation4 + $0x8] sm:$0xff]  ;;  %v1878_v60 = vld [vmem:[#allocation4] sm:$0xff] }
  0x26   :  { %267 = vmatpush.bf16.msra.mxu1 %v1856_v21  ;;  %v1887_v57 = vld [vmem:[#allocation4 + $0x48] sm:$0xff]  ;;  %v1886_v61 = vld [vmem:[#allocation4 + $0x40] sm:$0xff]  ;;  %v1897_v62 = vld [vmem:[#allocation4 + $0x98] sm:$0xff] }
  0x27   :  { %255 = vmatpush.bf16.msra.mxu0 %v1847_v22  ;;  %v1905_v63 = vld [vmem:[#allocation6 + $0x18] sm:$0xff]  ;;  %v1896_v2 = vld [vmem:[#allocation4 + $0x90] sm:$0xff]  ;;  %v1895_v6 = vld [vmem:[#allocation4 + $0x88] sm:$0xff] }
  0x28   :  { %417 = vmatpush.bf16.msra.mxu2 %v1863_v23  ;;  %v312_v38 = vld.sshfl [vmem:[#allocation1] sm:$0xff pattern:$0x73625140]  ;;  %v313_v39 = vld.sshfl [vmem:[#allocation1 + $0x8] sm:$0xff pattern:$0x73625140] }
  0x29   :  { %430 = vmatpush.bf16.msra.mxu3 %v1871_v24  ;;  %v1917_v0 = vld [vmem:[#allocation6 + $0x78] sm:$0xff]  ;;  %v1904_v3 = vld [vmem:[#allocation6 + $0x10] sm:$0xff]  ;;  %v1903_v7 = vld [vmem:[#allocation6 + $0x8] sm:$0xff] }
  0x2a   :  { %268 = vmatpush.bf16.msra.mxu1 %v1855_v25  ;;  %v1925_v1 = vld [vmem:[#allocation6 + $0xb8] sm:$0xff]  ;;  %v1916_v4 = vld [vmem:[#allocation6 + $0x70] sm:$0xff]  ;;  %v1915_v8 = vld [vmem:[#allocation6 + $0x68] sm:$0xff] }
  0x2b   :  { %256 = vmatpush.bf16.msra.mxu0 %v1846_v28  ;;  %v1924_v5 = vld [vmem:[#allocation6 + $0xb0] sm:$0xff]  ;;  %v1923_v9 = vld [vmem:[#allocation6 + $0xa8] sm:$0xff]  ;;  %v1894_v10 = vld [vmem:[#allocation4 + $0x80] sm:$0xff] }
  0x2c   :  { %418 = vmatpush.bf16.msra.mxu2 %v1862_v29  ;;  %v1902_v11 = vld [vmem:[#allocation6] sm:$0xff]  ;;  %v1961_v14 = vld [vmem:[%s2223_s3] ss:$0 sm:$0xff]  ;;  %v1912_v23 = vld [vmem:[#allocation6 + $0x50] sm:$0xff] }
  0x2d   :  { %431 = vmatpush.bf16.msra.mxu3 %v1870_v30  ;;  %v1914_v12 = vld [vmem:[#allocation6 + $0x60] sm:$0xff]  ;;  %v2174_v18 = vld [vmem:[%s2221_s1] sm:$0xff]  ;;  %v1920_v24 = vld [vmem:[#allocation6 + $0x90] sm:$0xff] }
  0x2e   :  { %269 = vmatpush.bf16.msra.mxu1 %v1854_v31  ;;  %v1922_v13 = vld [vmem:[#allocation6 + $0xa0] sm:$0xff]  ;;  %v1913_v19 = vld [vmem:[#allocation6 + $0x58] sm:$0xff] }
  0x2f   :  { %257 = vmatpush.bf16.msra.mxu0 %v1845_v32  ;;  %v1921_v20 = vld [vmem:[#allocation6 + $0x98] sm:$0xff] }
  0x30   :  { %419 = vmatpush.bf16.msra.mxu2 %v1861_v33 }
  0x31   :  { %432 = vmatpush.bf16.msra.mxu3 %v1869_v34 }
  0x32   :  { %270 = vmatpush.bf16.msra.mxu1 %v1853_v35  ;;  %258 = vmatmul.bf16.vlgmr.msra.gmra.mxu0 %v150_v26  ;;  %v1911_v35 = vld [vmem:[#allocation6 + $0x48] sm:$0xff] }
  0x33   :  { %587 = vmatpush.bf16.msrb.mxu0 %v1885_v36  ;;  %420 = vmatmul.bf16.vlgmr.msra.gmra.mxu2 %v312_v38  ;;  %v1919_v36 = vld [vmem:[#allocation6 + $0x88] sm:$0xff] }
  0x34   :  { %433 = vmatmul.bf16.vlgmr.msra.gmra.mxu3 %v313_v39  ;;  %745 = vmatpush.bf16.msrb.mxu2 %v1901_v40 }
  0x35   :  { %271 = vmatmul.bf16.vlgmr.msra.gmra.mxu1 %v151_v27  ;;  %850 = vmatpush.bf16.msrb.mxu3 %v1909_v41 }
  0x36   :  { %666 = vmatpush.bf16.msrb.mxu1 %v1893_v37 }
  0x37   :  { %588 = vmatpush.bf16.msrb.mxu0 %v1884_v42 }
  0x38   :  { %746 = vmatpush.bf16.msrb.mxu2 %v1900_v50 }
  0x39   :  { %851 = vmatpush.bf16.msrb.mxu3 %v1908_v51 }
  0x3a   :  { %667 = vmatpush.bf16.msrb.mxu1 %v1892_v43 }
  0x3b   :  { %589 = vmatpush.bf16.msrb.mxu0 %v1883_v44 }
  0x3c   :  { %747 = vmatpush.bf16.msrb.mxu2 %v1899_v54  ;;  %v1910_v54 = vld [vmem:[#allocation6 + $0x40] sm:$0xff] }
  0x3d   :  { %852 = vmatpush.bf16.msrb.mxu3 %v1907_v55  ;;  %v1918_v55 = vld [vmem:[#allocation6 + $0x80] sm:$0xff] }
  0x3e   :  { %668 = vmatpush.bf16.msrb.mxu1 %v1891_v45 }
  0x3f   :  { %590 = vmatpush.bf16.msrb.mxu0 %v1882_v46 }
  0x40   :  { %748 = vmatpush.bf16.msrb.mxu2 %v1898_v58 }
  0x41   :  { %853 = vmatpush.bf16.msrb.mxu3 %v1906_v59 }
  0x42   :  { %669 = vmatpush.bf16.msrb.mxu1 %v1890_v47 }
  0x43   :  { %591 = vmatpush.bf16.msrb.mxu0 %v1881_v48 }
  0x44   :  { %749 = vmatpush.bf16.msrb.mxu2 %v1897_v62 }
  0x45   :  { %854 = vmatpush.bf16.msrb.mxu3 %v1905_v63 }
  0x46   :  { %670 = vmatpush.bf16.msrb.mxu1 %v1889_v49 }
  0x47   :  { %592 = vmatpush.bf16.msrb.mxu0 %v1880_v52 }
  0x48   :  { %750 = vmatpush.bf16.msrb.mxu2 %v1896_v2 }
  0x49   :  { %855 = vmatpush.bf16.msrb.mxu3 %v1904_v3 }
  0x4a   :  { %671 = vmatpush.bf16.msrb.mxu1 %v1888_v53 }
  0x4b   :  { %593 = vmatpush.bf16.msrb.mxu0 %v1879_v56 }
  0x4c   :  { %751 = vmatpush.bf16.msrb.mxu2 %v1895_v6 }
  0x4d   :  { %856 = vmatpush.bf16.msrb.mxu3 %v1903_v7 }
  0x4e   :  { %672 = vmatpush.bf16.msrb.mxu1 %v1887_v57 }
  0x4f   :  { %594 = vmatpush.bf16.msrb.mxu0 %v1878_v60 }
  0x50   :  { %752 = vmatpush.bf16.msrb.mxu2 %v1894_v10 }
  0x51   :  { %857 = vmatpush.bf16.msrb.mxu3 %v1902_v11 }
  0x52   :  { %673 = vmatpush.bf16.msrb.mxu1 %v1886_v61 }
  0x53   :  { %929 = vmatpush.bf16.msra.mxu0 %v1917_v0 }
  0x54   :  { %858 = vmatmul.bf16.vlgmr.msrb.gmra.mxu3 %v2174_v18 }
  0x56   :  { %1008 = vmatpush.bf16.msra.mxu1 %v1925_v1 }
  0x57   :  { %930 = vmatpush.bf16.msra.mxu0 %v1916_v4 }
  0x5a   :  { %1009 = vmatpush.bf16.msra.mxu1 %v1924_v5 }
  0x5b   :  { %931 = vmatpush.bf16.msra.mxu0 %v1915_v8 }
  0x5e   :  { %1010 = vmatpush.bf16.msra.mxu1 %v1923_v9 }
  0x5f   :  { %932 = vmatpush.bf16.msra.mxu0 %v1914_v12 }
  0x62   :  { %1011 = vmatpush.bf16.msra.mxu1 %v1922_v13 }
  0x63   :  { %933 = vmatpush.bf16.msra.mxu0 %v1913_v19 }
  0x66   :  { %1012 = vmatpush.bf16.msra.mxu1 %v1921_v20 }
  0x67   :  { %934 = vmatpush.bf16.msra.mxu0 %v1912_v23 }
  0x6a   :  { %1013 = vmatpush.bf16.msra.mxu1 %v1920_v24 }
  0x6b   :  { %935 = vmatpush.bf16.msra.mxu0 %v1911_v35 }
  0x6e   :  { %1014 = vmatpush.bf16.msra.mxu1 %v1919_v36 }
  0x6f   :  { %936 = vmatpush.bf16.msra.mxu0 %v1910_v54  ;;  %v1941_v54 = vld [vmem:[#allocation7 + $0x78] sm:$0xff] }
  0x70   :  { %1248 = vmatpush.bf16.msra.mxu3 %v1941_v54 }
  0x72   :  { %1015 = vmatpush.bf16.msra.mxu1 %v1918_v55  ;;  %v1949_v55 = vld [vmem:[#allocation7 + $0xb8] sm:$0xff] }
  0xaf   :  { %v259_v15 = vpop.f32.mrf.mxu0 }
  0xb0   :  { %v260_v16 = vadd.f32 %v1961_v14, %v259_v15 }
  0xb2   :  { %v272_v17 = vpop.f32.mrf.mxu1 }
  0xb3   :  { %v273_v21 = vadd.f32 %v272_v17, %v260_v16 }
  0xb5   :  { %v439_v28 = vrot.slane %v273_v21, 1  ;;  %v442_v31 = vrot.slane %v273_v21, 4  ;;  %v443_v32 = vrot.slane %v273_v21, 5  ;;  %v444_v33 = vrot.slane %v273_v21, 6 }
  0xb6   :  { %v421_v22 = vpop.f32.mrf.mxu2  ;;  %v445_v34 = vrot.slane %v273_v21, 7  ;;  %v440_v45 = vrot.slane %v273_v21, 2  ;;  %v441_v56 = vrot.slane %v273_v21, 3 }
  0xb7   :  { %v422_v25 = vadd.f32 %v1961_v14, %v421_v22  ;;  %v434_v26 = vpop.f32.mrf.mxu3  ;;  %v261_v27 = vpop.f32.mrf.mxu0 }
  0xb9   :  { %v435_v29 = vadd.f32 %v434_v26, %v422_v25 }
  0xba   :  { %v274_v30 = vpop.f32.mrf.mxu1 }
  0xbb   :  { %v454_v37 = vrot.slane %v435_v29, 1  ;;  %v455_v38 = vrot.slane %v435_v29, 2  ;;  %v456_v39 = vrot.slane %v435_v29, 3  ;;  %v457_v40 = vrot.slane %v435_v29, 4 }
  0xbc   :  { %v458_v41 = vrot.slane %v435_v29, 5  ;;  %v459_v42 = vrot.slane %v435_v29, 6  ;;  %v460_v43 = vrot.slane %v435_v29, 7  ;;  %v461_v44 = vperm.slane %v435_v29, 0 }
  0xbd   :  { %v462_v46 = vperm.slane %v454_v37, 0  ;;  %v463_v47 = vperm.slane %v455_v38, 0  ;;  %v465_v48 = vperm.slane %v457_v40, 0  ;;  %v464_v57 = vperm.slane %v456_v39, 0 }
  0xbe   :  { %v466_v49 = vperm.slane %v458_v41, 0  ;;  %v467_v50 = vperm.slane %v459_v42, 0  ;;  %v468_v51 = vperm.slane %v460_v43, 0  ;;  %v478_v52 = vsel %vm477_vm0, %v273_v21, %v461_v44  ;;  %v423_v53 = vpop.f32.mrf.mxu2 }
  0xbf   :  { %v482_v58 = vsel %vm477_vm0, %v442_v31, %v465_v48  ;;  %494 = vst [vmem:[#allocation1] ss:$4 sm:$0xff] %v478_v52  ;;  %v436_v59 = vpop.f32.mrf.mxu3  ;;  %v479_v63 = vsel %vm477_vm0, %v439_v28, %v462_v46  ;;  %v480_v0 = vsel %vm477_vm0, %v440_v45, %v463_v47  ;;  %v481_v1 = vsel %vm477_vm0, %v441_v56, %v464_v57  ;;  %v1962_v45 = vld [vmem:[%s2226_s6] ss:$0 sm:$0xff] }
  0xc0   :  { %v483_v60 = vsel %vm477_vm0, %v443_v32, %v466_v49  ;;  %v484_v61 = vsel %vm477_vm0, %v444_v33, %v467_v50  ;;  %v485_v62 = vsel %vm477_vm0, %v445_v34, %v468_v51  ;;  %503 = vst [vmem:[#allocation1 + $0x20] ss:$4 sm:$0xff] %v482_v58  ;;  %v1933_v53 = vld [vmem:[#allocation7 + $0x38] sm:$0xff]  ;;  %v1932_v58 = vld [vmem:[#allocation7 + $0x30] sm:$0xff] }
  0xc1   :  { %505 = vst [vmem:[#allocation1 + $0x21] ss:$4 sm:$0xff] %v483_v60  ;;  %1169 = vmatpush.bf16.msra.mxu2 %v1933_v53  ;;  %v1940_v59 = vld [vmem:[#allocation7 + $0x70] sm:$0xff] }
  0xc2   :  { %507 = vst [vmem:[#allocation1 + $0x22] ss:$4 sm:$0xff] %v484_v61  ;;  %v1948_v60 = vld [vmem:[#allocation7 + $0xb0] sm:$0xff]  ;;  %1249 = vmatpush.bf16.msra.mxu3 %v1940_v59 }
  0xc3   :  { %509 = vst [vmem:[#allocation1 + $0x23] ss:$4 sm:$0xff] %v485_v62 }
  0xc4   :  { %496 = vst [vmem:[#allocation1 + $0x1] ss:$4 sm:$0xff] %v479_v63  ;;  %v1931_v63 = vld [vmem:[#allocation7 + $0x28] sm:$0xff] }
  0xc5   :  { %498 = vst [vmem:[#allocation1 + $0x2] ss:$4 sm:$0xff] %v480_v0  ;;  %1170 = vmatpush.bf16.msra.mxu2 %v1932_v58  ;;  %v1939_v0 = vld [vmem:[#allocation7 + $0x68] sm:$0xff] }
  0xc6   :  { %500 = vst [vmem:[#allocation1 + $0x3] ss:$4 sm:$0xff] %v481_v1  ;;  %v1947_v1 = vld [vmem:[#allocation7 + $0xa8] sm:$0xff]  ;;  %1250 = vmatpush.bf16.msra.mxu3 %v1939_v0 }
  0xc9   :  { %1171 = vmatpush.bf16.msra.mxu2 %v1931_v63 }
  0xca   :  { %v510_v2 = vld.sshfl [vmem:[#allocation1 + $0x20] sm:$0xff pattern:$0x73625140] }
  0xcb   :  { %v514_v3 = vpack.c.bf16 %v510_v2, %v510_v2 }
  0xcd   :  { %v501_v4 = vld.sshfl [vmem:[#allocation1] sm:$0xff pattern:$0x73625140]  ;;  %v536_v6 = vunpack.c.l.b16 %v514_v3 }
  0xce   :  { %v513_v5 = vpack.c.bf16 %v501_v4, %v501_v4 }
  0xd0   :  { %v535_v7 = vunpack.c.l.b16 %v513_v5  ;;  %v1930_v5 = vld [vmem:[#allocation7 + $0x20] sm:$0xff] }
  0xd1   :  { %1172 = vmatpush.bf16.msra.mxu2 %v1930_v5 }
  0xd2   :  { %v537_v8 = vpack.c.b16 %v536_v6, %v535_v7  ;;  %v1938_v6 = vld [vmem:[#allocation7 + $0x60] sm:$0xff] }
  0xd3   :  { %v1946_v7 = vld [vmem:[#allocation7 + $0xa0] sm:$0xff]  ;;  %1251 = vmatpush.bf16.msra.mxu3 %v1938_v6 }
  0xd4   :  { %595 = vmatmul.bf16.vlgmr.msrb.gmra.mxu0 %v537_v8  ;;  %674 = vmatmul.bf16.vlgmr.msrb.gmra.mxu1 %v537_v8 }
  0xd5   :  { %753 = vmatmul.bf16.vlgmr.msrb.gmra.mxu2 %v537_v8  ;;  %1327 = vmatpush.bf16.msrb.mxu0 %v1949_v55 }
  0xd7   :  { %v859_v12 = vpop.f32.mrf.mxu3 }
  0xd8   :  { %v1024_v15 = vrot.slane %v859_v12, 7  ;;  %v1937_v12 = vld [vmem:[#allocation7 + $0x58] sm:$0xff] }
  0xd9   :  { %1328 = vmatpush.bf16.msrb.mxu0 %v1948_v60  ;;  %1252 = vmatpush.bf16.msra.mxu3 %v1937_v12 }
  0xda   :  { %v1028_v21 = vsel %vm477_vm0, 0.0, %v1024_v15 }
  0xdd   :  { %1329 = vmatpush.bf16.msrb.mxu0 %v1947_v1 }
  0xdf   :  { %v861_v20 = vpop.f32.mrf.mxu3 }
  0xe0   :  { %v1025_v26 = vrot.slane %v861_v20, 7 }
  0xe1   :  { %1330 = vmatpush.bf16.msrb.mxu0 %v1946_v7 }
  0xe2   :  { %v1029_v35 = vsel %vm477_vm0, 0.0, %v1025_v26  ;;  %v1926_v26 = vld [vmem:[#allocation7] sm:$0xff] }
  0xe4   :  { %937 = vmatmul.bf16.vlgmr.msra.gmra.mxu0 %v2174_v18  ;;  %1016 = vmatmul.bf16.vlgmr.msra.gmra.mxu1 %v2174_v18 }
 0x151   :  { %v596_v9 = vpop.f32.mrf.mxu0  ;;  %v675_v10 = vpop.f32.mrf.mxu1 }
 0x152   :  { %v761_v19 = vrot.slane %v596_v9, 7 }
 0x154   :  { %v765_v27 = vsel %vm477_vm0, 0.0, %v761_v19  ;;  %v1944_v19 = vld [vmem:[#allocation7 + $0x90] sm:$0xff] }
 0x155   :  { %v767_v32 = vadd.f32 %v765_v27, %v675_v10  ;;  %v1942_v27 = vld [vmem:[#allocation7 + $0x80] sm:$0xff] }
 0x158   :  { %v754_v11 = vpop.f32.mrf.mxu2 }
 0x159   :  { %v598_v13 = vpop.f32.mrf.mxu0  ;;  %v677_v14 = vpop.f32.mrf.mxu1  ;;  %v771_v24 = vrot.slane %v754_v11, 1  ;;  %v1929_v11 = vld [vmem:[#allocation7 + $0x18] sm:$0xff] }
 0x15a   :  { %v762_v25 = vrot.slane %v598_v13, 7  ;;  %v1945_v13 = vld [vmem:[#allocation7 + $0x98] sm:$0xff]  ;;  %1173 = vmatpush.bf16.msra.mxu2 %v1929_v11 }
 0x15b   :  { %v776_v30 = vsel %vm775_vm1, %v771_v24, 0.0  ;;  %1331 = vmatpush.bf16.msrb.mxu0 %v1945_v13 }
 0x15c   :  { %v766_v31 = vsel %vm477_vm0, 0.0, %v762_v25  ;;  %v778_v40 = vadd.f32 %v776_v30, %v767_v32 }
 0x15d   :  { %v768_v41 = vadd.f32 %v766_v31, %v677_v14 }
 0x15f   :  { %1332 = vmatpush.bf16.msrb.mxu0 %v1944_v19 }
 0x160   :  { %v756_v23 = vpop.f32.mrf.mxu2 }
 0x161   :  { %v938_v16 = vpop.f32.mrf.mxu0  ;;  %v1017_v17 = vpop.f32.mrf.mxu1  ;;  %v772_v28 = vrot.slane %v756_v23, 1  ;;  %v1943_v23 = vld [vmem:[#allocation7 + $0x88] sm:$0xff] }
 0x162   :  { %v1034_v22 = vrot.slane %v1017_v17, 1  ;;  %v1030_v18 = vadd.f32 %v1028_v21, %v938_v16  ;;  %v1928_v16 = vld [vmem:[#allocation7 + $0x10] sm:$0xff]  ;;  %v1927_v21 = vld [vmem:[#allocation7 + $0x8] sm:$0xff] }
 0x163   :  { %v777_v37 = vsel %vm775_vm1, %v772_v28, 0.0  ;;  %v1936_v17 = vld [vmem:[#allocation7 + $0x50] sm:$0xff]  ;;  %1174 = vmatpush.bf16.msra.mxu2 %v1928_v16  ;;  %1333 = vmatpush.bf16.msrb.mxu0 %v1943_v23 }
 0x164   :  { %v1038_v29 = vsel %vm775_vm1, %v1034_v22, 0.0  ;;  %v779_v43 = vadd.f32 %v777_v37, %v768_v41  ;;  %1253 = vmatpush.bf16.msra.mxu3 %v1936_v17  ;;  %v1935_v22 = vld [vmem:[#allocation7 + $0x48] sm:$0xff] }
 0x165   :  { %v1040_v33 = vadd.f32 %v1038_v29, %v1030_v18  ;;  %v1934_v18 = vld [vmem:[#allocation7 + $0x40] sm:$0xff] }
 0x167   :  { %v1042_v44 = vadd.f32 %v1040_v33, %v778_v40  ;;  %1175 = vmatpush.bf16.msra.mxu2 %v1927_v21  ;;  %1334 = vmatpush.bf16.msrb.mxu0 %v1942_v27  ;;  %v1964_v40 = vld [vmem:[%s2228_s8] ss:$0 sm:$0xff] }
 0x168   :  { %1254 = vmatpush.bf16.msra.mxu3 %v1935_v22 }
 0x169   :  { %v940_v34 = vpop.f32.mrf.mxu0  ;;  %v1019_v36 = vpop.f32.mrf.mxu1  ;;  %v1048_v48 = vadd.f32 %v1962_v45, %v1042_v44 }
 0x16a   :  { %v1031_v38 = vadd.f32 %v1029_v35, %v940_v34  ;;  %v1035_v39 = vrot.slane %v1019_v36, 1  ;;  %v1963_v35 = vld [vmem:[%s2227_s7] ss:$0 sm:$0xff] }
 0x16b   :  { %1176 = vmatpush.bf16.msra.mxu2 %v1926_v26 }
 0x16c   :  { %v1039_v42 = vsel %vm775_vm1, %v1035_v39, 0.0  ;;  %1255 = vmatpush.bf16.msra.mxu3 %v1934_v18 }
 0x16d   :  { %v1041_v46 = vadd.f32 %v1039_v42, %v1031_v38 }
 0x16f   :  { %v1043_v47 = vadd.f32 %v1041_v46, %v779_v43 }
 0x171   :  { %v1049_v49 = vadd.f32 %v1962_v45, %v1043_v47 }
 0x173   :  { %v1050_v50 = vadd.f32 %v1049_v49, %v1048_v48 }
 0x175   :  { %v1051_v51 = vrot.slane %v1050_v50, 4 }
 0x177   :  { %v1052_v52 = vadd.f32 %v1051_v51, %v1050_v50 }
 0x179   :  { %v1053_v56 = vrot.slane %v1052_v52, 2 }
 0x17b   :  { %v1054_v57 = vadd.f32 %v1053_v56, %v1052_v52 }
 0x17d   :  { %v1055_v61 = vrot.slane %v1054_v57, 1 }
 0x17f   :  { %v1056_v62 = vadd.f32 %v1055_v61, %v1054_v57 }
 0x181   :  { %v1057_v2 = vmul.f32 0.0625, %v1056_v62 }
 0x183   :  { %v1058_v3 = vsub.f32 %v1048_v48, %v1057_v2  ;;  %v1059_v4 = vsub.f32 %v1049_v49, %v1057_v2 }
 0x185   :  { %v1060_v8 = vmul.f32 %v1058_v3, %v1058_v3  ;;  %v1061_v9 = vmul.f32 %v1059_v4, %v1059_v4  ;;  %v1074_v38 = vmul.f32 %v1963_v35, %v1058_v3  ;;  %v1075_v39 = vmul.f32 %v1963_v35, %v1059_v4  ;;  %v1965_v4 = vld [vmem:[%s2230_s10] ss:$0 sm:$0xff] }
 0x186   :  { %v1966_v35 = vld [vmem:[%s2231_s11] ss:$0 sm:$0xff] }
 0x187   :  { %v1062_v10 = vadd.f32 %v1061_v9, %v1060_v8 }
 0x189   :  { %v1063_v14 = vrot.slane %v1062_v10, 4 }
 0x18b   :  { %v1064_v15 = vadd.f32 %v1063_v14, %v1062_v10 }
 0x18d   :  { %v1065_v20 = vrot.slane %v1064_v15, 2 }
 0x18f   :  { %v1066_v24 = vadd.f32 %v1065_v20, %v1064_v15 }
 0x191   :  { %v1067_v25 = vrot.slane %v1066_v24, 1 }
 0x193   :  { %v1068_v28 = vadd.f32 %v1067_v25, %v1066_v24 }
 0x195   :  { %v1069_v29 = vmul.f32 0.0625, %v1068_v28 }
 0x197   :  { %v1076_v30 = vadd.f32 1e-05, %v1069_v29 }
 0x199   :  { %1968 = vrsqrt.f32 %v1076_v30  ;;  %vm1083_vm3 = vweird.f32 %v1076_v30 }
 0x19f   :  { %v1969_v31 = vpop.eup %1968 }
 0x1a0   :  { %v1078_v32 = vmul.f32 %v1969_v31, %v1076_v30  ;;  %vm1084_vm2 = vweird.f32 %v1969_v31 }
 0x1a1   :  { %vm1085_vm4 = vmor %vm1083_vm3, %vm1084_vm2 }
 0x1a2   :  { %v1079_v33 = vmul.f32 %v1969_v31, %v1078_v32 }
 0x1a4   :  { %v1080_v34 = vmul.f32 0.5, %v1079_v33 }
 0x1a6   :  { %v1081_v36 = vsub.f32 1.5, %v1080_v34 }
 0x1a8   :  { %v1082_v37 = vmul.f32 %v1969_v31, %v1081_v36 }
 0x1aa   :  { %v1086_v41 = vsel %vm1085_vm4, %v1969_v31, %v1082_v37 }
 0x1ab   :  { %v1088_v42 = vmul.f32 %v1086_v41, %v1075_v39  ;;  %v1087_v43 = vmul.f32 %v1086_v41, %v1074_v38 }
 0x1ad   :  { %v1093_v44 = vadd.f32 %v1964_v40, %v1087_v43  ;;  %v1094_v45 = vadd.f32 %v1964_v40, %v1088_v42  ;;  %v1967_v40 = vld [vmem:[%s2232_s12] ss:$0 sm:$0xff] }
 0x1af   :  { %v1095_v46 = vmax.f32 %v1093_v44, 0.0  ;;  %v1096_v47 = vmax.f32 %v1094_v45, 0.0 }
 0x1b1   :  { %v1097_v48 = vpack.c.bf16 %v1095_v46, %v1095_v46  ;;  %v1098_v49 = vpack.c.bf16 %v1096_v47, %v1096_v47 }
 0x1b3   :  { %v1117_v50 = vunpack.c.l.b16 %v1097_v48  ;;  %v1118_v51 = vunpack.c.l.b16 %v1098_v49 }
 0x1b5   :  { %v1119_v52 = vpack.c.b16 %v1118_v51, %v1117_v50 }
 0x1b7   :  { %1177 = vmatmul.bf16.vlgmr.msra.gmra.mxu2 %v1119_v52  ;;  %1256 = vmatmul.bf16.vlgmr.msra.gmra.mxu3 %v1119_v52 }
 0x1b8   :  { %1335 = vmatmul.bf16.vlgmr.msrb.gmra.mxu0 %v1119_v52 }
 0x235   :  { %v1336_v53 = vpop.f32.mrf.mxu0 }
 0x236   :  { %v1353_v59 = vrot.slane %v1336_v53, 1 }
 0x238   :  { %v1357_v0 = vsel %vm775_vm1, %v1353_v59, 0.0 }
 0x23a   :  { %v1178_v54 = vpop.f32.mrf.mxu2  ;;  %v1257_v56 = vpop.f32.mrf.mxu3 }
 0x23b   :  { %v1343_v55 = vrot.slane %v1178_v54, 7 }
 0x23d   :  { %v1347_v57 = vsel %vm477_vm0, 0.0, %v1343_v55  ;;  %v1338_v58 = vpop.f32.mrf.mxu0 }
 0x23e   :  { %v1349_v60 = vadd.f32 %v1347_v57, %v1257_v56  ;;  %v1354_v62 = vrot.slane %v1338_v58, 1 }
 0x240   :  { %v1359_v3 = vadd.f32 %v1357_v0, %v1349_v60  ;;  %v1358_v6 = vsel %vm775_vm1, %v1354_v62, 0.0 }
 0x242   :  { %v1180_v61 = vpop.f32.mrf.mxu2  ;;  %v1259_v1 = vpop.f32.mrf.mxu3  ;;  %v1365_v8 = vadd.f32 %v1965_v4, %v1359_v3 }
 0x243   :  { %v1344_v63 = vrot.slane %v1180_v61, 7 }
 0x245   :  { %v1348_v2 = vsel %vm477_vm0, 0.0, %v1344_v63 }
 0x246   :  { %v1350_v5 = vadd.f32 %v1348_v2, %v1259_v1 }
 0x248   :  { %v1360_v7 = vadd.f32 %v1358_v6, %v1350_v5 }
 0x24a   :  { %v1366_v9 = vadd.f32 %v1965_v4, %v1360_v7 }
 0x24c   :  { %v1367_v10 = vadd.f32 %v1366_v9, %v1365_v8 }
 0x24e   :  { %v1368_v11 = vrot.slane %v1367_v10, 4 }
 0x250   :  { %v1369_v12 = vadd.f32 %v1368_v11, %v1367_v10 }
 0x252   :  { %v1370_v13 = vrot.slane %v1369_v12, 2 }
 0x254   :  { %v1371_v14 = vadd.f32 %v1370_v13, %v1369_v12 }
 0x256   :  { %v1372_v15 = vrot.slane %v1371_v14, 1 }
 0x258   :  { %v1373_v16 = vadd.f32 %v1372_v15, %v1371_v14 }
 0x25a   :  { %v1374_v17 = vmul.f32 0.0625, %v1373_v16 }
 0x25c   :  { %v1375_v19 = vsub.f32 %v1365_v8, %v1374_v17  ;;  %v1376_v20 = vsub.f32 %v1366_v9, %v1374_v17 }
 0x25e   :  { %v1377_v21 = vmul.f32 %v1375_v19, %v1375_v19  ;;  %v1378_v22 = vmul.f32 %v1376_v20, %v1376_v20  ;;  %v1391_v38 = vmul.f32 %v1966_v35, %v1375_v19  ;;  %v1392_v39 = vmul.f32 %v1966_v35, %v1376_v20 }
 0x260   :  { %v1379_v23 = vadd.f32 %v1378_v22, %v1377_v21 }
 0x262   :  { %v1380_v24 = vrot.slane %v1379_v23, 4 }
 0x264   :  { %v1381_v25 = vadd.f32 %v1380_v24, %v1379_v23 }
 0x266   :  { %v1382_v26 = vrot.slane %v1381_v25, 2 }
 0x268   :  { %v1383_v18 = vadd.f32 %v1382_v26, %v1381_v25 }
 0x26a   :  { %v1384_v27 = vrot.slane %v1383_v18, 1 }
 0x26c   :  { %v1385_v28 = vadd.f32 %v1384_v27, %v1383_v18 }
 0x26e   :  { %v1386_v29 = vmul.f32 0.0625, %v1385_v28 }
 0x270   :  { %v1393_v30 = vadd.f32 1e-05, %v1386_v29 }
 0x272   :  { %1970 = vrsqrt.f32 %v1393_v30  ;;  %vm1400_vm6 = vweird.f32 %v1393_v30 }
 0x278   :  { %v1971_v31 = vpop.eup %1970 }
 0x279   :  { %v1395_v32 = vmul.f32 %v1971_v31, %v1393_v30  ;;  %vm1401_vm5 = vweird.f32 %v1971_v31 }
 0x27a   :  { %vm1402_vm7 = vmor %vm1400_vm6, %vm1401_vm5 }
 0x27b   :  { %v1396_v33 = vmul.f32 %v1971_v31, %v1395_v32 }
 0x27d   :  { %v1397_v34 = vmul.f32 0.5, %v1396_v33 }
 0x27f   :  { %v1398_v36 = vsub.f32 1.5, %v1397_v34 }
 0x281   :  { %v1399_v37 = vmul.f32 %v1971_v31, %v1398_v36 }
 0x283   :  { %v1403_v41 = vsel %vm1402_vm7, %v1971_v31, %v1399_v37 }
 0x284   :  { %v1404_v42 = vmul.f32 %v1403_v41, %v1391_v38  ;;  %v1405_v43 = vmul.f32 %v1403_v41, %v1392_v39 }
 0x286   :  { %v1410_v44 = vadd.f32 %v1967_v40, %v1404_v42  ;;  %v1411_v45 = vadd.f32 %v1967_v40, %v1405_v43 }
 0x288   :  { %v1412_v46 = vmax.f32 %v1410_v44, 0.0  ;;  %v1413_v47 = vmax.f32 %v1411_v45, 0.0 }
 0x28a   :  { %v1953_v48 = vpack.c.bf16 %v1413_v47, %v1412_v46 }
 0x28c   :  { %1954 = vst [vmem:[%s2233_s13] sm:$0xff] %v1953_v48  }
 0x28d   :  { %1422 = vsyncpa [#allocation3], 1 }
 0x28e   :  { %1423 = vsyncpa [#allocation5], 1 }
 0x28f   :  { %1424 = vsyncpa [#allocation8], 1 }

// kernel: ecg_embedding_forward.11
= control target key start
LH: loop header
LB: loop body
LE: loop exit
PB: predicated region body
PF: predicated region fallthrough
CT: control target
= control target key end

     0   :  { %v19_v0 = vlaneseq  ;;  %vm55_vm0 = vcmask 1041408   ;;  %s221_s0 = inlined_call_operand.vmem [shape: s32[2,8], index: 0, kind: input, shape index: {}]   ;;  %s222_s1 = inlined_call_operand.vmem [shape: f32[50,32], index: 1, kind: input, shape index: {}]   ;;  %s223_s2 = inlined_call_operand.vmem [shape: f32[8,32], index: 2, kind: input, shape index: {}]   ;;  %s224_s3 = inlined_call_operand.vmem [shape: bf16[2,8,32], index: 3, kind: input, shape index: {}]   ;;  %s225_s4 = inlined_call_operand.hbm [shape: f32[2,8,32], index: 4, kind: output, shape index: {}]  }
   0x1   :  { %v47_v1 = vld [vmem:[%s222_s1 + $0x30] sm:$0x3]  ;;  %v46_v2 = vld [vmem:[%s222_s1 + $0x28] sm:$0xff]  ;;  %v45_v4 = vld [vmem:[%s222_s1 + $0x20] sm:$0xff] }
   0x2   :  { %114 = vmatpush.msk.msra.mxu0 %vm55_vm0, %v47_v1  ;;  %121 = vmatpush.msk.msra.mxu1 %vm55_vm0, %v47_v1  ;;  %v23_v3 = vshrl.u32 %v19_v0, 7 }
   0x3   :  { %9 = vsyncpa [#allocation3], 0  ;;  %v44_v5 = vld [vmem:[%s222_s1 + $0x18] sm:$0xff]  ;;  %v18_v6 = vld [vmem:[%s221_s0] sm:$0x3]  ;;  %v20_v12 = vand.u32 127, %v19_v0 }
   0x4   :  { %69 = vmatpush.msra.mxu0 %v46_v2  ;;  %122 = vmatpush.msra.mxu1 %v46_v2  ;;  %v43_v7 = vld [vmem:[%s222_s1 + $0x10] sm:$0xff]  ;;  %v21_v8 = vperm.slane %v18_v6, 0  ;;  %v42_v9 = vld [vmem:[%s222_s1 + $0x8] sm:$0xff]  ;;  %v28_v10 = vperm.slane %v18_v6, 1  ;;  %v41_v11 = vld [vmem:[%s222_s1] sm:$0xff]  ;;  %vm48_vm1 = vcmask 408576  }
   0x5   :  { %132 = vset.pattern.permute.xlu0 %v23_v3  ;;  %v159_v14 = vmov 0.0   ;;  %v118_v18 = vld [vmem:[%s224_s3] sm:$0xff]   ;;  %vm91_vm4 = vcmask 261120   ;;  %s160_s1 = smov [#allocation2]   ;;  %s100_s11 = sshll.u32 %s225_s4, 4  ;;  %s101_s11 = int_to_ptr.hbm [resolvable:$true] %s100_s11 }
   0x6   :  { %70 = vmatpush.msra.mxu0 %v45_v4  ;;  %123 = vmatpush.msra.mxu1 %v45_v4  ;;  %v82_v19 = vld [vmem:[%s223_s2] sm:$0xff]  ;;  %v119_v20 = vunpack.c.l.bf16 %v118_v18  ;;  %v120_v24 = vunpack.c.h.bf16 %v118_v18  ;;  %s98_s8 = sshll.u32 %s160_s1, 4  ;;  %s161_s2 = smov 128   ;;  %s99_s8 = int_to_ptr.vmem [resolvable:$true] %s98_s8 }
   0x7   :  { %s162_s3 = smov 8  }
   0x8   :  { %71 = vmatpush.msra.mxu0 %v44_v5  ;;  %124 = vmatpush.msra.mxu1 %v44_v5 }
   0xa   :  { %72 = vmatpush.msra.mxu0 %v43_v7  ;;  %125 = vmatpush.msra.mxu1 %v43_v7 }
   0xc   :  { %73 = vmatpush.msra.mxu0 %v42_v9  ;;  %126 = vmatpush.msra.mxu1 %v42_v9 }
   0xd   :  { %26 = vperm.xlu0 %132, %v21_v8  }
   0xe   :  { %74 = vmatpush.msra.mxu0 %v41_v11  ;;  %127 = vmatpush.msra.mxu1 %v41_v11 }
  0x15   :  { %33 = vperm.xlu0 %132, %v28_v10  }
  0x7f   :  { %v27_v13 = vpop.permute.xlu0 %26 }
  0x80   :  { %vm35_vm2 = vcmp.eq.s32.totalorder %v27_v13, %v20_v12 }
  0x81   :  { %v112_v15 = vsel %vm35_vm2, 1.0, %v159_v14 }
  0x82   :  { %115 = vmatmul.msk.f32.vlgmr.msra.gmra.mxu0 %vm48_vm1, %v112_v15 }
  0x87   :  { %v34_v16 = vpop.permute.xlu0 %33 }
  0x88   :  { %vm36_vm3 = vcmp.eq.s32.totalorder %v34_v16, %v20_v12 }
  0x89   :  { %v113_v17 = vsel %vm36_vm3, 1.0, %v159_v14 }
  0x8a   :  { %116 = vmatmul.msk.f32.vlgmr.msra.gmra.mxu1 %vm48_vm1, %v113_v17 }
  0xff   :  { %v76_v21 = vpop.f32.mrf.mxu0 }
 0x100   :  { %v83_v22 = vadd.f32 %v82_v19, %v76_v21 }
 0x102   :  { %v89_v23 = vadd.f32 %v119_v20, %v83_v22 }
 0x104   :  { %92 = vst.msk [vmem:[#allocation2] sm:$0xff] %vm91_vm4, %v89_v23 }
 0x107   :  { %v79_v25 = vpop.f32.mrf.mxu1 }
 0x108   :  { %v84_v26 = vadd.f32 %v82_v19, %v79_v25 }
 0x10a   :  { %v90_v27 = vadd.f32 %v120_v24, %v84_v26 }
 0x10c   :  { %93 = vst.msk [vmem:[#allocation2 + $0x8] sm:$0xff] %vm91_vm4, %v90_v27 }
 0x10d   :  { %106 = dma.vmem_to_hbm [thread:$0]  %s99_s8, 256, %s101_s11, [#allocation3], %s161_s2, %s161_s2, %s162_s3  }
 0x10e   :  { %157 = dma.done.wait [#allocation3], 256  }
 0x10f   :  { %158 = vsyncadd [#allocation3], 4294967040 }
 0x110   :  { %111 = vsyncpa [#allocation3], 1 }

// kernel: ecg_embedding_forward.10
= control target key start
LH: loop header
LB: loop body
LE: loop exit
PB: predicated region body
PF: predicated region fallthrough
CT: control target
= control target key end

     0   :  { %20 = vsyncpa [#allocation3], 0  ;;  %s1668_s21 = smov [#allocation2]   ;;  %s1669_s23 = smov 64   ;;  %s2017_s0 = inlined_call_operand.vmem [shape: bf16[2,8,128], index: 0, kind: input, shape index: {}]   ;;  %s2018_s1 = inlined_call_operand.vmem [shape: bf16[2,16,64], index: 1, kind: input, shape index: {}]   ;;  %s2019_s2 = inlined_call_operand.vmem [shape: bf16[2,128,64], index: 2, kind: input, shape index: {}]   ;;  %s2020_s3 = inlined_call_operand.vmem [shape: f32[1,64], index: 3, kind: input, shape index: {}]   ;;  %s2021_s4 = inlined_call_operand.vmem [shape: bf16[3,64,64], index: 4, kind: input, shape index: {}]   ;;  %s2022_s5 = inlined_call_operand.vmem [shape: bf16[3,64,64], index: 5, kind: input, shape index: {}]   ;;  %s2023_s6 = inlined_call_operand.vmem [shape: f32[1,64], index: 6, kind: input, shape index: {}]   ;;  %s2024_s7 = inlined_call_operand.vmem [shape: f32[1,64], index: 7, kind: input, shape index: {}]   ;;  %s2025_s8 = inlined_call_operand.vmem [shape: f32[1,64], index: 8, kind: input, shape index: {}]   ;;  %s2026_s9 = inlined_call_operand.hbm [shape: bf16[3,64,64], index: 9, kind: input, shape index: {}]   ;;  %s2027_s10 = inlined_call_operand.vmem [shape: f32[1,64], index: 10, kind: input, shape index: {}]   ;;  %s2028_s11 = inlined_call_operand.vmem [shape: f32[1,64], index: 11, kind: input, shape index: {}]   ;;  %s2029_s12 = inlined_call_operand.vmem [shape: f32[1,64], index: 12, kind: input, shape index: {}]   ;;  %s2030_s13 = inlined_call_operand.vmem [shape: bf16[64,32], index: 13, kind: input, shape index: {}]   ;;  %s2031_s14 = inlined_call_operand.vmem [shape: f32[1,32], index: 14, kind: input, shape index: {}]   ;;  %s2032_s15 = inlined_call_operand.vmem [shape: bf16[2,16,32], index: 15, kind: output, shape index: {}]  }
   0x1   :  { %s43_s20 = sshll.u32 %s2026_s9, 4  ;;  %s45_s22 = sshll.u32 %s1668_s21, 4  ;;  %s44_s20 = int_to_ptr.hbm [resolvable:$true] %s43_s20  ;;  %s46_s22 = int_to_ptr.vmem [resolvable:$true] %s45_s22 }
   0x2   :  { %s1670_s24 = smov 4  }
   0x3   :  { %51 = dma.hbm_to_vmem [thread:$0]  %s44_s20, 1536, %s46_s22, [#allocation3], %s1669_s23, %s1669_s23, %s1670_s24  }
   0x4   :  { %1666 = dma.done.wait [#allocation3], 1536  }
   0x5   :  { %1667 = vsyncadd [#allocation3], 4294965760  ;;  %v1576_v0 = vld [vmem:[%s2019_s2 + $0x38] sm:$0xff]  ;;  %v1575_v2 = vld [vmem:[%s2019_s2 + $0x30] sm:$0xff]  ;;  %vm314_vm0 = vcmask 1040384   ;;  %vm428_vm1 = vcmask 523264  }
   0x6   :  { %v1584_v1 = vld [vmem:[%s2019_s2 + $0x78] sm:$0xff]  ;;  %143 = vmatpush.bf16.msra.mxu0 %v1576_v0  ;;  %v1583_v3 = vld [vmem:[%s2019_s2 + $0x70] sm:$0xff]  ;;  %v1574_v4 = vld [vmem:[%s2019_s2 + $0x28] sm:$0xff]  ;;  %vm582_vm2 = vcmask 1046528   ;;  %vm1254_vm9 = vcmask 257024  }
   0x7   :  { %222 = vmatpush.bf16.msra.mxu1 %v1584_v1  ;;  %v1582_v5 = vld [vmem:[%s2019_s2 + $0x68] sm:$0xff]  ;;  %v1573_v6 = vld [vmem:[%s2019_s2 + $0x20] sm:$0xff]  ;;  %v1572_v8 = vld [vmem:[%s2019_s2 + $0x18] sm:$0xff] }
   0x8   :  { %v1581_v7 = vld [vmem:[%s2019_s2 + $0x60] sm:$0xff]  ;;  %v1580_v9 = vld [vmem:[%s2019_s2 + $0x58] sm:$0xff]  ;;  %v1571_v10 = vld [vmem:[%s2019_s2 + $0x10] sm:$0xff] }
   0x9   :  { %v1579_v11 = vld [vmem:[%s2019_s2 + $0x50] sm:$0xff]  ;;  %v1570_v12 = vld [vmem:[%s2019_s2 + $0x8] sm:$0xff]  ;;  %v1569_v14 = vld [vmem:[%s2019_s2] sm:$0xff] }
   0xa   :  { %144 = vmatpush.bf16.msra.mxu0 %v1575_v2  ;;  %v1578_v13 = vld [vmem:[%s2019_s2 + $0x48] sm:$0xff]  ;;  %v1577_v15 = vld [vmem:[%s2019_s2 + $0x40] sm:$0xff]  ;;  %v1590_v17 = vld [vmem:[%s2021_s4 + $0x18] sm:$0xff] }
   0xb   :  { %223 = vmatpush.bf16.msra.mxu1 %v1583_v3  ;;  %v1568_v16 = vld [vmem:[%s2017_s0] sm:$0xff]  ;;  %v1594_v18 = vld [vmem:[%s2021_s4 + $0x38] sm:$0xff]  ;;  %439 = vmatpush.bf16.msra.mxu2 %v1590_v17  ;;  %v1589_v20 = vld [vmem:[%s2021_s4 + $0x10] sm:$0xff] }
   0xc   :  { %v1598_v19 = vld [vmem:[%s2021_s4 + $0x58] sm:$0xff]  ;;  %491 = vmatpush.bf16.msra.mxu3 %v1594_v18  ;;  %v1593_v21 = vld [vmem:[%s2021_s4 + $0x30] sm:$0xff]  ;;  %v1588_v23 = vld [vmem:[%s2021_s4 + $0x8] sm:$0xff] }
   0xd   :  { %v1597_v22 = vld [vmem:[%s2021_s4 + $0x50] sm:$0xff]  ;;  %v1592_v24 = vld [vmem:[%s2021_s4 + $0x28] sm:$0xff]  ;;  %v1587_v26 = vld [vmem:[%s2021_s4] sm:$0xff] }
   0xe   :  { %145 = vmatpush.bf16.msra.mxu0 %v1574_v4  ;;  %v1596_v25 = vld [vmem:[%s2021_s4 + $0x48] sm:$0xff]  ;;  %v1591_v27 = vld [vmem:[%s2021_s4 + $0x20] sm:$0xff]  ;;  %v1610_v30 = vld [vmem:[%s2022_s5 + $0x58] sm:$0xff] }
   0xf   :  { %224 = vmatpush.bf16.msra.mxu1 %v1582_v5  ;;  %440 = vmatpush.bf16.msra.mxu2 %v1589_v20  ;;  %v1595_v28 = vld [vmem:[%s2021_s4 + $0x40] sm:$0xff]  ;;  %v1606_v31 = vld [vmem:[%s2022_s5 + $0x38] sm:$0xff]  ;;  %v1609_v37 = vld [vmem:[%s2022_s5 + $0x50] sm:$0xff] }
  0x10   :  { %492 = vmatpush.bf16.msra.mxu3 %v1593_v21  ;;  %v1630_v29 = vld [vmem:[%s2020_s3] ss:$0 sm:$0xff]  ;;  %v1602_v34 = vld [vmem:[%s2022_s5 + $0x18] sm:$0xff]  ;;  %v1605_v38 = vld [vmem:[%s2022_s5 + $0x30] sm:$0xff] }
  0x11   :  { %v1608_v21 = vld [vmem:[%s2022_s5 + $0x48] sm:$0xff] }
  0x12   :  { %146 = vmatpush.bf16.msra.mxu0 %v1573_v6 }
  0x13   :  { %225 = vmatpush.bf16.msra.mxu1 %v1581_v7  ;;  %441 = vmatpush.bf16.msra.mxu2 %v1588_v23 }
  0x14   :  { %493 = vmatpush.bf16.msra.mxu3 %v1592_v24 }
  0x16   :  { %147 = vmatpush.bf16.msra.mxu0 %v1572_v8 }
  0x17   :  { %226 = vmatpush.bf16.msra.mxu1 %v1580_v9  ;;  %442 = vmatpush.bf16.msra.mxu2 %v1587_v26 }
  0x18   :  { %494 = vmatpush.bf16.msra.mxu3 %v1591_v27 }
  0x1a   :  { %148 = vmatpush.bf16.msra.mxu0 %v1571_v10 }
  0x1b   :  { %227 = vmatpush.bf16.msra.mxu1 %v1579_v11  ;;  %703 = vmatpush.bf16.msrb.mxu2 %v1606_v31 }
  0x1c   :  { %755 = vmatpush.bf16.msrb.mxu3 %v1610_v30  ;;  %v1607_v30 = vld [vmem:[%s2022_s5 + $0x40] sm:$0xff] }
  0x1e   :  { %149 = vmatpush.bf16.msra.mxu0 %v1570_v12 }
  0x1f   :  { %228 = vmatpush.bf16.msra.mxu1 %v1578_v13  ;;  %704 = vmatpush.bf16.msrb.mxu2 %v1605_v38 }
  0x20   :  { %756 = vmatpush.bf16.msrb.mxu3 %v1609_v37 }
  0x22   :  { %150 = vmatpush.bf16.msra.mxu0 %v1569_v14 }
  0x23   :  { %229 = vmatpush.bf16.msra.mxu1 %v1577_v15 }
  0x24   :  { %757 = vmatpush.bf16.msrb.mxu3 %v1608_v21 }
  0x25   :  { %151 = vmatmul.bf16.vlgmr.msra.gmra.mxu0 %v1568_v16 }
  0x26   :  { %230 = vmatmul.bf16.vlgmr.msra.gmra.mxu1 %v1568_v16  ;;  %543 = vmatpush.bf16.msrb.mxu0 %v1598_v19 }
  0x27   :  { %651 = vmatpush.bf16.msrb.mxu1 %v1602_v34 }
  0x28   :  { %758 = vmatpush.bf16.msrb.mxu3 %v1607_v30 }
  0x2a   :  { %544 = vmatpush.bf16.msrb.mxu0 %v1597_v22  ;;  %v1601_v22 = vld [vmem:[%s2022_s5 + $0x10] sm:$0xff] }
  0x2b   :  { %652 = vmatpush.bf16.msrb.mxu1 %v1601_v22 }
  0x2e   :  { %545 = vmatpush.bf16.msrb.mxu0 %v1596_v25  ;;  %v1604_v25 = vld [vmem:[%s2022_s5 + $0x28] sm:$0xff] }
  0x2f   :  { %705 = vmatpush.bf16.msrb.mxu2 %v1604_v25 }
  0x32   :  { %546 = vmatpush.bf16.msrb.mxu0 %v1595_v28 }
  0xa2   :  { %v152_v32 = vpop.f32.mrf.mxu0 }
  0xa3   :  { %v231_v33 = vpop.f32.mrf.mxu1  ;;  %v153_v35 = vadd.f32 %v1630_v29, %v152_v32 }
  0xa4   :  { %v232_v36 = vadd.f32 %v1630_v29, %v231_v33 }
  0xa5   :  { %v238_v39 = vrot.slane %v153_v35, 1  ;;  %v239_v40 = vrot.slane %v153_v35, 2  ;;  %v240_v41 = vrot.slane %v153_v35, 3  ;;  %v241_v42 = vrot.slane %v153_v35, 4 }
  0xa6   :  { %v242_v43 = vrot.slane %v153_v35, 5  ;;  %v243_v44 = vrot.slane %v153_v35, 6  ;;  %v268_v45 = vrot.slane %v232_v36, 1  ;;  %v269_v46 = vrot.slane %v232_v36, 2 }
  0xa7   :  { %v270_v47 = vrot.slane %v232_v36, 3  ;;  %v271_v48 = vrot.slane %v232_v36, 4  ;;  %v272_v49 = vrot.slane %v232_v36, 5  ;;  %v273_v50 = vrot.slane %v232_v36, 6 }
  0xa8   :  { %v274_v51 = vrot.slane %v232_v36, 7  ;;  %v282_v52 = vperm.slane %v232_v36, 0  ;;  %v283_v53 = vperm.slane %v268_v45, 0  ;;  %v284_v54 = vperm.slane %v269_v46, 0  ;;  %v1603_v36 = vld [vmem:[%s2022_s5 + $0x20] sm:$0xff] }
  0xa9   :  { %v285_v55 = vperm.slane %v270_v47, 0  ;;  %v286_v56 = vperm.slane %v271_v48, 0  ;;  %v287_v57 = vperm.slane %v272_v49, 0  ;;  %v244_v60 = vrot.slane %v153_v35, 7  ;;  %v1599_v45 = vld [vmem:[%s2022_s5] sm:$0xff]  ;;  %706 = vmatpush.bf16.msrb.mxu2 %v1603_v36 }
  0xaa   :  { %v154_v58 = vpop.f32.mrf.mxu0  ;;  %v288_v61 = vperm.slane %v273_v50, 0  ;;  %v315_v62 = vsel %vm314_vm0, %v153_v35, %v282_v52  ;;  %v316_v63 = vsel %vm314_vm0, %v238_v39, %v283_v53  ;;  %v289_v1 = vperm.slane %v274_v51, 0  ;;  %v1585_v51 = vld [vmem:[%s2018_s1] sm:$0xff] }
  0xab   :  { %v233_v59 = vpop.f32.mrf.mxu1  ;;  %v317_v2 = vsel %vm314_vm0, %v239_v40, %v284_v54  ;;  %v318_v3 = vsel %vm314_vm0, %v240_v41, %v285_v55  ;;  %347 = vst [vmem:[#allocation1] ss:$4 sm:$0xff] %v315_v62  ;;  %v319_v4 = vsel %vm314_vm0, %v241_v42, %v286_v56  ;;  %v155_v5 = vadd.f32 %v1630_v29, %v154_v58 }
  0xac   :  { %v234_v0 = vadd.f32 %v1630_v29, %v233_v59  ;;  %349 = vst [vmem:[#allocation1 + $0x1] ss:$4 sm:$0xff] %v316_v63  ;;  %v320_v6 = vsel %vm314_vm0, %v242_v43, %v287_v57  ;;  %v321_v8 = vsel %vm314_vm0, %v243_v44, %v288_v61  ;;  %v322_v12 = vsel %vm314_vm0, %v244_v60, %v289_v1  ;;  %v1600_v29 = vld [vmem:[%s2022_s5 + $0x8] sm:$0xff] }
  0xad   :  { %351 = vst [vmem:[#allocation1 + $0x2] ss:$4 sm:$0xff] %v317_v2  ;;  %v245_v15 = vrot.slane %v155_v5, 1  ;;  %v246_v23 = vrot.slane %v155_v5, 2  ;;  %v247_v26 = vrot.slane %v155_v5, 3  ;;  %v248_v31 = vrot.slane %v155_v5, 4  ;;  %653 = vmatpush.bf16.msrb.mxu1 %v1600_v29 }
  0xae   :  { %v275_v7 = vrot.slane %v234_v0, 1  ;;  %353 = vst [vmem:[#allocation1 + $0x3] ss:$4 sm:$0xff] %v318_v3  ;;  %v276_v9 = vrot.slane %v234_v0, 2  ;;  %v277_v10 = vrot.slane %v234_v0, 3  ;;  %v278_v11 = vrot.slane %v234_v0, 4 }
  0xaf   :  { %355 = vst [vmem:[#allocation1 + $0x20] ss:$4 sm:$0xff] %v319_v4  ;;  %v279_v13 = vrot.slane %v234_v0, 5  ;;  %v280_v16 = vrot.slane %v234_v0, 6  ;;  %v290_v17 = vperm.slane %v234_v0, 0  ;;  %v281_v19 = vrot.slane %v234_v0, 7 }
  0xb0   :  { %v291_v14 = vperm.slane %v275_v7, 0  ;;  %357 = vst [vmem:[#allocation1 + $0x21] ss:$4 sm:$0xff] %v320_v6  ;;  %v292_v18 = vperm.slane %v276_v9, 0  ;;  %v293_v20 = vperm.slane %v277_v10, 0  ;;  %v294_v24 = vperm.slane %v278_v11, 0 }
  0xb1   :  { %359 = vst [vmem:[#allocation1 + $0x22] ss:$4 sm:$0xff] %v321_v8  ;;  %v295_v27 = vperm.slane %v279_v13, 0  ;;  %v296_v32 = vperm.slane %v280_v16, 0  ;;  %v323_v33 = vsel %vm314_vm0, %v155_v5, %v290_v17  ;;  %v249_v37 = vrot.slane %v155_v5, 5  ;;  %654 = vmatpush.bf16.msrb.mxu1 %v1599_v45  ;;  %v1586_v60 = vld [vmem:[%s2018_s1 + $0x8] sm:$0xff] }
  0xb2   :  { %361 = vst [vmem:[#allocation1 + $0x23] ss:$4 sm:$0xff] %v322_v12  ;;  %v324_v28 = vsel %vm314_vm0, %v245_v15, %v291_v14  ;;  %v325_v34 = vsel %vm314_vm0, %v246_v23, %v292_v18  ;;  %v297_v38 = vperm.slane %v281_v19, 0  ;;  %v326_v39 = vsel %vm314_vm0, %v247_v26, %v293_v20 }
  0xb3   :  { %v250_v41 = vrot.slane %v155_v5, 6  ;;  %v327_v42 = vsel %vm314_vm0, %v248_v31, %v294_v24  ;;  %v251_v43 = vrot.slane %v155_v5, 7  ;;  %v328_v44 = vsel %vm314_vm0, %v249_v37, %v295_v27 }
  0xb4   :  { %1442 = vmatmul.msk.bf16.vlgmr.msrb.gmra.mxu1 %vm428_vm1, %v1585_v51 }
  0xb5   :  { %v362_v35 = vld.sshfl [vmem:[#allocation1] sm:$0xff pattern:$0x73625140]  ;;  %v329_v46 = vsel %vm314_vm0, %v250_v41, %v296_v32  ;;  %v330_v48 = vsel %vm314_vm0, %v251_v43, %v297_v38 }
  0xb6   :  { %364 = vst [vmem:[#allocation1] ss:$4 sm:$0xff] %v323_v33  ;;  %v378_v40 = vpack.c.bf16 %v362_v35, %v362_v35 }
  0xb7   :  { %365 = vst [vmem:[#allocation1 + $0x1] ss:$4 sm:$0xff] %v324_v28 }
  0xb8   :  { %366 = vst [vmem:[#allocation1 + $0x2] ss:$4 sm:$0xff] %v325_v34  ;;  %v398_v50 = vunpack.c.l.b16 %v378_v40 }
  0xb9   :  { %v363_v47 = vld.sshfl [vmem:[#allocation1 + $0x20] sm:$0xff pattern:$0x73625140]  ;;  %367 = vst [vmem:[#allocation1 + $0x3] ss:$4 sm:$0xff] %v326_v39 }
  0xba   :  { %368 = vst [vmem:[#allocation1 + $0x20] ss:$4 sm:$0xff] %v327_v42  ;;  %v379_v49 = vpack.c.bf16 %v363_v47, %v363_v47 }
  0xbb   :  { %369 = vst [vmem:[#allocation1 + $0x21] ss:$4 sm:$0xff] %v328_v44 }
  0xbc   :  { %370 = vst [vmem:[#allocation1 + $0x22] ss:$4 sm:$0xff] %v329_v46  ;;  %v399_v52 = vunpack.c.l.b16 %v379_v49 }
  0xbd   :  { %371 = vst [vmem:[#allocation1 + $0x23] ss:$4 sm:$0xff] %v330_v48 }
  0xbe   :  { %v402_v53 = vpack.c.b16 %v399_v52, %v398_v50 }
  0xc0   :  { %1364 = vmatmul.msk.bf16.vlgmr.msra.gmra.mxu2 %vm428_vm1, %v402_v53  ;;  %1390 = vmatmul.msk.bf16.vlgmr.msra.gmra.mxu3 %vm428_vm1, %v402_v53  ;;  %v372_v54 = vld.sshfl [vmem:[#allocation1] sm:$0xff pattern:$0x73625140] }
  0xc1   :  { %1416 = vmatmul.msk.bf16.vlgmr.msrb.gmra.mxu0 %vm428_vm1, %v402_v53  ;;  %v380_v56 = vpack.c.bf16 %v372_v54, %v372_v54  ;;  %v1631_v53 = vld [vmem:[%s2023_s6] ss:$0 sm:$0xff] }
  0xc3   :  { %v400_v58 = vunpack.c.l.b16 %v380_v56 }
  0xc4   :  { %v373_v55 = vld.sshfl [vmem:[#allocation1 + $0x20] sm:$0xff pattern:$0x73625140]  ;;  %1443 = vmatmul.msk.bf16.gmra.mxu1 %vm428_vm1, %v1586_v60 }
  0xc5   :  { %v381_v57 = vpack.c.bf16 %v373_v55, %v373_v55 }
  0xc7   :  { %v401_v59 = vunpack.c.l.b16 %v381_v57 }
  0xc9   :  { %v403_v61 = vpack.c.b16 %v401_v59, %v400_v58 }
  0xd0   :  { %1365 = vmatmul.msk.bf16.gmra.mxu2 %vm428_vm1, %v403_v61  ;;  %1391 = vmatmul.msk.bf16.gmra.mxu3 %vm428_vm1, %v403_v61 }
  0xd1   :  { %1417 = vmatmul.msk.bf16.gmra.mxu0 %vm428_vm1, %v403_v61 }
  0xe0   :  { %1468 = vmatmul.msk.bf16.vlgmr.msrb.gmra.mxu2 %vm428_vm1, %v1585_v51  ;;  %1494 = vmatmul.msk.bf16.vlgmr.msrb.gmra.mxu3 %vm428_vm1, %v1585_v51 }
  0xf0   :  { %1469 = vmatmul.msk.bf16.gmra.mxu2 %vm428_vm1, %v1586_v60  ;;  %1495 = vmatmul.msk.bf16.gmra.mxu3 %vm428_vm1, %v1586_v60 }
 0x131   :  { %v656_v5 = vpop.f32.mrf.mxu1 }
 0x132   :  { %v774_v15 = vrot.slane %v656_v5, 7 }
 0x134   :  { %v784_v22 = vsel %vm314_vm0, 0.0, %v774_v15 }
 0x139   :  { %v658_v9 = vpop.f32.mrf.mxu1 }
 0x13a   :  { %v775_v19 = vrot.slane %v658_v9, 7 }
 0x13c   :  { %v776_v26 = vsel %vm314_vm0, %v774_v15, %v775_v19 }
 0x13e   :  { %v548_v4 = vpop.f32.mrf.mxu0 }
 0x13f   :  { %v583_v28 = vrot.slane %v548_v4, 1 }
 0x141   :  { %v661_v13 = vpop.f32.mrf.mxu1 }
 0x142   :  { %v777_v44 = vrot.slane %v661_v13, 7 }
 0x143   :  { %v444_v62 = vpop.f32.mrf.mxu2  ;;  %v496_v63 = vpop.f32.mrf.mxu3 }
 0x144   :  { %v562_v14 = vrot.slane %v444_v62, 7  ;;  %v785_v55 = vsel %vm314_vm0, 0.0, %v777_v44 }
 0x146   :  { %v550_v8 = vpop.f32.mrf.mxu0  ;;  %v572_v21 = vsel %vm314_vm0, 0.0, %v562_v14 }
 0x147   :  { %v584_v23 = vrot.slane %v550_v8, 1  ;;  %v574_v31 = vadd.f32 %v572_v21, %v496_v63 }
 0x149   :  { %v585_v36 = vsel %vm582_vm2, %v583_v28, %v584_v23  ;;  %v663_v39 = vpop.f32.mrf.mxu1  ;;  %v593_v43 = vsel %vm582_vm2, %v584_v23, 0.0 }
 0x14a   :  { %v595_v45 = vadd.f32 %v585_v36, %v574_v31  ;;  %v778_v47 = vrot.slane %v663_v39, 7  ;;  %v1622_v39 = vld [vmem:[#allocation2 + $0x58] sm:$0xff] }
 0x14b   :  { %v446_v0 = vpop.f32.mrf.mxu2  ;;  %v498_v1 = vpop.f32.mrf.mxu3  ;;  %1053 = vmatpush.bf16.msra.mxu2 %v1622_v39 }
 0x14c   :  { %v563_v18 = vrot.slane %v446_v0, 7  ;;  %v779_v59 = vsel %vm314_vm0, %v777_v44, %v778_v47  ;;  %v1621_v44 = vld [vmem:[#allocation2 + $0x50] sm:$0xff] }
 0x14d   :  { %v1617_v47 = vld [vmem:[#allocation2 + $0x30] sm:$0xff] }
 0x14e   :  { %v553_v12 = vpop.f32.mrf.mxu0  ;;  %v564_v24 = vsel %vm314_vm0, %v562_v14, %v563_v18 }
 0x14f   :  { %v575_v32 = vadd.f32 %v564_v24, %v498_v1  ;;  %v586_v54 = vrot.slane %v553_v12, 1  ;;  %1054 = vmatpush.bf16.msra.mxu2 %v1621_v44 }
 0x151   :  { %v596_v46 = vadd.f32 %v593_v43, %v575_v32 }
 0x153   :  { %v449_v2 = vpop.f32.mrf.mxu2  ;;  %v501_v3 = vpop.f32.mrf.mxu3 }
 0x154   :  { %v565_v37 = vrot.slane %v449_v2, 7 }
 0x156   :  { %v555_v40 = vpop.f32.mrf.mxu0  ;;  %v573_v48 = vsel %vm314_vm0, 0.0, %v565_v37 }
 0x157   :  { %v587_v49 = vrot.slane %v555_v40, 1  ;;  %v576_v56 = vadd.f32 %v573_v48, %v501_v3  ;;  %v1614_v40 = vld [vmem:[#allocation2 + $0x18] sm:$0xff] }
 0x158   :  { %949 = vmatpush.bf16.msra.mxu0 %v1614_v40 }
 0x159   :  { %v588_v61 = vsel %vm582_vm2, %v586_v54, %v587_v49  ;;  %v594_v5 = vsel %vm582_vm2, %v587_v49, 0.0 }
 0x15a   :  { %v597_v3 = vadd.f32 %v588_v61, %v576_v56  ;;  %v1611_v56 = vld [vmem:[#allocation2] sm:$0xff] }
 0x15b   :  { %v451_v6 = vpop.f32.mrf.mxu2  ;;  %v503_v7 = vpop.f32.mrf.mxu3 }
 0x15c   :  { %v566_v38 = vrot.slane %v451_v6, 7 }
 0x15e   :  { %v567_v50 = vsel %vm314_vm0, %v565_v37, %v566_v38 }
 0x15f   :  { %v577_v57 = vadd.f32 %v567_v50, %v503_v7  ;;  %v1620_v50 = vld [vmem:[#allocation2 + $0x48] sm:$0xff] }
 0x160   :  { %1055 = vmatpush.bf16.msra.mxu2 %v1620_v50 }
 0x161   :  { %v598_v7 = vadd.f32 %v594_v5, %v577_v57  ;;  %v1632_v5 = vld [vmem:[%s2024_s7] ss:$0 sm:$0xff] }
 0x163   :  { %v708_v10 = vpop.f32.mrf.mxu2  ;;  %v760_v11 = vpop.f32.mrf.mxu3 }
 0x164   :  { %v794_v25 = vrot.slane %v760_v11, 1  ;;  %v786_v33 = vadd.f32 %v784_v22, %v708_v10 }
 0x16b   :  { %v710_v16 = vpop.f32.mrf.mxu2  ;;  %v762_v17 = vpop.f32.mrf.mxu3 }
 0x16c   :  { %v795_v20 = vrot.slane %v762_v17, 1  ;;  %v787_v27 = vadd.f32 %v776_v26, %v710_v16 }
 0x16e   :  { %v796_v29 = vsel %vm582_vm2, %v794_v25, %v795_v20  ;;  %v804_v30 = vsel %vm582_vm2, %v795_v20, 0.0 }
 0x16f   :  { %v806_v41 = vadd.f32 %v796_v29, %v786_v33  ;;  %v807_v42 = vadd.f32 %v804_v30, %v787_v27 }
 0x171   :  { %v810_v51 = vadd.f32 %v806_v41, %v595_v45  ;;  %v811_v52 = vadd.f32 %v807_v42, %v596_v46  ;;  %v1618_v42 = vld [vmem:[#allocation2 + $0x38] sm:$0xff]  ;;  %v1613_v45 = vld [vmem:[#allocation2 + $0x10] sm:$0xff] }
 0x172   :  { %1001 = vmatpush.bf16.msra.mxu1 %v1618_v42  ;;  %950 = vmatpush.bf16.msra.mxu0 %v1613_v45 }
 0x173   :  { %v713_v34 = vpop.f32.mrf.mxu2  ;;  %v765_v35 = vpop.f32.mrf.mxu3  ;;  %v818_v1 = vadd.f32 %v1631_v53, %v810_v51  ;;  %v819_v2 = vadd.f32 %v1631_v53, %v811_v52  ;;  %v1612_v51 = vld [vmem:[#allocation2 + $0x8] sm:$0xff] }
 0x174   :  { %v797_v62 = vrot.slane %v765_v35, 1  ;;  %v788_v4 = vadd.f32 %v785_v55, %v713_v34  ;;  %v1619_v55 = vld [vmem:[#allocation2 + $0x40] sm:$0xff] }
 0x175   :  { %v822_v11 = vsel %vm428_vm1, %v818_v1, 0.0  ;;  %v823_v12 = vsel %vm428_vm1, %v819_v2, 0.0  ;;  %1056 = vmatpush.bf16.msra.mxu2 %v1619_v55 }
 0x176   :  { %v824_v17 = vadd.f32 %v823_v12, %v822_v11  ;;  %1002 = vmatpush.bf16.msra.mxu1 %v1617_v47  ;;  %951 = vmatpush.bf16.msra.mxu0 %v1612_v51 }
 0x17a   :  { %952 = vmatpush.bf16.msra.mxu0 %v1611_v56 }
 0x17b   :  { %v715_v58 = vpop.f32.mrf.mxu2  ;;  %v767_v60 = vpop.f32.mrf.mxu3 }
 0x17c   :  { %v789_v63 = vadd.f32 %v779_v59, %v715_v58  ;;  %v798_v0 = vrot.slane %v767_v60, 1  ;;  %v1615_v58 = vld [vmem:[#allocation2 + $0x20] sm:$0xff] }
 0x17e   :  { %v799_v6 = vsel %vm582_vm2, %v797_v62, %v798_v0  ;;  %v805_v8 = vsel %vm582_vm2, %v798_v0, 0.0 }
 0x17f   :  { %v808_v9 = vadd.f32 %v799_v6, %v788_v4  ;;  %v809_v10 = vadd.f32 %v805_v8, %v789_v63 }
 0x181   :  { %v812_v13 = vadd.f32 %v808_v9, %v597_v3  ;;  %v813_v14 = vadd.f32 %v809_v10, %v598_v7  ;;  %v1633_v9 = vld [vmem:[%s2025_s8] ss:$0 sm:$0xff] }
 0x183   :  { %v820_v15 = vadd.f32 %v1631_v53, %v812_v13  ;;  %v821_v16 = vadd.f32 %v1631_v53, %v813_v14  ;;  %v1616_v53 = vld [vmem:[#allocation2 + $0x28] sm:$0xff] }
 0x184   :  { %1003 = vmatpush.bf16.msra.mxu1 %v1616_v53 }
 0x185   :  { %v825_v18 = vsel %vm428_vm1, %v820_v15, 0.0  ;;  %v827_v20 = vsel %vm428_vm1, %v821_v16, 0.0 }
 0x186   :  { %v826_v19 = vadd.f32 %v825_v18, %v824_v17 }
 0x188   :  { %v828_v21 = vadd.f32 %v827_v20, %v826_v19  ;;  %1004 = vmatpush.bf16.msra.mxu1 %v1615_v58 }
 0x18a   :  { %v829_v22 = vrot.slane %v828_v21, 4 }
 0x18c   :  { %v830_v23 = vadd.f32 %v829_v22, %v828_v21 }
 0x18e   :  { %v831_v24 = vrot.slane %v830_v23, 2 }
 0x190   :  { %v832_v25 = vadd.f32 %v831_v24, %v830_v23 }
 0x192   :  { %v833_v26 = vrot.slane %v832_v25, 1 }
 0x194   :  { %v834_v27 = vadd.f32 %v833_v26, %v832_v25 }
 0x196   :  { %v835_v28 = vmul.f32 0.03125, %v834_v27 }
 0x198   :  { %v836_v29 = vsub.f32 %v818_v1, %v835_v28  ;;  %v837_v30 = vsub.f32 %v819_v2, %v835_v28  ;;  %v1937_v31 = vsub.f32 %v820_v15, %v835_v28  ;;  %v1939_v32 = vsub.f32 %v821_v16, %v835_v28 }
 0x19a   :  { %v840_v33 = vmul.f32 %v836_v29, %v836_v29  ;;  %v841_v34 = vmul.f32 %v837_v30, %v837_v30  ;;  %v842_v35 = vmul.f32 %v1937_v31, %v1937_v31  ;;  %v843_v36 = vmul.f32 %v1939_v32, %v1939_v32 }
 0x19b   :  { %v862_v3 = vmul.f32 %v1632_v5, %v836_v29  ;;  %v863_v7 = vmul.f32 %v1632_v5, %v837_v30  ;;  %v864_v17 = vmul.f32 %v1632_v5, %v1937_v31  ;;  %v865_v18 = vmul.f32 %v1632_v5, %v1939_v32 }
 0x19c   :  { %v844_v37 = vsel %vm428_vm1, %v840_v33, 0.0  ;;  %v845_v38 = vsel %vm428_vm1, %v841_v34, 0.0  ;;  %v847_v43 = vsel %vm428_vm1, %v842_v35, 0.0  ;;  %v849_v48 = vsel %vm428_vm1, %v843_v36, 0.0 }
 0x19d   :  { %v846_v41 = vadd.f32 %v845_v38, %v844_v37 }
 0x19f   :  { %v848_v46 = vadd.f32 %v847_v43, %v846_v41 }
 0x1a1   :  { %v850_v49 = vadd.f32 %v849_v48, %v848_v46 }
 0x1a3   :  { %v851_v52 = vrot.slane %v850_v49, 4 }
 0x1a5   :  { %v852_v54 = vadd.f32 %v851_v52, %v850_v49 }
 0x1a7   :  { %v853_v57 = vrot.slane %v852_v54, 2 }
 0x1a9   :  { %v854_v59 = vadd.f32 %v853_v57, %v852_v54 }
 0x1ab   :  { %v855_v60 = vrot.slane %v854_v59, 1 }
 0x1ad   :  { %v856_v61 = vadd.f32 %v855_v60, %v854_v59  ;;  %v1634_v59 = vld [vmem:[%s2027_s10] ss:$0 sm:$0xff] }
 0x1af   :  { %v857_v62 = vmul.f32 0.03125, %v856_v61 }
 0x1b1   :  { %v866_v63 = vadd.f32 1e-05, %v857_v62 }
 0x1b3   :  { %1638 = vrsqrt.f32 %v866_v63  ;;  %vm873_vm4 = vweird.f32 %v866_v63 }
 0x1b9   :  { %v1639_v0 = vpop.eup %1638 }
 0x1ba   :  { %v868_v1 = vmul.f32 %v1639_v0, %v866_v63  ;;  %vm874_vm3 = vweird.f32 %v1639_v0 }
 0x1bb   :  { %vm875_vm5 = vmor %vm873_vm4, %vm874_vm3 }
 0x1bc   :  { %v869_v2 = vmul.f32 %v1639_v0, %v868_v1 }
 0x1be   :  { %v870_v4 = vmul.f32 0.5, %v869_v2 }
 0x1c0   :  { %v871_v6 = vsub.f32 1.5, %v870_v4 }
 0x1c2   :  { %v872_v8 = vmul.f32 %v1639_v0, %v871_v6 }
 0x1c4   :  { %v876_v10 = vsel %vm875_vm5, %v1639_v0, %v872_v8 }
 0x1c5   :  { %v877_v11 = vmul.f32 %v876_v10, %v862_v3  ;;  %v878_v12 = vmul.f32 %v876_v10, %v863_v7  ;;  %v879_v21 = vmul.f32 %v876_v10, %v864_v17  ;;  %v880_v22 = vmul.f32 %v876_v10, %v865_v18 }
 0x1c7   :  { %v885_v13 = vadd.f32 %v1633_v9, %v877_v11  ;;  %v886_v14 = vadd.f32 %v1633_v9, %v878_v12  ;;  %v887_v26 = vadd.f32 %v1633_v9, %v879_v21  ;;  %v888_v27 = vadd.f32 %v1633_v9, %v880_v22 }
 0x1c9   :  { %v889_v15 = vmax.f32 %v885_v13, 0.0  ;;  %v890_v16 = vmax.f32 %v886_v14, 0.0  ;;  %v891_v28 = vmax.f32 %v887_v26, 0.0  ;;  %v892_v29 = vmax.f32 %v888_v27, 0.0 }
 0x1cb   :  { %v893_v19 = vpack.c.bf16 %v889_v15, %v889_v15  ;;  %v894_v20 = vpack.c.bf16 %v890_v16, %v890_v16  ;;  %v895_v30 = vpack.c.bf16 %v891_v28, %v891_v28  ;;  %v896_v31 = vpack.c.bf16 %v892_v29, %v892_v29 }
 0x1cd   :  { %v909_v23 = vunpack.c.l.b16 %v893_v19  ;;  %v910_v24 = vunpack.c.l.b16 %v894_v20  ;;  %v911_v32 = vunpack.c.l.b16 %v895_v30  ;;  %v912_v33 = vunpack.c.l.b16 %v896_v31 }
 0x1cf   :  { %v913_v25 = vpack.c.b16 %v910_v24, %v909_v23  ;;  %v914_v34 = vpack.c.b16 %v912_v33, %v911_v32 }
 0x1d1   :  { %1512 = vmatmul.msk.bf16.vlgmr.msra.gmra.mxu0 %vm428_vm1, %v913_v25  ;;  %1530 = vmatmul.msk.bf16.vlgmr.msra.gmra.mxu1 %vm428_vm1, %v913_v25 }
 0x1d2   :  { %1548 = vmatmul.msk.bf16.vlgmr.msra.gmra.mxu2 %vm428_vm1, %v913_v25 }
 0x1e1   :  { %1513 = vmatmul.msk.bf16.gmra.mxu0 %vm428_vm1, %v914_v34  ;;  %1531 = vmatmul.msk.bf16.gmra.mxu1 %vm428_vm1, %v914_v34 }
 0x1e2   :  { %1549 = vmatmul.msk.bf16.gmra.mxu2 %vm428_vm1, %v914_v34 }
 0x24e   :  { %v954_v35 = vpop.f32.mrf.mxu0  ;;  %v1006_v36 = vpop.f32.mrf.mxu1 }
 0x24f   :  { %v1072_v42 = vrot.slane %v954_v35, 7 }
 0x251   :  { %v1082_v45 = vsel %vm314_vm0, 0.0, %v1072_v42 }
 0x252   :  { %v1084_v53 = vadd.f32 %v1082_v45, %v1006_v36 }
 0x255   :  { %v1058_v37 = vpop.f32.mrf.mxu2 }
 0x256   :  { %v956_v38 = vpop.f32.mrf.mxu0  ;;  %v1008_v39 = vpop.f32.mrf.mxu1  ;;  %v1092_v46 = vrot.slane %v1058_v37, 1 }
 0x257   :  { %v1073_v43 = vrot.slane %v956_v38, 7  ;;  %v1626_v38 = vld [vmem:[%s2030_s13 + $0x18] sm:$0xff] }
 0x258   :  { %1235 = vmatpush.bf16.msra.mxu3 %v1626_v38 }
 0x259   :  { %v1074_v47 = vsel %vm314_vm0, %v1072_v42, %v1073_v43 }
 0x25a   :  { %v1085_v54 = vadd.f32 %v1074_v47, %v1008_v39  ;;  %v1623_v47 = vld [vmem:[%s2030_s13] sm:$0xff] }
 0x25d   :  { %v1060_v40 = vpop.f32.mrf.mxu2 }
 0x25e   :  { %v959_v41 = vpop.f32.mrf.mxu0  ;;  %v1093_v44 = vrot.slane %v1060_v40, 1  ;;  %v1011_v48 = vpop.f32.mrf.mxu1 }
 0x25f   :  { %v1075_v55 = vrot.slane %v959_v41, 7  ;;  %v1625_v41 = vld [vmem:[%s2030_s13 + $0x10] sm:$0xff] }
 0x260   :  { %v1094_v50 = vsel %vm582_vm2, %v1092_v46, %v1093_v44  ;;  %v1102_v51 = vsel %vm582_vm2, %v1093_v44, 0.0  ;;  %1236 = vmatpush.bf16.msra.mxu3 %v1625_v41  ;;  %v1624_v44 = vld [vmem:[%s2030_s13 + $0x8] sm:$0xff] }
 0x261   :  { %v1104_v57 = vadd.f32 %v1094_v50, %v1084_v53  ;;  %v1105_v58 = vadd.f32 %v1102_v51, %v1085_v54  ;;  %v1083_v60 = vsel %vm314_vm0, 0.0, %v1075_v55 }
 0x262   :  { %v1086_v5 = vadd.f32 %v1083_v60, %v1011_v48 }
 0x263   :  { %v1112_v62 = vadd.f32 %v1634_v59, %v1104_v57  ;;  %v1113_v63 = vadd.f32 %v1634_v59, %v1105_v58  ;;  %v1635_v57 = vld [vmem:[%s2028_s11] ss:$0 sm:$0xff] }
 0x264   :  { %1237 = vmatpush.bf16.msra.mxu3 %v1624_v44 }
 0x265   :  { %v1063_v49 = vpop.f32.mrf.mxu2  ;;  %v1116_v7 = vsel %vm428_vm1, %v1112_v62, 0.0  ;;  %v1117_v9 = vsel %vm428_vm1, %v1113_v63, 0.0 }
 0x266   :  { %v961_v52 = vpop.f32.mrf.mxu0  ;;  %v1095_v1 = vrot.slane %v1063_v49, 1  ;;  %v1013_v2 = vpop.f32.mrf.mxu1  ;;  %v1118_v14 = vadd.f32 %v1117_v9, %v1116_v7 }
 0x267   :  { %v1076_v56 = vrot.slane %v961_v52, 7 }
 0x268   :  { %1238 = vmatpush.bf16.msra.mxu3 %v1623_v47 }
 0x269   :  { %v1077_v61 = vsel %vm314_vm0, %v1075_v55, %v1076_v56 }
 0x26a   :  { %v1087_v6 = vadd.f32 %v1077_v61, %v1013_v2 }
 0x26d   :  { %v1065_v0 = vpop.f32.mrf.mxu2 }
 0x26e   :  { %v1096_v4 = vrot.slane %v1065_v0, 1 }
 0x270   :  { %v1097_v8 = vsel %vm582_vm2, %v1095_v1, %v1096_v4  ;;  %v1103_v3 = vsel %vm582_vm2, %v1096_v4, 0.0 }
 0x271   :  { %v1106_v10 = vadd.f32 %v1097_v8, %v1086_v5  ;;  %v1107_v11 = vadd.f32 %v1103_v3, %v1087_v6 }
 0x273   :  { %v1114_v12 = vadd.f32 %v1634_v59, %v1106_v10  ;;  %v1115_v13 = vadd.f32 %v1634_v59, %v1107_v11 }
 0x275   :  { %v1119_v15 = vsel %vm428_vm1, %v1114_v12, 0.0  ;;  %v1121_v17 = vsel %vm428_vm1, %v1115_v13, 0.0 }
 0x276   :  { %v1120_v16 = vadd.f32 %v1119_v15, %v1118_v14 }
 0x278   :  { %v1122_v18 = vadd.f32 %v1121_v17, %v1120_v16  ;;  %v1637_v16 = vld [vmem:[%s2031_s14] ss:$0 sm:$0xff] }
 0x27a   :  { %v1123_v19 = vrot.slane %v1122_v18, 4 }
 0x27c   :  { %v1124_v20 = vadd.f32 %v1123_v19, %v1122_v18 }
 0x27e   :  { %v1125_v21 = vrot.slane %v1124_v20, 2 }
 0x280   :  { %v1126_v22 = vadd.f32 %v1125_v21, %v1124_v20 }
 0x282   :  { %v1127_v23 = vrot.slane %v1126_v22, 1 }
 0x284   :  { %v1128_v24 = vadd.f32 %v1127_v23, %v1126_v22 }
 0x286   :  { %v1129_v25 = vmul.f32 0.03125, %v1128_v24 }
 0x288   :  { %v1130_v26 = vsub.f32 %v1112_v62, %v1129_v25  ;;  %v1131_v27 = vsub.f32 %v1113_v63, %v1129_v25  ;;  %v1132_v28 = vsub.f32 %v1114_v12, %v1129_v25  ;;  %v1133_v29 = vsub.f32 %v1115_v13, %v1129_v25  ;;  %v1636_v62 = vld [vmem:[%s2029_s12] ss:$0 sm:$0xff] }
 0x28a   :  { %v1134_v30 = vmul.f32 %v1130_v26, %v1130_v26  ;;  %v1135_v31 = vmul.f32 %v1131_v27, %v1131_v27  ;;  %v1136_v32 = vmul.f32 %v1132_v28, %v1132_v28  ;;  %v1137_v33 = vmul.f32 %v1133_v29, %v1133_v29 }
 0x28b   :  { %v1156_v60 = vmul.f32 %v1635_v57, %v1130_v26  ;;  %v1157_v61 = vmul.f32 %v1635_v57, %v1131_v27  ;;  %v1159_v3 = vmul.f32 %v1635_v57, %v1133_v29  ;;  %v1158_v7 = vmul.f32 %v1635_v57, %v1132_v28 }
 0x28c   :  { %v1138_v34 = vsel %vm428_vm1, %v1134_v30, 0.0  ;;  %v1139_v35 = vsel %vm428_vm1, %v1135_v31, 0.0  ;;  %v1141_v37 = vsel %vm428_vm1, %v1136_v32, 0.0  ;;  %v1143_v40 = vsel %vm428_vm1, %v1137_v33, 0.0 }
 0x28d   :  { %v1140_v36 = vadd.f32 %v1139_v35, %v1138_v34 }
 0x28f   :  { %v1142_v39 = vadd.f32 %v1141_v37, %v1140_v36 }
 0x291   :  { %v1144_v42 = vadd.f32 %v1143_v40, %v1142_v39 }
 0x293   :  { %v1145_v43 = vrot.slane %v1144_v42, 4 }
 0x295   :  { %v1146_v45 = vadd.f32 %v1145_v43, %v1144_v42 }
 0x297   :  { %v1147_v46 = vrot.slane %v1146_v45, 2 }
 0x299   :  { %v1148_v48 = vadd.f32 %v1147_v46, %v1146_v45 }
 0x29b   :  { %v1149_v49 = vrot.slane %v1148_v48, 1 }
 0x29d   :  { %v1150_v50 = vadd.f32 %v1149_v49, %v1148_v48 }
 0x29f   :  { %v1151_v51 = vmul.f32 0.03125, %v1150_v50 }
 0x2a1   :  { %v1160_v52 = vadd.f32 1e-05, %v1151_v51 }
 0x2a3   :  { %1640 = vrsqrt.f32 %v1160_v52  ;;  %vm1167_vm7 = vweird.f32 %v1160_v52 }
 0x2a9   :  { %v1641_v53 = vpop.eup %1640 }
 0x2aa   :  { %v1162_v54 = vmul.f32 %v1641_v53, %v1160_v52  ;;  %vm1168_vm6 = vweird.f32 %v1641_v53 }
 0x2ab   :  { %vm1169_vm8 = vmor %vm1167_vm7, %vm1168_vm6 }
 0x2ac   :  { %v1163_v55 = vmul.f32 %v1641_v53, %v1162_v54 }
 0x2ae   :  { %v1164_v56 = vmul.f32 0.5, %v1163_v55 }
 0x2b0   :  { %v1165_v58 = vsub.f32 1.5, %v1164_v56 }
 0x2b2   :  { %v1166_v59 = vmul.f32 %v1641_v53, %v1165_v58 }
 0x2b4   :  { %v1170_v63 = vsel %vm1169_vm8, %v1641_v53, %v1166_v59 }
 0x2b5   :  { %v1171_v0 = vmul.f32 %v1170_v63, %v1156_v60  ;;  %v1172_v1 = vmul.f32 %v1170_v63, %v1157_v61  ;;  %v1173_v9 = vmul.f32 %v1170_v63, %v1158_v7  ;;  %v1174_v10 = vmul.f32 %v1170_v63, %v1159_v3 }
 0x2b7   :  { %v1179_v2 = vadd.f32 %v1636_v62, %v1171_v0  ;;  %v1180_v4 = vadd.f32 %v1636_v62, %v1172_v1  ;;  %v1181_v11 = vadd.f32 %v1636_v62, %v1173_v9  ;;  %v1182_v12 = vadd.f32 %v1636_v62, %v1174_v10 }
 0x2b9   :  { %v1183_v5 = vmax.f32 %v1179_v2, 0.0  ;;  %v1184_v6 = vmax.f32 %v1180_v4, 0.0  ;;  %v1185_v13 = vmax.f32 %v1181_v11, 0.0  ;;  %v1186_v14 = vmax.f32 %v1182_v12, 0.0 }
 0x2bb   :  { %v1187_v8 = vpack.c.bf16 %v1184_v6, %v1183_v5  ;;  %v1188_v15 = vpack.c.bf16 %v1186_v14, %v1185_v13 }
 0x2bd   :  { %1566 = vmatmul.msk.bf16.vlgmr.msra.gmra.mxu3 %vm428_vm1, %v1187_v8 }
 0x2cd   :  { %1567 = vmatmul.msk.bf16.gmra.mxu3 %vm428_vm1, %v1188_v15 }
 0x340   :  { %v1240_v17 = vpop.f32.mrf.mxu3 }
 0x341   :  { %v1241_v18 = vadd.f32 %v1637_v16, %v1240_v17 }
 0x343   :  { %v1250_v19 = vpack.c.bf16 %v1241_v18, %v1241_v18 }
 0x345   :  { %1255 = vst.msk [vmem:[%s2032_s15] sm:$0xf] %vm1254_vm9, %v1250_v19 }
 0x348   :  { %v1242_v20 = vpop.f32.mrf.mxu3 }
 0x349   :  { %v1243_v21 = vadd.f32 %v1637_v16, %v1242_v20 }
 0x34b   :  { %v1251_v22 = vpack.c.bf16 %v1243_v21, %v1243_v21 }
 0x34d   :  { %1256 = vst.msk [vmem:[%s2032_s15 + $0x4] sm:$0xf] %vm1254_vm9, %v1251_v22 }
 0x350   :  { %v1245_v23 = vpop.f32.mrf.mxu3 }
 0x351   :  { %v1246_v24 = vadd.f32 %v1637_v16, %v1245_v23 }
 0x353   :  { %v1252_v25 = vpack.c.bf16 %v1246_v24, %v1246_v24 }
 0x355   :  { %1257 = vst.msk [vmem:[%s2032_s15 + $0x8] sm:$0xf] %vm1254_vm9, %v1252_v25 }
 0x358   :  { %v1247_v26 = vpop.f32.mrf.mxu3 }
 0x359   :  { %v1248_v27 = vadd.f32 %v1637_v16, %v1247_v26 }
 0x35b   :  { %v1253_v28 = vpack.c.bf16 %v1248_v27, %v1248_v27 }
 0x35d   :  { %1258 = vst.msk [vmem:[%s2032_s15 + $0xc] sm:$0xf] %vm1254_vm9, %v1253_v28 }
 0x35e   :  { %1263 = vsyncpa [#allocation3], 1 }

</bundles_post_ra>
